<compile_context>
chip_gen: v7x
topology: tpu7x:2x2x1
jax: 0.10.0
libtpu: 0.0.40
codegen_flags: <defaults>
</compile_context>

<pallas_src>
import functools

import jax
import jax.numpy as jnp
from jax.experimental import pallas as pl
from jax.experimental.pallas import tpu as pltpu


# ----------------------------------------------------------------------------
# Optional single-buffering of row-invariant operands (review item #1).
# Probed once at startup with a tiny copy kernel; any failure -> default
# double buffering (still correct, just more VMEM residency).
# ----------------------------------------------------------------------------
_USE_BUFFERED1 = False


def _copy_kernel(x_ref, o_ref):
    o_ref[...] = x_ref[...]


def _probe_buffered1():
    try:
        spec = pl.BlockSpec((8, 128), lambda i: (0, 0),
                            pipeline_mode=pl.Buffered(1))
        y = pl.pallas_call(
            _copy_kernel,
            out_shape=jax.ShapeDtypeStruct((8, 128), jnp.float32),
            grid_spec=pltpu.PrefetchScalarGridSpec(
                num_scalar_prefetch=0, grid=(2,),
                in_specs=[spec],
                out_specs=pl.BlockSpec((8, 128), lambda i: (0, 0))),
        )(jnp.ones((8, 128), jnp.float32))
        jax.block_until_ready(y)
        return True
    except Exception:  # noqa: BLE001  (fall back to default buffering)
        return False


def _row_invariant_spec(block_shape, index_map):
    if _USE_BUFFERED1:
        return pl.BlockSpec(block_shape, index_map,
                            pipeline_mode=pl.Buffered(1))
    return pl.BlockSpec(block_shape, index_map)


# ----------------------------------------------------------------------------
# Fused sweep kernel: one direction PAIR, one image row per grid step.
#   grid = (pair, row); pair is "parallel" (independent directions -> one TC
#   each on v7x), row is "arbitrary" and carries the finished previous row's
#   h/c in VMEM scratch.
#   x_ref  : (1, 1, WN, 2*Cin)  bf16   row input, both dirs of the pair on K
#   wx_ref : (1, 2*Cin, 5C)     bf16   block-diagonal input weights
#   b_ref  : (1, 1, 5C)         f32    bias
#   u1/u2  : (1, C, 5C)         bf16   block-diagonal recurrent weights
#   wc_ref : (1, C, out_ch_p)   bf16   1x1-conv weights (lane-padded cols)
#   out_ref: (1, 1, WN, out_ch_p) f32  per-pair conv partial (lane-dense)
# ----------------------------------------------------------------------------
def _sweep_kernel(x_ref, wx_ref, b_ref, u1_ref, u2_ref, wc_ref,
                  out_ref, prev_h_ref, prev_c_ref, *, C, W, N):
    row = pl.program_id(1)
    WN = W * N
    u1 = u1_ref[0]
    u2 = u2_ref[0]
    wx = wx_ref[0]

    # Fused input projection for the whole row (xz never touches HBM).
    xz = jnp.dot(x_ref[0, 0], wx, preferred_element_type=jnp.float32) + b_ref[0]

    def cell(z, c_neg, c_pos=None):
        # Gate slices are 128-lane aligned (C is a multiple of 128).
        i_g = jax.nn.sigmoid(z[:, 0 * C:1 * C])
        f1g = jax.nn.sigmoid(z[:, 1 * C:2 * C])
        o_g = jax.nn.sigmoid(z[:, 3 * C:4 * C])
        g_g = jnp.tanh(z[:, 4 * C:5 * C])
        c_new = f1g * c_neg + i_g * g_g
        if c_pos is not None:
            f2g = jax.nn.sigmoid(z[:, 2 * C:3 * C])
            c_new = c_new + f2g * c_pos
        h_new = o_g * jnp.tanh(c_new)
        return h_new, c_new

    @pl.when(row == 0)
    def _():
        # Row 0 reads its own running values (reference clamps i-1 -> 0), so it
        # is a serial left-to-right column scan.  The j+1 neighbor is always
        # still the zero init state on row 0, so the u2 term and c_pos vanish.
        # W is static -> fully unrolled; results stored per column into the
        # scratch slices (bounded live range, no concatenate).
        h_col = jnp.zeros((N, C), jnp.float32)
        c_col = jnp.zeros((N, C), jnp.float32)
        for j in range(W):
            z = xz[j * N:(j + 1) * N, :]
            if j > 0:
                z = z + jnp.dot(h_col.astype(u1.dtype), u1,
                                preferred_element_type=jnp.float32)
            h_col, c_col = cell(z, c_col)                  # c_pos == 0 on row 0
            prev_h_ref[j * N:(j + 1) * N, :] = h_col
            prev_c_ref[j * N:(j + 1) * N, :] = c_col

    @pl.when(row > 0)
    def _():
        h_prev = prev_h_ref[...]                            # finished prev row
        c_prev = prev_c_ref[...]
        rid = jax.lax.broadcasted_iota(jnp.int32, (WN, C), 0)
        # Boundary-clamped neighbor gathers: XLU roll + first/last-N fix-up.
        h_neg = jnp.where(rid < N, h_prev, pltpu.roll(h_prev, N, 0))
        c_neg = jnp.where(rid < N, c_prev, pltpu.roll(c_prev, N, 0))
        h_pos = jnp.where(rid >= WN - N, h_prev, pltpu.roll(h_prev, WN - N, 0))
        c_pos = jnp.where(rid >= WN - N, c_prev, pltpu.roll(c_prev, WN - N, 0))
        z = (xz
             + jnp.dot(h_neg.astype(u1.dtype), u1,
                       preferred_element_type=jnp.float32)
             + jnp.dot(h_pos.astype(u2.dtype), u2,
                       preferred_element_type=jnp.float32))
        h_new, c_new = cell(z, c_neg, c_pos)
        prev_h_ref[...] = h_new
        prev_c_ref[...] = c_new

    # Fused, lane-dense 1x1-conv partial for this pair on the finished row
    # (the 2*hid feature map of the pair never hits HBM; pair partials are
    # summed and the bias added outside the kernel -- exact, conv is linear).
    wc = wc_ref[0]
    out_ref[0, 0] = jnp.dot(prev_h_ref[...].astype(wc.dtype), wc,
                            preferred_element_type=jnp.float32)


# ----------------------------------------------------------------------------
# PyraMiDLSTM layer / model (glue in plain JAX; hot path in the kernel above).
# ----------------------------------------------------------------------------
def pyramid_layer_forward(x_nchw, lp):
    Nb, Cin, H, W = x_nchw.shape
    C = lp["u1"].shape[1]                 # 2 * hid_p (per direction pair)
    G = lp["u1"].shape[2]                 # 5 * C
    out_ch_p = lp["conv_wT"].shape[2]     # lane-padded conv channels
    out_ch = lp["conv_b"].shape[0]
    WN = W * Nb
    Cin2 = 2 * Cin

    out = jnp.transpose(x_nchw, (2, 3, 0, 1))              # (H, W, N, Cin)
    # Four sweep directions; outputs are concatenated WITHOUT un-flipping,
    # exactly as the reference does.  Pair p carries directions (2p, 2p+1)
    # stacked on the channel (K) axis (Wx is block-diagonal over directions).
    dirs = [out,
            jnp.flip(out, axis=0),
            jnp.flip(out, axis=1),
            jnp.flip(jnp.flip(out, axis=0), axis=1)]
    dirs = [d.reshape(H, WN, Cin) for d in dirs]
    x4 = jnp.stack([jnp.concatenate(dirs[0:2], axis=-1),
                    jnp.concatenate(dirs[2:4], axis=-1)],
                   axis=0).astype(jnp.bfloat16)             # (2, H, WN, 2*Cin)

    kernel = functools.partial(_sweep_kernel, C=C, W=W, N=Nb)
    conv_part = pl.pallas_call(
        kernel,
        out_shape=jax.ShapeDtypeStruct((2, H, WN, out_ch_p), jnp.float32),
        grid_spec=pltpu.PrefetchScalarGridSpec(
            num_scalar_prefetch=0,
            grid=(2, H),                                    # (pair, row)
            in_specs=[
                pl.BlockSpec((1, 1, WN, Cin2), lambda p, i: (p, i, 0, 0)),
                _row_invariant_spec((1, Cin2, G), lambda p, i: (p, 0, 0)),
                _row_invariant_spec((1, 1, G), lambda p, i: (p, 0, 0)),
                _row_invariant_spec((1, C, G), lambda p, i: (p, 0, 0)),
                _row_invariant_spec((1, C, G), lambda p, i: (p, 0, 0)),
                _row_invariant_spec((1, C, out_ch_p), lambda p, i: (p, 0, 0)),
            ],
            out_specs=pl.BlockSpec((1, 1, WN, out_ch_p),
                                   lambda p, i: (p, i, 0, 0)),
            scratch_shapes=[
                pltpu.VMEM((WN, C), jnp.float32),   # previous-row h (this pair)
                pltpu.VMEM((WN, C), jnp.float32),   # previous-row c (this pair)
            ],
        ),
        compiler_params=pltpu.CompilerParams(
            # pair axis is parallel (one TC each on v7x); row axis carries the
            # recurrence and must stay sequential.
            dimension_semantics=("parallel", "arbitrary"),
            # Keep the scoped limit <= ~48 MiB so the same config also fits
            # v7x's 64 MiB physical VMEM (review item on per-gen budgets).
            vmem_limit_bytes=48 * 1024 * 1024),
    )(x4, lp["wx"], lp["b"], lp["u1"], lp["u2"], lp["conv_wT"])

    # Sum the two direction-pair partials, add bias, drop lane padding.
    y = conv_part.sum(axis=0)[:, :, :out_ch] + lp["conv_b"]
    y = y.reshape(H, W, Nb, out_ch)
    return jnp.transpose(y, (2, 3, 0, 1))                   # (N, out_ch, H, W)


def pyramid_model_forward(x, all_layer_params):
    out = x
    for lp in all_layer_params:
        out = pyramid_layer_forward(out, lp)
    return out


# ----------------------------------------------------------------------------
# Parameter construction: per-direction weights packed per PAIR into a
# block-diagonal, gate-major, lane-padded layout.
#   z column = gate * C + dl * hid_p + unit, h column = dl * hid_p + unit,
#   with C = 2 * hid_p (multiple of 128 lanes), dl in {0,1} the local dir.
# Padded units have zero weights/bias and provably stay at 0 (exact in bf16).
# ----------------------------------------------------------------------------
def init_layer_params(key, in_ch, hid, out_ch):
    hid_p = ((hid + 63) // 64) * 64       # so C = 2*hid_p is a multiple of 128
    C = 2 * hid_p
    G = 5 * C
    out_ch_p = ((out_ch + 127) // 128) * 128

    wx = jnp.zeros((2, 2 * in_ch, G), jnp.float32)
    u1 = jnp.zeros((2, C, G), jnp.float32)
    u2 = jnp.zeros((2, C, G), jnp.float32)
    b = jnp.zeros((2, 1, G), jnp.float32)
    conv_wT = jnp.zeros((2, C, out_ch_p), jnp.float32)

    kc = jax.random.fold_in(key, 100)
    conv_w = 0.1 * jax.random.normal(kc, (out_ch, 4 * hid), jnp.float32)
    conv_b = jnp.zeros((out_ch,), jnp.float32)

    for d in range(4):                    # global direction -> (pair, local)
        p, dl = divmod(d, 2)
        kd = jax.random.fold_in(key, d)
        k1, k2, k3 = jax.random.split(kd, 3)
        wx_d = 0.1 * jax.random.normal(k1, (in_ch, 5 * hid), jnp.float32)
        u1_d = 0.1 * jax.random.normal(k2, (hid, 5 * hid), jnp.float32)
        u2_d = 0.1 * jax.random.normal(k3, (hid, 5 * hid), jnp.float32)
        for g in range(5):
            c0 = g * C + dl * hid_p
            wx = wx.at[p, dl * in_ch:(dl + 1) * in_ch, c0:c0 + hid].set(
                wx_d[:, g * hid:(g + 1) * hid])
            u1 = u1.at[p, dl * hid_p:dl * hid_p + hid, c0:c0 + hid].set(
                u1_d[:, g * hid:(g + 1) * hid])
            u2 = u2.at[p, dl * hid_p:dl * hid_p + hid, c0:c0 + hid].set(
                u2_d[:, g * hid:(g + 1) * hid])
        conv_wT = conv_wT.at[p, dl * hid_p:dl * hid_p + hid, :out_ch].set(
            conv_w[:, d * hid:(d + 1) * hid].T)

    # bf16 storage for MXU operands (zeros stay exactly zero); bias and all
    # recurrent state / gate math remain f32.
    return dict(wx=wx.astype(jnp.bfloat16), u1=u1.astype(jnp.bfloat16),
                u2=u2.astype(jnp.bfloat16), b=b,
                conv_wT=conv_wT.astype(jnp.bfloat16), conv_b=conv_b)


if __name__ == "__main__":
    _USE_BUFFERED1 = _probe_buffered1()

    key = jax.random.PRNGKey(0)
    Nb, Cch, H, W = 2, 4, 16, 16
    params_cfg = {"hidden_dim": [32, 32], "output_dim": 4}

    x = jax.random.normal(key, (Nb, Cch, H, W), jnp.float32)

    layer_params = []
    for i, hid in enumerate(params_cfg["hidden_dim"]):
        in_ch = Cch if i == 0 else params_cfg["hidden_dim"][i - 1]
        out_ch = (params_cfg["hidden_dim"][i + 1]
                  if i + 1 != len(params_cfg["hidden_dim"])
                  else params_cfg["output_dim"])
        layer_params.append(
            init_layer_params(jax.random.fold_in(key, 1000 + i),
                              in_ch, hid, out_ch))

    out = jax.jit(pyramid_model_forward)(x, layer_params)
    out = jax.block_until_ready(out)
    assert out.shape == (Nb, params_cfg["output_dim"], H, W), out.shape
    assert bool(jnp.all(jnp.isfinite(out)))
    print("KERNEL_OK")
</pallas_src>

<mosaic_0001>
module attributes {stable_mosaic.version = 11 : i64} {
  func.func @_copy_kernel(%arg0: i32, %arg1: memref<8x128xf32, #tpu.memory_space<vmem>>, %arg2: memref<8x128xf32, #tpu.memory_space<vmem>>) attributes {dimension_semantics = [#tpu.dimension_semantics<arbitrary>], iteration_bounds = array<i64: 2>, scalar_prefetch = 0 : i64, scratch_operands = 0 : i64, tpu.core_type = #tpu.core_type<tc>, window_params = [{pipeline_mode = #tpu.pipeline_mode<synchronous>, transform_indices = @transform_0, window_bounds = array<i64: 8, 128>}, {pipeline_mode = #tpu.pipeline_mode<synchronous>, transform_indices = @transform_1, window_bounds = array<i64: 8, 128>}]} {
    %c0 = arith.constant 0 : index
    %c0_0 = arith.constant 0 : index
    %0 = vector.load %arg1[%c0, %c0_0] : memref<8x128xf32, #tpu.memory_space<vmem>>, vector<8x128xf32>
    %c0_1 = arith.constant 0 : index
    %c0_2 = arith.constant 0 : index
    %1 = vector.load %arg2[%c0_1, %c0_2] : memref<8x128xf32, #tpu.memory_space<vmem>>, vector<8x128xf32>
    tpu.vector_store %arg2[%c0_1, %c0_2], %0 {strides = array<i32>} : memref<8x128xf32, #tpu.memory_space<vmem>>, vector<8x128xf32>,
    return
  }
  func.func @transform_0(%arg0: i32) -> (i32, i32) {
    %c0_i32 = arith.constant 0 : i32
    %c0_i32_0 = arith.constant 0 : i32
    %c0_i32_1 = arith.constant 0 : i32
    return %c0_i32, %c0_i32_0 : i32, i32
  }
  func.func @transform_1(%arg0: i32) -> (i32, i32) {
    %c0_i32 = arith.constant 0 : i32
    %c0_i32_0 = arith.constant 0 : i32
    %c0_i32_1 = arith.constant 0 : i32
    return %c0_i32, %c0_i32_0 : i32, i32
  }
}

module attributes {stable_mosaic.version = 11 : i64} {
  func.func @_sweep_kernel(%arg0: i32, %arg1: i32, %arg2: memref<1x1x32x8xbf16, #tpu.memory_space<vmem>>, %arg3: memref<1x8x640xbf16, #tpu.memory_space<vmem>>, %arg4: memref<1x1x640xf32, #tpu.memory_space<vmem>>, %arg5: memref<1x128x640xbf16, #tpu.memory_space<vmem>>, %arg6: memref<1x128x640xbf16, #tpu.memory_space<vmem>>, %arg7: memref<1x128x128xbf16, #tpu.memory_space<vmem>>, %arg8: memref<1x1x32x128xf32, #tpu.memory_space<vmem>>, %arg9: memref<32x128xf32, #tpu.memory_space<vmem>>, %arg10: memref<32x128xf32, #tpu.memory_space<vmem>>) attributes {dimension_semantics = [#tpu.dimension_semantics<parallel>, #tpu.dimension_semantics<arbitrary>], iteration_bounds = array<i64: 2, 16>, scalar_prefetch = 0 : i64, scratch_operands = 2 : i64, tpu.core_type = #tpu.core_type<tc>, window_params = [{transform_indices = @transform_0, window_bounds = array<i64: 1, 1, 32, 8>}, {transform_indices = @transform_1, window_bounds = array<i64: 1, 8, 640>}, {transform_indices = @transform_2, window_bounds = array<i64: 1, 1, 640>}, {transform_indices = @transform_3, window_bounds = array<i64: 1, 128, 640>}, {transform_indices = @transform_4, window_bounds = array<i64: 1, 128, 640>}, {transform_indices = @transform_5, window_bounds = array<i64: 1, 128, 128>}, {transform_indices = @transform_6, window_bounds = array<i64: 1, 1, 32, 128>}]} {
    %c0 = arith.constant 0 : index
    %c0_0 = arith.constant 0 : index
    %c0_1 = arith.constant 0 : index
    %0 = vector.load %arg5[%c0, %c0_0, %c0_1] : memref<1x128x640xbf16, #tpu.memory_space<vmem>>, vector<1x128x640xbf16>
    %1 = vector.shape_cast %0 : vector<1x128x640xbf16> to vector<128x640xbf16>
    %c0_2 = arith.constant 0 : index
    %c0_3 = arith.constant 0 : index
    %c0_4 = arith.constant 0 : index
    %2 = vector.load %arg6[%c0_2, %c0_3, %c0_4] : memref<1x128x640xbf16, #tpu.memory_space<vmem>>, vector<1x128x640xbf16>
    %3 = vector.shape_cast %2 : vector<1x128x640xbf16> to vector<128x640xbf16>
    %c0_5 = arith.constant 0 : index
    %c0_6 = arith.constant 0 : index
    %c0_7 = arith.constant 0 : index
    %4 = vector.load %arg3[%c0_5, %c0_6, %c0_7] : memref<1x8x640xbf16, #tpu.memory_space<vmem>>, vector<1x8x640xbf16>
    %5 = vector.shape_cast %4 : vector<1x8x640xbf16> to vector<8x640xbf16>
    %c0_8 = arith.constant 0 : index
    %c0_9 = arith.constant 0 : index
    %c0_10 = arith.constant 0 : index
    %c0_11 = arith.constant 0 : index
    %6 = vector.load %arg2[%c0_8, %c0_9, %c0_10, %c0_11] : memref<1x1x32x8xbf16, #tpu.memory_space<vmem>>, vector<1x1x32x8xbf16>
    %7 = vector.shape_cast %6 : vector<1x1x32x8xbf16> to vector<32x8xbf16>
    %cst = arith.constant dense<0.000000e+00> : vector<32x640xf32>
    %8 = tpu.matmul %7, %5, %cst {dimension_numbers = #tpu.dot_dimension_numbers<[1], [0], [0], [1], [0, 0, 1, 1], [], []>} : vector<32x8xbf16>, vector<8x640xbf16>, vector<32x640xf32> -> vector<32x640xf32>
    %c0_12 = arith.constant 0 : index
    %c0_13 = arith.constant 0 : index
    %c0_14 = arith.constant 0 : index
    %9 = vector.load %arg4[%c0_12, %c0_13, %c0_14] : memref<1x1x640xf32, #tpu.memory_space<vmem>>, vector<1x1x640xf32>
    %10 = vector.shape_cast %9 : vector<1x1x640xf32> to vector<1x640xf32>
    %11 = vector.broadcast %10 : vector<1x640xf32> to vector<32x640xf32>
    %12 = arith.addf %8, %11 : vector<32x640xf32>
    %c0_i32 = arith.constant 0 : i32
    %13 = arith.cmpi eq, %arg1, %c0_i32 : i32
    %14 = arith.extui %13 : i1 to i32
    %c0_i32_15 = arith.constant 0 : i32
    %15 = arith.cmpi ne, %14, %c0_i32_15 : i32
    scf.if %15 {
      %cst_28 = arith.constant 0.000000e+00 : f32
      %27 = vector.broadcast %cst_28 : f32 to vector<2x128xf32>
      %28 = vector.extract_strided_slice %12 {offsets = [0, 0], sizes = [2, 640], strides = [1, 1]} : vector<32x640xf32> to vector<2x640xf32>
      %29 = vector.extract_strided_slice %28 {offsets = [0, 0], sizes = [2, 128], strides = [1, 1]} : vector<2x640xf32> to vector<2x128xf32>
      %30 = arith.negf %29 : vector<2x128xf32>
      %31 = math.exp %30 : vector<2x128xf32>
      %cst_29 = arith.constant 1.000000e+00 : f32
      %32 = vector.broadcast %cst_29 : f32 to vector<2x128xf32>
      %33 = arith.addf %32, %31 : vector<2x128xf32>
      %34 = arith.divf %32, %33 : vector<2x128xf32>
      %35 = vector.extract_strided_slice %28 {offsets = [0, 128], sizes = [2, 128], strides = [1, 1]} : vector<2x640xf32> to vector<2x128xf32>
      %36 = arith.negf %35 : vector<2x128xf32>
      %37 = math.exp %36 : vector<2x128xf32>
      %cst_30 = arith.constant 1.000000e+00 : f32
      %38 = vector.broadcast %cst_30 : f32 to vector<2x128xf32>
      %39 = arith.addf %38, %37 : vector<2x128xf32>
      %40 = arith.divf %38, %39 : vector<2x128xf32>
      %41 = vector.extract_strided_slice %28 {offsets = [0, 384], sizes = [2, 128], strides = [1, 1]} : vector<2x640xf32> to vector<2x128xf32>
      %42 = arith.negf %41 : vector<2x128xf32>
      %43 = math.exp %42 : vector<2x128xf32>
      %cst_31 = arith.constant 1.000000e+00 : f32
      %44 = vector.broadcast %cst_31 : f32 to vector<2x128xf32>
      %45 = arith.addf %44, %43 : vector<2x128xf32>
      %46 = arith.divf %44, %45 : vector<2x128xf32>
      %47 = vector.extract_strided_slice %28 {offsets = [0, 512], sizes = [2, 128], strides = [1, 1]} : vector<2x640xf32> to vector<2x128xf32>
      %48 = math.tanh %47 : vector<2x128xf32>
      %49 = arith.mulf %40, %27 : vector<2x128xf32>
      %50 = arith.mulf %34, %48 : vector<2x128xf32>
      %51 = arith.addf %49, %50 : vector<2x128xf32>
      %52 = math.tanh %51 : vector<2x128xf32>
      %53 = arith.mulf %46, %52 : vector<2x128xf32>
      %c0_32 = arith.constant 0 : index
      %c0_33 = arith.constant 0 : index
      %54 = vector.load %arg9[%c0_32, %c0_33] : memref<32x128xf32, #tpu.memory_space<vmem>>, vector<2x128xf32>
      tpu.vector_store %arg9[%c0_32, %c0_33], %53 {strides = array<i32>} : memref<32x128xf32, #tpu.memory_space<vmem>>, vector<2x128xf32>,
      %c0_34 = arith.constant 0 : index
      %c0_35 = arith.constant 0 : index
      %55 = vector.load %arg10[%c0_34, %c0_35] : memref<32x128xf32, #tpu.memory_space<vmem>>, vector<2x128xf32>
      tpu.vector_store %arg10[%c0_34, %c0_35], %51 {strides = array<i32>} : memref<32x128xf32, #tpu.memory_space<vmem>>, vector<2x128xf32>,
      %56 = vector.extract_strided_slice %12 {offsets = [2, 0], sizes = [2, 640], strides = [1, 1]} : vector<32x640xf32> to vector<2x640xf32>
      %57 = arith.truncf %53 : vector<2x128xf32> to vector<2x128xbf16>
      %cst_36 = arith.constant dense<0.000000e+00> : vector<2x640xf32>
      %58 = tpu.matmul %57, %1, %cst_36 {dimension_numbers = #tpu.dot_dimension_numbers<[1], [0], [0], [1], [0, 0, 1, 1], [], []>} : vector<2x128xbf16>, vector<128x640xbf16>, vector<2x640xf32> -> vector<2x640xf32>
      %59 = arith.addf %56, %58 : vector<2x640xf32>
      %60 = vector.extract_strided_slice %59 {offsets = [0, 0], sizes = [2, 128], strides = [1, 1]} : vector<2x640xf32> to vector<2x128xf32>
      %61 = arith.negf %60 : vector<2x128xf32>
      %62 = math.exp %61 : vector<2x128xf32>
      %cst_37 = arith.constant 1.000000e+00 : f32
      %63 = vector.broadcast %cst_37 : f32 to vector<2x128xf32>
      %64 = arith.addf %63, %62 : vector<2x128xf32>
      %65 = arith.divf %63, %64 : vector<2x128xf32>
      %66 = vector.extract_strided_slice %59 {offsets = [0, 128], sizes = [2, 128], strides = [1, 1]} : vector<2x640xf32> to vector<2x128xf32>
      %67 = arith.negf %66 : vector<2x128xf32>
      %68 = math.exp %67 : vector<2x128xf32>
      %cst_38 = arith.constant 1.000000e+00 : f32
      %69 = vector.broadcast %cst_38 : f32 to vector<2x128xf32>
      %70 = arith.addf %69, %68 : vector<2x128xf32>
      %71 = arith.divf %69, %70 : vector<2x128xf32>
      %72 = vector.extract_strided_slice %59 {offsets = [0, 384], sizes = [2, 128], strides = [1, 1]} : vector<2x640xf32> to vector<2x128xf32>
      %73 = arith.negf %72 : vector<2x128xf32>
      %74 = math.exp %73 : vector<2x128xf32>
      %cst_39 = arith.constant 1.000000e+00 : f32
      %75 = vector.broadcast %cst_39 : f32 to vector<2x128xf32>
      %76 = arith.addf %75, %74 : vector<2x128xf32>
      %77 = arith.divf %75, %76 : vector<2x128xf32>
      %78 = vector.extract_strided_slice %59 {offsets = [0, 512], sizes = [2, 128], strides = [1, 1]} : vector<2x640xf32> to vector<2x128xf32>
      %79 = math.tanh %78 : vector<2x128xf32>
      %80 = arith.mulf %71, %51 : vector<2x128xf32>
      %81 = arith.mulf %65, %79 : vector<2x128xf32>
      %82 = arith.addf %80, %81 : vector<2x128xf32>
      %83 = math.tanh %82 : vector<2x128xf32>
      %84 = arith.mulf %77, %83 : vector<2x128xf32>
      %c2 = arith.constant 2 : index
      %c0_40 = arith.constant 0 : index
      %85 = vector.load %arg9[%c2, %c0_40] : memref<32x128xf32, #tpu.memory_space<vmem>>, vector<2x128xf32>
      tpu.vector_store %arg9[%c2, %c0_40], %84 {strides = array<i32>} : memref<32x128xf32, #tpu.memory_space<vmem>>, vector<2x128xf32>,
      %c2_41 = arith.constant 2 : index
      %c0_42 = arith.constant 0 : index
      %86 = vector.load %arg10[%c2_41, %c0_42] : memref<32x128xf32, #tpu.memory_space<vmem>>, vector<2x128xf32>
      tpu.vector_store %arg10[%c2_41, %c0_42], %82 {strides = array<i32>} : memref<32x128xf32, #tpu.memory_space<vmem>>, vector<2x128xf32>,
      %87 = vector.extract_strided_slice %12 {offsets = [4, 0], sizes = [2, 640], strides = [1, 1]} : vector<32x640xf32> to vector<2x640xf32>
      %88 = arith.truncf %84 : vector<2x128xf32> to vector<2x128xbf16>
      %cst_43 = arith.constant dense<0.000000e+00> : vector<2x640xf32>
      %89 = tpu.matmul %88, %1, %cst_43 {dimension_numbers = #tpu.dot_dimension_numbers<[1], [0], [0], [1], [0, 0, 1, 1], [], []>} : vector<2x128xbf16>, vector<128x640xbf16>, vector<2x640xf32> -> vector<2x640xf32>
      %90 = arith.addf %87, %89 : vector<2x640xf32>
      %91 = vector.extract_strided_slice %90 {offsets = [0, 0], sizes = [2, 128], strides = [1, 1]} : vector<2x640xf32> to vector<2x128xf32>
      %92 = arith.negf %91 : vector<2x128xf32>
      %93 = math.exp %92 : vector<2x128xf32>
      %cst_44 = arith.constant 1.000000e+00 : f32
      %94 = vector.broadcast %cst_44 : f32 to vector<2x128xf32>
      %95 = arith.addf %94, %93 : vector<2x128xf32>
      %96 = arith.divf %94, %95 : vector<2x128xf32>
      %97 = vector.extract_strided_slice %90 {offsets = [0, 128], sizes = [2, 128], strides = [1, 1]} : vector<2x640xf32> to vector<2x128xf32>
      %98 = arith.negf %97 : vector<2x128xf32>
      %99 = math.exp %98 : vector<2x128xf32>
      %cst_45 = arith.constant 1.000000e+00 : f32
      %100 = vector.broadcast %cst_45 : f32 to vector<2x128xf32>
      %101 = arith.addf %100, %99 : vector<2x128xf32>
      %102 = arith.divf %100, %101 : vector<2x128xf32>
      %103 = vector.extract_strided_slice %90 {offsets = [0, 384], sizes = [2, 128], strides = [1, 1]} : vector<2x640xf32> to vector<2x128xf32>
      %104 = arith.negf %103 : vector<2x128xf32>
      %105 = math.exp %104 : vector<2x128xf32>
      %cst_46 = arith.constant 1.000000e+00 : f32
      %106 = vector.broadcast %cst_46 : f32 to vector<2x128xf32>
      %107 = arith.addf %106, %105 : vector<2x128xf32>
      %108 = arith.divf %106, %107 : vector<2x128xf32>
      %109 = vector.extract_strided_slice %90 {offsets = [0, 512], sizes = [2, 128], strides = [1, 1]} : vector<2x640xf32> to vector<2x128xf32>
      %110 = math.tanh %109 : vector<2x128xf32>
      %111 = arith.mulf %102, %82 : vector<2x128xf32>
      %112 = arith.mulf %96, %110 : vector<2x128xf32>
      %113 = arith.addf %111, %112 : vector<2x128xf32>
      %114 = math.tanh %113 : vector<2x128xf32>
      %115 = arith.mulf %108, %114 : vector<2x128xf32>
      %c4 = arith.constant 4 : index
      %c0_47 = arith.constant 0 : index
      %116 = vector.load %arg9[%c4, %c0_47] : memref<32x128xf32, #tpu.memory_space<vmem>>, vector<2x128xf32>
      tpu.vector_store %arg9[%c4, %c0_47], %115 {strides = array<i32>} : memref<32x128xf32, #tpu.memory_space<vmem>>, vector<2x128xf32>,
      %c4_48 = arith.constant 4 : index
      %c0_49 = arith.constant 0 : index
      %117 = vector.load %arg10[%c4_48, %c0_49] : memref<32x128xf32, #tpu.memory_space<vmem>>, vector<2x128xf32>
      tpu.vector_store %arg10[%c4_48, %c0_49], %113 {strides = array<i32>} : memref<32x128xf32, #tpu.memory_space<vmem>>, vector<2x128xf32>,
      %118 = vector.extract_strided_slice %12 {offsets = [6, 0], sizes = [2, 640], strides = [1, 1]} : vector<32x640xf32> to vector<2x640xf32>
      %119 = arith.truncf %115 : vector<2x128xf32> to vector<2x128xbf16>
      %cst_50 = arith.constant dense<0.000000e+00> : vector<2x640xf32>
      %120 = tpu.matmul %119, %1, %cst_50 {dimension_numbers = #tpu.dot_dimension_numbers<[1], [0], [0], [1], [0, 0, 1, 1], [], []>} : vector<2x128xbf16>, vector<128x640xbf16>, vector<2x640xf32> -> vector<2x640xf32>
      %121 = arith.addf %118, %120 : vector<2x640xf32>
      %122 = vector.extract_strided_slice %121 {offsets = [0, 0], sizes = [2, 128], strides = [1, 1]} : vector<2x640xf32> to vector<2x128xf32>
      %123 = arith.negf %122 : vector<2x128xf32>
      %124 = math.exp %123 : vector<2x128xf32>
      %cst_51 = arith.constant 1.000000e+00 : f32
      %125 = vector.broadcast %cst_51 : f32 to vector<2x128xf32>
      %126 = arith.addf %125, %124 : vector<2x128xf32>
      %127 = arith.divf %125, %126 : vector<2x128xf32>
      %128 = vector.extract_strided_slice %121 {offsets = [0, 128], sizes = [2, 128], strides = [1, 1]} : vector<2x640xf32> to vector<2x128xf32>
      %129 = arith.negf %128 : vector<2x128xf32>
      %130 = math.exp %129 : vector<2x128xf32>
      %cst_52 = arith.constant 1.000000e+00 : f32
      %131 = vector.broadcast %cst_52 : f32 to vector<2x128xf32>
      %132 = arith.addf %131, %130 : vector<2x128xf32>
      %133 = arith.divf %131, %132 : vector<2x128xf32>
      %134 = vector.extract_strided_slice %121 {offsets = [0, 384], sizes = [2, 128], strides = [1, 1]} : vector<2x640xf32> to vector<2x128xf32>
      %135 = arith.negf %134 : vector<2x128xf32>
      %136 = math.exp %135 : vector<2x128xf32>
      %cst_53 = arith.constant 1.000000e+00 : f32
      %137 = vector.broadcast %cst_53 : f32 to vector<2x128xf32>
      %138 = arith.addf %137, %136 : vector<2x128xf32>
      %139 = arith.divf %137, %138 : vector<2x128xf32>
      %140 = vector.extract_strided_slice %121 {offsets = [0, 512], sizes = [2, 128], strides = [1, 1]} : vector<2x640xf32> to vector<2x128xf32>
      %141 = math.tanh %140 : vector<2x128xf32>
      %142 = arith.mulf %133, %113 : vector<2x128xf32>
      %143 = arith.mulf %127, %141 : vector<2x128xf32>
      %144 = arith.addf %142, %143 : vector<2x128xf32>
      %145 = math.tanh %144 : vector<2x128xf32>
      %146 = arith.mulf %139, %145 : vector<2x128xf32>
      %c6 = arith.constant 6 : index
      %c0_54 = arith.constant 0 : index
      %147 = vector.load %arg9[%c6, %c0_54] : memref<32x128xf32, #tpu.memory_space<vmem>>, vector<2x128xf32>
      tpu.vector_store %arg9[%c6, %c0_54], %146 {strides = array<i32>} : memref<32x128xf32, #tpu.memory_space<vmem>>, vector<2x128xf32>,
      %c6_55 = arith.constant 6 : index
      %c0_56 = arith.constant 0 : index
      %148 = vector.load %arg10[%c6_55, %c0_56] : memref<32x128xf32, #tpu.memory_space<vmem>>, vector<2x128xf32>
      tpu.vector_store %arg10[%c6_55, %c0_56], %144 {strides = array<i32>} : memref<32x128xf32, #tpu.memory_space<vmem>>, vector<2x128xf32>,
      %149 = vector.extract_strided_slice %12 {offsets = [8, 0], sizes = [2, 640], strides = [1, 1]} : vector<32x640xf32> to vector<2x640xf32>
      %150 = arith.truncf %146 : vector<2x128xf32> to vector<2x128xbf16>
      %cst_57 = arith.constant dense<0.000000e+00> : vector<2x640xf32>
      %151 = tpu.matmul %150, %1, %cst_57 {dimension_numbers = #tpu.dot_dimension_numbers<[1], [0], [0], [1], [0, 0, 1, 1], [], []>} : vector<2x128xbf16>, vector<128x640xbf16>, vector<2x640xf32> -> vector<2x640xf32>
      %152 = arith.addf %149, %151 : vector<2x640xf32>
      %153 = vector.extract_strided_slice %152 {offsets = [0, 0], sizes = [2, 128], strides = [1, 1]} : vector<2x640xf32> to vector<2x128xf32>
      %154 = arith.negf %153 : vector<2x128xf32>
      %155 = math.exp %154 : vector<2x128xf32>
      %cst_58 = arith.constant 1.000000e+00 : f32
      %156 = vector.broadcast %cst_58 : f32 to vector<2x128xf32>
      %157 = arith.addf %156, %155 : vector<2x128xf32>
      %158 = arith.divf %156, %157 : vector<2x128xf32>
      %159 = vector.extract_strided_slice %152 {offsets = [0, 128], sizes = [2, 128], strides = [1, 1]} : vector<2x640xf32> to vector<2x128xf32>
      %160 = arith.negf %159 : vector<2x128xf32>
      %161 = math.exp %160 : vector<2x128xf32>
      %cst_59 = arith.constant 1.000000e+00 : f32
      %162 = vector.broadcast %cst_59 : f32 to vector<2x128xf32>
      %163 = arith.addf %162, %161 : vector<2x128xf32>
      %164 = arith.divf %162, %163 : vector<2x128xf32>
      %165 = vector.extract_strided_slice %152 {offsets = [0, 384], sizes = [2, 128], strides = [1, 1]} : vector<2x640xf32> to vector<2x128xf32>
      %166 = arith.negf %165 : vector<2x128xf32>
      %167 = math.exp %166 : vector<2x128xf32>
      %cst_60 = arith.constant 1.000000e+00 : f32
      %168 = vector.broadcast %cst_60 : f32 to vector<2x128xf32>
      %169 = arith.addf %168, %167 : vector<2x128xf32>
      %170 = arith.divf %168, %169 : vector<2x128xf32>
      %171 = vector.extract_strided_slice %152 {offsets = [0, 512], sizes = [2, 128], strides = [1, 1]} : vector<2x640xf32> to vector<2x128xf32>
      %172 = math.tanh %171 : vector<2x128xf32>
      %173 = arith.mulf %164, %144 : vector<2x128xf32>
      %174 = arith.mulf %158, %172 : vector<2x128xf32>
      %175 = arith.addf %173, %174 : vector<2x128xf32>
      %176 = math.tanh %175 : vector<2x128xf32>
      %177 = arith.mulf %170, %176 : vector<2x128xf32>
      %c8 = arith.constant 8 : index
      %c0_61 = arith.constant 0 : index
      %178 = vector.load %arg9[%c8, %c0_61] : memref<32x128xf32, #tpu.memory_space<vmem>>, vector<2x128xf32>
      tpu.vector_store %arg9[%c8, %c0_61], %177 {strides = array<i32>} : memref<32x128xf32, #tpu.memory_space<vmem>>, vector<2x128xf32>,
      %c8_62 = arith.constant 8 : index
      %c0_63 = arith.constant 0 : index
      %179 = vector.load %arg10[%c8_62, %c0_63] : memref<32x128xf32, #tpu.memory_space<vmem>>, vector<2x128xf32>
      tpu.vector_store %arg10[%c8_62, %c0_63], %175 {strides = array<i32>} : memref<32x128xf32, #tpu.memory_space<vmem>>, vector<2x128xf32>,
      %180 = vector.extract_strided_slice %12 {offsets = [10, 0], sizes = [2, 640], strides = [1, 1]} : vector<32x640xf32> to vector<2x640xf32>
      %181 = arith.truncf %177 : vector<2x128xf32> to vector<2x128xbf16>
      %cst_64 = arith.constant dense<0.000000e+00> : vector<2x640xf32>
      %182 = tpu.matmul %181, %1, %cst_64 {dimension_numbers = #tpu.dot_dimension_numbers<[1], [0], [0], [1], [0, 0, 1, 1], [], []>} : vector<2x128xbf16>, vector<128x640xbf16>, vector<2x640xf32> -> vector<2x640xf32>
      %183 = arith.addf %180, %182 : vector<2x640xf32>
      %184 = vector.extract_strided_slice %183 {offsets = [0, 0], sizes = [2, 128], strides = [1, 1]} : vector<2x640xf32> to vector<2x128xf32>
      %185 = arith.negf %184 : vector<2x128xf32>
      %186 = math.exp %185 : vector<2x128xf32>
      %cst_65 = arith.constant 1.000000e+00 : f32
      %187 = vector.broadcast %cst_65 : f32 to vector<2x128xf32>
      %188 = arith.addf %187, %186 : vector<2x128xf32>
      %189 = arith.divf %187, %188 : vector<2x128xf32>
      %190 = vector.extract_strided_slice %183 {offsets = [0, 128], sizes = [2, 128], strides = [1, 1]} : vector<2x640xf32> to vector<2x128xf32>
      %191 = arith.negf %190 : vector<2x128xf32>
      %192 = math.exp %191 : vector<2x128xf32>
      %cst_66 = arith.constant 1.000000e+00 : f32
      %193 = vector.broadcast %cst_66 : f32 to vector<2x128xf32>
      %194 = arith.addf %193, %192 : vector<2x128xf32>
      %195 = arith.divf %193, %194 : vector<2x128xf32>
      %196 = vector.extract_strided_slice %183 {offsets = [0, 384], sizes = [2, 128], strides = [1, 1]} : vector<2x640xf32> to vector<2x128xf32>
      %197 = arith.negf %196 : vector<2x128xf32>
      %198 = math.exp %197 : vector<2x128xf32>
      %cst_67 = arith.constant 1.000000e+00 : f32
      %199 = vector.broadcast %cst_67 : f32 to vector<2x128xf32>
      %200 = arith.addf %199, %198 : vector<2x128xf32>
      %201 = arith.divf %199, %200 : vector<2x128xf32>
      %202 = vector.extract_strided_slice %183 {offsets = [0, 512], sizes = [2, 128], strides = [1, 1]} : vector<2x640xf32> to vector<2x128xf32>
      %203 = math.tanh %202 : vector<2x128xf32>
      %204 = arith.mulf %195, %175 : vector<2x128xf32>
      %205 = arith.mulf %189, %203 : vector<2x128xf32>
      %206 = arith.addf %204, %205 : vector<2x128xf32>
      %207 = math.tanh %206 : vector<2x128xf32>
      %208 = arith.mulf %201, %207 : vector<2x128xf32>
      %c10 = arith.constant 10 : index
      %c0_68 = arith.constant 0 : index
      %209 = vector.load %arg9[%c10, %c0_68] : memref<32x128xf32, #tpu.memory_space<vmem>>, vector<2x128xf32>
      tpu.vector_store %arg9[%c10, %c0_68], %208 {strides = array<i32>} : memref<32x128xf32, #tpu.memory_space<vmem>>, vector<2x128xf32>,
      %c10_69 = arith.constant 10 : index
      %c0_70 = arith.constant 0 : index
      %210 = vector.load %arg10[%c10_69, %c0_70] : memref<32x128xf32, #tpu.memory_space<vmem>>, vector<2x128xf32>
      tpu.vector_store %arg10[%c10_69, %c0_70], %206 {strides = array<i32>} : memref<32x128xf32, #tpu.memory_space<vmem>>, vector<2x128xf32>,
      %211 = vector.extract_strided_slice %12 {offsets = [12, 0], sizes = [2, 640], strides = [1, 1]} : vector<32x640xf32> to vector<2x640xf32>
      %212 = arith.truncf %208 : vector<2x128xf32> to vector<2x128xbf16>
      %cst_71 = arith.constant dense<0.000000e+00> : vector<2x640xf32>
      %213 = tpu.matmul %212, %1, %cst_71 {dimension_numbers = #tpu.dot_dimension_numbers<[1], [0], [0], [1], [0, 0, 1, 1], [], []>} : vector<2x128xbf16>, vector<128x640xbf16>, vector<2x640xf32> -> vector<2x640xf32>
      %214 = arith.addf %211, %213 : vector<2x640xf32>
      %215 = vector.extract_strided_slice %214 {offsets = [0, 0], sizes = [2, 128], strides = [1, 1]} : vector<2x640xf32> to vector<2x128xf32>
      %216 = arith.negf %215 : vector<2x128xf32>
      %217 = math.exp %216 : vector<2x128xf32>
      %cst_72 = arith.constant 1.000000e+00 : f32
      %218 = vector.broadcast %cst_72 : f32 to vector<2x128xf32>
      %219 = arith.addf %218, %217 : vector<2x128xf32>
      %220 = arith.divf %218, %219 : vector<2x128xf32>
      %221 = vector.extract_strided_slice %214 {offsets = [0, 128], sizes = [2, 128], strides = [1, 1]} : vector<2x640xf32> to vector<2x128xf32>
      %222 = arith.negf %221 : vector<2x128xf32>
      %223 = math.exp %222 : vector<2x128xf32>
      %cst_73 = arith.constant 1.000000e+00 : f32
      %224 = vector.broadcast %cst_73 : f32 to vector<2x128xf32>
      %225 = arith.addf %224, %223 : vector<2x128xf32>
      %226 = arith.divf %224, %225 : vector<2x128xf32>
      %227 = vector.extract_strided_slice %214 {offsets = [0, 384], sizes = [2, 128], strides = [1, 1]} : vector<2x640xf32> to vector<2x128xf32>
      %228 = arith.negf %227 : vector<2x128xf32>
      %229 = math.exp %228 : vector<2x128xf32>
      %cst_74 = arith.constant 1.000000e+00 : f32
      %230 = vector.broadcast %cst_74 : f32 to vector<2x128xf32>
      %231 = arith.addf %230, %229 : vector<2x128xf32>
      %232 = arith.divf %230, %231 : vector<2x128xf32>
      %233 = vector.extract_strided_slice %214 {offsets = [0, 512], sizes = [2, 128], strides = [1, 1]} : vector<2x640xf32> to vector<2x128xf32>
      %234 = math.tanh %233 : vector<2x128xf32>
      %235 = arith.mulf %226, %206 : vector<2x128xf32>
      %236 = arith.mulf %220, %234 : vector<2x128xf32>
      %237 = arith.addf %235, %236 : vector<2x128xf32>
      %238 = math.tanh %237 : vector<2x128xf32>
      %239 = arith.mulf %232, %238 : vector<2x128xf32>
      %c12 = arith.constant 12 : index
      %c0_75 = arith.constant 0 : index
      %240 = vector.load %arg9[%c12, %c0_75] : memref<32x128xf32, #tpu.memory_space<vmem>>, vector<2x128xf32>
      tpu.vector_store %arg9[%c12, %c0_75], %239 {strides = array<i32>} : memref<32x128xf32, #tpu.memory_space<vmem>>, vector<2x128xf32>,
      %c12_76 = arith.constant 12 : index
      %c0_77 = arith.constant 0 : index
      %241 = vector.load %arg10[%c12_76, %c0_77] : memref<32x128xf32, #tpu.memory_space<vmem>>, vector<2x128xf32>
      tpu.vector_store %arg10[%c12_76, %c0_77], %237 {strides = array<i32>} : memref<32x128xf32, #tpu.memory_space<vmem>>, vector<2x128xf32>,
      %242 = vector.extract_strided_slice %12 {offsets = [14, 0], sizes = [2, 640], strides = [1, 1]} : vector<32x640xf32> to vector<2x640xf32>
      %243 = arith.truncf %239 : vector<2x128xf32> to vector<2x128xbf16>
      %cst_78 = arith.constant dense<0.000000e+00> : vector<2x640xf32>
      %244 = tpu.matmul %243, %1, %cst_78 {dimension_numbers = #tpu.dot_dimension_numbers<[1], [0], [0], [1], [0, 0, 1, 1], [], []>} : vector<2x128xbf16>, vector<128x640xbf16>, vector<2x640xf32> -> vector<2x640xf32>
      %245 = arith.addf %242, %244 : vector<2x640xf32>
      %246 = vector.extract_strided_slice %245 {offsets = [0, 0], sizes = [2, 128], strides = [1, 1]} : vector<2x640xf32> to vector<2x128xf32>
      %247 = arith.negf %246 : vector<2x128xf32>
      %248 = math.exp %247 : vector<2x128xf32>
      %cst_79 = arith.constant 1.000000e+00 : f32
      %249 = vector.broadcast %cst_79 : f32 to vector<2x128xf32>
      %250 = arith.addf %249, %248 : vector<2x128xf32>
      %251 = arith.divf %249, %250 : vector<2x128xf32>
      %252 = vector.extract_strided_slice %245 {offsets = [0, 128], sizes = [2, 128], strides = [1, 1]} : vector<2x640xf32> to vector<2x128xf32>
      %253 = arith.negf %252 : vector<2x128xf32>
      %254 = math.exp %253 : vector<2x128xf32>
      %cst_80 = arith.constant 1.000000e+00 : f32
      %255 = vector.broadcast %cst_80 : f32 to vector<2x128xf32>
      %256 = arith.addf %255, %254 : vector<2x128xf32>
      %257 = arith.divf %255, %256 : vector<2x128xf32>
      %258 = vector.extract_strided_slice %245 {offsets = [0, 384], sizes = [2, 128], strides = [1, 1]} : vector<2x640xf32> to vector<2x128xf32>
      %259 = arith.negf %258 : vector<2x128xf32>
      %260 = math.exp %259 : vector<2x128xf32>
      %cst_81 = arith.constant 1.000000e+00 : f32
      %261 = vector.broadcast %cst_81 : f32 to vector<2x128xf32>
      %262 = arith.addf %261, %260 : vector<2x128xf32>
      %263 = arith.divf %261, %262 : vector<2x128xf32>
      %264 = vector.extract_strided_slice %245 {offsets = [0, 512], sizes = [2, 128], strides = [1, 1]} : vector<2x640xf32> to vector<2x128xf32>
      %265 = math.tanh %264 : vector<2x128xf32>
      %266 = arith.mulf %257, %237 : vector<2x128xf32>
      %267 = arith.mulf %251, %265 : vector<2x128xf32>
      %268 = arith.addf %266, %267 : vector<2x128xf32>
      %269 = math.tanh %268 : vector<2x128xf32>
      %270 = arith.mulf %263, %269 : vector<2x128xf32>
      %c14 = arith.constant 14 : index
      %c0_82 = arith.constant 0 : index
      %271 = vector.load %arg9[%c14, %c0_82] : memref<32x128xf32, #tpu.memory_space<vmem>>, vector<2x128xf32>
      tpu.vector_store %arg9[%c14, %c0_82], %270 {strides = array<i32>} : memref<32x128xf32, #tpu.memory_space<vmem>>, vector<2x128xf32>,
      %c14_83 = arith.constant 14 : index
      %c0_84 = arith.constant 0 : index
      %272 = vector.load %arg10[%c14_83, %c0_84] : memref<32x128xf32, #tpu.memory_space<vmem>>, vector<2x128xf32>
      tpu.vector_store %arg10[%c14_83, %c0_84], %268 {strides = array<i32>} : memref<32x128xf32, #tpu.memory_space<vmem>>, vector<2x128xf32>,
      %273 = vector.extract_strided_slice %12 {offsets = [16, 0], sizes = [2, 640], strides = [1, 1]} : vector<32x640xf32> to vector<2x640xf32>
      %274 = arith.truncf %270 : vector<2x128xf32> to vector<2x128xbf16>
      %cst_85 = arith.constant dense<0.000000e+00> : vector<2x640xf32>
      %275 = tpu.matmul %274, %1, %cst_85 {dimension_numbers = #tpu.dot_dimension_numbers<[1], [0], [0], [1], [0, 0, 1, 1], [], []>} : vector<2x128xbf16>, vector<128x640xbf16>, vector<2x640xf32> -> vector<2x640xf32>
      %276 = arith.addf %273, %275 : vector<2x640xf32>
      %277 = vector.extract_strided_slice %276 {offsets = [0, 0], sizes = [2, 128], strides = [1, 1]} : vector<2x640xf32> to vector<2x128xf32>
      %278 = arith.negf %277 : vector<2x128xf32>
      %279 = math.exp %278 : vector<2x128xf32>
      %cst_86 = arith.constant 1.000000e+00 : f32
      %280 = vector.broadcast %cst_86 : f32 to vector<2x128xf32>
      %281 = arith.addf %280, %279 : vector<2x128xf32>
      %282 = arith.divf %280, %281 : vector<2x128xf32>
      %283 = vector.extract_strided_slice %276 {offsets = [0, 128], sizes = [2, 128], strides = [1, 1]} : vector<2x640xf32> to vector<2x128xf32>
      %284 = arith.negf %283 : vector<2x128xf32>
      %285 = math.exp %284 : vector<2x128xf32>
      %cst_87 = arith.constant 1.000000e+00 : f32
      %286 = vector.broadcast %cst_87 : f32 to vector<2x128xf32>
      %287 = arith.addf %286, %285 : vector<2x128xf32>
      %288 = arith.divf %286, %287 : vector<2x128xf32>
      %289 = vector.extract_strided_slice %276 {offsets = [0, 384], sizes = [2, 128], strides = [1, 1]} : vector<2x640xf32> to vector<2x128xf32>
      %290 = arith.negf %289 : vector<2x128xf32>
      %291 = math.exp %290 : vector<2x128xf32>
      %cst_88 = arith.constant 1.000000e+00 : f32
      %292 = vector.broadcast %cst_88 : f32 to vector<2x128xf32>
      %293 = arith.addf %292, %291 : vector<2x128xf32>
      %294 = arith.divf %292, %293 : vector<2x128xf32>
      %295 = vector.extract_strided_slice %276 {offsets = [0, 512], sizes = [2, 128], strides = [1, 1]} : vector<2x640xf32> to vector<2x128xf32>
      %296 = math.tanh %295 : vector<2x128xf32>
      %297 = arith.mulf %288, %268 : vector<2x128xf32>
      %298 = arith.mulf %282, %296 : vector<2x128xf32>
      %299 = arith.addf %297, %298 : vector<2x128xf32>
      %300 = math.tanh %299 : vector<2x128xf32>
      %301 = arith.mulf %294, %300 : vector<2x128xf32>
      %c16 = arith.constant 16 : index
      %c0_89 = arith.constant 0 : index
      %302 = vector.load %arg9[%c16, %c0_89] : memref<32x128xf32, #tpu.memory_space<vmem>>, vector<2x128xf32>
      tpu.vector_store %arg9[%c16, %c0_89], %301 {strides = array<i32>} : memref<32x128xf32, #tpu.memory_space<vmem>>, vector<2x128xf32>,
      %c16_90 = arith.constant 16 : index
      %c0_91 = arith.constant 0 : index
      %303 = vector.load %arg10[%c16_90, %c0_91] : memref<32x128xf32, #tpu.memory_space<vmem>>, vector<2x128xf32>
      tpu.vector_store %arg10[%c16_90, %c0_91], %299 {strides = array<i32>} : memref<32x128xf32, #tpu.memory_space<vmem>>, vector<2x128xf32>,
      %304 = vector.extract_strided_slice %12 {offsets = [18, 0], sizes = [2, 640], strides = [1, 1]} : vector<32x640xf32> to vector<2x640xf32>
      %305 = arith.truncf %301 : vector<2x128xf32> to vector<2x128xbf16>
      %cst_92 = arith.constant dense<0.000000e+00> : vector<2x640xf32>
      %306 = tpu.matmul %305, %1, %cst_92 {dimension_numbers = #tpu.dot_dimension_numbers<[1], [0], [0], [1], [0, 0, 1, 1], [], []>} : vector<2x128xbf16>, vector<128x640xbf16>, vector<2x640xf32> -> vector<2x640xf32>
      %307 = arith.addf %304, %306 : vector<2x640xf32>
      %308 = vector.extract_strided_slice %307 {offsets = [0, 0], sizes = [2, 128], strides = [1, 1]} : vector<2x640xf32> to vector<2x128xf32>
      %309 = arith.negf %308 : vector<2x128xf32>
      %310 = math.exp %309 : vector<2x128xf32>
      %cst_93 = arith.constant 1.000000e+00 : f32
      %311 = vector.broadcast %cst_93 : f32 to vector<2x128xf32>
      %312 = arith.addf %311, %310 : vector<2x128xf32>
      %313 = arith.divf %311, %312 : vector<2x128xf32>
      %314 = vector.extract_strided_slice %307 {offsets = [0, 128], sizes = [2, 128], strides = [1, 1]} : vector<2x640xf32> to vector<2x128xf32>
      %315 = arith.negf %314 : vector<2x128xf32>
      %316 = math.exp %315 : vector<2x128xf32>
      %cst_94 = arith.constant 1.000000e+00 : f32
      %317 = vector.broadcast %cst_94 : f32 to vector<2x128xf32>
      %318 = arith.addf %317, %316 : vector<2x128xf32>
      %319 = arith.divf %317, %318 : vector<2x128xf32>
      %320 = vector.extract_strided_slice %307 {offsets = [0, 384], sizes = [2, 128], strides = [1, 1]} : vector<2x640xf32> to vector<2x128xf32>
      %321 = arith.negf %320 : vector<2x128xf32>
      %322 = math.exp %321 : vector<2x128xf32>
      %cst_95 = arith.constant 1.000000e+00 : f32
      %323 = vector.broadcast %cst_95 : f32 to vector<2x128xf32>
      %324 = arith.addf %323, %322 : vector<2x128xf32>
      %325 = arith.divf %323, %324 : vector<2x128xf32>
      %326 = vector.extract_strided_slice %307 {offsets = [0, 512], sizes = [2, 128], strides = [1, 1]} : vector<2x640xf32> to vector<2x128xf32>
      %327 = math.tanh %326 : vector<2x128xf32>
      %328 = arith.mulf %319, %299 : vector<2x128xf32>
      %329 = arith.mulf %313, %327 : vector<2x128xf32>
      %330 = arith.addf %328, %329 : vector<2x128xf32>
      %331 = math.tanh %330 : vector<2x128xf32>
      %332 = arith.mulf %325, %331 : vector<2x128xf32>
      %c18 = arith.constant 18 : index
      %c0_96 = arith.constant 0 : index
      %333 = vector.load %arg9[%c18, %c0_96] : memref<32x128xf32, #tpu.memory_space<vmem>>, vector<2x128xf32>
      tpu.vector_store %arg9[%c18, %c0_96], %332 {strides = array<i32>} : memref<32x128xf32, #tpu.memory_space<vmem>>, vector<2x128xf32>,
      %c18_97 = arith.constant 18 : index
      %c0_98 = arith.constant 0 : index
      %334 = vector.load %arg10[%c18_97, %c0_98] : memref<32x128xf32, #tpu.memory_space<vmem>>, vector<2x128xf32>
      tpu.vector_store %arg10[%c18_97, %c0_98], %330 {strides = array<i32>} : memref<32x128xf32, #tpu.memory_space<vmem>>, vector<2x128xf32>,
      %335 = vector.extract_strided_slice %12 {offsets = [20, 0], sizes = [2, 640], strides = [1, 1]} : vector<32x640xf32> to vector<2x640xf32>
      %336 = arith.truncf %332 : vector<2x128xf32> to vector<2x128xbf16>
      %cst_99 = arith.constant dense<0.000000e+00> : vector<2x640xf32>
      %337 = tpu.matmul %336, %1, %cst_99 {dimension_numbers = #tpu.dot_dimension_numbers<[1], [0], [0], [1], [0, 0, 1, 1], [], []>} : vector<2x128xbf16>, vector<128x640xbf16>, vector<2x640xf32> -> vector<2x640xf32>
      %338 = arith.addf %335, %337 : vector<2x640xf32>
      %339 = vector.extract_strided_slice %338 {offsets = [0, 0], sizes = [2, 128], strides = [1, 1]} : vector<2x640xf32> to vector<2x128xf32>
      %340 = arith.negf %339 : vector<2x128xf32>
      %341 = math.exp %340 : vector<2x128xf32>
      %cst_100 = arith.constant 1.000000e+00 : f32
      %342 = vector.broadcast %cst_100 : f32 to vector<2x128xf32>
      %343 = arith.addf %342, %341 : vector<2x128xf32>
      %344 = arith.divf %342, %343 : vector<2x128xf32>
      %345 = vector.extract_strided_slice %338 {offsets = [0, 128], sizes = [2, 128], strides = [1, 1]} : vector<2x640xf32> to vector<2x128xf32>
      %346 = arith.negf %345 : vector<2x128xf32>
      %347 = math.exp %346 : vector<2x128xf32>
      %cst_101 = arith.constant 1.000000e+00 : f32
      %348 = vector.broadcast %cst_101 : f32 to vector<2x128xf32>
      %349 = arith.addf %348, %347 : vector<2x128xf32>
      %350 = arith.divf %348, %349 : vector<2x128xf32>
      %351 = vector.extract_strided_slice %338 {offsets = [0, 384], sizes = [2, 128], strides = [1, 1]} : vector<2x640xf32> to vector<2x128xf32>
      %352 = arith.negf %351 : vector<2x128xf32>
      %353 = math.exp %352 : vector<2x128xf32>
      %cst_102 = arith.constant 1.000000e+00 : f32
      %354 = vector.broadcast %cst_102 : f32 to vector<2x128xf32>
      %355 = arith.addf %354, %353 : vector<2x128xf32>
      %356 = arith.divf %354, %355 : vector<2x128xf32>
      %357 = vector.extract_strided_slice %338 {offsets = [0, 512], sizes = [2, 128], strides = [1, 1]} : vector<2x640xf32> to vector<2x128xf32>
      %358 = math.tanh %357 : vector<2x128xf32>
      %359 = arith.mulf %350, %330 : vector<2x128xf32>
      %360 = arith.mulf %344, %358 : vector<2x128xf32>
      %361 = arith.addf %359, %360 : vector<2x128xf32>
      %362 = math.tanh %361 : vector<2x128xf32>
      %363 = arith.mulf %356, %362 : vector<2x128xf32>
      %c20 = arith.constant 20 : index
      %c0_103 = arith.constant 0 : index
      %364 = vector.load %arg9[%c20, %c0_103] : memref<32x128xf32, #tpu.memory_space<vmem>>, vector<2x128xf32>
      tpu.vector_store %arg9[%c20, %c0_103], %363 {strides = array<i32>} : memref<32x128xf32, #tpu.memory_space<vmem>>, vector<2x128xf32>,
      %c20_104 = arith.constant 20 : index
      %c0_105 = arith.constant 0 : index
      %365 = vector.load %arg10[%c20_104, %c0_105] : memref<32x128xf32, #tpu.memory_space<vmem>>, vector<2x128xf32>
      tpu.vector_store %arg10[%c20_104, %c0_105], %361 {strides = array<i32>} : memref<32x128xf32, #tpu.memory_space<vmem>>, vector<2x128xf32>,
      %366 = vector.extract_strided_slice %12 {offsets = [22, 0], sizes = [2, 640], strides = [1, 1]} : vector<32x640xf32> to vector<2x640xf32>
      %367 = arith.truncf %363 : vector<2x128xf32> to vector<2x128xbf16>
      %cst_106 = arith.constant dense<0.000000e+00> : vector<2x640xf32>
      %368 = tpu.matmul %367, %1, %cst_106 {dimension_numbers = #tpu.dot_dimension_numbers<[1], [0], [0], [1], [0, 0, 1, 1], [], []>} : vector<2x128xbf16>, vector<128x640xbf16>, vector<2x640xf32> -> vector<2x640xf32>
      %369 = arith.addf %366, %368 : vector<2x640xf32>
      %370 = vector.extract_strided_slice %369 {offsets = [0, 0], sizes = [2, 128], strides = [1, 1]} : vector<2x640xf32> to vector<2x128xf32>
      %371 = arith.negf %370 : vector<2x128xf32>
      %372 = math.exp %371 : vector<2x128xf32>
      %cst_107 = arith.constant 1.000000e+00 : f32
      %373 = vector.broadcast %cst_107 : f32 to vector<2x128xf32>
      %374 = arith.addf %373, %372 : vector<2x128xf32>
      %375 = arith.divf %373, %374 : vector<2x128xf32>
      %376 = vector.extract_strided_slice %369 {offsets = [0, 128], sizes = [2, 128], strides = [1, 1]} : vector<2x640xf32> to vector<2x128xf32>
      %377 = arith.negf %376 : vector<2x128xf32>
      %378 = math.exp %377 : vector<2x128xf32>
      %cst_108 = arith.constant 1.000000e+00 : f32
      %379 = vector.broadcast %cst_108 : f32 to vector<2x128xf32>
      %380 = arith.addf %379, %378 : vector<2x128xf32>
      %381 = arith.divf %379, %380 : vector<2x128xf32>
      %382 = vector.extract_strided_slice %369 {offsets = [0, 384], sizes = [2, 128], strides = [1, 1]} : vector<2x640xf32> to vector<2x128xf32>
      %383 = arith.negf %382 : vector<2x128xf32>
      %384 = math.exp %383 : vector<2x128xf32>
      %cst_109 = arith.constant 1.000000e+00 : f32
      %385 = vector.broadcast %cst_109 : f32 to vector<2x128xf32>
      %386 = arith.addf %385, %384 : vector<2x128xf32>
      %387 = arith.divf %385, %386 : vector<2x128xf32>
      %388 = vector.extract_strided_slice %369 {offsets = [0, 512], sizes = [2, 128], strides = [1, 1]} : vector<2x640xf32> to vector<2x128xf32>
      %389 = math.tanh %388 : vector<2x128xf32>
      %390 = arith.mulf %381, %361 : vector<2x128xf32>
      %391 = arith.mulf %375, %389 : vector<2x128xf32>
      %392 = arith.addf %390, %391 : vector<2x128xf32>
      %393 = math.tanh %392 : vector<2x128xf32>
      %394 = arith.mulf %387, %393 : vector<2x128xf32>
      %c22 = arith.constant 22 : index
      %c0_110 = arith.constant 0 : index
      %395 = vector.load %arg9[%c22, %c0_110] : memref<32x128xf32, #tpu.memory_space<vmem>>, vector<2x128xf32>
      tpu.vector_store %arg9[%c22, %c0_110], %394 {strides = array<i32>} : memref<32x128xf32, #tpu.memory_space<vmem>>, vector<2x128xf32>,
      %c22_111 = arith.constant 22 : index
      %c0_112 = arith.constant 0 : index
      %396 = vector.load %arg10[%c22_111, %c0_112] : memref<32x128xf32, #tpu.memory_space<vmem>>, vector<2x128xf32>
      tpu.vector_store %arg10[%c22_111, %c0_112], %392 {strides = array<i32>} : memref<32x128xf32, #tpu.memory_space<vmem>>, vector<2x128xf32>,
      %397 = vector.extract_strided_slice %12 {offsets = [24, 0], sizes = [2, 640], strides = [1, 1]} : vector<32x640xf32> to vector<2x640xf32>
      %398 = arith.truncf %394 : vector<2x128xf32> to vector<2x128xbf16>
      %cst_113 = arith.constant dense<0.000000e+00> : vector<2x640xf32>
      %399 = tpu.matmul %398, %1, %cst_113 {dimension_numbers = #tpu.dot_dimension_numbers<[1], [0], [0], [1], [0, 0, 1, 1], [], []>} : vector<2x128xbf16>, vector<128x640xbf16>, vector<2x640xf32> -> vector<2x640xf32>
      %400 = arith.addf %397, %399 : vector<2x640xf32>
      %401 = vector.extract_strided_slice %400 {offsets = [0, 0], sizes = [2, 128], strides = [1, 1]} : vector<2x640xf32> to vector<2x128xf32>
      %402 = arith.negf %401 : vector<2x128xf32>
      %403 = math.exp %402 : vector<2x128xf32>
      %cst_114 = arith.constant 1.000000e+00 : f32
      %404 = vector.broadcast %cst_114 : f32 to vector<2x128xf32>
      %405 = arith.addf %404, %403 : vector<2x128xf32>
      %406 = arith.divf %404, %405 : vector<2x128xf32>
      %407 = vector.extract_strided_slice %400 {offsets = [0, 128], sizes = [2, 128], strides = [1, 1]} : vector<2x640xf32> to vector<2x128xf32>
      %408 = arith.negf %407 : vector<2x128xf32>
      %409 = math.exp %408 : vector<2x128xf32>
      %cst_115 = arith.constant 1.000000e+00 : f32
      %410 = vector.broadcast %cst_115 : f32 to vector<2x128xf32>
      %411 = arith.addf %410, %409 : vector<2x128xf32>
      %412 = arith.divf %410, %411 : vector<2x128xf32>
      %413 = vector.extract_strided_slice %400 {offsets = [0, 384], sizes = [2, 128], strides = [1, 1]} : vector<2x640xf32> to vector<2x128xf32>
      %414 = arith.negf %413 : vector<2x128xf32>
      %415 = math.exp %414 : vector<2x128xf32>
      %cst_116 = arith.constant 1.000000e+00 : f32
      %416 = vector.broadcast %cst_116 : f32 to vector<2x128xf32>
      %417 = arith.addf %416, %415 : vector<2x128xf32>
      %418 = arith.divf %416, %417 : vector<2x128xf32>
      %419 = vector.extract_strided_slice %400 {offsets = [0, 512], sizes = [2, 128], strides = [1, 1]} : vector<2x640xf32> to vector<2x128xf32>
      %420 = math.tanh %419 : vector<2x128xf32>
      %421 = arith.mulf %412, %392 : vector<2x128xf32>
      %422 = arith.mulf %406, %420 : vector<2x128xf32>
      %423 = arith.addf %421, %422 : vector<2x128xf32>
      %424 = math.tanh %423 : vector<2x128xf32>
      %425 = arith.mulf %418, %424 : vector<2x128xf32>
      %c24 = arith.constant 24 : index
      %c0_117 = arith.constant 0 : index
      %426 = vector.load %arg9[%c24, %c0_117] : memref<32x128xf32, #tpu.memory_space<vmem>>, vector<2x128xf32>
      tpu.vector_store %arg9[%c24, %c0_117], %425 {strides = array<i32>} : memref<32x128xf32, #tpu.memory_space<vmem>>, vector<2x128xf32>,
      %c24_118 = arith.constant 24 : index
      %c0_119 = arith.constant 0 : index
      %427 = vector.load %arg10[%c24_118, %c0_119] : memref<32x128xf32, #tpu.memory_space<vmem>>, vector<2x128xf32>
      tpu.vector_store %arg10[%c24_118, %c0_119], %423 {strides = array<i32>} : memref<32x128xf32, #tpu.memory_space<vmem>>, vector<2x128xf32>,
      %428 = vector.extract_strided_slice %12 {offsets = [26, 0], sizes = [2, 640], strides = [1, 1]} : vector<32x640xf32> to vector<2x640xf32>
      %429 = arith.truncf %425 : vector<2x128xf32> to vector<2x128xbf16>
      %cst_120 = arith.constant dense<0.000000e+00> : vector<2x640xf32>
      %430 = tpu.matmul %429, %1, %cst_120 {dimension_numbers = #tpu.dot_dimension_numbers<[1], [0], [0], [1], [0, 0, 1, 1], [], []>} : vector<2x128xbf16>, vector<128x640xbf16>, vector<2x640xf32> -> vector<2x640xf32>
      %431 = arith.addf %428, %430 : vector<2x640xf32>
      %432 = vector.extract_strided_slice %431 {offsets = [0, 0], sizes = [2, 128], strides = [1, 1]} : vector<2x640xf32> to vector<2x128xf32>
      %433 = arith.negf %432 : vector<2x128xf32>
      %434 = math.exp %433 : vector<2x128xf32>
      %cst_121 = arith.constant 1.000000e+00 : f32
      %435 = vector.broadcast %cst_121 : f32 to vector<2x128xf32>
      %436 = arith.addf %435, %434 : vector<2x128xf32>
      %437 = arith.divf %435, %436 : vector<2x128xf32>
      %438 = vector.extract_strided_slice %431 {offsets = [0, 128], sizes = [2, 128], strides = [1, 1]} : vector<2x640xf32> to vector<2x128xf32>
      %439 = arith.negf %438 : vector<2x128xf32>
      %440 = math.exp %439 : vector<2x128xf32>
      %cst_122 = arith.constant 1.000000e+00 : f32
      %441 = vector.broadcast %cst_122 : f32 to vector<2x128xf32>
      %442 = arith.addf %441, %440 : vector<2x128xf32>
      %443 = arith.divf %441, %442 : vector<2x128xf32>
      %444 = vector.extract_strided_slice %431 {offsets = [0, 384], sizes = [2, 128], strides = [1, 1]} : vector<2x640xf32> to vector<2x128xf32>
      %445 = arith.negf %444 : vector<2x128xf32>
      %446 = math.exp %445 : vector<2x128xf32>
      %cst_123 = arith.constant 1.000000e+00 : f32
      %447 = vector.broadcast %cst_123 : f32 to vector<2x128xf32>
      %448 = arith.addf %447, %446 : vector<2x128xf32>
      %449 = arith.divf %447, %448 : vector<2x128xf32>
      %450 = vector.extract_strided_slice %431 {offsets = [0, 512], sizes = [2, 128], strides = [1, 1]} : vector<2x640xf32> to vector<2x128xf32>
      %451 = math.tanh %450 : vector<2x128xf32>
      %452 = arith.mulf %443, %423 : vector<2x128xf32>
      %453 = arith.mulf %437, %451 : vector<2x128xf32>
      %454 = arith.addf %452, %453 : vector<2x128xf32>
      %455 = math.tanh %454 : vector<2x128xf32>
      %456 = arith.mulf %449, %455 : vector<2x128xf32>
      %c26 = arith.constant 26 : index
      %c0_124 = arith.constant 0 : index
      %457 = vector.load %arg9[%c26, %c0_124] : memref<32x128xf32, #tpu.memory_space<vmem>>, vector<2x128xf32>
      tpu.vector_store %arg9[%c26, %c0_124], %456 {strides = array<i32>} : memref<32x128xf32, #tpu.memory_space<vmem>>, vector<2x128xf32>,
      %c26_125 = arith.constant 26 : index
      %c0_126 = arith.constant 0 : index
      %458 = vector.load %arg10[%c26_125, %c0_126] : memref<32x128xf32, #tpu.memory_space<vmem>>, vector<2x128xf32>
      tpu.vector_store %arg10[%c26_125, %c0_126], %454 {strides = array<i32>} : memref<32x128xf32, #tpu.memory_space<vmem>>, vector<2x128xf32>,
      %459 = vector.extract_strided_slice %12 {offsets = [28, 0], sizes = [2, 640], strides = [1, 1]} : vector<32x640xf32> to vector<2x640xf32>
      %460 = arith.truncf %456 : vector<2x128xf32> to vector<2x128xbf16>
      %cst_127 = arith.constant dense<0.000000e+00> : vector<2x640xf32>
      %461 = tpu.matmul %460, %1, %cst_127 {dimension_numbers = #tpu.dot_dimension_numbers<[1], [0], [0], [1], [0, 0, 1, 1], [], []>} : vector<2x128xbf16>, vector<128x640xbf16>, vector<2x640xf32> -> vector<2x640xf32>
      %462 = arith.addf %459, %461 : vector<2x640xf32>
      %463 = vector.extract_strided_slice %462 {offsets = [0, 0], sizes = [2, 128], strides = [1, 1]} : vector<2x640xf32> to vector<2x128xf32>
      %464 = arith.negf %463 : vector<2x128xf32>
      %465 = math.exp %464 : vector<2x128xf32>
      %cst_128 = arith.constant 1.000000e+00 : f32
      %466 = vector.broadcast %cst_128 : f32 to vector<2x128xf32>
      %467 = arith.addf %466, %465 : vector<2x128xf32>
      %468 = arith.divf %466, %467 : vector<2x128xf32>
      %469 = vector.extract_strided_slice %462 {offsets = [0, 128], sizes = [2, 128], strides = [1, 1]} : vector<2x640xf32> to vector<2x128xf32>
      %470 = arith.negf %469 : vector<2x128xf32>
      %471 = math.exp %470 : vector<2x128xf32>
      %cst_129 = arith.constant 1.000000e+00 : f32
      %472 = vector.broadcast %cst_129 : f32 to vector<2x128xf32>
      %473 = arith.addf %472, %471 : vector<2x128xf32>
      %474 = arith.divf %472, %473 : vector<2x128xf32>
      %475 = vector.extract_strided_slice %462 {offsets = [0, 384], sizes = [2, 128], strides = [1, 1]} : vector<2x640xf32> to vector<2x128xf32>
      %476 = arith.negf %475 : vector<2x128xf32>
      %477 = math.exp %476 : vector<2x128xf32>
      %cst_130 = arith.constant 1.000000e+00 : f32
      %478 = vector.broadcast %cst_130 : f32 to vector<2x128xf32>
      %479 = arith.addf %478, %477 : vector<2x128xf32>
      %480 = arith.divf %478, %479 : vector<2x128xf32>
      %481 = vector.extract_strided_slice %462 {offsets = [0, 512], sizes = [2, 128], strides = [1, 1]} : vector<2x640xf32> to vector<2x128xf32>
      %482 = math.tanh %481 : vector<2x128xf32>
      %483 = arith.mulf %474, %454 : vector<2x128xf32>
      %484 = arith.mulf %468, %482 : vector<2x128xf32>
      %485 = arith.addf %483, %484 : vector<2x128xf32>
      %486 = math.tanh %485 : vector<2x128xf32>
      %487 = arith.mulf %480, %486 : vector<2x128xf32>
      %c28 = arith.constant 28 : index
      %c0_131 = arith.constant 0 : index
      %488 = vector.load %arg9[%c28, %c0_131] : memref<32x128xf32, #tpu.memory_space<vmem>>, vector<2x128xf32>
      tpu.vector_store %arg9[%c28, %c0_131], %487 {strides = array<i32>} : memref<32x128xf32, #tpu.memory_space<vmem>>, vector<2x128xf32>,
      %c28_132 = arith.constant 28 : index
      %c0_133 = arith.constant 0 : index
      %489 = vector.load %arg10[%c28_132, %c0_133] : memref<32x128xf32, #tpu.memory_space<vmem>>, vector<2x128xf32>
      tpu.vector_store %arg10[%c28_132, %c0_133], %485 {strides = array<i32>} : memref<32x128xf32, #tpu.memory_space<vmem>>, vector<2x128xf32>,
      %490 = vector.extract_strided_slice %12 {offsets = [30, 0], sizes = [2, 640], strides = [1, 1]} : vector<32x640xf32> to vector<2x640xf32>
      %491 = arith.truncf %487 : vector<2x128xf32> to vector<2x128xbf16>
      %cst_134 = arith.constant dense<0.000000e+00> : vector<2x640xf32>
      %492 = tpu.matmul %491, %1, %cst_134 {dimension_numbers = #tpu.dot_dimension_numbers<[1], [0], [0], [1], [0, 0, 1, 1], [], []>} : vector<2x128xbf16>, vector<128x640xbf16>, vector<2x640xf32> -> vector<2x640xf32>
      %493 = arith.addf %490, %492 : vector<2x640xf32>
      %494 = vector.extract_strided_slice %493 {offsets = [0, 0], sizes = [2, 128], strides = [1, 1]} : vector<2x640xf32> to vector<2x128xf32>
      %495 = arith.negf %494 : vector<2x128xf32>
      %496 = math.exp %495 : vector<2x128xf32>
      %cst_135 = arith.constant 1.000000e+00 : f32
      %497 = vector.broadcast %cst_135 : f32 to vector<2x128xf32>
      %498 = arith.addf %497, %496 : vector<2x128xf32>
      %499 = arith.divf %497, %498 : vector<2x128xf32>
      %500 = vector.extract_strided_slice %493 {offsets = [0, 128], sizes = [2, 128], strides = [1, 1]} : vector<2x640xf32> to vector<2x128xf32>
      %501 = arith.negf %500 : vector<2x128xf32>
      %502 = math.exp %501 : vector<2x128xf32>
      %cst_136 = arith.constant 1.000000e+00 : f32
      %503 = vector.broadcast %cst_136 : f32 to vector<2x128xf32>
      %504 = arith.addf %503, %502 : vector<2x128xf32>
      %505 = arith.divf %503, %504 : vector<2x128xf32>
      %506 = vector.extract_strided_slice %493 {offsets = [0, 384], sizes = [2, 128], strides = [1, 1]} : vector<2x640xf32> to vector<2x128xf32>
      %507 = arith.negf %506 : vector<2x128xf32>
      %508 = math.exp %507 : vector<2x128xf32>
      %cst_137 = arith.constant 1.000000e+00 : f32
      %509 = vector.broadcast %cst_137 : f32 to vector<2x128xf32>
      %510 = arith.addf %509, %508 : vector<2x128xf32>
      %511 = arith.divf %509, %510 : vector<2x128xf32>
      %512 = vector.extract_strided_slice %493 {offsets = [0, 512], sizes = [2, 128], strides = [1, 1]} : vector<2x640xf32> to vector<2x128xf32>
      %513 = math.tanh %512 : vector<2x128xf32>
      %514 = arith.mulf %505, %485 : vector<2x128xf32>
      %515 = arith.mulf %499, %513 : vector<2x128xf32>
      %516 = arith.addf %514, %515 : vector<2x128xf32>
      %517 = math.tanh %516 : vector<2x128xf32>
      %518 = arith.mulf %511, %517 : vector<2x128xf32>
      %c30 = arith.constant 30 : index
      %c0_138 = arith.constant 0 : index
      %519 = vector.load %arg9[%c30, %c0_138] : memref<32x128xf32, #tpu.memory_space<vmem>>, vector<2x128xf32>
      tpu.vector_store %arg9[%c30, %c0_138], %518 {strides = array<i32>} : memref<32x128xf32, #tpu.memory_space<vmem>>, vector<2x128xf32>,
      %c30_139 = arith.constant 30 : index
      %c0_140 = arith.constant 0 : index
      %520 = vector.load %arg10[%c30_139, %c0_140] : memref<32x128xf32, #tpu.memory_space<vmem>>, vector<2x128xf32>
      tpu.vector_store %arg10[%c30_139, %c0_140], %516 {strides = array<i32>} : memref<32x128xf32, #tpu.memory_space<vmem>>, vector<2x128xf32>,
    } else {
    }
    %c0_i32_16 = arith.constant 0 : i32
    %16 = arith.cmpi sgt, %arg1, %c0_i32_16 : i32
    %17 = arith.extui %16 : i1 to i32
    %c0_i32_17 = arith.constant 0 : i32
    %18 = arith.cmpi ne, %17, %c0_i32_17 : i32
    scf.if %18 {
      %c0_28 = arith.constant 0 : index
      %c0_29 = arith.constant 0 : index
      %27 = vector.load %arg9[%c0_28, %c0_29] : memref<32x128xf32, #tpu.memory_space<vmem>>, vector<32x128xf32>
      %c0_30 = arith.constant 0 : index
      %c0_31 = arith.constant 0 : index
      %28 = vector.load %arg10[%c0_30, %c0_31] : memref<32x128xf32, #tpu.memory_space<vmem>>, vector<32x128xf32>
      %29 = tpu.iota {dimensions = array<i32: 0>} : vector<32x128xi32>
      %c2_i32 = arith.constant 2 : i32
      %30 = vector.broadcast %c2_i32 : i32 to vector<32x128xi32>
      %31 = arith.cmpi slt, %29, %30 : vector<32x128xi32>
      %c2_i32_32 = arith.constant 2 : i32
      %32 = tpu.dynamic_rotate %27 by %c2_i32_32 dim 0 : vector<32x128xf32>, i32 -> vector<32x128xf32>
      %33 = arith.select %31, %27, %32 : vector<32x128xi1>, vector<32x128xf32>
      %c2_i32_33 = arith.constant 2 : i32
      %34 = vector.broadcast %c2_i32_33 : i32 to vector<32x128xi32>
      %35 = arith.cmpi slt, %29, %34 : vector<32x128xi32>
      %c2_i32_34 = arith.constant 2 : i32
      %36 = tpu.dynamic_rotate %28 by %c2_i32_34 dim 0 : vector<32x128xf32>, i32 -> vector<32x128xf32>
      %37 = arith.select %35, %28, %36 : vector<32x128xi1>, vector<32x128xf32>
      %c30_i32 = arith.constant 30 : i32
      %38 = vector.broadcast %c30_i32 : i32 to vector<32x128xi32>
      %39 = arith.cmpi sge, %29, %38 : vector<32x128xi32>
      %c30_i32_35 = arith.constant 30 : i32
      %40 = tpu.dynamic_rotate %27 by %c30_i32_35 dim 0 : vector<32x128xf32>, i32 -> vector<32x128xf32>
      %41 = arith.select %39, %27, %40 : vector<32x128xi1>, vector<32x128xf32>
      %c30_i32_36 = arith.constant 30 : i32
      %42 = vector.broadcast %c30_i32_36 : i32 to vector<32x128xi32>
      %43 = arith.cmpi sge, %29, %42 : vector<32x128xi32>
      %c30_i32_37 = arith.constant 30 : i32
      %44 = tpu.dynamic_rotate %28 by %c30_i32_37 dim 0 : vector<32x128xf32>, i32 -> vector<32x128xf32>
      %45 = arith.select %43, %28, %44 : vector<32x128xi1>, vector<32x128xf32>
      %46 = arith.truncf %33 : vector<32x128xf32> to vector<32x128xbf16>
      %cst_38 = arith.constant dense<0.000000e+00> : vector<32x640xf32>
      %47 = tpu.matmul %46, %1, %cst_38 {dimension_numbers = #tpu.dot_dimension_numbers<[1], [0], [0], [1], [0, 0, 1, 1], [], []>} : vector<32x128xbf16>, vector<128x640xbf16>, vector<32x640xf32> -> vector<32x640xf32>
      %48 = arith.addf %12, %47 : vector<32x640xf32>
      %49 = arith.truncf %41 : vector<32x128xf32> to vector<32x128xbf16>
      %cst_39 = arith.constant dense<0.000000e+00> : vector<32x640xf32>
      %50 = tpu.matmul %49, %3, %cst_39 {dimension_numbers = #tpu.dot_dimension_numbers<[1], [0], [0], [1], [0, 0, 1, 1], [], []>} : vector<32x128xbf16>, vector<128x640xbf16>, vector<32x640xf32> -> vector<32x640xf32>
      %51 = arith.addf %48, %50 : vector<32x640xf32>
      %52 = vector.extract_strided_slice %51 {offsets = [0, 0], sizes = [32, 128], strides = [1, 1]} : vector<32x640xf32> to vector<32x128xf32>
      %53 = arith.negf %52 : vector<32x128xf32>
      %54 = math.exp %53 : vector<32x128xf32>
      %cst_40 = arith.constant 1.000000e+00 : f32
      %55 = vector.broadcast %cst_40 : f32 to vector<32x128xf32>
      %56 = arith.addf %55, %54 : vector<32x128xf32>
      %57 = arith.divf %55, %56 : vector<32x128xf32>
      %58 = vector.extract_strided_slice %51 {offsets = [0, 128], sizes = [32, 128], strides = [1, 1]} : vector<32x640xf32> to vector<32x128xf32>
      %59 = arith.negf %58 : vector<32x128xf32>
      %60 = math.exp %59 : vector<32x128xf32>
      %cst_41 = arith.constant 1.000000e+00 : f32
      %61 = vector.broadcast %cst_41 : f32 to vector<32x128xf32>
      %62 = arith.addf %61, %60 : vector<32x128xf32>
      %63 = arith.divf %61, %62 : vector<32x128xf32>
      %64 = vector.extract_strided_slice %51 {offsets = [0, 384], sizes = [32, 128], strides = [1, 1]} : vector<32x640xf32> to vector<32x128xf32>
      %65 = arith.negf %64 : vector<32x128xf32>
      %66 = math.exp %65 : vector<32x128xf32>
      %cst_42 = arith.constant 1.000000e+00 : f32
      %67 = vector.broadcast %cst_42 : f32 to vector<32x128xf32>
      %68 = arith.addf %67, %66 : vector<32x128xf32>
      %69 = arith.divf %67, %68 : vector<32x128xf32>
      %70 = vector.extract_strided_slice %51 {offsets = [0, 512], sizes = [32, 128], strides = [1, 1]} : vector<32x640xf32> to vector<32x128xf32>
      %71 = math.tanh %70 : vector<32x128xf32>
      %72 = arith.mulf %63, %37 : vector<32x128xf32>
      %73 = arith.mulf %57, %71 : vector<32x128xf32>
      %74 = arith.addf %72, %73 : vector<32x128xf32>
      %75 = vector.extract_strided_slice %51 {offsets = [0, 256], sizes = [32, 128], strides = [1, 1]} : vector<32x640xf32> to vector<32x128xf32>
      %76 = arith.negf %75 : vector<32x128xf32>
      %77 = math.exp %76 : vector<32x128xf32>
      %cst_43 = arith.constant 1.000000e+00 : f32
      %78 = vector.broadcast %cst_43 : f32 to vector<32x128xf32>
      %79 = arith.addf %78, %77 : vector<32x128xf32>
      %80 = arith.divf %78, %79 : vector<32x128xf32>
      %81 = arith.mulf %80, %45 : vector<32x128xf32>
      %82 = arith.addf %74, %81 : vector<32x128xf32>
      %83 = math.tanh %82 : vector<32x128xf32>
      %84 = arith.mulf %69, %83 : vector<32x128xf32>
      %c0_44 = arith.constant 0 : index
      %c0_45 = arith.constant 0 : index
      %85 = vector.load %arg9[%c0_44, %c0_45] : memref<32x128xf32, #tpu.memory_space<vmem>>, vector<32x128xf32>
      tpu.vector_store %arg9[%c0_44, %c0_45], %84 {strides = array<i32>} : memref<32x128xf32, #tpu.memory_space<vmem>>, vector<32x128xf32>,
      %c0_46 = arith.constant 0 : index
      %c0_47 = arith.constant 0 : index
      %86 = vector.load %arg10[%c0_46, %c0_47] : memref<32x128xf32, #tpu.memory_space<vmem>>, vector<32x128xf32>
      tpu.vector_store %arg10[%c0_46, %c0_47], %82 {strides = array<i32>} : memref<32x128xf32, #tpu.memory_space<vmem>>, vector<32x128xf32>,
    } else {
    }
    %c0_18 = arith.constant 0 : index
    %c0_19 = arith.constant 0 : index
    %c0_20 = arith.constant 0 : index
    %19 = vector.load %arg7[%c0_18, %c0_19, %c0_20] : memref<1x128x128xbf16, #tpu.memory_space<vmem>>, vector<1x128x128xbf16>
    %20 = vector.shape_cast %19 : vector<1x128x128xbf16> to vector<128x128xbf16>
    %c0_21 = arith.constant 0 : index
    %c0_22 = arith.constant 0 : index
    %21 = vector.load %arg9[%c0_21, %c0_22] : memref<32x128xf32, #tpu.memory_space<vmem>>, vector<32x128xf32>
    %22 = arith.truncf %21 : vector<32x128xf32> to vector<32x128xbf16>
    %cst_23 = arith.constant dense<0.000000e+00> : vector<32x128xf32>
    %23 = tpu.matmul %22, %20, %cst_23 {dimension_numbers = #tpu.dot_dimension_numbers<[1], [0], [0], [1], [0, 0, 1, 1], [], []>} : vector<32x128xbf16>, vector<128x128xbf16>, vector<32x128xf32> -> vector<32x128xf32>
    %c0_24 = arith.constant 0 : index
    %c0_25 = arith.constant 0 : index
    %c0_26 = arith.constant 0 : index
    %c0_27 = arith.constant 0 : index
    %24 = vector.load %arg8[%c0_24, %c0_25, %c0_26, %c0_27] : memref<1x1x32x128xf32, #tpu.memory_space<vmem>>, vector<1x1x32x128xf32>
    %25 = vector.shape_cast %24 : vector<1x1x32x128xf32> to vector<32x128xf32>
    %26 = vector.shape_cast %23 : vector<32x128xf32> to vector<1x1x32x128xf32>
    tpu.vector_store %arg8[%c0_24, %c0_25, %c0_26, %c0_27], %26 {strides = array<i32>} : memref<1x1x32x128xf32, #tpu.memory_space<vmem>>, vector<1x1x32x128xf32>,
    return
  }
  func.func @transform_0(%arg0: i32, %arg1: i32) -> (i32, i32, i32, i32) {
    %c0_i32 = arith.constant 0 : i32
    %c0_i32_0 = arith.constant 0 : i32
    %c0_i32_1 = arith.constant 0 : i32
    return %arg0, %arg1, %c0_i32, %c0_i32_0 : i32, i32, i32, i32
  }
  func.func @transform_1(%arg0: i32, %arg1: i32) -> (i32, i32, i32) {
    %c0_i32 = arith.constant 0 : i32
    %c0_i32_0 = arith.constant 0 : i32
    %c0_i32_1 = arith.constant 0 : i32
    return %arg0, %c0_i32, %c0_i32_0 : i32, i32, i32
  }
  func.func @transform_2(%arg0: i32, %arg1: i32) -> (i32, i32, i32) {
    %c0_i32 = arith.constant 0 : i32
    %c0_i32_0 = arith.constant 0 : i32
    %c0_i32_1 = arith.constant 0 : i32
    return %arg0, %c0_i32, %c0_i32_0 : i32, i32, i32
  }
  func.func @transform_3(%arg0: i32, %arg1: i32) -> (i32, i32, i32) {
    %c0_i32 = arith.constant 0 : i32
    %c0_i32_0 = arith.constant 0 : i32
    %c0_i32_1 = arith.constant 0 : i32
    return %arg0, %c0_i32, %c0_i32_0 : i32, i32, i32
  }
  func.func @transform_4(%arg0: i32, %arg1: i32) -> (i32, i32, i32) {
    %c0_i32 = arith.constant 0 : i32
    %c0_i32_0 = arith.constant 0 : i32
    %c0_i32_1 = arith.constant 0 : i32
    return %arg0, %c0_i32, %c0_i32_0 : i32, i32, i32
  }
  func.func @transform_5(%arg0: i32, %arg1: i32) -> (i32, i32, i32) {
    %c0_i32 = arith.constant 0 : i32
    %c0_i32_0 = arith.constant 0 : i32
    %c0_i32_1 = arith.constant 0 : i32
    return %arg0, %c0_i32, %c0_i32_0 : i32, i32, i32
  }
  func.func @transform_6(%arg0: i32, %arg1: i32) -> (i32, i32, i32, i32) {
    %c0_i32 = arith.constant 0 : i32
    %c0_i32_0 = arith.constant 0 : i32
    %c0_i32_1 = arith.constant 0 : i32
    return %arg0, %arg1, %c0_i32, %c0_i32_0 : i32, i32, i32, i32
  }
}

module attributes {stable_mosaic.version = 11 : i64} {
  func.func @_sweep_kernel(%arg0: i32, %arg1: i32, %arg2: memref<1x1x32x64xbf16, #tpu.memory_space<vmem>>, %arg3: memref<1x64x640xbf16, #tpu.memory_space<vmem>>, %arg4: memref<1x1x640xf32, #tpu.memory_space<vmem>>, %arg5: memref<1x128x640xbf16, #tpu.memory_space<vmem>>, %arg6: memref<1x128x640xbf16, #tpu.memory_space<vmem>>, %arg7: memref<1x128x128xbf16, #tpu.memory_space<vmem>>, %arg8: memref<1x1x32x128xf32, #tpu.memory_space<vmem>>, %arg9: memref<32x128xf32, #tpu.memory_space<vmem>>, %arg10: memref<32x128xf32, #tpu.memory_space<vmem>>) attributes {dimension_semantics = [#tpu.dimension_semantics<parallel>, #tpu.dimension_semantics<arbitrary>], iteration_bounds = array<i64: 2, 16>, scalar_prefetch = 0 : i64, scratch_operands = 2 : i64, tpu.core_type = #tpu.core_type<tc>, window_params = [{transform_indices = @transform_0, window_bounds = array<i64: 1, 1, 32, 64>}, {transform_indices = @transform_1, window_bounds = array<i64: 1, 64, 640>}, {transform_indices = @transform_2, window_bounds = array<i64: 1, 1, 640>}, {transform_indices = @transform_3, window_bounds = array<i64: 1, 128, 640>}, {transform_indices = @transform_4, window_bounds = array<i64: 1, 128, 640>}, {transform_indices = @transform_5, window_bounds = array<i64: 1, 128, 128>}, {transform_indices = @transform_6, window_bounds = array<i64: 1, 1, 32, 128>}]} {
    %c0 = arith.constant 0 : index
    %c0_0 = arith.constant 0 : index
    %c0_1 = arith.constant 0 : index
    %0 = vector.load %arg5[%c0, %c0_0, %c0_1] : memref<1x128x640xbf16, #tpu.memory_space<vmem>>, vector<1x128x640xbf16>
    %1 = vector.shape_cast %0 : vector<1x128x640xbf16> to vector<128x640xbf16>
    %c0_2 = arith.constant 0 : index
    %c0_3 = arith.constant 0 : index
    %c0_4 = arith.constant 0 : index
    %2 = vector.load %arg6[%c0_2, %c0_3, %c0_4] : memref<1x128x640xbf16, #tpu.memory_space<vmem>>, vector<1x128x640xbf16>
    %3 = vector.shape_cast %2 : vector<1x128x640xbf16> to vector<128x640xbf16>
    %c0_5 = arith.constant 0 : index
    %c0_6 = arith.constant 0 : index
    %c0_7 = arith.constant 0 : index
    %4 = vector.load %arg3[%c0_5, %c0_6, %c0_7] : memref<1x64x640xbf16, #tpu.memory_space<vmem>>, vector<1x64x640xbf16>
    %5 = vector.shape_cast %4 : vector<1x64x640xbf16> to vector<64x640xbf16>
    %c0_8 = arith.constant 0 : index
    %c0_9 = arith.constant 0 : index
    %c0_10 = arith.constant 0 : index
    %c0_11 = arith.constant 0 : index
    %6 = vector.load %arg2[%c0_8, %c0_9, %c0_10, %c0_11] : memref<1x1x32x64xbf16, #tpu.memory_space<vmem>>, vector<1x1x32x64xbf16>
    %7 = vector.shape_cast %6 : vector<1x1x32x64xbf16> to vector<32x64xbf16>
    %cst = arith.constant dense<0.000000e+00> : vector<32x640xf32>
    %8 = tpu.matmul %7, %5, %cst {dimension_numbers = #tpu.dot_dimension_numbers<[1], [0], [0], [1], [0, 0, 1, 1], [], []>} : vector<32x64xbf16>, vector<64x640xbf16>, vector<32x640xf32> -> vector<32x640xf32>
    %c0_12 = arith.constant 0 : index
    %c0_13 = arith.constant 0 : index
    %c0_14 = arith.constant 0 : index
    %9 = vector.load %arg4[%c0_12, %c0_13, %c0_14] : memref<1x1x640xf32, #tpu.memory_space<vmem>>, vector<1x1x640xf32>
    %10 = vector.shape_cast %9 : vector<1x1x640xf32> to vector<1x640xf32>
    %11 = vector.broadcast %10 : vector<1x640xf32> to vector<32x640xf32>
    %12 = arith.addf %8, %11 : vector<32x640xf32>
    %c0_i32 = arith.constant 0 : i32
    %13 = arith.cmpi eq, %arg1, %c0_i32 : i32
    %14 = arith.extui %13 : i1 to i32
    %c0_i32_15 = arith.constant 0 : i32
    %15 = arith.cmpi ne, %14, %c0_i32_15 : i32
    scf.if %15 {
      %cst_28 = arith.constant 0.000000e+00 : f32
      %27 = vector.broadcast %cst_28 : f32 to vector<2x128xf32>
      %28 = vector.extract_strided_slice %12 {offsets = [0, 0], sizes = [2, 640], strides = [1, 1]} : vector<32x640xf32> to vector<2x640xf32>
      %29 = vector.extract_strided_slice %28 {offsets = [0, 0], sizes = [2, 128], strides = [1, 1]} : vector<2x640xf32> to vector<2x128xf32>
      %30 = arith.negf %29 : vector<2x128xf32>
      %31 = math.exp %30 : vector<2x128xf32>
      %cst_29 = arith.constant 1.000000e+00 : f32
      %32 = vector.broadcast %cst_29 : f32 to vector<2x128xf32>
      %33 = arith.addf %32, %31 : vector<2x128xf32>
      %34 = arith.divf %32, %33 : vector<2x128xf32>
      %35 = vector.extract_strided_slice %28 {offsets = [0, 128], sizes = [2, 128], strides = [1, 1]} : vector<2x640xf32> to vector<2x128xf32>
      %36 = arith.negf %35 : vector<2x128xf32>
      %37 = math.exp %36 : vector<2x128xf32>
      %cst_30 = arith.constant 1.000000e+00 : f32
      %38 = vector.broadcast %cst_30 : f32 to vector<2x128xf32>
      %39 = arith.addf %38, %37 : vector<2x128xf32>
      %40 = arith.divf %38, %39 : vector<2x128xf32>
      %41 = vector.extract_strided_slice %28 {offsets = [0, 384], sizes = [2, 128], strides = [1, 1]} : vector<2x640xf32> to vector<2x128xf32>
      %42 = arith.negf %41 : vector<2x128xf32>
      %43 = math.exp %42 : vector<2x128xf32>
      %cst_31 = arith.constant 1.000000e+00 : f32
      %44 = vector.broadcast %cst_31 : f32 to vector<2x128xf32>
      %45 = arith.addf %44, %43 : vector<2x128xf32>
      %46 = arith.divf %44, %45 : vector<2x128xf32>
      %47 = vector.extract_strided_slice %28 {offsets = [0, 512], sizes = [2, 128], strides = [1, 1]} : vector<2x640xf32> to vector<2x128xf32>
      %48 = math.tanh %47 : vector<2x128xf32>
      %49 = arith.mulf %40, %27 : vector<2x128xf32>
      %50 = arith.mulf %34, %48 : vector<2x128xf32>
      %51 = arith.addf %49, %50 : vector<2x128xf32>
      %52 = math.tanh %51 : vector<2x128xf32>
      %53 = arith.mulf %46, %52 : vector<2x128xf32>
      %c0_32 = arith.constant 0 : index
      %c0_33 = arith.constant 0 : index
      %54 = vector.load %arg9[%c0_32, %c0_33] : memref<32x128xf32, #tpu.memory_space<vmem>>, vector<2x128xf32>
      tpu.vector_store %arg9[%c0_32, %c0_33], %53 {strides = array<i32>} : memref<32x128xf32, #tpu.memory_space<vmem>>, vector<2x128xf32>,
      %c0_34 = arith.constant 0 : index
      %c0_35 = arith.constant 0 : index
      %55 = vector.load %arg10[%c0_34, %c0_35] : memref<32x128xf32, #tpu.memory_space<vmem>>, vector<2x128xf32>
      tpu.vector_store %arg10[%c0_34, %c0_35], %51 {strides = array<i32>} : memref<32x128xf32, #tpu.memory_space<vmem>>, vector<2x128xf32>,
      %56 = vector.extract_strided_slice %12 {offsets = [2, 0], sizes = [2, 640], strides = [1, 1]} : vector<32x640xf32> to vector<2x640xf32>
      %57 = arith.truncf %53 : vector<2x128xf32> to vector<2x128xbf16>
      %cst_36 = arith.constant dense<0.000000e+00> : vector<2x640xf32>
      %58 = tpu.matmul %57, %1, %cst_36 {dimension_numbers = #tpu.dot_dimension_numbers<[1], [0], [0], [1], [0, 0, 1, 1], [], []>} : vector<2x128xbf16>, vector<128x640xbf16>, vector<2x640xf32> -> vector<2x640xf32>
      %59 = arith.addf %56, %58 : vector<2x640xf32>
      %60 = vector.extract_strided_slice %59 {offsets = [0, 0], sizes = [2, 128], strides = [1, 1]} : vector<2x640xf32> to vector<2x128xf32>
      %61 = arith.negf %60 : vector<2x128xf32>
      %62 = math.exp %61 : vector<2x128xf32>
      %cst_37 = arith.constant 1.000000e+00 : f32
      %63 = vector.broadcast %cst_37 : f32 to vector<2x128xf32>
      %64 = arith.addf %63, %62 : vector<2x128xf32>
      %65 = arith.divf %63, %64 : vector<2x128xf32>
      %66 = vector.extract_strided_slice %59 {offsets = [0, 128], sizes = [2, 128], strides = [1, 1]} : vector<2x640xf32> to vector<2x128xf32>
      %67 = arith.negf %66 : vector<2x128xf32>
      %68 = math.exp %67 : vector<2x128xf32>
      %cst_38 = arith.constant 1.000000e+00 : f32
      %69 = vector.broadcast %cst_38 : f32 to vector<2x128xf32>
      %70 = arith.addf %69, %68 : vector<2x128xf32>
      %71 = arith.divf %69, %70 : vector<2x128xf32>
      %72 = vector.extract_strided_slice %59 {offsets = [0, 384], sizes = [2, 128], strides = [1, 1]} : vector<2x640xf32> to vector<2x128xf32>
      %73 = arith.negf %72 : vector<2x128xf32>
      %74 = math.exp %73 : vector<2x128xf32>
      %cst_39 = arith.constant 1.000000e+00 : f32
      %75 = vector.broadcast %cst_39 : f32 to vector<2x128xf32>
      %76 = arith.addf %75, %74 : vector<2x128xf32>
      %77 = arith.divf %75, %76 : vector<2x128xf32>
      %78 = vector.extract_strided_slice %59 {offsets = [0, 512], sizes = [2, 128], strides = [1, 1]} : vector<2x640xf32> to vector<2x128xf32>
      %79 = math.tanh %78 : vector<2x128xf32>
      %80 = arith.mulf %71, %51 : vector<2x128xf32>
      %81 = arith.mulf %65, %79 : vector<2x128xf32>
      %82 = arith.addf %80, %81 : vector<2x128xf32>
      %83 = math.tanh %82 : vector<2x128xf32>
      %84 = arith.mulf %77, %83 : vector<2x128xf32>
      %c2 = arith.constant 2 : index
      %c0_40 = arith.constant 0 : index
      %85 = vector.load %arg9[%c2, %c0_40] : memref<32x128xf32, #tpu.memory_space<vmem>>, vector<2x128xf32>
      tpu.vector_store %arg9[%c2, %c0_40], %84 {strides = array<i32>} : memref<32x128xf32, #tpu.memory_space<vmem>>, vector<2x128xf32>,
      %c2_41 = arith.constant 2 : index
      %c0_42 = arith.constant 0 : index
      %86 = vector.load %arg10[%c2_41, %c0_42] : memref<32x128xf32, #tpu.memory_space<vmem>>, vector<2x128xf32>
      tpu.vector_store %arg10[%c2_41, %c0_42], %82 {strides = array<i32>} : memref<32x128xf32, #tpu.memory_space<vmem>>, vector<2x128xf32>,
      %87 = vector.extract_strided_slice %12 {offsets = [4, 0], sizes = [2, 640], strides = [1, 1]} : vector<32x640xf32> to vector<2x640xf32>
      %88 = arith.truncf %84 : vector<2x128xf32> to vector<2x128xbf16>
      %cst_43 = arith.constant dense<0.000000e+00> : vector<2x640xf32>
      %89 = tpu.matmul %88, %1, %cst_43 {dimension_numbers = #tpu.dot_dimension_numbers<[1], [0], [0], [1], [0, 0, 1, 1], [], []>} : vector<2x128xbf16>, vector<128x640xbf16>, vector<2x640xf32> -> vector<2x640xf32>
      %90 = arith.addf %87, %89 : vector<2x640xf32>
      %91 = vector.extract_strided_slice %90 {offsets = [0, 0], sizes = [2, 128], strides = [1, 1]} : vector<2x640xf32> to vector<2x128xf32>
      %92 = arith.negf %91 : vector<2x128xf32>
      %93 = math.exp %92 : vector<2x128xf32>
      %cst_44 = arith.constant 1.000000e+00 : f32
      %94 = vector.broadcast %cst_44 : f32 to vector<2x128xf32>
      %95 = arith.addf %94, %93 : vector<2x128xf32>
      %96 = arith.divf %94, %95 : vector<2x128xf32>
      %97 = vector.extract_strided_slice %90 {offsets = [0, 128], sizes = [2, 128], strides = [1, 1]} : vector<2x640xf32> to vector<2x128xf32>
      %98 = arith.negf %97 : vector<2x128xf32>
      %99 = math.exp %98 : vector<2x128xf32>
      %cst_45 = arith.constant 1.000000e+00 : f32
      %100 = vector.broadcast %cst_45 : f32 to vector<2x128xf32>
      %101 = arith.addf %100, %99 : vector<2x128xf32>
      %102 = arith.divf %100, %101 : vector<2x128xf32>
      %103 = vector.extract_strided_slice %90 {offsets = [0, 384], sizes = [2, 128], strides = [1, 1]} : vector<2x640xf32> to vector<2x128xf32>
      %104 = arith.negf %103 : vector<2x128xf32>
      %105 = math.exp %104 : vector<2x128xf32>
      %cst_46 = arith.constant 1.000000e+00 : f32
      %106 = vector.broadcast %cst_46 : f32 to vector<2x128xf32>
      %107 = arith.addf %106, %105 : vector<2x128xf32>
      %108 = arith.divf %106, %107 : vector<2x128xf32>
      %109 = vector.extract_strided_slice %90 {offsets = [0, 512], sizes = [2, 128], strides = [1, 1]} : vector<2x640xf32> to vector<2x128xf32>
      %110 = math.tanh %109 : vector<2x128xf32>
      %111 = arith.mulf %102, %82 : vector<2x128xf32>
      %112 = arith.mulf %96, %110 : vector<2x128xf32>
      %113 = arith.addf %111, %112 : vector<2x128xf32>
      %114 = math.tanh %113 : vector<2x128xf32>
      %115 = arith.mulf %108, %114 : vector<2x128xf32>
      %c4 = arith.constant 4 : index
      %c0_47 = arith.constant 0 : index
      %116 = vector.load %arg9[%c4, %c0_47] : memref<32x128xf32, #tpu.memory_space<vmem>>, vector<2x128xf32>
      tpu.vector_store %arg9[%c4, %c0_47], %115 {strides = array<i32>} : memref<32x128xf32, #tpu.memory_space<vmem>>, vector<2x128xf32>,
      %c4_48 = arith.constant 4 : index
      %c0_49 = arith.constant 0 : index
      %117 = vector.load %arg10[%c4_48, %c0_49] : memref<32x128xf32, #tpu.memory_space<vmem>>, vector<2x128xf32>
      tpu.vector_store %arg10[%c4_48, %c0_49], %113 {strides = array<i32>} : memref<32x128xf32, #tpu.memory_space<vmem>>, vector<2x128xf32>,
      %118 = vector.extract_strided_slice %12 {offsets = [6, 0], sizes = [2, 640], strides = [1, 1]} : vector<32x640xf32> to vector<2x640xf32>
      %119 = arith.truncf %115 : vector<2x128xf32> to vector<2x128xbf16>
      %cst_50 = arith.constant dense<0.000000e+00> : vector<2x640xf32>
      %120 = tpu.matmul %119, %1, %cst_50 {dimension_numbers = #tpu.dot_dimension_numbers<[1], [0], [0], [1], [0, 0, 1, 1], [], []>} : vector<2x128xbf16>, vector<128x640xbf16>, vector<2x640xf32> -> vector<2x640xf32>
      %121 = arith.addf %118, %120 : vector<2x640xf32>
      %122 = vector.extract_strided_slice %121 {offsets = [0, 0], sizes = [2, 128], strides = [1, 1]} : vector<2x640xf32> to vector<2x128xf32>
      %123 = arith.negf %122 : vector<2x128xf32>
      %124 = math.exp %123 : vector<2x128xf32>
      %cst_51 = arith.constant 1.000000e+00 : f32
      %125 = vector.broadcast %cst_51 : f32 to vector<2x128xf32>
      %126 = arith.addf %125, %124 : vector<2x128xf32>
      %127 = arith.divf %125, %126 : vector<2x128xf32>
      %128 = vector.extract_strided_slice %121 {offsets = [0, 128], sizes = [2, 128], strides = [1, 1]} : vector<2x640xf32> to vector<2x128xf32>
      %129 = arith.negf %128 : vector<2x128xf32>
      %130 = math.exp %129 : vector<2x128xf32>
      %cst_52 = arith.constant 1.000000e+00 : f32
      %131 = vector.broadcast %cst_52 : f32 to vector<2x128xf32>
      %132 = arith.addf %131, %130 : vector<2x128xf32>
      %133 = arith.divf %131, %132 : vector<2x128xf32>
      %134 = vector.extract_strided_slice %121 {offsets = [0, 384], sizes = [2, 128], strides = [1, 1]} : vector<2x640xf32> to vector<2x128xf32>
      %135 = arith.negf %134 : vector<2x128xf32>
      %136 = math.exp %135 : vector<2x128xf32>
      %cst_53 = arith.constant 1.000000e+00 : f32
      %137 = vector.broadcast %cst_53 : f32 to vector<2x128xf32>
      %138 = arith.addf %137, %136 : vector<2x128xf32>
      %139 = arith.divf %137, %138 : vector<2x128xf32>
      %140 = vector.extract_strided_slice %121 {offsets = [0, 512], sizes = [2, 128], strides = [1, 1]} : vector<2x640xf32> to vector<2x128xf32>
      %141 = math.tanh %140 : vector<2x128xf32>
      %142 = arith.mulf %133, %113 : vector<2x128xf32>
      %143 = arith.mulf %127, %141 : vector<2x128xf32>
      %144 = arith.addf %142, %143 : vector<2x128xf32>
      %145 = math.tanh %144 : vector<2x128xf32>
      %146 = arith.mulf %139, %145 : vector<2x128xf32>
      %c6 = arith.constant 6 : index
      %c0_54 = arith.constant 0 : index
      %147 = vector.load %arg9[%c6, %c0_54] : memref<32x128xf32, #tpu.memory_space<vmem>>, vector<2x128xf32>
      tpu.vector_store %arg9[%c6, %c0_54], %146 {strides = array<i32>} : memref<32x128xf32, #tpu.memory_space<vmem>>, vector<2x128xf32>,
      %c6_55 = arith.constant 6 : index
      %c0_56 = arith.constant 0 : index
      %148 = vector.load %arg10[%c6_55, %c0_56] : memref<32x128xf32, #tpu.memory_space<vmem>>, vector<2x128xf32>
      tpu.vector_store %arg10[%c6_55, %c0_56], %144 {strides = array<i32>} : memref<32x128xf32, #tpu.memory_space<vmem>>, vector<2x128xf32>,
      %149 = vector.extract_strided_slice %12 {offsets = [8, 0], sizes = [2, 640], strides = [1, 1]} : vector<32x640xf32> to vector<2x640xf32>
      %150 = arith.truncf %146 : vector<2x128xf32> to vector<2x128xbf16>
      %cst_57 = arith.constant dense<0.000000e+00> : vector<2x640xf32>
      %151 = tpu.matmul %150, %1, %cst_57 {dimension_numbers = #tpu.dot_dimension_numbers<[1], [0], [0], [1], [0, 0, 1, 1], [], []>} : vector<2x128xbf16>, vector<128x640xbf16>, vector<2x640xf32> -> vector<2x640xf32>
      %152 = arith.addf %149, %151 : vector<2x640xf32>
      %153 = vector.extract_strided_slice %152 {offsets = [0, 0], sizes = [2, 128], strides = [1, 1]} : vector<2x640xf32> to vector<2x128xf32>
      %154 = arith.negf %153 : vector<2x128xf32>
      %155 = math.exp %154 : vector<2x128xf32>
      %cst_58 = arith.constant 1.000000e+00 : f32
      %156 = vector.broadcast %cst_58 : f32 to vector<2x128xf32>
      %157 = arith.addf %156, %155 : vector<2x128xf32>
      %158 = arith.divf %156, %157 : vector<2x128xf32>
      %159 = vector.extract_strided_slice %152 {offsets = [0, 128], sizes = [2, 128], strides = [1, 1]} : vector<2x640xf32> to vector<2x128xf32>
      %160 = arith.negf %159 : vector<2x128xf32>
      %161 = math.exp %160 : vector<2x128xf32>
      %cst_59 = arith.constant 1.000000e+00 : f32
      %162 = vector.broadcast %cst_59 : f32 to vector<2x128xf32>
      %163 = arith.addf %162, %161 : vector<2x128xf32>
      %164 = arith.divf %162, %163 : vector<2x128xf32>
      %165 = vector.extract_strided_slice %152 {offsets = [0, 384], sizes = [2, 128], strides = [1, 1]} : vector<2x640xf32> to vector<2x128xf32>
      %166 = arith.negf %165 : vector<2x128xf32>
      %167 = math.exp %166 : vector<2x128xf32>
      %cst_60 = arith.constant 1.000000e+00 : f32
      %168 = vector.broadcast %cst_60 : f32 to vector<2x128xf32>
      %169 = arith.addf %168, %167 : vector<2x128xf32>
      %170 = arith.divf %168, %169 : vector<2x128xf32>
      %171 = vector.extract_strided_slice %152 {offsets = [0, 512], sizes = [2, 128], strides = [1, 1]} : vector<2x640xf32> to vector<2x128xf32>
      %172 = math.tanh %171 : vector<2x128xf32>
      %173 = arith.mulf %164, %144 : vector<2x128xf32>
      %174 = arith.mulf %158, %172 : vector<2x128xf32>
      %175 = arith.addf %173, %174 : vector<2x128xf32>
      %176 = math.tanh %175 : vector<2x128xf32>
      %177 = arith.mulf %170, %176 : vector<2x128xf32>
      %c8 = arith.constant 8 : index
      %c0_61 = arith.constant 0 : index
      %178 = vector.load %arg9[%c8, %c0_61] : memref<32x128xf32, #tpu.memory_space<vmem>>, vector<2x128xf32>
      tpu.vector_store %arg9[%c8, %c0_61], %177 {strides = array<i32>} : memref<32x128xf32, #tpu.memory_space<vmem>>, vector<2x128xf32>,
      %c8_62 = arith.constant 8 : index
      %c0_63 = arith.constant 0 : index
      %179 = vector.load %arg10[%c8_62, %c0_63] : memref<32x128xf32, #tpu.memory_space<vmem>>, vector<2x128xf32>
      tpu.vector_store %arg10[%c8_62, %c0_63], %175 {strides = array<i32>} : memref<32x128xf32, #tpu.memory_space<vmem>>, vector<2x128xf32>,
      %180 = vector.extract_strided_slice %12 {offsets = [10, 0], sizes = [2, 640], strides = [1, 1]} : vector<32x640xf32> to vector<2x640xf32>
      %181 = arith.truncf %177 : vector<2x128xf32> to vector<2x128xbf16>
      %cst_64 = arith.constant dense<0.000000e+00> : vector<2x640xf32>
      %182 = tpu.matmul %181, %1, %cst_64 {dimension_numbers = #tpu.dot_dimension_numbers<[1], [0], [0], [1], [0, 0, 1, 1], [], []>} : vector<2x128xbf16>, vector<128x640xbf16>, vector<2x640xf32> -> vector<2x640xf32>
      %183 = arith.addf %180, %182 : vector<2x640xf32>
      %184 = vector.extract_strided_slice %183 {offsets = [0, 0], sizes = [2, 128], strides = [1, 1]} : vector<2x640xf32> to vector<2x128xf32>
      %185 = arith.negf %184 : vector<2x128xf32>
      %186 = math.exp %185 : vector<2x128xf32>
      %cst_65 = arith.constant 1.000000e+00 : f32
      %187 = vector.broadcast %cst_65 : f32 to vector<2x128xf32>
      %188 = arith.addf %187, %186 : vector<2x128xf32>
      %189 = arith.divf %187, %188 : vector<2x128xf32>
      %190 = vector.extract_strided_slice %183 {offsets = [0, 128], sizes = [2, 128], strides = [1, 1]} : vector<2x640xf32> to vector<2x128xf32>
      %191 = arith.negf %190 : vector<2x128xf32>
      %192 = math.exp %191 : vector<2x128xf32>
      %cst_66 = arith.constant 1.000000e+00 : f32
      %193 = vector.broadcast %cst_66 : f32 to vector<2x128xf32>
      %194 = arith.addf %193, %192 : vector<2x128xf32>
      %195 = arith.divf %193, %194 : vector<2x128xf32>
      %196 = vector.extract_strided_slice %183 {offsets = [0, 384], sizes = [2, 128], strides = [1, 1]} : vector<2x640xf32> to vector<2x128xf32>
      %197 = arith.negf %196 : vector<2x128xf32>
      %198 = math.exp %197 : vector<2x128xf32>
      %cst_67 = arith.constant 1.000000e+00 : f32
      %199 = vector.broadcast %cst_67 : f32 to vector<2x128xf32>
      %200 = arith.addf %199, %198 : vector<2x128xf32>
      %201 = arith.divf %199, %200 : vector<2x128xf32>
      %202 = vector.extract_strided_slice %183 {offsets = [0, 512], sizes = [2, 128], strides = [1, 1]} : vector<2x640xf32> to vector<2x128xf32>
      %203 = math.tanh %202 : vector<2x128xf32>
      %204 = arith.mulf %195, %175 : vector<2x128xf32>
      %205 = arith.mulf %189, %203 : vector<2x128xf32>
      %206 = arith.addf %204, %205 : vector<2x128xf32>
      %207 = math.tanh %206 : vector<2x128xf32>
      %208 = arith.mulf %201, %207 : vector<2x128xf32>
      %c10 = arith.constant 10 : index
      %c0_68 = arith.constant 0 : index
      %209 = vector.load %arg9[%c10, %c0_68] : memref<32x128xf32, #tpu.memory_space<vmem>>, vector<2x128xf32>
      tpu.vector_store %arg9[%c10, %c0_68], %208 {strides = array<i32>} : memref<32x128xf32, #tpu.memory_space<vmem>>, vector<2x128xf32>,
      %c10_69 = arith.constant 10 : index
      %c0_70 = arith.constant 0 : index
      %210 = vector.load %arg10[%c10_69, %c0_70] : memref<32x128xf32, #tpu.memory_space<vmem>>, vector<2x128xf32>
      tpu.vector_store %arg10[%c10_69, %c0_70], %206 {strides = array<i32>} : memref<32x128xf32, #tpu.memory_space<vmem>>, vector<2x128xf32>,
      %211 = vector.extract_strided_slice %12 {offsets = [12, 0], sizes = [2, 640], strides = [1, 1]} : vector<32x640xf32> to vector<2x640xf32>
      %212 = arith.truncf %208 : vector<2x128xf32> to vector<2x128xbf16>
      %cst_71 = arith.constant dense<0.000000e+00> : vector<2x640xf32>
      %213 = tpu.matmul %212, %1, %cst_71 {dimension_numbers = #tpu.dot_dimension_numbers<[1], [0], [0], [1], [0, 0, 1, 1], [], []>} : vector<2x128xbf16>, vector<128x640xbf16>, vector<2x640xf32> -> vector<2x640xf32>
      %214 = arith.addf %211, %213 : vector<2x640xf32>
      %215 = vector.extract_strided_slice %214 {offsets = [0, 0], sizes = [2, 128], strides = [1, 1]} : vector<2x640xf32> to vector<2x128xf32>
      %216 = arith.negf %215 : vector<2x128xf32>
      %217 = math.exp %216 : vector<2x128xf32>
      %cst_72 = arith.constant 1.000000e+00 : f32
      %218 = vector.broadcast %cst_72 : f32 to vector<2x128xf32>
      %219 = arith.addf %218, %217 : vector<2x128xf32>
      %220 = arith.divf %218, %219 : vector<2x128xf32>
      %221 = vector.extract_strided_slice %214 {offsets = [0, 128], sizes = [2, 128], strides = [1, 1]} : vector<2x640xf32> to vector<2x128xf32>
      %222 = arith.negf %221 : vector<2x128xf32>
      %223 = math.exp %222 : vector<2x128xf32>
      %cst_73 = arith.constant 1.000000e+00 : f32
      %224 = vector.broadcast %cst_73 : f32 to vector<2x128xf32>
      %225 = arith.addf %224, %223 : vector<2x128xf32>
      %226 = arith.divf %224, %225 : vector<2x128xf32>
      %227 = vector.extract_strided_slice %214 {offsets = [0, 384], sizes = [2, 128], strides = [1, 1]} : vector<2x640xf32> to vector<2x128xf32>
      %228 = arith.negf %227 : vector<2x128xf32>
      %229 = math.exp %228 : vector<2x128xf32>
      %cst_74 = arith.constant 1.000000e+00 : f32
      %230 = vector.broadcast %cst_74 : f32 to vector<2x128xf32>
      %231 = arith.addf %230, %229 : vector<2x128xf32>
      %232 = arith.divf %230, %231 : vector<2x128xf32>
      %233 = vector.extract_strided_slice %214 {offsets = [0, 512], sizes = [2, 128], strides = [1, 1]} : vector<2x640xf32> to vector<2x128xf32>
      %234 = math.tanh %233 : vector<2x128xf32>
      %235 = arith.mulf %226, %206 : vector<2x128xf32>
      %236 = arith.mulf %220, %234 : vector<2x128xf32>
      %237 = arith.addf %235, %236 : vector<2x128xf32>
      %238 = math.tanh %237 : vector<2x128xf32>
      %239 = arith.mulf %232, %238 : vector<2x128xf32>
      %c12 = arith.constant 12 : index
      %c0_75 = arith.constant 0 : index
      %240 = vector.load %arg9[%c12, %c0_75] : memref<32x128xf32, #tpu.memory_space<vmem>>, vector<2x128xf32>
      tpu.vector_store %arg9[%c12, %c0_75], %239 {strides = array<i32>} : memref<32x128xf32, #tpu.memory_space<vmem>>, vector<2x128xf32>,
      %c12_76 = arith.constant 12 : index
      %c0_77 = arith.constant 0 : index
      %241 = vector.load %arg10[%c12_76, %c0_77] : memref<32x128xf32, #tpu.memory_space<vmem>>, vector<2x128xf32>
      tpu.vector_store %arg10[%c12_76, %c0_77], %237 {strides = array<i32>} : memref<32x128xf32, #tpu.memory_space<vmem>>, vector<2x128xf32>,
      %242 = vector.extract_strided_slice %12 {offsets = [14, 0], sizes = [2, 640], strides = [1, 1]} : vector<32x640xf32> to vector<2x640xf32>
      %243 = arith.truncf %239 : vector<2x128xf32> to vector<2x128xbf16>
      %cst_78 = arith.constant dense<0.000000e+00> : vector<2x640xf32>
      %244 = tpu.matmul %243, %1, %cst_78 {dimension_numbers = #tpu.dot_dimension_numbers<[1], [0], [0], [1], [0, 0, 1, 1], [], []>} : vector<2x128xbf16>, vector<128x640xbf16>, vector<2x640xf32> -> vector<2x640xf32>
      %245 = arith.addf %242, %244 : vector<2x640xf32>
      %246 = vector.extract_strided_slice %245 {offsets = [0, 0], sizes = [2, 128], strides = [1, 1]} : vector<2x640xf32> to vector<2x128xf32>
      %247 = arith.negf %246 : vector<2x128xf32>
      %248 = math.exp %247 : vector<2x128xf32>
      %cst_79 = arith.constant 1.000000e+00 : f32
      %249 = vector.broadcast %cst_79 : f32 to vector<2x128xf32>
      %250 = arith.addf %249, %248 : vector<2x128xf32>
      %251 = arith.divf %249, %250 : vector<2x128xf32>
      %252 = vector.extract_strided_slice %245 {offsets = [0, 128], sizes = [2, 128], strides = [1, 1]} : vector<2x640xf32> to vector<2x128xf32>
      %253 = arith.negf %252 : vector<2x128xf32>
      %254 = math.exp %253 : vector<2x128xf32>
      %cst_80 = arith.constant 1.000000e+00 : f32
      %255 = vector.broadcast %cst_80 : f32 to vector<2x128xf32>
      %256 = arith.addf %255, %254 : vector<2x128xf32>
      %257 = arith.divf %255, %256 : vector<2x128xf32>
      %258 = vector.extract_strided_slice %245 {offsets = [0, 384], sizes = [2, 128], strides = [1, 1]} : vector<2x640xf32> to vector<2x128xf32>
      %259 = arith.negf %258 : vector<2x128xf32>
      %260 = math.exp %259 : vector<2x128xf32>
      %cst_81 = arith.constant 1.000000e+00 : f32
      %261 = vector.broadcast %cst_81 : f32 to vector<2x128xf32>
      %262 = arith.addf %261, %260 : vector<2x128xf32>
      %263 = arith.divf %261, %262 : vector<2x128xf32>
      %264 = vector.extract_strided_slice %245 {offsets = [0, 512], sizes = [2, 128], strides = [1, 1]} : vector<2x640xf32> to vector<2x128xf32>
      %265 = math.tanh %264 : vector<2x128xf32>
      %266 = arith.mulf %257, %237 : vector<2x128xf32>
      %267 = arith.mulf %251, %265 : vector<2x128xf32>
      %268 = arith.addf %266, %267 : vector<2x128xf32>
      %269 = math.tanh %268 : vector<2x128xf32>
      %270 = arith.mulf %263, %269 : vector<2x128xf32>
      %c14 = arith.constant 14 : index
      %c0_82 = arith.constant 0 : index
      %271 = vector.load %arg9[%c14, %c0_82] : memref<32x128xf32, #tpu.memory_space<vmem>>, vector<2x128xf32>
      tpu.vector_store %arg9[%c14, %c0_82], %270 {strides = array<i32>} : memref<32x128xf32, #tpu.memory_space<vmem>>, vector<2x128xf32>,
      %c14_83 = arith.constant 14 : index
      %c0_84 = arith.constant 0 : index
      %272 = vector.load %arg10[%c14_83, %c0_84] : memref<32x128xf32, #tpu.memory_space<vmem>>, vector<2x128xf32>
      tpu.vector_store %arg10[%c14_83, %c0_84], %268 {strides = array<i32>} : memref<32x128xf32, #tpu.memory_space<vmem>>, vector<2x128xf32>,
      %273 = vector.extract_strided_slice %12 {offsets = [16, 0], sizes = [2, 640], strides = [1, 1]} : vector<32x640xf32> to vector<2x640xf32>
      %274 = arith.truncf %270 : vector<2x128xf32> to vector<2x128xbf16>
      %cst_85 = arith.constant dense<0.000000e+00> : vector<2x640xf32>
      %275 = tpu.matmul %274, %1, %cst_85 {dimension_numbers = #tpu.dot_dimension_numbers<[1], [0], [0], [1], [0, 0, 1, 1], [], []>} : vector<2x128xbf16>, vector<128x640xbf16>, vector<2x640xf32> -> vector<2x640xf32>
      %276 = arith.addf %273, %275 : vector<2x640xf32>
      %277 = vector.extract_strided_slice %276 {offsets = [0, 0], sizes = [2, 128], strides = [1, 1]} : vector<2x640xf32> to vector<2x128xf32>
      %278 = arith.negf %277 : vector<2x128xf32>
      %279 = math.exp %278 : vector<2x128xf32>
      %cst_86 = arith.constant 1.000000e+00 : f32
      %280 = vector.broadcast %cst_86 : f32 to vector<2x128xf32>
      %281 = arith.addf %280, %279 : vector<2x128xf32>
      %282 = arith.divf %280, %281 : vector<2x128xf32>
      %283 = vector.extract_strided_slice %276 {offsets = [0, 128], sizes = [2, 128], strides = [1, 1]} : vector<2x640xf32> to vector<2x128xf32>
      %284 = arith.negf %283 : vector<2x128xf32>
      %285 = math.exp %284 : vector<2x128xf32>
      %cst_87 = arith.constant 1.000000e+00 : f32
      %286 = vector.broadcast %cst_87 : f32 to vector<2x128xf32>
      %287 = arith.addf %286, %285 : vector<2x128xf32>
      %288 = arith.divf %286, %287 : vector<2x128xf32>
      %289 = vector.extract_strided_slice %276 {offsets = [0, 384], sizes = [2, 128], strides = [1, 1]} : vector<2x640xf32> to vector<2x128xf32>
      %290 = arith.negf %289 : vector<2x128xf32>
      %291 = math.exp %290 : vector<2x128xf32>
      %cst_88 = arith.constant 1.000000e+00 : f32
      %292 = vector.broadcast %cst_88 : f32 to vector<2x128xf32>
      %293 = arith.addf %292, %291 : vector<2x128xf32>
      %294 = arith.divf %292, %293 : vector<2x128xf32>
      %295 = vector.extract_strided_slice %276 {offsets = [0, 512], sizes = [2, 128], strides = [1, 1]} : vector<2x640xf32> to vector<2x128xf32>
      %296 = math.tanh %295 : vector<2x128xf32>
      %297 = arith.mulf %288, %268 : vector<2x128xf32>
      %298 = arith.mulf %282, %296 : vector<2x128xf32>
      %299 = arith.addf %297, %298 : vector<2x128xf32>
      %300 = math.tanh %299 : vector<2x128xf32>
      %301 = arith.mulf %294, %300 : vector<2x128xf32>
      %c16 = arith.constant 16 : index
      %c0_89 = arith.constant 0 : index
      %302 = vector.load %arg9[%c16, %c0_89] : memref<32x128xf32, #tpu.memory_space<vmem>>, vector<2x128xf32>
      tpu.vector_store %arg9[%c16, %c0_89], %301 {strides = array<i32>} : memref<32x128xf32, #tpu.memory_space<vmem>>, vector<2x128xf32>,
      %c16_90 = arith.constant 16 : index
      %c0_91 = arith.constant 0 : index
      %303 = vector.load %arg10[%c16_90, %c0_91] : memref<32x128xf32, #tpu.memory_space<vmem>>, vector<2x128xf32>
      tpu.vector_store %arg10[%c16_90, %c0_91], %299 {strides = array<i32>} : memref<32x128xf32, #tpu.memory_space<vmem>>, vector<2x128xf32>,
      %304 = vector.extract_strided_slice %12 {offsets = [18, 0], sizes = [2, 640], strides = [1, 1]} : vector<32x640xf32> to vector<2x640xf32>
      %305 = arith.truncf %301 : vector<2x128xf32> to vector<2x128xbf16>
      %cst_92 = arith.constant dense<0.000000e+00> : vector<2x640xf32>
      %306 = tpu.matmul %305, %1, %cst_92 {dimension_numbers = #tpu.dot_dimension_numbers<[1], [0], [0], [1], [0, 0, 1, 1], [], []>} : vector<2x128xbf16>, vector<128x640xbf16>, vector<2x640xf32> -> vector<2x640xf32>
      %307 = arith.addf %304, %306 : vector<2x640xf32>
      %308 = vector.extract_strided_slice %307 {offsets = [0, 0], sizes = [2, 128], strides = [1, 1]} : vector<2x640xf32> to vector<2x128xf32>
      %309 = arith.negf %308 : vector<2x128xf32>
      %310 = math.exp %309 : vector<2x128xf32>
      %cst_93 = arith.constant 1.000000e+00 : f32
      %311 = vector.broadcast %cst_93 : f32 to vector<2x128xf32>
      %312 = arith.addf %311, %310 : vector<2x128xf32>
      %313 = arith.divf %311, %312 : vector<2x128xf32>
      %314 = vector.extract_strided_slice %307 {offsets = [0, 128], sizes = [2, 128], strides = [1, 1]} : vector<2x640xf32> to vector<2x128xf32>
      %315 = arith.negf %314 : vector<2x128xf32>
      %316 = math.exp %315 : vector<2x128xf32>
      %cst_94 = arith.constant 1.000000e+00 : f32
      %317 = vector.broadcast %cst_94 : f32 to vector<2x128xf32>
      %318 = arith.addf %317, %316 : vector<2x128xf32>
      %319 = arith.divf %317, %318 : vector<2x128xf32>
      %320 = vector.extract_strided_slice %307 {offsets = [0, 384], sizes = [2, 128], strides = [1, 1]} : vector<2x640xf32> to vector<2x128xf32>
      %321 = arith.negf %320 : vector<2x128xf32>
      %322 = math.exp %321 : vector<2x128xf32>
      %cst_95 = arith.constant 1.000000e+00 : f32
      %323 = vector.broadcast %cst_95 : f32 to vector<2x128xf32>
      %324 = arith.addf %323, %322 : vector<2x128xf32>
      %325 = arith.divf %323, %324 : vector<2x128xf32>
      %326 = vector.extract_strided_slice %307 {offsets = [0, 512], sizes = [2, 128], strides = [1, 1]} : vector<2x640xf32> to vector<2x128xf32>
      %327 = math.tanh %326 : vector<2x128xf32>
      %328 = arith.mulf %319, %299 : vector<2x128xf32>
      %329 = arith.mulf %313, %327 : vector<2x128xf32>
      %330 = arith.addf %328, %329 : vector<2x128xf32>
      %331 = math.tanh %330 : vector<2x128xf32>
      %332 = arith.mulf %325, %331 : vector<2x128xf32>
      %c18 = arith.constant 18 : index
      %c0_96 = arith.constant 0 : index
      %333 = vector.load %arg9[%c18, %c0_96] : memref<32x128xf32, #tpu.memory_space<vmem>>, vector<2x128xf32>
      tpu.vector_store %arg9[%c18, %c0_96], %332 {strides = array<i32>} : memref<32x128xf32, #tpu.memory_space<vmem>>, vector<2x128xf32>,
      %c18_97 = arith.constant 18 : index
      %c0_98 = arith.constant 0 : index
      %334 = vector.load %arg10[%c18_97, %c0_98] : memref<32x128xf32, #tpu.memory_space<vmem>>, vector<2x128xf32>
      tpu.vector_store %arg10[%c18_97, %c0_98], %330 {strides = array<i32>} : memref<32x128xf32, #tpu.memory_space<vmem>>, vector<2x128xf32>,
      %335 = vector.extract_strided_slice %12 {offsets = [20, 0], sizes = [2, 640], strides = [1, 1]} : vector<32x640xf32> to vector<2x640xf32>
      %336 = arith.truncf %332 : vector<2x128xf32> to vector<2x128xbf16>
      %cst_99 = arith.constant dense<0.000000e+00> : vector<2x640xf32>
      %337 = tpu.matmul %336, %1, %cst_99 {dimension_numbers = #tpu.dot_dimension_numbers<[1], [0], [0], [1], [0, 0, 1, 1], [], []>} : vector<2x128xbf16>, vector<128x640xbf16>, vector<2x640xf32> -> vector<2x640xf32>
      %338 = arith.addf %335, %337 : vector<2x640xf32>
      %339 = vector.extract_strided_slice %338 {offsets = [0, 0], sizes = [2, 128], strides = [1, 1]} : vector<2x640xf32> to vector<2x128xf32>
      %340 = arith.negf %339 : vector<2x128xf32>
      %341 = math.exp %340 : vector<2x128xf32>
      %cst_100 = arith.constant 1.000000e+00 : f32
      %342 = vector.broadcast %cst_100 : f32 to vector<2x128xf32>
      %343 = arith.addf %342, %341 : vector<2x128xf32>
      %344 = arith.divf %342, %343 : vector<2x128xf32>
      %345 = vector.extract_strided_slice %338 {offsets = [0, 128], sizes = [2, 128], strides = [1, 1]} : vector<2x640xf32> to vector<2x128xf32>
      %346 = arith.negf %345 : vector<2x128xf32>
      %347 = math.exp %346 : vector<2x128xf32>
      %cst_101 = arith.constant 1.000000e+00 : f32
      %348 = vector.broadcast %cst_101 : f32 to vector<2x128xf32>
      %349 = arith.addf %348, %347 : vector<2x128xf32>
      %350 = arith.divf %348, %349 : vector<2x128xf32>
      %351 = vector.extract_strided_slice %338 {offsets = [0, 384], sizes = [2, 128], strides = [1, 1]} : vector<2x640xf32> to vector<2x128xf32>
      %352 = arith.negf %351 : vector<2x128xf32>
      %353 = math.exp %352 : vector<2x128xf32>
      %cst_102 = arith.constant 1.000000e+00 : f32
      %354 = vector.broadcast %cst_102 : f32 to vector<2x128xf32>
      %355 = arith.addf %354, %353 : vector<2x128xf32>
      %356 = arith.divf %354, %355 : vector<2x128xf32>
      %357 = vector.extract_strided_slice %338 {offsets = [0, 512], sizes = [2, 128], strides = [1, 1]} : vector<2x640xf32> to vector<2x128xf32>
      %358 = math.tanh %357 : vector<2x128xf32>
      %359 = arith.mulf %350, %330 : vector<2x128xf32>
      %360 = arith.mulf %344, %358 : vector<2x128xf32>
      %361 = arith.addf %359, %360 : vector<2x128xf32>
      %362 = math.tanh %361 : vector<2x128xf32>
      %363 = arith.mulf %356, %362 : vector<2x128xf32>
      %c20 = arith.constant 20 : index
      %c0_103 = arith.constant 0 : index
      %364 = vector.load %arg9[%c20, %c0_103] : memref<32x128xf32, #tpu.memory_space<vmem>>, vector<2x128xf32>
      tpu.vector_store %arg9[%c20, %c0_103], %363 {strides = array<i32>} : memref<32x128xf32, #tpu.memory_space<vmem>>, vector<2x128xf32>,
      %c20_104 = arith.constant 20 : index
      %c0_105 = arith.constant 0 : index
      %365 = vector.load %arg10[%c20_104, %c0_105] : memref<32x128xf32, #tpu.memory_space<vmem>>, vector<2x128xf32>
      tpu.vector_store %arg10[%c20_104, %c0_105], %361 {strides = array<i32>} : memref<32x128xf32, #tpu.memory_space<vmem>>, vector<2x128xf32>,
      %366 = vector.extract_strided_slice %12 {offsets = [22, 0], sizes = [2, 640], strides = [1, 1]} : vector<32x640xf32> to vector<2x640xf32>
      %367 = arith.truncf %363 : vector<2x128xf32> to vector<2x128xbf16>
      %cst_106 = arith.constant dense<0.000000e+00> : vector<2x640xf32>
      %368 = tpu.matmul %367, %1, %cst_106 {dimension_numbers = #tpu.dot_dimension_numbers<[1], [0], [0], [1], [0, 0, 1, 1], [], []>} : vector<2x128xbf16>, vector<128x640xbf16>, vector<2x640xf32> -> vector<2x640xf32>
      %369 = arith.addf %366, %368 : vector<2x640xf32>
      %370 = vector.extract_strided_slice %369 {offsets = [0, 0], sizes = [2, 128], strides = [1, 1]} : vector<2x640xf32> to vector<2x128xf32>
      %371 = arith.negf %370 : vector<2x128xf32>
      %372 = math.exp %371 : vector<2x128xf32>
      %cst_107 = arith.constant 1.000000e+00 : f32
      %373 = vector.broadcast %cst_107 : f32 to vector<2x128xf32>
      %374 = arith.addf %373, %372 : vector<2x128xf32>
      %375 = arith.divf %373, %374 : vector<2x128xf32>
      %376 = vector.extract_strided_slice %369 {offsets = [0, 128], sizes = [2, 128], strides = [1, 1]} : vector<2x640xf32> to vector<2x128xf32>
      %377 = arith.negf %376 : vector<2x128xf32>
      %378 = math.exp %377 : vector<2x128xf32>
      %cst_108 = arith.constant 1.000000e+00 : f32
      %379 = vector.broadcast %cst_108 : f32 to vector<2x128xf32>
      %380 = arith.addf %379, %378 : vector<2x128xf32>
      %381 = arith.divf %379, %380 : vector<2x128xf32>
      %382 = vector.extract_strided_slice %369 {offsets = [0, 384], sizes = [2, 128], strides = [1, 1]} : vector<2x640xf32> to vector<2x128xf32>
      %383 = arith.negf %382 : vector<2x128xf32>
      %384 = math.exp %383 : vector<2x128xf32>
      %cst_109 = arith.constant 1.000000e+00 : f32
      %385 = vector.broadcast %cst_109 : f32 to vector<2x128xf32>
      %386 = arith.addf %385, %384 : vector<2x128xf32>
      %387 = arith.divf %385, %386 : vector<2x128xf32>
      %388 = vector.extract_strided_slice %369 {offsets = [0, 512], sizes = [2, 128], strides = [1, 1]} : vector<2x640xf32> to vector<2x128xf32>
      %389 = math.tanh %388 : vector<2x128xf32>
      %390 = arith.mulf %381, %361 : vector<2x128xf32>
      %391 = arith.mulf %375, %389 : vector<2x128xf32>
      %392 = arith.addf %390, %391 : vector<2x128xf32>
      %393 = math.tanh %392 : vector<2x128xf32>
      %394 = arith.mulf %387, %393 : vector<2x128xf32>
      %c22 = arith.constant 22 : index
      %c0_110 = arith.constant 0 : index
      %395 = vector.load %arg9[%c22, %c0_110] : memref<32x128xf32, #tpu.memory_space<vmem>>, vector<2x128xf32>
      tpu.vector_store %arg9[%c22, %c0_110], %394 {strides = array<i32>} : memref<32x128xf32, #tpu.memory_space<vmem>>, vector<2x128xf32>,
      %c22_111 = arith.constant 22 : index
      %c0_112 = arith.constant 0 : index
      %396 = vector.load %arg10[%c22_111, %c0_112] : memref<32x128xf32, #tpu.memory_space<vmem>>, vector<2x128xf32>
      tpu.vector_store %arg10[%c22_111, %c0_112], %392 {strides = array<i32>} : memref<32x128xf32, #tpu.memory_space<vmem>>, vector<2x128xf32>,
      %397 = vector.extract_strided_slice %12 {offsets = [24, 0], sizes = [2, 640], strides = [1, 1]} : vector<32x640xf32> to vector<2x640xf32>
      %398 = arith.truncf %394 : vector<2x128xf32> to vector<2x128xbf16>
      %cst_113 = arith.constant dense<0.000000e+00> : vector<2x640xf32>
      %399 = tpu.matmul %398, %1, %cst_113 {dimension_numbers = #tpu.dot_dimension_numbers<[1], [0], [0], [1], [0, 0, 1, 1], [], []>} : vector<2x128xbf16>, vector<128x640xbf16>, vector<2x640xf32> -> vector<2x640xf32>
      %400 = arith.addf %397, %399 : vector<2x640xf32>
      %401 = vector.extract_strided_slice %400 {offsets = [0, 0], sizes = [2, 128], strides = [1, 1]} : vector<2x640xf32> to vector<2x128xf32>
      %402 = arith.negf %401 : vector<2x128xf32>
      %403 = math.exp %402 : vector<2x128xf32>
      %cst_114 = arith.constant 1.000000e+00 : f32
      %404 = vector.broadcast %cst_114 : f32 to vector<2x128xf32>
      %405 = arith.addf %404, %403 : vector<2x128xf32>
      %406 = arith.divf %404, %405 : vector<2x128xf32>
      %407 = vector.extract_strided_slice %400 {offsets = [0, 128], sizes = [2, 128], strides = [1, 1]} : vector<2x640xf32> to vector<2x128xf32>
      %408 = arith.negf %407 : vector<2x128xf32>
      %409 = math.exp %408 : vector<2x128xf32>
      %cst_115 = arith.constant 1.000000e+00 : f32
      %410 = vector.broadcast %cst_115 : f32 to vector<2x128xf32>
      %411 = arith.addf %410, %409 : vector<2x128xf32>
      %412 = arith.divf %410, %411 : vector<2x128xf32>
      %413 = vector.extract_strided_slice %400 {offsets = [0, 384], sizes = [2, 128], strides = [1, 1]} : vector<2x640xf32> to vector<2x128xf32>
      %414 = arith.negf %413 : vector<2x128xf32>
      %415 = math.exp %414 : vector<2x128xf32>
      %cst_116 = arith.constant 1.000000e+00 : f32
      %416 = vector.broadcast %cst_116 : f32 to vector<2x128xf32>
      %417 = arith.addf %416, %415 : vector<2x128xf32>
      %418 = arith.divf %416, %417 : vector<2x128xf32>
      %419 = vector.extract_strided_slice %400 {offsets = [0, 512], sizes = [2, 128], strides = [1, 1]} : vector<2x640xf32> to vector<2x128xf32>
      %420 = math.tanh %419 : vector<2x128xf32>
      %421 = arith.mulf %412, %392 : vector<2x128xf32>
      %422 = arith.mulf %406, %420 : vector<2x128xf32>
      %423 = arith.addf %421, %422 : vector<2x128xf32>
      %424 = math.tanh %423 : vector<2x128xf32>
      %425 = arith.mulf %418, %424 : vector<2x128xf32>
      %c24 = arith.constant 24 : index
      %c0_117 = arith.constant 0 : index
      %426 = vector.load %arg9[%c24, %c0_117] : memref<32x128xf32, #tpu.memory_space<vmem>>, vector<2x128xf32>
      tpu.vector_store %arg9[%c24, %c0_117], %425 {strides = array<i32>} : memref<32x128xf32, #tpu.memory_space<vmem>>, vector<2x128xf32>,
      %c24_118 = arith.constant 24 : index
      %c0_119 = arith.constant 0 : index
      %427 = vector.load %arg10[%c24_118, %c0_119] : memref<32x128xf32, #tpu.memory_space<vmem>>, vector<2x128xf32>
      tpu.vector_store %arg10[%c24_118, %c0_119], %423 {strides = array<i32>} : memref<32x128xf32, #tpu.memory_space<vmem>>, vector<2x128xf32>,
      %428 = vector.extract_strided_slice %12 {offsets = [26, 0], sizes = [2, 640], strides = [1, 1]} : vector<32x640xf32> to vector<2x640xf32>
      %429 = arith.truncf %425 : vector<2x128xf32> to vector<2x128xbf16>
      %cst_120 = arith.constant dense<0.000000e+00> : vector<2x640xf32>
      %430 = tpu.matmul %429, %1, %cst_120 {dimension_numbers = #tpu.dot_dimension_numbers<[1], [0], [0], [1], [0, 0, 1, 1], [], []>} : vector<2x128xbf16>, vector<128x640xbf16>, vector<2x640xf32> -> vector<2x640xf32>
      %431 = arith.addf %428, %430 : vector<2x640xf32>
      %432 = vector.extract_strided_slice %431 {offsets = [0, 0], sizes = [2, 128], strides = [1, 1]} : vector<2x640xf32> to vector<2x128xf32>
      %433 = arith.negf %432 : vector<2x128xf32>
      %434 = math.exp %433 : vector<2x128xf32>
      %cst_121 = arith.constant 1.000000e+00 : f32
      %435 = vector.broadcast %cst_121 : f32 to vector<2x128xf32>
      %436 = arith.addf %435, %434 : vector<2x128xf32>
      %437 = arith.divf %435, %436 : vector<2x128xf32>
      %438 = vector.extract_strided_slice %431 {offsets = [0, 128], sizes = [2, 128], strides = [1, 1]} : vector<2x640xf32> to vector<2x128xf32>
      %439 = arith.negf %438 : vector<2x128xf32>
      %440 = math.exp %439 : vector<2x128xf32>
      %cst_122 = arith.constant 1.000000e+00 : f32
      %441 = vector.broadcast %cst_122 : f32 to vector<2x128xf32>
      %442 = arith.addf %441, %440 : vector<2x128xf32>
      %443 = arith.divf %441, %442 : vector<2x128xf32>
      %444 = vector.extract_strided_slice %431 {offsets = [0, 384], sizes = [2, 128], strides = [1, 1]} : vector<2x640xf32> to vector<2x128xf32>
      %445 = arith.negf %444 : vector<2x128xf32>
      %446 = math.exp %445 : vector<2x128xf32>
      %cst_123 = arith.constant 1.000000e+00 : f32
      %447 = vector.broadcast %cst_123 : f32 to vector<2x128xf32>
      %448 = arith.addf %447, %446 : vector<2x128xf32>
      %449 = arith.divf %447, %448 : vector<2x128xf32>
      %450 = vector.extract_strided_slice %431 {offsets = [0, 512], sizes = [2, 128], strides = [1, 1]} : vector<2x640xf32> to vector<2x128xf32>
      %451 = math.tanh %450 : vector<2x128xf32>
      %452 = arith.mulf %443, %423 : vector<2x128xf32>
      %453 = arith.mulf %437, %451 : vector<2x128xf32>
      %454 = arith.addf %452, %453 : vector<2x128xf32>
      %455 = math.tanh %454 : vector<2x128xf32>
      %456 = arith.mulf %449, %455 : vector<2x128xf32>
      %c26 = arith.constant 26 : index
      %c0_124 = arith.constant 0 : index
      %457 = vector.load %arg9[%c26, %c0_124] : memref<32x128xf32, #tpu.memory_space<vmem>>, vector<2x128xf32>
      tpu.vector_store %arg9[%c26, %c0_124], %456 {strides = array<i32>} : memref<32x128xf32, #tpu.memory_space<vmem>>, vector<2x128xf32>,
      %c26_125 = arith.constant 26 : index
      %c0_126 = arith.constant 0 : index
      %458 = vector.load %arg10[%c26_125, %c0_126] : memref<32x128xf32, #tpu.memory_space<vmem>>, vector<2x128xf32>
      tpu.vector_store %arg10[%c26_125, %c0_126], %454 {strides = array<i32>} : memref<32x128xf32, #tpu.memory_space<vmem>>, vector<2x128xf32>,
      %459 = vector.extract_strided_slice %12 {offsets = [28, 0], sizes = [2, 640], strides = [1, 1]} : vector<32x640xf32> to vector<2x640xf32>
      %460 = arith.truncf %456 : vector<2x128xf32> to vector<2x128xbf16>
      %cst_127 = arith.constant dense<0.000000e+00> : vector<2x640xf32>
      %461 = tpu.matmul %460, %1, %cst_127 {dimension_numbers = #tpu.dot_dimension_numbers<[1], [0], [0], [1], [0, 0, 1, 1], [], []>} : vector<2x128xbf16>, vector<128x640xbf16>, vector<2x640xf32> -> vector<2x640xf32>
      %462 = arith.addf %459, %461 : vector<2x640xf32>
      %463 = vector.extract_strided_slice %462 {offsets = [0, 0], sizes = [2, 128], strides = [1, 1]} : vector<2x640xf32> to vector<2x128xf32>
      %464 = arith.negf %463 : vector<2x128xf32>
      %465 = math.exp %464 : vector<2x128xf32>
      %cst_128 = arith.constant 1.000000e+00 : f32
      %466 = vector.broadcast %cst_128 : f32 to vector<2x128xf32>
      %467 = arith.addf %466, %465 : vector<2x128xf32>
      %468 = arith.divf %466, %467 : vector<2x128xf32>
      %469 = vector.extract_strided_slice %462 {offsets = [0, 128], sizes = [2, 128], strides = [1, 1]} : vector<2x640xf32> to vector<2x128xf32>
      %470 = arith.negf %469 : vector<2x128xf32>
      %471 = math.exp %470 : vector<2x128xf32>
      %cst_129 = arith.constant 1.000000e+00 : f32
      %472 = vector.broadcast %cst_129 : f32 to vector<2x128xf32>
      %473 = arith.addf %472, %471 : vector<2x128xf32>
      %474 = arith.divf %472, %473 : vector<2x128xf32>
      %475 = vector.extract_strided_slice %462 {offsets = [0, 384], sizes = [2, 128], strides = [1, 1]} : vector<2x640xf32> to vector<2x128xf32>
      %476 = arith.negf %475 : vector<2x128xf32>
      %477 = math.exp %476 : vector<2x128xf32>
      %cst_130 = arith.constant 1.000000e+00 : f32
      %478 = vector.broadcast %cst_130 : f32 to vector<2x128xf32>
      %479 = arith.addf %478, %477 : vector<2x128xf32>
      %480 = arith.divf %478, %479 : vector<2x128xf32>
      %481 = vector.extract_strided_slice %462 {offsets = [0, 512], sizes = [2, 128], strides = [1, 1]} : vector<2x640xf32> to vector<2x128xf32>
      %482 = math.tanh %481 : vector<2x128xf32>
      %483 = arith.mulf %474, %454 : vector<2x128xf32>
      %484 = arith.mulf %468, %482 : vector<2x128xf32>
      %485 = arith.addf %483, %484 : vector<2x128xf32>
      %486 = math.tanh %485 : vector<2x128xf32>
      %487 = arith.mulf %480, %486 : vector<2x128xf32>
      %c28 = arith.constant 28 : index
      %c0_131 = arith.constant 0 : index
      %488 = vector.load %arg9[%c28, %c0_131] : memref<32x128xf32, #tpu.memory_space<vmem>>, vector<2x128xf32>
      tpu.vector_store %arg9[%c28, %c0_131], %487 {strides = array<i32>} : memref<32x128xf32, #tpu.memory_space<vmem>>, vector<2x128xf32>,
      %c28_132 = arith.constant 28 : index
      %c0_133 = arith.constant 0 : index
      %489 = vector.load %arg10[%c28_132, %c0_133] : memref<32x128xf32, #tpu.memory_space<vmem>>, vector<2x128xf32>
      tpu.vector_store %arg10[%c28_132, %c0_133], %485 {strides = array<i32>} : memref<32x128xf32, #tpu.memory_space<vmem>>, vector<2x128xf32>,
      %490 = vector.extract_strided_slice %12 {offsets = [30, 0], sizes = [2, 640], strides = [1, 1]} : vector<32x640xf32> to vector<2x640xf32>
      %491 = arith.truncf %487 : vector<2x128xf32> to vector<2x128xbf16>
      %cst_134 = arith.constant dense<0.000000e+00> : vector<2x640xf32>
      %492 = tpu.matmul %491, %1, %cst_134 {dimension_numbers = #tpu.dot_dimension_numbers<[1], [0], [0], [1], [0, 0, 1, 1], [], []>} : vector<2x128xbf16>, vector<128x640xbf16>, vector<2x640xf32> -> vector<2x640xf32>
      %493 = arith.addf %490, %492 : vector<2x640xf32>
      %494 = vector.extract_strided_slice %493 {offsets = [0, 0], sizes = [2, 128], strides = [1, 1]} : vector<2x640xf32> to vector<2x128xf32>
      %495 = arith.negf %494 : vector<2x128xf32>
      %496 = math.exp %495 : vector<2x128xf32>
      %cst_135 = arith.constant 1.000000e+00 : f32
      %497 = vector.broadcast %cst_135 : f32 to vector<2x128xf32>
      %498 = arith.addf %497, %496 : vector<2x128xf32>
      %499 = arith.divf %497, %498 : vector<2x128xf32>
      %500 = vector.extract_strided_slice %493 {offsets = [0, 128], sizes = [2, 128], strides = [1, 1]} : vector<2x640xf32> to vector<2x128xf32>
      %501 = arith.negf %500 : vector<2x128xf32>
      %502 = math.exp %501 : vector<2x128xf32>
      %cst_136 = arith.constant 1.000000e+00 : f32
      %503 = vector.broadcast %cst_136 : f32 to vector<2x128xf32>
      %504 = arith.addf %503, %502 : vector<2x128xf32>
      %505 = arith.divf %503, %504 : vector<2x128xf32>
      %506 = vector.extract_strided_slice %493 {offsets = [0, 384], sizes = [2, 128], strides = [1, 1]} : vector<2x640xf32> to vector<2x128xf32>
      %507 = arith.negf %506 : vector<2x128xf32>
      %508 = math.exp %507 : vector<2x128xf32>
      %cst_137 = arith.constant 1.000000e+00 : f32
      %509 = vector.broadcast %cst_137 : f32 to vector<2x128xf32>
      %510 = arith.addf %509, %508 : vector<2x128xf32>
      %511 = arith.divf %509, %510 : vector<2x128xf32>
      %512 = vector.extract_strided_slice %493 {offsets = [0, 512], sizes = [2, 128], strides = [1, 1]} : vector<2x640xf32> to vector<2x128xf32>
      %513 = math.tanh %512 : vector<2x128xf32>
      %514 = arith.mulf %505, %485 : vector<2x128xf32>
      %515 = arith.mulf %499, %513 : vector<2x128xf32>
      %516 = arith.addf %514, %515 : vector<2x128xf32>
      %517 = math.tanh %516 : vector<2x128xf32>
      %518 = arith.mulf %511, %517 : vector<2x128xf32>
      %c30 = arith.constant 30 : index
      %c0_138 = arith.constant 0 : index
      %519 = vector.load %arg9[%c30, %c0_138] : memref<32x128xf32, #tpu.memory_space<vmem>>, vector<2x128xf32>
      tpu.vector_store %arg9[%c30, %c0_138], %518 {strides = array<i32>} : memref<32x128xf32, #tpu.memory_space<vmem>>, vector<2x128xf32>,
      %c30_139 = arith.constant 30 : index
      %c0_140 = arith.constant 0 : index
      %520 = vector.load %arg10[%c30_139, %c0_140] : memref<32x128xf32, #tpu.memory_space<vmem>>, vector<2x128xf32>
      tpu.vector_store %arg10[%c30_139, %c0_140], %516 {strides = array<i32>} : memref<32x128xf32, #tpu.memory_space<vmem>>, vector<2x128xf32>,
    } else {
    }
    %c0_i32_16 = arith.constant 0 : i32
    %16 = arith.cmpi sgt, %arg1, %c0_i32_16 : i32
    %17 = arith.extui %16 : i1 to i32
    %c0_i32_17 = arith.constant 0 : i32
    %18 = arith.cmpi ne, %17, %c0_i32_17 : i32
    scf.if %18 {
      %c0_28 = arith.constant 0 : index
      %c0_29 = arith.constant 0 : index
      %27 = vector.load %arg9[%c0_28, %c0_29] : memref<32x128xf32, #tpu.memory_space<vmem>>, vector<32x128xf32>
      %c0_30 = arith.constant 0 : index
      %c0_31 = arith.constant 0 : index
      %28 = vector.load %arg10[%c0_30, %c0_31] : memref<32x128xf32, #tpu.memory_space<vmem>>, vector<32x128xf32>
      %29 = tpu.iota {dimensions = array<i32: 0>} : vector<32x128xi32>
      %c2_i32 = arith.constant 2 : i32
      %30 = vector.broadcast %c2_i32 : i32 to vector<32x128xi32>
      %31 = arith.cmpi slt, %29, %30 : vector<32x128xi32>
      %c2_i32_32 = arith.constant 2 : i32
      %32 = tpu.dynamic_rotate %27 by %c2_i32_32 dim 0 : vector<32x128xf32>, i32 -> vector<32x128xf32>
      %33 = arith.select %31, %27, %32 : vector<32x128xi1>, vector<32x128xf32>
      %c2_i32_33 = arith.constant 2 : i32
      %34 = vector.broadcast %c2_i32_33 : i32 to vector<32x128xi32>
      %35 = arith.cmpi slt, %29, %34 : vector<32x128xi32>
      %c2_i32_34 = arith.constant 2 : i32
      %36 = tpu.dynamic_rotate %28 by %c2_i32_34 dim 0 : vector<32x128xf32>, i32 -> vector<32x128xf32>
      %37 = arith.select %35, %28, %36 : vector<32x128xi1>, vector<32x128xf32>
      %c30_i32 = arith.constant 30 : i32
      %38 = vector.broadcast %c30_i32 : i32 to vector<32x128xi32>
      %39 = arith.cmpi sge, %29, %38 : vector<32x128xi32>
      %c30_i32_35 = arith.constant 30 : i32
      %40 = tpu.dynamic_rotate %27 by %c30_i32_35 dim 0 : vector<32x128xf32>, i32 -> vector<32x128xf32>
      %41 = arith.select %39, %27, %40 : vector<32x128xi1>, vector<32x128xf32>
      %c30_i32_36 = arith.constant 30 : i32
      %42 = vector.broadcast %c30_i32_36 : i32 to vector<32x128xi32>
      %43 = arith.cmpi sge, %29, %42 : vector<32x128xi32>
      %c30_i32_37 = arith.constant 30 : i32
      %44 = tpu.dynamic_rotate %28 by %c30_i32_37 dim 0 : vector<32x128xf32>, i32 -> vector<32x128xf32>
      %45 = arith.select %43, %28, %44 : vector<32x128xi1>, vector<32x128xf32>
      %46 = arith.truncf %33 : vector<32x128xf32> to vector<32x128xbf16>
      %cst_38 = arith.constant dense<0.000000e+00> : vector<32x640xf32>
      %47 = tpu.matmul %46, %1, %cst_38 {dimension_numbers = #tpu.dot_dimension_numbers<[1], [0], [0], [1], [0, 0, 1, 1], [], []>} : vector<32x128xbf16>, vector<128x640xbf16>, vector<32x640xf32> -> vector<32x640xf32>
      %48 = arith.addf %12, %47 : vector<32x640xf32>
      %49 = arith.truncf %41 : vector<32x128xf32> to vector<32x128xbf16>
      %cst_39 = arith.constant dense<0.000000e+00> : vector<32x640xf32>
      %50 = tpu.matmul %49, %3, %cst_39 {dimension_numbers = #tpu.dot_dimension_numbers<[1], [0], [0], [1], [0, 0, 1, 1], [], []>} : vector<32x128xbf16>, vector<128x640xbf16>, vector<32x640xf32> -> vector<32x640xf32>
      %51 = arith.addf %48, %50 : vector<32x640xf32>
      %52 = vector.extract_strided_slice %51 {offsets = [0, 0], sizes = [32, 128], strides = [1, 1]} : vector<32x640xf32> to vector<32x128xf32>
      %53 = arith.negf %52 : vector<32x128xf32>
      %54 = math.exp %53 : vector<32x128xf32>
      %cst_40 = arith.constant 1.000000e+00 : f32
      %55 = vector.broadcast %cst_40 : f32 to vector<32x128xf32>
      %56 = arith.addf %55, %54 : vector<32x128xf32>
      %57 = arith.divf %55, %56 : vector<32x128xf32>
      %58 = vector.extract_strided_slice %51 {offsets = [0, 128], sizes = [32, 128], strides = [1, 1]} : vector<32x640xf32> to vector<32x128xf32>
      %59 = arith.negf %58 : vector<32x128xf32>
      %60 = math.exp %59 : vector<32x128xf32>
      %cst_41 = arith.constant 1.000000e+00 : f32
      %61 = vector.broadcast %cst_41 : f32 to vector<32x128xf32>
      %62 = arith.addf %61, %60 : vector<32x128xf32>
      %63 = arith.divf %61, %62 : vector<32x128xf32>
      %64 = vector.extract_strided_slice %51 {offsets = [0, 384], sizes = [32, 128], strides = [1, 1]} : vector<32x640xf32> to vector<32x128xf32>
      %65 = arith.negf %64 : vector<32x128xf32>
      %66 = math.exp %65 : vector<32x128xf32>
      %cst_42 = arith.constant 1.000000e+00 : f32
      %67 = vector.broadcast %cst_42 : f32 to vector<32x128xf32>
      %68 = arith.addf %67, %66 : vector<32x128xf32>
      %69 = arith.divf %67, %68 : vector<32x128xf32>
      %70 = vector.extract_strided_slice %51 {offsets = [0, 512], sizes = [32, 128], strides = [1, 1]} : vector<32x640xf32> to vector<32x128xf32>
      %71 = math.tanh %70 : vector<32x128xf32>
      %72 = arith.mulf %63, %37 : vector<32x128xf32>
      %73 = arith.mulf %57, %71 : vector<32x128xf32>
      %74 = arith.addf %72, %73 : vector<32x128xf32>
      %75 = vector.extract_strided_slice %51 {offsets = [0, 256], sizes = [32, 128], strides = [1, 1]} : vector<32x640xf32> to vector<32x128xf32>
      %76 = arith.negf %75 : vector<32x128xf32>
      %77 = math.exp %76 : vector<32x128xf32>
      %cst_43 = arith.constant 1.000000e+00 : f32
      %78 = vector.broadcast %cst_43 : f32 to vector<32x128xf32>
      %79 = arith.addf %78, %77 : vector<32x128xf32>
      %80 = arith.divf %78, %79 : vector<32x128xf32>
      %81 = arith.mulf %80, %45 : vector<32x128xf32>
      %82 = arith.addf %74, %81 : vector<32x128xf32>
      %83 = math.tanh %82 : vector<32x128xf32>
      %84 = arith.mulf %69, %83 : vector<32x128xf32>
      %c0_44 = arith.constant 0 : index
      %c0_45 = arith.constant 0 : index
      %85 = vector.load %arg9[%c0_44, %c0_45] : memref<32x128xf32, #tpu.memory_space<vmem>>, vector<32x128xf32>
      tpu.vector_store %arg9[%c0_44, %c0_45], %84 {strides = array<i32>} : memref<32x128xf32, #tpu.memory_space<vmem>>, vector<32x128xf32>,
      %c0_46 = arith.constant 0 : index
      %c0_47 = arith.constant 0 : index
      %86 = vector.load %arg10[%c0_46, %c0_47] : memref<32x128xf32, #tpu.memory_space<vmem>>, vector<32x128xf32>
      tpu.vector_store %arg10[%c0_46, %c0_47], %82 {strides = array<i32>} : memref<32x128xf32, #tpu.memory_space<vmem>>, vector<32x128xf32>,
    } else {
    }
    %c0_18 = arith.constant 0 : index
    %c0_19 = arith.constant 0 : index
    %c0_20 = arith.constant 0 : index
    %19 = vector.load %arg7[%c0_18, %c0_19, %c0_20] : memref<1x128x128xbf16, #tpu.memory_space<vmem>>, vector<1x128x128xbf16>
    %20 = vector.shape_cast %19 : vector<1x128x128xbf16> to vector<128x128xbf16>
    %c0_21 = arith.constant 0 : index
    %c0_22 = arith.constant 0 : index
    %21 = vector.load %arg9[%c0_21, %c0_22] : memref<32x128xf32, #tpu.memory_space<vmem>>, vector<32x128xf32>
    %22 = arith.truncf %21 : vector<32x128xf32> to vector<32x128xbf16>
    %cst_23 = arith.constant dense<0.000000e+00> : vector<32x128xf32>
    %23 = tpu.matmul %22, %20, %cst_23 {dimension_numbers = #tpu.dot_dimension_numbers<[1], [0], [0], [1], [0, 0, 1, 1], [], []>} : vector<32x128xbf16>, vector<128x128xbf16>, vector<32x128xf32> -> vector<32x128xf32>
    %c0_24 = arith.constant 0 : index
    %c0_25 = arith.constant 0 : index
    %c0_26 = arith.constant 0 : index
    %c0_27 = arith.constant 0 : index
    %24 = vector.load %arg8[%c0_24, %c0_25, %c0_26, %c0_27] : memref<1x1x32x128xf32, #tpu.memory_space<vmem>>, vector<1x1x32x128xf32>
    %25 = vector.shape_cast %24 : vector<1x1x32x128xf32> to vector<32x128xf32>
    %26 = vector.shape_cast %23 : vector<32x128xf32> to vector<1x1x32x128xf32>
    tpu.vector_store %arg8[%c0_24, %c0_25, %c0_26, %c0_27], %26 {strides = array<i32>} : memref<1x1x32x128xf32, #tpu.memory_space<vmem>>, vector<1x1x32x128xf32>,
    return
  }
  func.func @transform_0(%arg0: i32, %arg1: i32) -> (i32, i32, i32, i32) {
    %c0_i32 = arith.constant 0 : i32
    %c0_i32_0 = arith.constant 0 : i32
    %c0_i32_1 = arith.constant 0 : i32
    return %arg0, %arg1, %c0_i32, %c0_i32_0 : i32, i32, i32, i32
  }
  func.func @transform_1(%arg0: i32, %arg1: i32) -> (i32, i32, i32) {
    %c0_i32 = arith.constant 0 : i32
    %c0_i32_0 = arith.constant 0 : i32
    %c0_i32_1 = arith.constant 0 : i32
    return %arg0, %c0_i32, %c0_i32_0 : i32, i32, i32
  }
  func.func @transform_2(%arg0: i32, %arg1: i32) -> (i32, i32, i32) {
    %c0_i32 = arith.constant 0 : i32
    %c0_i32_0 = arith.constant 0 : i32
    %c0_i32_1 = arith.constant 0 : i32
    return %arg0, %c0_i32, %c0_i32_0 : i32, i32, i32
  }
  func.func @transform_3(%arg0: i32, %arg1: i32) -> (i32, i32, i32) {
    %c0_i32 = arith.constant 0 : i32
    %c0_i32_0 = arith.constant 0 : i32
    %c0_i32_1 = arith.constant 0 : i32
    return %arg0, %c0_i32, %c0_i32_0 : i32, i32, i32
  }
  func.func @transform_4(%arg0: i32, %arg1: i32) -> (i32, i32, i32) {
    %c0_i32 = arith.constant 0 : i32
    %c0_i32_0 = arith.constant 0 : i32
    %c0_i32_1 = arith.constant 0 : i32
    return %arg0, %c0_i32, %c0_i32_0 : i32, i32, i32
  }
  func.func @transform_5(%arg0: i32, %arg1: i32) -> (i32, i32, i32) {
    %c0_i32 = arith.constant 0 : i32
    %c0_i32_0 = arith.constant 0 : i32
    %c0_i32_1 = arith.constant 0 : i32
    return %arg0, %c0_i32, %c0_i32_0 : i32, i32, i32
  }
  func.func @transform_6(%arg0: i32, %arg1: i32) -> (i32, i32, i32, i32) {
    %c0_i32 = arith.constant 0 : i32
    %c0_i32_0 = arith.constant 0 : i32
    %c0_i32_1 = arith.constant 0 : i32
    return %arg0, %arg1, %c0_i32, %c0_i32_0 : i32, i32, i32, i32
  }
}

</mosaic_0001>

<bundles_post_ra>
// kernel: tpu_custom_call.1
= control target key start
LH: loop header
LB: loop body
LE: loop exit
PB: predicated region body
PF: predicated region fallthrough
CT: control target
= control target key end

     0   :  { %6 = vsyncpa [#allocation3], 0  ;;  %s340_s0 = inlined_call_operand.hbm [shape: f32[8,128], index: 0, kind: input, shape index: {}]   ;;  %s341_s1 = inlined_call_operand.hbm [shape: f32[8,128], index: 1, kind: output, shape index: {}]  }
   0x1   :  { %7 = vsyncpa [#allocation4], 0  ;;  %s261_s6 = smov 0  }
   0x2 LB: > { %s144_s7 = sadd.s32 4294967295, %s247_s6   ;;  %p145_p0 = scmp.ge.s32.totalorder %s247_s6, 1  ;;  %s247_s6 = sphi %s261_s6, %s13_s6  }
   0x3   : > { %p60_p1 = scmp.lt.s32.totalorder %s247_s6, 3  ;;  %p275_p3 = scmp.eq.s32.totalorder %s144_s7, 0 }
   0x4   : > { %s249_s10 = smov [#allocation2]   ;;  %s179_s15 = scalar_lea.hbm %s340_s0, 128 }
   0x5   : > { %p269_p2 = pnand %p145_p0, %p60_p1  ;;  %s73_s11 = sshll.u32 %s249_s10, 4  ;;  %s74_s11 = int_to_ptr.vmem [resolvable:$true] %s73_s11 }
   0x6   : > { %s346_s9 = scalar_select %p275_p3, 1, 0 }
   0x7   : > { %s345_s8 = scalar_select %p269_p2, 1, 0 }
   0x8   : > { %p161_p4 = pneg %p269_p2  ;;  %p180_p6 = scmp.ne.s32.totalorder %s340_s0, %s179_s15 }
   0x9   : > { %p186_p10 = scmp.lt.u32.totalorder %s179_s15, %s340_s0 }
   0xa   : > { %p283_p5 = pnand %p275_p3, %p161_p4 }
   0xc   : > { %p181_p7 = pneg %p283_p5 }
   0xe   : > { %p182_p8 = pnand %p181_p7, %p180_p6 }
  0x10   : > { %p183_p9 = pneg %p182_p8 }
  0x12   : > { %p188_p11 = pnand %p186_p10, %p183_p9 }
  0x14   : > { %191 = shalt.err (!%p188_p11)
}
  0x15   : > { %s192_s20 = scalar_lea.vmem %s74_s11, 128  ;;  %p200_p1 = scmp.lt.s32.totalorder %s74_s11, %s74_s11 }
  0x16   : > { %p193_p12 = scmp.ne.s32.totalorder %s74_s11, %s192_s20  ;;  %p201_p4 = scmp.lt.s32.totalorder %s192_s20, %s192_s20 }
  0x18   : > { %p195_p13 = pnand %p193_p12, %p181_p7  ;;  %p202_p3 = por %p201_p4, %p200_p1 }
  0x1a   : > { %p196_p0 = pneg %p195_p13 }
  0x1c   : > { %p203_p2 = pnand %p202_p3, %p196_p0 }
  0x1e   : > { %206 = shalt.err (!%p203_p2)
}
  0x1f   : > { %164 = dma.hbm_to_vmem [thread:$0]  (!%p283_p5), %s340_s0, 128, %s74_s11, [#allocation3]  }
  0x20   : > { %p348_p6 = scmp.ne.s32.totalorder %s345_s8, 0 }
  0x21   : > { %p349_p8 = scmp.ne.s32.totalorder (!%p348_p6), %s346_s9, 0 }
  0x22   : > { %86 = sbr.rel (%p348_p6) target bundleno = 67 (0x43), region = 24 }
  0x29   : > { %238 = dma.done.wait (%p349_p8), [#allocation3], 128  }
  0x2a   : > { %240 = vsyncadd (%p349_p8), [#allocation3], 4294967168  ;;  %s250_s23 = smov [#allocation5]   ;;  %p311_p2 = scmp.eq.s32.totalorder %s144_s7, 1  ;;  %v96_v0 = vld [vmem:[#allocation2] sm:$0xff] }
  0x2b   : > { %s105_s24 = sshll.u32 %s250_s23, 4  ;;  %97 = vst [vmem:[#allocation5] sm:$0xff] %v96_v0  ;;  %s106_s24 = int_to_ptr.vmem [resolvable:$true] %s105_s24 }
  0x2c   : > { %s207_s26 = scalar_lea.vmem %s106_s24, 128  ;;  %p214_p9 = scmp.lt.s32.totalorder %s106_s24, %s106_s24 }
  0x2d   : > { %p208_p3 = scmp.ne.s32.totalorder %s106_s24, %s207_s26  ;;  %p215_p10 = scmp.lt.s32.totalorder %s207_s26, %s207_s26 }
  0x2f   : > { %p209_p5 = pnand %p208_p3, %p311_p2  ;;  %p216_p11 = por %p215_p10, %p214_p9 }
  0x31   : > { %p210_p7 = pneg %p209_p5 }
  0x33   : > { %p217_p12 = pnand %p216_p11, %p210_p7 }
  0x35   : > { %220 = shalt.err (!%p217_p12)
}
  0x36   : > { %s221_s29 = scalar_lea.hbm %s341_s1, 128 }
  0x37   : > { %p222_p13 = scmp.ne.s32.totalorder %s341_s1, %s221_s29  ;;  %p227_p4 = scmp.lt.u32.totalorder %s221_s29, %s341_s1 }
  0x39   : > { %p223_p0 = pnand %p222_p13, %p311_p2 }
  0x3b   : > { %p224_p1 = pneg %p223_p0 }
  0x3d   : > { %p229_p6 = pnand %p227_p4, %p224_p1 }
  0x3f   : > { %232 = shalt.err (!%p229_p6)
}
  0x40   : > { %158 = dma.vmem_to_hbm [thread:$0]  (%p311_p2), %s106_s24, 128, %s341_s1, [#allocation4]  }
  0x41   : > { %242 = dma.done.wait (%p311_p2), [#allocation4], 128  }
  0x42   : > { %244 = vsyncadd (%p311_p2), [#allocation4], 4294967168 }
  0x43 PF: > { %s13_s6 = sadd.s32 1, %s247_s6  }
  0x44   : > { %p10_p8 = scmp.ge.s32.totalorder %s13_s6, 4  }
  0x46   :  { %12 = sbr.rel (!%p10_p8) target bundleno = 2 (0x2), region = 53 }
  0x4d   :  { %118 = vsyncpa [#allocation3], 1 }
  0x4e   :  { %120 = vsyncpa [#allocation3 + $0x1], 1 }
  0x4f   :  { %121 = vsyncpa [#allocation4], 1 }
  0x50   :  { %123 = vsyncpa [#allocation4 + $0x1], 1 }

// kernel: pyramid_model_forward.2
= control target key start
LH: loop header
LB: loop body
LE: loop exit
PB: predicated region body
PF: predicated region fallthrough
CT: control target
= control target key end

     0   :  { %s5997_s21 = smov 0   ;;  %s5999_s22 = smov 0   ;;  %s7822_s0 = inlined_call_operand.vmem [shape: bf16[2,16,32,8], index: 0, kind: input, shape index: {}]   ;;  %s7823_s1 = inlined_call_operand.vmem [shape: bf16[2,8,640], index: 1, kind: input, shape index: {}]   ;;  %s7824_s2 = inlined_call_operand.vmem [shape: f32[2,1,640], index: 2, kind: input, shape index: {}]   ;;  %s7825_s3 = inlined_call_operand.vmem [shape: bf16[2,128,640], index: 3, kind: input, shape index: {}]   ;;  %s7826_s4 = inlined_call_operand.vmem [shape: bf16[2,128,640], index: 4, kind: input, shape index: {}]   ;;  %s7827_s5 = inlined_call_operand.vmem [shape: bf16[2,128,128], index: 5, kind: input, shape index: {}]   ;;  %s7828_s6 = inlined_call_operand.vmem [shape: f32[2,16,32,128], index: 6, kind: output, shape index: {}]  }
   0x1   :  { %s6001_s23 = smov 0   ;;  %s6003_s24 = smov 0  }
   0x2   :  { %s6005_s25 = smov 0  }
   0x3 LB: > { %s25_s26 = sadd.s32 1, %s5947_s23  ;;  %s28_s27 = sadd.s32 1, %s5951_s24  ;;  %s5955_s25 = sphi %s6005_s25, %s16_s25   ;;  %s5951_s24 = sphi %s6003_s24, %s8225_s24   ;;  %s5947_s23 = sphi %s6001_s23, %s8224_s23   ;;  %s5943_s22 = sphi %s5999_s22, %s8223_s22   ;;  %s5939_s21 = sphi %s5997_s21, %s8222_s21  }
   0x4   : > { %p26_p0 = scmp.ge.s32.totalorder %s25_s26, 16  ;;  %p4719_p1 = scmp.ge.s32.totalorder %s5955_s25, 1 }
   0x5   : > { %p281_p2 = scmp.lt.s32.totalorder %s5955_s25, 33 }
   0x6   : > { %s8227_s26 = smov (%p26_p0, %s25_s26), 0  ;;  %s8229_s27 = smov (!%p26_p0, %s28_s27), %s5951_s24 }
   0x7   : > { %p282_p3 = pnand %p4719_p1, %p281_p2  ;;  %p30_p4 = scmp.ge.s32.totalorder %s8229_s27, 2 }
   0x9   : > { %s8231_s27 = smov (%p30_p4, %s8229_s27), 0  ;;  %285 = sbr.rel (%p282_p3) target bundleno = 5152 (0x1420), region = 44 }
  0x10   : > { %p343_p5 = scmp.lt.s32.totalorder %s5943_s22, 1  ;;  %p345_p6 = scmp.lt.s32.totalorder %s5939_s21, 15  ;;  %v7829_v0 = vmov 0   ;;  %vm546_vm0 = vcmask 1043456   ;;  %vm539_vm1 = vcmask 64512  }
  0x11   : > { %594 = vmatprep.mubr.bf16.mxu0 %v7829_v0  ;;  %647 = vmatprep.mubr.bf16.mxu1 %v7829_v0  ;;  %p4746_p7 = scmp.ne.s32.totalorder %s5939_s21, 0 }
  0x12   : > { %s8233_s22 = smov (!%p343_p5, %s5943_s22), 1  ;;  %vm5960_vm2 = vmmov (!%p4746_p7), 0  }
  0x13   : > { %s346_s28 = scalar_select %p345_p6, %s5939_s21, 15 }
  0x14   : > { %s5518_s29 = smul.u32 20, %s8233_s22  ;;  %s4721_s30 = sshll.u32 %s8233_s22, 6 }
  0x15   : > { %s5520_s7 = smul.u32 320, %s8233_s22  ;;  %s4720_s8 = sshll.u32 %s346_s28, 2 }
  0x16   : > { %s6041_s11 = scalar_lea.vmem %s7823_s1, %s5518_s29  ;;  %s6063_s15 = sadd.s32 %s4721_s30, %s4720_s8 }
  0x17   : > { %s6048_s14 = scalar_lea.vmem %s7825_s3, %s5520_s7  ;;  %v482_v1 = vld [vmem:[%s6041_s11] sm:$0xff]  ;;  %v6052_v2 = vld [vmem:[%s6041_s11 + $0x10] ss:$0 sps:$4 sm:$0xff]   ;;  %s6068_s18 = scalar_lea.vmem %s7827_s5, %s4721_s30 }
  0x18   : > { %v6055_v3 = vld [vmem:[%s6048_s14] sm:$0xff]  ;;  %v6058_v4 = vld [vmem:[%s6048_s14 + $0x8] sm:$0xff]  ;;  %v6061_v5 = vld [vmem:[%s6048_s14 + $0x10] sm:$0xf]  ;;  %v4734_v6 = vcombine.high %v482_v1, %v482_v1  ;;  %v4733_v7 = vcombine.low %v482_v1, %v482_v1  ;;  %s4730_s19 = sshll.u32 %s6063_s15, 3  ;;  %s6193_s9 = scalar_lea.vmem %s7826_s4, %s5520_s7 }
  0x19   : > { %7956 = vst [vmem:[#allocation4_spill] sm:$0xff] %v6055_v3  ;;  %7957 = vst [vmem:[#allocation5_spill] sm:$0xff] %v6058_v4  ;;  %v6071_v8 = vld [vmem:[%s6048_s14 + $0x14] sm:$0xff]  ;;  %v6074_v9 = vld [vmem:[%s6048_s14 + $0x1c] sm:$0xff]  ;;  %s6094_s29 = scalar_lea.vmem %s7828_s6, %s4730_s19  ;;  %s4722_s7 = sshll.u32 %s6063_s15, 2 }
  0x1a   : > { %7958 = vst [vmem:[#allocation6_spill] sm:$0xff] %v6061_v5  ;;  %7959 = vst [vmem:[#allocation7_spill] sm:$0xff] %v6071_v8  ;;  %v6077_v10 = vld [vmem:[%s6048_s14 + $0x24] sm:$0xf]  ;;  %v6081_v11 = vld [vmem:[%s6048_s14 + $0x28] sm:$0xff]  ;;  %4738 = vmatprep.subr.msk.bf16.mxu0 %vm546_vm0, %v4734_v6  ;;  %v548_v14 = vsel %vm546_vm0, %v4733_v7, 0  ;;  %s351_s13 = scalar_lea.vmem %s7822_s0, %s4722_s7 }
  0x1b   : > { %7960 = vst [vmem:[#allocation8_spill] sm:$0xff] %v6074_v9  ;;  %7961 = vst [vmem:[#allocation9_spill] sm:$0xff] %v6077_v10  ;;  %v6084_v12 = vld [vmem:[%s6048_s14 + $0x30] sm:$0xff]  ;;  %v6087_v13 = vld [vmem:[%s6048_s14 + $0x38] sm:$0xf]  ;;  %563 = vmatpush1.bf16.msra.mxu0 %v548_v14 }
  0x1c   : > { %7962 = vst [vmem:[#allocation10_spill] sm:$0xff] %v6081_v11  ;;  %7963 = vst [vmem:[#allocation11_spill] sm:$0xff] %v6084_v12  ;;  %v6097_v15 = vld [vmem:[%s6048_s14 + $0x3c] sm:$0xff]  ;;  %v6100_v16 = vld [vmem:[%s6048_s14 + $0x44] sm:$0xff]  ;;  %5517 = vmatprep.subr.msk.bf16.mxu0 %vm546_vm0, %v6052_v2 }
  0x1d   : > { %7964 = vst [vmem:[#allocation12_spill] sm:$0xff] %v6087_v13  ;;  %7965 = vst [vmem:[#allocation13_spill] sm:$0xff] %v6097_v15  ;;  %v6103_v17 = vld [vmem:[%s6048_s14 + $0x4c] sm:$0xf]  ;;  %v6106_v18 = vld [vmem:[%s6048_s14 + $0x50] sm:$0xff] }
  0x1e   : > { %7966 = vst [vmem:[#allocation14_spill] sm:$0xff] %v6100_v16  ;;  %7967 = vst [vmem:[#allocation15_spill] sm:$0xff] %v6103_v17  ;;  %v6109_v19 = vld [vmem:[%s6048_s14 + $0x58] sm:$0xff]  ;;  %v6112_v20 = vld [vmem:[%s6048_s14 + $0x60] sm:$0xf] }
  0x1f   : > { %7968 = vst [vmem:[#allocation16_spill] sm:$0xff] %v6106_v18  ;;  %7969 = vst [vmem:[#allocation17_spill] sm:$0xff] %v6109_v19  ;;  %v6117_v21 = vld [vmem:[%s6048_s14 + $0x64] sm:$0xff]  ;;  %v6120_v22 = vld [vmem:[%s6048_s14 + $0x6c] sm:$0xff] }
  0x20   : > { %7970 = vst [vmem:[#allocation18_spill] sm:$0xff] %v6112_v20  ;;  %7971 = vst [vmem:[#allocation19_spill] sm:$0xff] %v6117_v21  ;;  %v6123_v23 = vld [vmem:[%s6048_s14 + $0x74] sm:$0xf]  ;;  %v6126_v24 = vld [vmem:[%s6048_s14 + $0x78] sm:$0xff] }
  0x21   : > { %7972 = vst [vmem:[#allocation20_spill] sm:$0xff] %v6120_v22  ;;  %7973 = vst [vmem:[#allocation21_spill] sm:$0xff] %v6123_v23  ;;  %v6129_v25 = vld [vmem:[%s6048_s14 + $0x80] sm:$0xff]  ;;  %v6132_v26 = vld [vmem:[%s6048_s14 + $0x88] sm:$0xf] }
  0x22   : > { %7974 = vst [vmem:[#allocation22_spill] sm:$0xff] %v6126_v24  ;;  %7975 = vst [vmem:[#allocation23_spill] sm:$0xff] %v6129_v25  ;;  %v6135_v27 = vld [vmem:[%s6048_s14 + $0x8c] sm:$0xff]  ;;  %v6138_v28 = vld [vmem:[%s6048_s14 + $0x94] sm:$0xff] }
  0x23   : > { %7976 = vst [vmem:[#allocation24_spill] sm:$0xff] %v6132_v26  ;;  %7977 = vst [vmem:[#allocation25_spill] sm:$0xff] %v6135_v27  ;;  %v6141_v29 = vld [vmem:[%s6048_s14 + $0x9c] sm:$0xf]  ;;  %v6144_v30 = vld [vmem:[%s6048_s14 + $0xa0] sm:$0xff] }
  0x24   : > { %7978 = vst [vmem:[#allocation26_spill] sm:$0xff] %v6138_v28  ;;  %7979 = vst [vmem:[#allocation27_spill] sm:$0xff] %v6141_v29  ;;  %v6147_v31 = vld [vmem:[%s6048_s14 + $0xa8] sm:$0xff]  ;;  %v6150_v32 = vld [vmem:[%s6048_s14 + $0xb0] sm:$0xf] }
  0x25   : > { %7980 = vst [vmem:[#allocation28_spill] sm:$0xff] %v6144_v30  ;;  %7981 = vst [vmem:[#allocation29_spill] sm:$0xff] %v6147_v31  ;;  %v6153_v33 = vld [vmem:[%s6048_s14 + $0xb4] sm:$0xff]  ;;  %v6156_v34 = vld [vmem:[%s6048_s14 + $0xbc] sm:$0xff] }
  0x26   : > { %7982 = vst [vmem:[#allocation30_spill] sm:$0xff] %v6150_v32  ;;  %7983 = vst [vmem:[#allocation31_spill] sm:$0xff] %v6153_v33  ;;  %v6159_v35 = vld [vmem:[%s6048_s14 + $0xc4] sm:$0xf]  ;;  %v6162_v36 = vld [vmem:[%s6048_s14 + $0xc8] sm:$0xff] }
  0x27   : > { %7984 = vst [vmem:[#allocation32_spill] sm:$0xff] %v6156_v34  ;;  %7985 = vst [vmem:[#allocation33_spill] sm:$0xff] %v6159_v35  ;;  %v6165_v37 = vld [vmem:[%s6048_s14 + $0xd0] sm:$0xff]  ;;  %v6168_v38 = vld [vmem:[%s6048_s14 + $0xd8] sm:$0xf] }
  0x28   : > { %7986 = vst [vmem:[#allocation34_spill] sm:$0xff] %v6162_v36  ;;  %7987 = vst [vmem:[#allocation35_spill] sm:$0xff] %v6165_v37  ;;  %v6171_v39 = vld [vmem:[%s6048_s14 + $0xdc] sm:$0xff]  ;;  %v6174_v40 = vld [vmem:[%s6048_s14 + $0xe4] sm:$0xff] }
  0x29   : > { %7988 = vst [vmem:[#allocation36_spill] sm:$0xff] %v6168_v38  ;;  %7989 = vst [vmem:[#allocation37_spill] sm:$0xff] %v6171_v39  ;;  %v6177_v41 = vld [vmem:[%s6048_s14 + $0xec] sm:$0xf]  ;;  %v6180_v42 = vld [vmem:[%s6048_s14 + $0xf0] sm:$0xff] }
  0x2a   : > { %7990 = vst [vmem:[#allocation38_spill] sm:$0xff] %v6174_v40  ;;  %7991 = vst [vmem:[#allocation39_spill] sm:$0xff] %v6177_v41  ;;  %v6183_v43 = vld [vmem:[%s6048_s14 + $0xf8] sm:$0xff]  ;;  %v6186_v44 = vld [vmem:[%s6048_s14 + $0x100] sm:$0xf] }
  0x2b   : > { %7992 = vst [vmem:[#allocation40_spill] sm:$0xff] %v6180_v42  ;;  %7993 = vst [vmem:[#allocation41_spill] sm:$0xff] %v6183_v43  ;;  %v6196_v45 = vld [vmem:[%s6048_s14 + $0x104] sm:$0xff]  ;;  %v6199_v46 = vld [vmem:[%s6048_s14 + $0x10c] sm:$0xff] }
  0x2c   : > { %7994 = vst [vmem:[#allocation42_spill] sm:$0xff] %v6186_v44  ;;  %7995 = vst [vmem:[#allocation43_spill] sm:$0xff] %v6196_v45  ;;  %v6202_v47 = vld [vmem:[%s6048_s14 + $0x114] sm:$0xf]  ;;  %v6205_v48 = vld [vmem:[%s6048_s14 + $0x118] sm:$0xff] }
  0x2d   : > { %7996 = vst [vmem:[#allocation44_spill] sm:$0xff] %v6199_v46  ;;  %7997 = vst [vmem:[#allocation45_spill] sm:$0xff] %v6202_v47  ;;  %v6208_v49 = vld [vmem:[%s6048_s14 + $0x120] sm:$0xff]  ;;  %v6211_v50 = vld [vmem:[%s6048_s14 + $0x128] sm:$0xf] }
  0x2e   : > { %7998 = vst [vmem:[#allocation46_spill] sm:$0xff] %v6205_v48  ;;  %7999 = vst [vmem:[#allocation47_spill] sm:$0xff] %v6208_v49  ;;  %v6214_v51 = vld [vmem:[%s6048_s14 + $0x12c] sm:$0xff]  ;;  %v6217_v52 = vld [vmem:[%s6048_s14 + $0x134] sm:$0xff] }
  0x2f   : > { %8000 = vst [vmem:[#allocation48_spill] sm:$0xff] %v6211_v50  ;;  %8001 = vst [vmem:[#allocation49_spill] sm:$0xff] %v6214_v51  ;;  %v6220_v53 = vld [vmem:[%s6048_s14 + $0x13c] sm:$0xf]  ;;  %v6223_v54 = vld [vmem:[%s6193_s9] sm:$0xff] }
  0x30   : > { %8002 = vst [vmem:[#allocation50_spill] sm:$0xff] %v6217_v52  ;;  %8003 = vst [vmem:[#allocation51_spill] sm:$0xff] %v6220_v53  ;;  %v6226_v55 = vld [vmem:[%s6193_s9 + $0x8] sm:$0xff]  ;;  %v6229_v56 = vld [vmem:[%s6193_s9 + $0x10] sm:$0xf] }
  0x31   : > { %8004 = vst [vmem:[#allocation52_spill] sm:$0xff] %v6223_v54  ;;  %8005 = vst [vmem:[#allocation53_spill] sm:$0xff] %v6226_v55  ;;  %v6232_v57 = vld [vmem:[%s6193_s9 + $0x14] sm:$0xff]  ;;  %v6235_v58 = vld [vmem:[%s6193_s9 + $0x1c] sm:$0xff] }
  0x32   : > { %8006 = vst [vmem:[#allocation54_spill] sm:$0xff] %v6229_v56  ;;  %8007 = vst [vmem:[#allocation55_spill] sm:$0xff] %v6232_v57  ;;  %v6238_v59 = vld [vmem:[%s6193_s9 + $0x24] sm:$0xf]  ;;  %v6241_v60 = vld [vmem:[%s6193_s9 + $0x28] sm:$0xff] }
  0x33   : > { %8008 = vst [vmem:[#allocation56_spill] sm:$0xff] %v6235_v58  ;;  %8009 = vst [vmem:[#allocation57_spill] sm:$0xff] %v6238_v59  ;;  %v6244_v61 = vld [vmem:[%s6193_s9 + $0x30] sm:$0xff]  ;;  %v6247_v62 = vld [vmem:[%s6193_s9 + $0x38] sm:$0xf] }
  0x34   : > { %8010 = vst [vmem:[#allocation58_spill] sm:$0xff] %v6241_v60  ;;  %8011 = vst [vmem:[#allocation59_spill] sm:$0xff] %v6244_v61  ;;  %v6250_v63 = vld [vmem:[%s6193_s9 + $0x3c] sm:$0xff]  ;;  %v6253_v1 = vld [vmem:[%s6193_s9 + $0x44] sm:$0xff] }
  0x35   : > { %8012 = vst [vmem:[#allocation60_spill] sm:$0xff] %v6247_v62  ;;  %8013 = vst [vmem:[#allocation61_spill] sm:$0xff] %v6250_v63  ;;  %v6256_v6 = vld [vmem:[%s6193_s9 + $0x4c] sm:$0xf]  ;;  %v6259_v7 = vld [vmem:[%s6193_s9 + $0x50] sm:$0xff] }
  0x36   : > { %8014 = vst [vmem:[#allocation62_spill] sm:$0xff] %v6253_v1  ;;  %8015 = vst [vmem:[#allocation63_spill] sm:$0xff] %v6256_v6  ;;  %v6262_v14 = vld [vmem:[%s6193_s9 + $0x58] sm:$0xff]  ;;  %v6265_v0 = vld [vmem:[%s6193_s9 + $0x60] sm:$0xf] }
  0x37   : > { %8016 = vst [vmem:[#allocation64_spill] sm:$0xff] %v6259_v7  ;;  %8017 = vst [vmem:[#allocation65_spill] sm:$0xff] %v6262_v14  ;;  %v6268_v62 = vld [vmem:[%s6193_s9 + $0x64] sm:$0xff]  ;;  %v6271_v61 = vld [vmem:[%s6193_s9 + $0x6c] sm:$0xff] }
  0x38   : > { %8018 = vst [vmem:[#allocation66_spill] sm:$0xff] %v6265_v0  ;;  %8019 = vst [vmem:[#allocation67_spill] sm:$0xff] %v6268_v62  ;;  %v6274_v1 = vld [vmem:[%s6193_s9 + $0x74] sm:$0xf]  ;;  %v6277_v6 = vld [vmem:[%s6193_s9 + $0x78] sm:$0xff] }
  0x39   : > { %8020 = vst [vmem:[#allocation68_spill] sm:$0xff] %v6271_v61  ;;  %8021 = vst [vmem:[#allocation69_spill] sm:$0xff] %v6274_v1  ;;  %v6280_v56 = vld [vmem:[%s6193_s9 + $0x80] sm:$0xff]  ;;  %v6283_v14 = vld [vmem:[%s6193_s9 + $0x88] sm:$0xf] }
  0x3a   : > { %8022 = vst [vmem:[#allocation70_spill] sm:$0xff] %v6277_v6  ;;  %8023 = vst [vmem:[#allocation71_spill] sm:$0xff] %v6280_v56  ;;  %v6286_v0 = vld [vmem:[%s6193_s9 + $0x8c] sm:$0xff]  ;;  %v6289_v59 = vld [vmem:[%s6193_s9 + $0x94] sm:$0xff] }
  0x3b   : > { %8024 = vst [vmem:[#allocation72_spill] sm:$0xff] %v6283_v14  ;;  %8025 = vst [vmem:[#allocation73_spill] sm:$0xff] %v6286_v0  ;;  %v6292_v61 = vld [vmem:[%s6193_s9 + $0x9c] sm:$0xf]  ;;  %v6295_v1 = vld [vmem:[%s6193_s9 + $0xa0] sm:$0xff] }
  0x3c   : > { %8026 = vst [vmem:[#allocation74_spill] sm:$0xff] %v6289_v59  ;;  %8027 = vst [vmem:[#allocation75_spill] sm:$0xff] %v6292_v61  ;;  %v6298_v55 = vld [vmem:[%s6193_s9 + $0xa8] sm:$0xff]  ;;  %v6301_v56 = vld [vmem:[%s6193_s9 + $0xb0] sm:$0xf] }
  0x3d   : > { %8028 = vst [vmem:[#allocation76_spill] sm:$0xff] %v6295_v1  ;;  %8029 = vst [vmem:[#allocation77_spill] sm:$0xff] %v6298_v55  ;;  %v6304_v14 = vld [vmem:[%s6193_s9 + $0xb4] sm:$0xff]  ;;  %v6307_v58 = vld [vmem:[%s6193_s9 + $0xbc] sm:$0xff] }
  0x3e   : > { %8030 = vst [vmem:[#allocation78_spill] sm:$0xff] %v6301_v56  ;;  %8031 = vst [vmem:[#allocation79_spill] sm:$0xff] %v6304_v14  ;;  %v6310_v6 = vld [vmem:[%s6193_s9 + $0xc4] sm:$0xf]  ;;  %v6313_v59 = vld [vmem:[%s6193_s9 + $0xc8] sm:$0xff] }
  0x3f   : > { %8032 = vst [vmem:[#allocation80_spill] sm:$0xff] %v6307_v58  ;;  %8033 = vst [vmem:[#allocation81_spill] sm:$0xff] %v6310_v6  ;;  %v6316_v61 = vld [vmem:[%s6193_s9 + $0xd0] sm:$0xff]  ;;  %v6319_v1 = vld [vmem:[%s6193_s9 + $0xd8] sm:$0xf] }
  0x40   : > { %8034 = vst [vmem:[#allocation82_spill] sm:$0xff] %v6313_v59  ;;  %8035 = vst [vmem:[#allocation83_spill] sm:$0xff] %v6316_v61  ;;  %v6323_v56 = vld [vmem:[%s6193_s9 + $0xdc] sm:$0xff]  ;;  %v6326_v55 = vld [vmem:[%s6193_s9 + $0xe4] sm:$0xff] }
  0x41   : > { %8036 = vst [vmem:[#allocation84_spill] sm:$0xff] %v6319_v1  ;;  %8037 = vst [vmem:[#allocation85_spill] sm:$0xff] %v6323_v56  ;;  %v6329_v58 = vld [vmem:[%s6193_s9 + $0xec] sm:$0xf]  ;;  %v6332_v14 = vld [vmem:[%s6193_s9 + $0xf0] sm:$0xff] }
  0x42   : > { %8038 = vst [vmem:[#allocation86_spill] sm:$0xff] %v6326_v55  ;;  %8039 = vst [vmem:[#allocation87_spill] sm:$0xff] %v6329_v58  ;;  %v6335_v6 = vld [vmem:[%s6193_s9 + $0xf8] sm:$0xff]  ;;  %v6338_v59 = vld [vmem:[%s6193_s9 + $0x100] sm:$0xf] }
  0x43   : > { %8040 = vst [vmem:[#allocation88_spill] sm:$0xff] %v6332_v14  ;;  %8041 = vst [vmem:[#allocation89_spill] sm:$0xff] %v6335_v6  ;;  %v6341_v61 = vld [vmem:[%s6193_s9 + $0x104] sm:$0xff]  ;;  %v6344_v0 = vld [vmem:[%s6193_s9 + $0x10c] sm:$0xff] }
  0x44   : > { %8042 = vst [vmem:[#allocation90_spill] sm:$0xff] %v6338_v59  ;;  %8043 = vst [vmem:[#allocation91_spill] sm:$0xff] %v6341_v61  ;;  %v6347_v1 = vld [vmem:[%s6193_s9 + $0x114] sm:$0xf]  ;;  %v6353_v55 = vld [vmem:[%s6193_s9 + $0x118] sm:$0xff] }
  0x45   : > { %8044 = vst [vmem:[#allocation92_spill] sm:$0xff] %v6344_v0  ;;  %8045 = vst [vmem:[#allocation93_spill] sm:$0xff] %v6347_v1  ;;  %v6356_v58 = vld [vmem:[%s6193_s9 + $0x120] sm:$0xff]  ;;  %v6359_v14 = vld [vmem:[%s6193_s9 + $0x128] sm:$0xf]  ;;  %v560_v1 = vsel %vm546_vm0, %v6052_v2, 0  ;;  %v491_v2 = vlaneseq }
  0x46   : > { %8046 = vst [vmem:[#allocation94_spill] sm:$0xff] %v6353_v55  ;;  %8047 = vst [vmem:[#allocation95_spill] sm:$0xff] %v6356_v58  ;;  %v6362_v56 = vld [vmem:[%s6193_s9 + $0x12c] sm:$0xff]  ;;  %v6365_v6 = vld [vmem:[%s6193_s9 + $0x134] sm:$0xff]  ;;  %v8052_v58 = vmov 0  }
  0x47   : > { %8048 = vst [vmem:[#allocation96_spill] sm:$0xff] %v6359_v14  ;;  %8049 = vst [vmem:[#allocation97_spill] sm:$0xff] %v6362_v56  ;;  %v6368_v59 = vld [vmem:[%s6193_s9 + $0x13c] sm:$0xf]  ;;  %v5569_v0 = vld [vmem:[%s351_s13] sm:$0xff]  }
  0x48   : > { %8050 = vst [vmem:[#allocation98_spill] sm:$0xff] %v6365_v6  ;;  %8051 = vst [vmem:[#allocation99_spill] sm:$0xff] %v6368_v59  ;;  %v483_v61 = vld [vmem:[%s6041_s11 + $0x8] sm:$0xff]  ;;  %4739 = vmatmul.mubr.msk.bf16.vlgmr.msra.gmra.mrb[0].mxu0 %vm539_vm1, %v5569_v0  ;;  %s5519_s11 = smul.u32 5, %s8233_s22 }
  0x49   : > { %v4736_v55 = vcombine.high %v483_v61, %v483_v61  ;;  %v4735_v7 = vcombine.low %v483_v61, %v483_v61  ;;  %5112 = vmatpush3.bf16.msra.mxu0 %v560_v1  ;;  %604 = vmatprep.mubr.bf16.mxu0 %v8052_v58  ;;  %v5572_v59 = vld [vmem:[%s351_s13 + $0x8] sm:$0xff]   ;;  %v6384_v61 = vshrl.u32 %v491_v2, 7 }
  0x4a   : > { %s360_s16 = scalar_lea.vmem %s7824_s2, %s5519_s11 }
  0x4b   : > { %4741 = vmatprep.subr.msk.bf16.mxu1 %vm546_vm0, %v4736_v55  ;;  %v554_v14 = vsel %vm546_vm0, %v4735_v7, 0  ;;  %8053 = vst [vmem:[#allocation100_spill] sm:$0xff] %v6384_v61  ;;  %v493_v55 = vsub.s32 0, %v6384_v61  ;;  %v489_v1 = vld [vmem:[%s360_s16] sm:$0x1f] }
  0x4c   : > { %616 = vmatpush1.bf16.msra.mxu1 %v554_v14 }
  0x4d   : > { %v494_v7 = vrot.slane %v489_v1, %v493_v55 }
  0x4f   : > { %4742 = vmatmul.mubr.msk.bf16.vlgmr.msra.gmra.mrb[0].mxu1 %vm539_vm1, %v5569_v0 }
  0x50   : > { %657 = vmatprep.mubr.bf16.mxu1 %v8052_v58  ;;  %4740 = vmatmul.mubr.msk.bf16.gmra.mrb[4].mxu0 %vm539_vm1, %v5572_v59  ;;  %v497_v58 = vsub.s32 1, %v6384_v61 }
  0x51   : > { %5113 = vmatprep.mubr.msk.bf16.mxu0 %vm539_vm1, %v5569_v0  ;;  %v501_v0 = vsub.s32 2, %v6384_v61 }
  0x52   : > { %v498_v14 = vrot.slane %v489_v1, %v497_v58 }
  0x53   : > { %v502_v57 = vrot.slane %v489_v1, %v501_v0 }
  0x57   : > { %4743 = vmatmul.mubr.msk.bf16.gmra.mrb[4].mxu1 %vm539_vm1, %v5572_v59 }
  0x58   : > { %5114 = vmatmul.mubr.msk.bf16.vlgmr.msra.gmra.mrb[8].mxu0 %vm539_vm1, %v5572_v59  ;;  %v505_v59 = vsub.s32 3, %v6384_v61 }
  0x5a   : > { %v506_v53 = vrot.slane %v489_v1, %v505_v59 }
 0x11b   : > { %v596_v6 = vpop.f32.mrb[0].mxu0 }
 0x11c   : > { %v6393_v56 = vadd.f32 %v596_v6, %v494_v7  ;;  %v598_v2 = vpop.f32.mrb[1].mxu0 }
 0x11d   : > { %v6395_v62 = vadd.f32 %v598_v2, %v498_v14  ;;  %v600_v60 = vpop.f32.mrb[2].mxu0 }
 0x11e   : > { %8054 = vst [vmem:[#allocation101_spill] sm:$0xff] %v6393_v56  ;;  %v6397_v63 = vadd.f32 %v600_v60, %v494_v7  ;;  %v602_v54 = vpop.f32.mrb[3].mxu0 }
 0x11f   : > { %8055 = vst [vmem:[#allocation102_spill] sm:$0xff] %v6395_v62  ;;  %v6399_v50 = vadd.f32 %v602_v54, %v498_v14 }
 0x120   : > { %8056 = vst [vmem:[#allocation103_spill] sm:$0xff] %v6397_v63  ;;  %v509_v63 = vsub.s32 4, %v6384_v61 }
 0x121   : > { %8057 = vst [vmem:[#allocation104_spill] sm:$0xff] %v6399_v50 }
 0x122   : > { %v649_v55 = vpop.f32.mrb[0].mxu1  ;;  %v510_v50 = vrot.slane %v489_v1, %v509_v63 }
 0x123   : > { %v6401_v58 = vadd.f32 %v649_v55, %v502_v57  ;;  %v651_v44 = vpop.f32.mrb[1].mxu1  ;;  %v606_v38 = vpop.f32.mrb[4].mxu0 }
 0x124   : > { %v6403_v47 = vadd.f32 %v651_v44, %v506_v53  ;;  %v653_v6 = vpop.f32.mrb[2].mxu1  ;;  %v6405_v41 = vadd.f32 %v606_v38, %v494_v7  ;;  %v608_v32 = vpop.f32.mrb[5].mxu0 }
 0x125   : > { %8058 = vst [vmem:[#allocation105_spill] sm:$0xff] %v6401_v58  ;;  %v6407_v2 = vadd.f32 %v653_v6, %v502_v57  ;;  %v655_v60 = vpop.f32.mrb[3].mxu1  ;;  %v6410_v0 = vadd.f32 %v608_v32, %v498_v14  ;;  %v610_v59 = vpop.f32.mrb[6].mxu0 }
 0x126   : > { %8059 = vst [vmem:[#allocation106_spill] sm:$0xff] %v6403_v47  ;;  %8060 = vst [vmem:[#allocation107_spill] sm:$0xff] %v6405_v41  ;;  %v6412_v54 = vadd.f32 %v655_v60, %v506_v53  ;;  %v6414_v55 = vadd.f32 %v610_v59, %v494_v7  ;;  %v612_v58 = vpop.f32.mrb[7].mxu0 }
 0x127   : > { %8061 = vst [vmem:[#allocation108_spill] sm:$0xff] %v6407_v2  ;;  %8062 = vst [vmem:[#allocation109_spill] sm:$0xff] %v6410_v0  ;;  %v6416_v44 = vadd.f32 %v612_v58, %v498_v14  ;;  %v6460_v58 = vcombine.high (!%p4746_p7), %v6106_v18, %v6117_v21 }
 0x128   : > { %8063 = vst [vmem:[#allocation110_spill] sm:$0xff] %v6412_v54  ;;  %8064 = vst [vmem:[#allocation111_spill] sm:$0xff] %v6414_v55 }
 0x129   : > { %8065 = vst [vmem:[#allocation112_spill] sm:$0xff] %v6416_v44 }
 0x12a   : > { %v659_v35 = vpop.f32.mrb[4].mxu1 }
 0x12b   : > { %v6418_v38 = vadd.f32 %v659_v35, %v502_v57  ;;  %v661_v6 = vpop.f32.mrb[5].mxu1  ;;  %v5115_v26 = vpop.f32.mrb[8].mxu0  ;;  %720 = sbr.rel (%p4746_p7) target bundleno = 4535 (0x11b7), region = 48 }
 0x12c   : > { %v6420_v2 = vadd.f32 %v661_v6, %v506_v53  ;;  %v663_v41 = vpop.f32.mrb[6].mxu1  ;;  %v6424_v32 = vadd.f32 %v5115_v26, %v510_v50  ;;  %v702_v0 = vpop.f32.mrb[9].mxu0  ;;  %v6441_v26 = vcombine.low (!%p4746_p7), %v6055_v3, %v6071_v8  ;;  %v6468_v6 = vcombine.high (!%p4746_p7), %v6084_v12, %v6100_v16 }
 0x12d   : > { %8066 = vst [vmem:[#allocation113_spill] sm:$0xff] %v6418_v38  ;;  %v6422_v61 = vadd.f32 %v663_v41, %v502_v57  ;;  %v665_v60 = vpop.f32.mrb[7].mxu1  ;;  %v6428_v59 = vadd.f32 %v702_v0, %v510_v50  ;;  %v5116_v14 = vpop.f32.mrb[10].mxu0  ;;  %v6437_v41 = vcombine.high (!%p4746_p7), %v6055_v3, %v6071_v8  ;;  %v6455_v57 = vcombine.high (!%p4746_p7), %v6058_v4, %v6074_v9 }
 0x12e   : > { %8067 = vst [vmem:[#allocation114_spill] sm:$0xff] %v6420_v2  ;;  %8069 = vst [vmem:[#allocation116_spill] sm:$0xff] %v6424_v32  ;;  %v6426_v7 = vadd.f32 %v665_v60, %v506_v53  ;;  %v6430_v63 = vadd.f32 %v5116_v14, %v510_v50  ;;  %v705_v35 = vpop.f32.mrb[11].mxu0  ;;  %v6445_v53 = vcombine.high (!%p4746_p7), %v6081_v11, %v6097_v15  ;;  %v7873_v60 = vmov (!%p4746_p7), 0  }
 0x12f   : > { %8068 = vst [vmem:[#allocation115_spill] sm:$0xff] %v6422_v61  ;;  %8071 = vst [vmem:[#allocation118_spill] sm:$0xff] %v6428_v59  ;;  %v6432_v1 = vadd.f32 %v705_v35, %v510_v50  ;;  %956 = vmatprep.subr.bf16.mxu0 (!%p4746_p7), %v6437_v41  ;;  %v6451_v50 = vcombine.low (!%p4746_p7), %v6081_v11, %v6097_v15  ;;  %v6464_v0 = vcombine.low (!%p4746_p7), %v6058_v4, %v6074_v9 }
 0x130   : > { %8070 = vst [vmem:[#allocation117_spill] sm:$0xff] %v6426_v7  ;;  %8072 = vst [vmem:[#allocation119_spill] sm:$0xff] %v6430_v63  ;;  %957 = vmatpush1.bf16.msra.mxu0 (!%p4746_p7), %v6441_v26  ;;  %997 = vmatprep.subr.bf16.mxu1 (!%p4746_p7), %v6455_v57  ;;  %v4747_v14 = vmul.f32 (!%p4746_p7), -1.442695, %v6393_v56  ;;  %v4748_v35 = vmul.f32 (!%p4746_p7), -1.442695, %v6395_v62  ;;  %v6477_v61 = vcombine.low (!%p4746_p7), %v6084_v12, %v6100_v16 }
 0x131   : > { %8073 = vst [vmem:[#allocation120_spill] sm:$0xff] %v6432_v1  ;;  %958 = vmatprep.subr.bf16.mxu0 (!%p4746_p7), %v6445_v53  ;;  %988 = vmatprep.mubr.bf16.mxu0 (!%p4746_p7), %v7873_v60  ;;  %v6483_v38 = vcombine.low (!%p4746_p7), %v6106_v18, %v6117_v21  ;;  %v6488_v4 = vcombine.high (!%p4746_p7), %v6109_v19, %v6120_v22 }
 0x132   : > { %998 = vmatpush1.bf16.msra.mxu1 %v6464_v0  ;;  %1029 = vmatprep.mubr.bf16.mxu1 %v7873_v60  ;;  %5573 = vpow2.f32 %v4747_v14  ;;  %v6493_v12 = vcombine.high %v6126_v24, %v6135_v27  ;;  %v6498_v60 = vcombine.low %v6109_v19, %v6120_v22  ;;  %v6503_v14 = vcombine.low %v6126_v24, %v6135_v27 }
 0x133   : > { %999 = vmatprep.subr.bf16.mxu1 %v6468_v6  ;;  %5575 = vpow2.f32 %v4748_v35  ;;  %v6508_v16 = vcombine.high %v6129_v25, %v6138_v28  ;;  %v6513_v35 = vcombine.high %v6144_v30, %v6153_v33  ;;  %v4749_v19 = vmul.f32 -1.442695, %v6403_v47 }
 0x134   : > { %959 = vmatpush1.bf16.msra.mxu0 %v6451_v50  ;;  %v6519_v22 = vcombine.low %v6129_v25, %v6138_v28  ;;  %v6524_v9 = vcombine.low %v6144_v30, %v6153_v33  ;;  %v6529_v24 = vcombine.high %v6147_v31, %v6156_v34  ;;  %v6534_v27 = vcombine.high %v6162_v36, %v6171_v39 }
 0x135   : > { %960 = vmatprep.subr.bf16.mxu0 %v6460_v58  ;;  %5577 = vpow2.f32 %v4749_v19  ;;  %v6540_v30 = vcombine.low %v6147_v31, %v6156_v34  ;;  %v6545_v33 = vcombine.low %v6162_v36, %v6171_v39  ;;  %v6550_v19 = vcombine.high %v6165_v37, %v6174_v40 }
 0x136   : > { %1000 = vmatpush1.bf16.msra.mxu1 %v6477_v61  ;;  %5579 = vtanh.f32 %v6428_v59  ;;  %v6560_v31 = vcombine.low %v6165_v37, %v6174_v40  ;;  %v6570_v34 = vcombine.high %v6183_v43, %v6199_v46  ;;  %v6585_v40 = vcombine.low %v6205_v48, %v6214_v51 }
 0x137   : > { %1001 = vmatprep.subr.bf16.mxu1 %v6488_v4 }
 0x138   : > { %961 = vmatpush1.bf16.msra.mxu0 %v6483_v38 }
 0x139   : > { %962 = vmatprep.subr.bf16.mxu0 %v6493_v12 }
 0x13a   : > { %1002 = vmatpush1.bf16.msra.mxu1 %v6498_v60 }
 0x13b   : > { %1003 = vmatprep.subr.bf16.mxu1 %v6508_v16 }
 0x13c   : > { %963 = vmatpush1.bf16.msra.mxu0 %v6503_v14  ;;  %v5574_v25 = vpop.eup %5573 }
 0x13d   : > { %964 = vmatprep.subr.bf16.mxu0 %v6513_v35  ;;  %v5576_v28 = vpop.eup %5575  ;;  %v724_v18 = vadd.f32 1.0, %v5574_v25  ;;  %v6555_v25 = vcombine.high %v6180_v42, %v6196_v45 }
 0x13e   : > { %1004 = vmatpush1.bf16.msra.mxu1 %v6519_v22  ;;  %v730_v21 = vadd.f32 1.0, %v5576_v28  ;;  %v6565_v28 = vcombine.low %v6180_v42, %v6196_v45  ;;  %v6590_v42 = vcombine.high %v6208_v49, %v6217_v52 }
 0x13f   : > { %1005 = vmatprep.subr.bf16.mxu1 %v6529_v24  ;;  %5581 = vrcp.f32 %v724_v18  ;;  %v6575_v18 = vcombine.high %v6205_v48, %v6214_v51  ;;  %v5578_v37 = vpop.eup %5577  ;;  %v7936_v51 = vmov 0.0  }
 0x140   : > { %965 = vmatpush1.bf16.msra.mxu0 %v6524_v9  ;;  %5583 = vrcp.f32 %v730_v21  ;;  %v6580_v21 = vcombine.low %v6183_v43, %v6199_v46  ;;  %v5580_v45 = vpop.eup %5579  ;;  %v736_v39 = vadd.f32 1.0, %v5578_v37  ;;  %v6596_v43 = vcombine.low %v6208_v49, %v6217_v52  ;;  %v8077_v52 = vld [vmem:[#allocation30_spill] sm:$0xff] }
 0x141   : > { %966 = vmatprep.subr.bf16.mxu0 %v6534_v27 }
 0x142   : > { %1006 = vmatpush1.bf16.msra.mxu1 %v6540_v30  ;;  %5585 = vrcp.f32 %v736_v39  ;;  %v8074_v39 = vmov 0  }
 0x143   : > { %1007 = vmatprep.subr.bf16.mxu1 %v6550_v19 }
 0x144   : > { %967 = vmatpush1.bf16.msra.mxu0 %v6545_v33 }
 0x145   : > { %968 = vmatprep.subr.bf16.mxu0 %v6555_v25 }
 0x146   : > { %1008 = vmatpush1.bf16.msra.mxu1 %v6560_v31 }
 0x147   : > { %1009 = vmatprep.subr.bf16.mxu1 %v6570_v34 }
 0x148   : > { %969 = vmatpush1.bf16.msra.mxu0 %v6565_v28 }
 0x149   : > { %970 = vmatprep.subr.bf16.mxu0 %v6575_v18  ;;  %v5582_v36 = vpop.eup %5581 }
 0x14a   : > { %1010 = vmatpush1.bf16.msra.mxu1 %v6580_v21  ;;  %v5584_v46 = vpop.eup %5583  ;;  %v741_v48 = vmul.f32 %v5582_v36, %v5580_v45  ;;  %v6609_v45 = vcombine.low %v6061_v5, %v6077_v10 }
 0x14b   : > { %1011 = vmatprep.subr.bf16.mxu1 %v6590_v42  ;;  %v740_v11 = vmul.f32 0.0, %v5584_v46 }
 0x14c   : > { %971 = vmatpush1.bf16.msra.mxu0 %v6585_v40  ;;  %v5586_v37 = vpop.eup %5585 }
 0x14d   : > { %5117 = vmatprep.subr.bf16.mxu0 %v7936_v51  ;;  %v6601_v15 = vadd.f32 %v741_v48, %v740_v11  ;;  %v6614_v11 = vcombine.low %v6087_v13, %v6103_v17  ;;  %v6625_v48 = vcombine.low %v6112_v20, %v6123_v23 }
 0x14e   : > { %1012 = vmatpush1.bf16.msra.mxu1 %v6596_v43 }
 0x14f   : > { %1126 = vmatprep.subr.bf16.mxu1 %v6437_v41  ;;  %5587 = vtanh.f32 %v6601_v15  ;;  %746 = vst [vmem:[#allocation3] sm:$0x3] %v6601_v15 }
 0x159   : > { %v5588_v49 = vpop.eup %5587 }
 0x15a   : > { %v744_v36 = vmul.f32 %v5588_v49, %v5586_v37  ;;  %v8075_v49 = vld [vmem:[#allocation24_spill] sm:$0xff] }
 0x15b   : > { %v6633_v37 = vcombine.low %v8075_v49, %v6141_v29  ;;  %v8078_v49 = vld [vmem:[#allocation39_spill] sm:$0xff]  ;;  %v8079_v29 = vld [vmem:[#allocation36_spill] sm:$0xff] }
 0x15c   : > { %745 = vst [vmem:[#allocation2] sm:$0x3] %v744_v36  ;;  %v747_v46 = vpack.c.bf16 %v744_v36, %v744_v36  ;;  %v8076_v36 = vld [vmem:[#allocation33_spill] sm:$0xff]  ;;  %v6649_v23 = vcombine.low %v8079_v29, %v8078_v49  ;;  %v8082_v29 = vld [vmem:[#allocation51_spill] sm:$0xff]  ;;  %v8083_v49 = vld [vmem:[#allocation48_spill] sm:$0xff] }
 0x15d   : > { %v6641_v20 = vcombine.low %v8077_v52, %v8076_v36  ;;  %v8080_v52 = vld [vmem:[#allocation45_spill] sm:$0xff]  ;;  %v8081_v36 = vld [vmem:[#allocation42_spill] sm:$0xff]  ;;  %v6665_v17 = vcombine.low %v8083_v49, %v8082_v29 }
 0x15e   : > { %989 = vmatmul.mubr.bf16.vlgmr.msra.gmra.mrb[0].mxu0 %v747_v46  ;;  %1030 = vmatmul.mubr.bf16.vlgmr.msra.gmra.mrb[0].mxu1 %v747_v46  ;;  %v6657_v13 = vcombine.low %v8081_v36, %v8080_v52 }
 0x15f   : > { %5118 = vmatpush3.bf16.msra.mxu0 %v6609_v45  ;;  %5133 = vmatprep.mubr.msk.bf16.mxu0 %vm5960_vm2, %v7936_v51 }
 0x160   : > { %5119 = vmatprep.subr.bf16.mxu0 %v7936_v51  ;;  %1127 = vmatpush1.bf16.msra.mxu1 %v6441_v26 }
 0x161   : > { %1128 = vmatprep.subr.bf16.mxu1 %v6445_v53  ;;  %1158 = vmatprep.mubr.bf16.mxu1 %v8074_v39 }
 0x163   : > { %5120 = vmatpush3.bf16.msra.mxu0 %v6614_v11 }
 0x164   : > { %5121 = vmatprep.subr.bf16.mxu0 %v7936_v51  ;;  %1129 = vmatpush1.bf16.msra.mxu1 %v6451_v50 }
 0x165   : > { %1130 = vmatprep.subr.bf16.mxu1 %v6460_v58 }
 0x167   : > { %5122 = vmatpush3.bf16.msra.mxu0 %v6625_v48 }
 0x168   : > { %5123 = vmatprep.subr.bf16.mxu0 %v7936_v51  ;;  %1131 = vmatpush1.bf16.msra.mxu1 %v6483_v38 }
 0x169   : > { %1132 = vmatprep.subr.bf16.mxu1 %v6493_v12 }
 0x16b   : > { %5124 = vmatpush3.bf16.msra.mxu0 %v6633_v37 }
 0x16c   : > { %5125 = vmatprep.subr.bf16.mxu0 %v7936_v51  ;;  %1133 = vmatpush1.bf16.msra.mxu1 %v6503_v14 }
 0x16d   : > { %1134 = vmatprep.subr.bf16.mxu1 %v6513_v35 }
 0x16f   : > { %5126 = vmatpush3.bf16.msra.mxu0 %v6641_v20 }
 0x170   : > { %5127 = vmatprep.subr.bf16.mxu0 %v7936_v51  ;;  %1135 = vmatpush1.bf16.msra.mxu1 %v6524_v9 }
 0x171   : > { %1136 = vmatprep.subr.bf16.mxu1 %v6534_v27 }
 0x173   : > { %5128 = vmatpush3.bf16.msra.mxu0 %v6649_v23 }
 0x174   : > { %5129 = vmatprep.subr.bf16.mxu0 %v7936_v51  ;;  %1137 = vmatpush1.bf16.msra.mxu1 %v6545_v33 }
 0x175   : > { %1138 = vmatprep.subr.bf16.mxu1 %v6555_v25 }
 0x177   : > { %5130 = vmatpush3.bf16.msra.mxu0 %v6657_v13 }
 0x178   : > { %5131 = vmatprep.subr.bf16.mxu0 %v7936_v51  ;;  %1139 = vmatpush1.bf16.msra.mxu1 %v6565_v28 }
 0x179   : > { %1140 = vmatprep.subr.bf16.mxu1 %v6575_v18 }
 0x17b   : > { %5132 = vmatpush3.bf16.msra.mxu0 %v6665_v17 }
 0x17c   : > { %1167 = vmatprep.subr.bf16.mxu0 %v6455_v57  ;;  %1141 = vmatpush1.bf16.msra.mxu1 %v6585_v40 }
 0x17d   : > { %5137 = vmatprep.subr.bf16.mxu1 %v7936_v51 }
 0x17e   : > { %5134 = vmatmul.mubr.bf16.vlgmr.msra.gmra.mrb[4].mxu0 %v747_v46 }
 0x17f   : > { %1168 = vmatpush1.bf16.msra.mxu0 %v6464_v0  ;;  %1199 = vmatprep.mubr.bf16.mxu0 %v8074_v39 }
 0x180   : > { %1169 = vmatprep.subr.bf16.mxu0 %v6468_v6 }
 0x183   : > { %1170 = vmatpush1.bf16.msra.mxu0 %v6477_v61 }
 0x184   : > { %1171 = vmatprep.subr.bf16.mxu0 %v6488_v4 }
 0x187   : > { %1172 = vmatpush1.bf16.msra.mxu0 %v6498_v60 }
 0x188   : > { %1173 = vmatprep.subr.bf16.mxu0 %v6508_v16 }
 0x18b   : > { %1174 = vmatpush1.bf16.msra.mxu0 %v6519_v22 }
 0x18c   : > { %1175 = vmatprep.subr.bf16.mxu0 %v6529_v24 }
 0x18f   : > { %1176 = vmatpush1.bf16.msra.mxu0 %v6540_v30 }
 0x190   : > { %1177 = vmatprep.subr.bf16.mxu0 %v6550_v19 }
 0x193   : > { %1178 = vmatpush1.bf16.msra.mxu0 %v6560_v31 }
 0x194   : > { %1179 = vmatprep.subr.bf16.mxu0 %v6570_v34 }
 0x197   : > { %1180 = vmatpush1.bf16.msra.mxu0 %v6580_v21 }
 0x198   : > { %1181 = vmatprep.subr.bf16.mxu0 %v6590_v42 }
 0x19b   : > { %1182 = vmatpush1.bf16.msra.mxu0 %v6596_v43 }
 0x19c   : > { %1296 = vmatprep.subr.bf16.mxu0 %v6437_v41 }
 0x231   : > { %v990_v46 = vpop.f32.mrb[0].mxu0  ;;  %v1031_v52 = vpop.f32.mrb[0].mxu1 }
 0x232   : > { %v992_v36 = vpop.f32.mrb[1].mxu0  ;;  %v1032_v29 = vpop.f32.mrb[1].mxu1  ;;  %v1081_v8 = vrot.slane %v990_v46, 6 }
 0x233   : > { %v994_v49 = vpop.f32.mrb[2].mxu0  ;;  %v1034_v51 = vpop.f32.mrb[2].mxu1  ;;  %v1082_v3 = vrot.slane %v992_v36, 6  ;;  %v1083_v32 = vrot.slane %v1032_v29, 6 }
 0x234   : > { %v995_v5 = vpop.f32.mrb[3].mxu0  ;;  %v1035_v10 = vpop.f32.mrb[3].mxu1  ;;  %v1089_v7 = vadd.f32 %v1081_v8, %v6393_v56 }
 0x235   : > { %v1090_v63 = vadd.f32 %v1082_v3, %v6395_v62  ;;  %v1091_v2 = vadd.f32 %v1083_v32, %v6403_v47 }
 0x236   : > { %v4790_v44 = vmul.f32 -1.442695, %v1089_v7 }
 0x237   : > { %v4791_v55 = vmul.f32 -1.442695, %v1090_v63  ;;  %v4792_v54 = vmul.f32 -1.442695, %v1091_v2 }
 0x239   : > { %5589 = vpow2.f32 %v4791_v55 }
 0x23a   : > { %5591 = vpow2.f32 %v4790_v44  ;;  %v1113_v44 = vrot.slane %v6601_v15, 6  ;;  %v8084_v15 = vmov 0.0  }
 0x23b   : > { %5593 = vpow2.f32 %v4792_v54 }
 0x243   : > { %v5590_v52 = vpop.eup %5589 }
 0x244   : > { %v5592_v1 = vpop.eup %5591  ;;  %v1102_v49 = vadd.f32 1.0, %v5590_v52 }
 0x245   : > { %v1096_v51 = vadd.f32 1.0, %v5592_v1  ;;  %v5594_v55 = vpop.eup %5593 }
 0x246   : > { %5595 = vrcp.f32 %v1102_v49  ;;  %v1108_v63 = vadd.f32 1.0, %v5594_v55 }
 0x247   : > { %5597 = vrcp.f32 %v1096_v51 }
 0x250   : > { %v5596_v32 = vpop.eup %5595 }
 0x251   : > { %v1071_v5 = vpop.f32.mrb[4].mxu0  ;;  %v5598_v7 = vpop.eup %5597  ;;  %v1115_v29 = vmul.f32 %v5596_v32, %v1113_v44 }
 0x252   : > { %v1084_v10 = vrot.slane %v1071_v5, 6  ;;  %v5135_v46 = vpop.f32.mrb[5].mxu0 }
 0x253   : > { %v1074_v36 = vpop.f32.mrb[6].mxu0 }
 0x254   : > { %v1092_v3 = vadd.f32 %v1084_v10, %v6428_v59  ;;  %v5136_v8 = vpop.f32.mrb[7].mxu0 }
 0x256   : > { %5599 = vtanh.f32 %v1092_v3 }
 0x257   : > { %5601 = vrcp.f32 %v1108_v63 }
 0x260   : > { %v5600_v2 = vpop.eup %5599 }
 0x261   : > { %v1116_v1 = vmul.f32 %v5600_v2, %v5598_v7  ;;  %v5602_v52 = vpop.eup %5601 }
 0x263   : > { %v6696_v54 = vadd.f32 %v1116_v1, %v1115_v29 }
 0x265   : > { %5603 = vtanh.f32 %v6696_v54  ;;  %1121 = vst [vmem:[#allocation3] sm:$0xc] %v6696_v54 }
 0x26f   : > { %v5604_v49 = vpop.eup %5603 }
 0x270   : > { %v1119_v51 = vmul.f32 %v5604_v49, %v5602_v52 }
 0x272   : > { %1120 = vst [vmem:[#allocation2] sm:$0xc] %v1119_v51  ;;  %v1122_v5 = vpack.c.bf16 %v1119_v51, %v1119_v51 }
 0x274   : > { %v1124_v10 = vrot.slane %v1122_v5, 1 }
 0x276   : > { %1159 = vmatmul.mubr.bf16.vlgmr.msra.gmra.mrb[4].mxu1 %v1124_v10  ;;  %1200 = vmatmul.mubr.bf16.vlgmr.msra.gmra.mrb[8].mxu0 %v1124_v10 }
 0x277   : > { %5138 = vmatpush3.bf16.msra.mxu1 %v6609_v45  ;;  %5153 = vmatprep.mubr.msk.bf16.mxu1 %vm5960_vm2, %v8084_v15 }
 0x278   : > { %5139 = vmatprep.subr.bf16.mxu1 %v8084_v15  ;;  %1297 = vmatpush1.bf16.msra.mxu0 %v6441_v26 }
 0x279   : > { %1298 = vmatprep.subr.bf16.mxu0 %v6445_v53  ;;  %1328 = vmatprep.mubr.bf16.mxu0 %v8074_v39 }
 0x27b   : > { %5140 = vmatpush3.bf16.msra.mxu1 %v6614_v11 }
 0x27c   : > { %5141 = vmatprep.subr.bf16.mxu1 %v8084_v15  ;;  %1299 = vmatpush1.bf16.msra.mxu0 %v6451_v50 }
 0x27d   : > { %1300 = vmatprep.subr.bf16.mxu0 %v6460_v58 }
 0x27f   : > { %5142 = vmatpush3.bf16.msra.mxu1 %v6625_v48 }
 0x280   : > { %5143 = vmatprep.subr.bf16.mxu1 %v8084_v15  ;;  %1301 = vmatpush1.bf16.msra.mxu0 %v6483_v38 }
 0x281   : > { %1302 = vmatprep.subr.bf16.mxu0 %v6493_v12 }
 0x283   : > { %5144 = vmatpush3.bf16.msra.mxu1 %v6633_v37 }
 0x284   : > { %5145 = vmatprep.subr.bf16.mxu1 %v8084_v15  ;;  %1303 = vmatpush1.bf16.msra.mxu0 %v6503_v14 }
 0x285   : > { %1304 = vmatprep.subr.bf16.mxu0 %v6513_v35 }
 0x287   : > { %5146 = vmatpush3.bf16.msra.mxu1 %v6641_v20 }
 0x288   : > { %5147 = vmatprep.subr.bf16.mxu1 %v8084_v15  ;;  %1305 = vmatpush1.bf16.msra.mxu0 %v6524_v9 }
 0x289   : > { %1306 = vmatprep.subr.bf16.mxu0 %v6534_v27 }
 0x28b   : > { %5148 = vmatpush3.bf16.msra.mxu1 %v6649_v23 }
 0x28c   : > { %5149 = vmatprep.subr.bf16.mxu1 %v8084_v15  ;;  %1307 = vmatpush1.bf16.msra.mxu0 %v6545_v33 }
 0x28d   : > { %1308 = vmatprep.subr.bf16.mxu0 %v6555_v25 }
 0x28f   : > { %5150 = vmatpush3.bf16.msra.mxu1 %v6657_v13 }
 0x290   : > { %5151 = vmatprep.subr.bf16.mxu1 %v8084_v15  ;;  %1309 = vmatpush1.bf16.msra.mxu0 %v6565_v28 }
 0x291   : > { %1310 = vmatprep.subr.bf16.mxu0 %v6575_v18 }
 0x293   : > { %5152 = vmatpush3.bf16.msra.mxu1 %v6665_v17 }
 0x294   : > { %1337 = vmatprep.subr.bf16.mxu1 %v6455_v57  ;;  %1311 = vmatpush1.bf16.msra.mxu0 %v6585_v40 }
 0x295   : > { %5157 = vmatprep.subr.bf16.mxu0 %v8084_v15 }
 0x296   : > { %5154 = vmatmul.mubr.bf16.vlgmr.msra.gmra.mrb[8].mxu1 %v1124_v10 }
 0x297   : > { %1338 = vmatpush1.bf16.msra.mxu1 %v6464_v0  ;;  %1369 = vmatprep.mubr.bf16.mxu1 %v8074_v39 }
 0x298   : > { %1339 = vmatprep.subr.bf16.mxu1 %v6468_v6 }
 0x29b   : > { %1340 = vmatpush1.bf16.msra.mxu1 %v6477_v61 }
 0x29c   : > { %1341 = vmatprep.subr.bf16.mxu1 %v6488_v4 }
 0x29f   : > { %1342 = vmatpush1.bf16.msra.mxu1 %v6498_v60 }
 0x2a0   : > { %1343 = vmatprep.subr.bf16.mxu1 %v6508_v16 }
 0x2a3   : > { %1344 = vmatpush1.bf16.msra.mxu1 %v6519_v22 }
 0x2a4   : > { %1345 = vmatprep.subr.bf16.mxu1 %v6529_v24 }
 0x2a7   : > { %1346 = vmatpush1.bf16.msra.mxu1 %v6540_v30 }
 0x2a8   : > { %1347 = vmatprep.subr.bf16.mxu1 %v6550_v19 }
 0x2ab   : > { %1348 = vmatpush1.bf16.msra.mxu1 %v6560_v31 }
 0x2ac   : > { %1349 = vmatprep.subr.bf16.mxu1 %v6570_v34 }
 0x2af   : > { %1350 = vmatpush1.bf16.msra.mxu1 %v6580_v21 }
 0x2b0   : > { %1351 = vmatprep.subr.bf16.mxu1 %v6590_v42 }
 0x2b3   : > { %1352 = vmatpush1.bf16.msra.mxu1 %v6596_v43 }
 0x2b4   : > { %1466 = vmatprep.subr.bf16.mxu1 %v6437_v41 }
 0x349   : > { %v1160_v46 = vpop.f32.mrb[4].mxu1  ;;  %v1201_v36 = vpop.f32.mrb[8].mxu0 }
 0x34a   : > { %v1162_v3 = vpop.f32.mrb[5].mxu1  ;;  %v1202_v8 = vpop.f32.mrb[9].mxu0  ;;  %v1251_v1 = vrot.slane %v1160_v46, 4 }
 0x34b   : > { %v1252_v55 = vrot.slane %v1162_v3, 4  ;;  %v1164_v44 = vpop.f32.mrb[6].mxu1  ;;  %v1204_v32 = vpop.f32.mrb[10].mxu0  ;;  %v1253_v10 = vrot.slane %v1202_v8, 4 }
 0x34c   : > { %v1165_v7 = vpop.f32.mrb[7].mxu1  ;;  %v1205_v63 = vpop.f32.mrb[11].mxu0  ;;  %v1259_v52 = vadd.f32 %v1251_v1, %v6393_v56  ;;  %v1283_v44 = vrot.slane %v6696_v54, 6 }
 0x34d   : > { %v1260_v2 = vadd.f32 %v1252_v55, %v6395_v62  ;;  %v1261_v36 = vadd.f32 %v1253_v10, %v6403_v47 }
 0x34e   : > { %v4793_v49 = vmul.f32 -1.442695, %v1259_v52 }
 0x34f   : > { %v4794_v29 = vmul.f32 -1.442695, %v1260_v2  ;;  %v4795_v32 = vmul.f32 -1.442695, %v1261_v36 }
 0x351   : > { %5605 = vpow2.f32 %v4794_v29 }
 0x352   : > { %5607 = vpow2.f32 %v4793_v49 }
 0x35b   : > { %v5606_v51 = vpop.eup %5605 }
 0x35c   : > { %v1272_v5 = vadd.f32 1.0, %v5606_v51  ;;  %v5608_v3 = vpop.eup %5607 }
 0x35d   : > { %v1266_v63 = vadd.f32 1.0, %v5608_v3 }
 0x35e   : > { %5609 = vrcp.f32 %v1272_v5 }
 0x35f   : > { %5611 = vpow2.f32 %v4795_v32 }
 0x360   : > { %5613 = vrcp.f32 %v1266_v63 }
 0x368   : > { %v5610_v7 = vpop.eup %5609 }
 0x369   : > { %v1285_v55 = vmul.f32 %v5610_v7, %v1283_v44  ;;  %v1241_v2 = vpop.f32.mrb[8].mxu1  ;;  %v5612_v8 = vpop.eup %5611 }
 0x36a   : > { %v1254_v46 = vrot.slane %v1241_v2, 4  ;;  %v5155_v29 = vpop.f32.mrb[9].mxu1  ;;  %v5614_v51 = vpop.eup %5613  ;;  %v1278_v10 = vadd.f32 1.0, %v5612_v8 }
 0x36b   : > { %v1244_v1 = vpop.f32.mrb[10].mxu1 }
 0x36c   : > { %v1262_v52 = vadd.f32 %v1254_v46, %v6428_v59  ;;  %v5156_v49 = vpop.f32.mrb[11].mxu1 }
 0x36e   : > { %5615 = vtanh.f32 %v1262_v52 }
 0x36f   : > { %5617 = vrcp.f32 %v1278_v10 }
 0x378   : > { %v5616_v5 = vpop.eup %5615 }
 0x379   : > { %v1286_v47 = vmul.f32 %v5616_v5, %v5614_v51  ;;  %v5618_v36 = vpop.eup %5617 }
 0x37b   : > { %v6757_v54 = vadd.f32 %v1286_v47, %v1285_v55 }
 0x37d   : > { %5619 = vtanh.f32 %v6757_v54  ;;  %1291 = vst [vmem:[#allocation3] sm:$0x30] %v6757_v54 }
 0x387   : > { %v5620_v3 = vpop.eup %5619 }
 0x388   : > { %v1289_v44 = vmul.f32 %v5620_v3, %v5618_v36 }
 0x38a   : > { %1290 = vst [vmem:[#allocation2] sm:$0x30] %v1289_v44  ;;  %v1292_v32 = vpack.c.bf16 %v1289_v44, %v1289_v44 }
 0x38c   : > { %v1294_v7 = vrot.slane %v1292_v32, 2 }
 0x38e   : > { %1329 = vmatmul.mubr.bf16.vlgmr.msra.gmra.mrb[12].mxu0 %v1294_v7  ;;  %1370 = vmatmul.mubr.bf16.vlgmr.msra.gmra.mrb[12].mxu1 %v1294_v7 }
 0x38f   : > { %5158 = vmatpush3.bf16.msra.mxu0 %v6609_v45  ;;  %5173 = vmatprep.mubr.msk.bf16.mxu0 %vm5960_vm2, %v8084_v15 }
 0x390   : > { %5159 = vmatprep.subr.bf16.mxu0 %v8084_v15  ;;  %1467 = vmatpush1.bf16.msra.mxu1 %v6441_v26 }
 0x391   : > { %1468 = vmatprep.subr.bf16.mxu1 %v6445_v53  ;;  %1498 = vmatprep.mubr.bf16.mxu1 %v8074_v39 }
 0x393   : > { %5160 = vmatpush3.bf16.msra.mxu0 %v6614_v11 }
 0x394   : > { %5161 = vmatprep.subr.bf16.mxu0 %v8084_v15  ;;  %1469 = vmatpush1.bf16.msra.mxu1 %v6451_v50 }
 0x395   : > { %1470 = vmatprep.subr.bf16.mxu1 %v6460_v58 }
 0x397   : > { %5162 = vmatpush3.bf16.msra.mxu0 %v6625_v48 }
 0x398   : > { %5163 = vmatprep.subr.bf16.mxu0 %v8084_v15  ;;  %1471 = vmatpush1.bf16.msra.mxu1 %v6483_v38 }
 0x399   : > { %1472 = vmatprep.subr.bf16.mxu1 %v6493_v12 }
 0x39b   : > { %5164 = vmatpush3.bf16.msra.mxu0 %v6633_v37 }
 0x39c   : > { %5165 = vmatprep.subr.bf16.mxu0 %v8084_v15  ;;  %1473 = vmatpush1.bf16.msra.mxu1 %v6503_v14 }
 0x39d   : > { %1474 = vmatprep.subr.bf16.mxu1 %v6513_v35 }
 0x39f   : > { %5166 = vmatpush3.bf16.msra.mxu0 %v6641_v20 }
 0x3a0   : > { %5167 = vmatprep.subr.bf16.mxu0 %v8084_v15  ;;  %1475 = vmatpush1.bf16.msra.mxu1 %v6524_v9 }
 0x3a1   : > { %1476 = vmatprep.subr.bf16.mxu1 %v6534_v27 }
 0x3a3   : > { %5168 = vmatpush3.bf16.msra.mxu0 %v6649_v23 }
 0x3a4   : > { %5169 = vmatprep.subr.bf16.mxu0 %v8084_v15  ;;  %1477 = vmatpush1.bf16.msra.mxu1 %v6545_v33 }
 0x3a5   : > { %1478 = vmatprep.subr.bf16.mxu1 %v6555_v25 }
 0x3a7   : > { %5170 = vmatpush3.bf16.msra.mxu0 %v6657_v13 }
 0x3a8   : > { %5171 = vmatprep.subr.bf16.mxu0 %v8084_v15  ;;  %1479 = vmatpush1.bf16.msra.mxu1 %v6565_v28 }
 0x3a9   : > { %1480 = vmatprep.subr.bf16.mxu1 %v6575_v18 }
 0x3ab   : > { %5172 = vmatpush3.bf16.msra.mxu0 %v6665_v17 }
 0x3ac   : > { %1507 = vmatprep.subr.bf16.mxu0 %v6455_v57  ;;  %1481 = vmatpush1.bf16.msra.mxu1 %v6585_v40 }
 0x3ad   : > { %5177 = vmatprep.subr.bf16.mxu1 %v8084_v15 }
 0x3ae   : > { %5174 = vmatmul.mubr.bf16.vlgmr.msra.gmra.mrb[16].mxu0 %v1294_v7  ;;  %v8085_v7 = vld [vmem:[#allocation106_spill] sm:$0xff] }
 0x3af   : > { %1508 = vmatpush1.bf16.msra.mxu0 %v6464_v0  ;;  %1539 = vmatprep.mubr.bf16.mxu0 %v8074_v39 }
 0x3b0   : > { %1509 = vmatprep.subr.bf16.mxu0 %v6468_v6 }
 0x3b3   : > { %1510 = vmatpush1.bf16.msra.mxu0 %v6477_v61 }
 0x3b4   : > { %1511 = vmatprep.subr.bf16.mxu0 %v6488_v4 }
 0x3b7   : > { %1512 = vmatpush1.bf16.msra.mxu0 %v6498_v60 }
 0x3b8   : > { %1513 = vmatprep.subr.bf16.mxu0 %v6508_v16 }
 0x3bb   : > { %1514 = vmatpush1.bf16.msra.mxu0 %v6519_v22 }
 0x3bc   : > { %1515 = vmatprep.subr.bf16.mxu0 %v6529_v24 }
 0x3bf   : > { %1516 = vmatpush1.bf16.msra.mxu0 %v6540_v30 }
 0x3c0   : > { %1517 = vmatprep.subr.bf16.mxu0 %v6550_v19 }
 0x3c3   : > { %1518 = vmatpush1.bf16.msra.mxu0 %v6560_v31 }
 0x3c4   : > { %1519 = vmatprep.subr.bf16.mxu0 %v6570_v34 }
 0x3c7   : > { %1520 = vmatpush1.bf16.msra.mxu0 %v6580_v21 }
 0x3c8   : > { %1521 = vmatprep.subr.bf16.mxu0 %v6590_v42 }
 0x3cb   : > { %1522 = vmatpush1.bf16.msra.mxu0 %v6596_v43 }
 0x3cc   : > { %1621 = vmatprep.subr.bf16.mxu0 %v6437_v41 }
 0x461   : > { %v1330_v47 = vpop.f32.mrb[12].mxu0  ;;  %v1371_v63 = vpop.f32.mrb[12].mxu1 }
 0x462   : > { %v1332_v55 = vpop.f32.mrb[13].mxu0  ;;  %v1372_v2 = vpop.f32.mrb[13].mxu1  ;;  %v1421_v5 = vrot.slane %v1330_v47, 2 }
 0x463   : > { %v1422_v46 = vrot.slane %v1332_v55, 2  ;;  %v1334_v29 = vpop.f32.mrb[14].mxu0  ;;  %v1374_v1 = vpop.f32.mrb[14].mxu1  ;;  %v1423_v32 = vrot.slane %v1372_v2, 2 }
 0x464   : > { %v1335_v52 = vpop.f32.mrb[15].mxu0  ;;  %v1375_v49 = vpop.f32.mrb[15].mxu1  ;;  %v1429_v10 = vadd.f32 %v1421_v5, %v6393_v56  ;;  %v1453_v29 = vrot.slane %v6757_v54, 6 }
 0x465   : > { %v1430_v8 = vadd.f32 %v1422_v46, %v6395_v62  ;;  %v1431_v63 = vadd.f32 %v1423_v32, %v8085_v7 }
 0x466   : > { %v4796_v36 = vmul.f32 -1.442695, %v1429_v10 }
 0x467   : > { %v4797_v51 = vmul.f32 -1.442695, %v1430_v8  ;;  %v4798_v1 = vmul.f32 -1.442695, %v1431_v63 }
 0x469   : > { %5621 = vpow2.f32 %v4797_v51 }
 0x46a   : > { %5623 = vpow2.f32 %v4796_v36 }
 0x473   : > { %v5622_v3 = vpop.eup %5621 }
 0x474   : > { %v1442_v44 = vadd.f32 1.0, %v5622_v3  ;;  %v5624_v55 = vpop.eup %5623 }
 0x475   : > { %v1436_v49 = vadd.f32 1.0, %v5624_v55 }
 0x476   : > { %5625 = vrcp.f32 %v1442_v44 }
 0x477   : > { %5627 = vpow2.f32 %v4798_v1 }
 0x478   : > { %5629 = vrcp.f32 %v1436_v49 }
 0x480   : > { %v5626_v52 = vpop.eup %5625 }
 0x481   : > { %v1455_v46 = vmul.f32 %v5626_v52, %v1453_v29  ;;  %v1411_v8 = vpop.f32.mrb[16].mxu0  ;;  %v5628_v2 = vpop.eup %5627 }
 0x482   : > { %v1424_v47 = vrot.slane %v1411_v8, 2  ;;  %v5175_v51 = vpop.f32.mrb[17].mxu0  ;;  %v5630_v3 = vpop.eup %5629  ;;  %v1448_v32 = vadd.f32 1.0, %v5628_v2 }
 0x483   : > { %v1414_v5 = vpop.f32.mrb[18].mxu0  ;;  %v8086_v51 = vld [vmem:[#allocation104_spill] sm:$0xff] }
 0x484   : > { %v1432_v10 = vadd.f32 %v1424_v47, %v6428_v59  ;;  %v5176_v36 = vpop.f32.mrb[19].mxu0 }
 0x486   : > { %5631 = vtanh.f32 %v1432_v10 }
 0x487   : > { %5633 = vrcp.f32 %v1448_v32  ;;  %v8087_v32 = vld [vmem:[#allocation103_spill] sm:$0xff] }
 0x490   : > { %v5632_v44 = vpop.eup %5631 }
 0x491   : > { %v1456_v7 = vmul.f32 %v5632_v44, %v5630_v3  ;;  %v5634_v63 = vpop.eup %5633 }
 0x493   : > { %v6818_v54 = vadd.f32 %v1456_v7, %v1455_v46 }
 0x495   : > { %5635 = vtanh.f32 %v6818_v54  ;;  %1461 = vst [vmem:[#allocation3] sm:$0xc0] %v6818_v54  ;;  %v1611_v59 = vrot.slane %v6818_v54, 6 }
 0x49f   : > { %v5636_v55 = vpop.eup %5635 }
 0x4a0   : > { %v1459_v29 = vmul.f32 %v5636_v55, %v5634_v63 }
 0x4a2   : > { %1460 = vst [vmem:[#allocation2] sm:$0xc0] %v1459_v29  ;;  %v1462_v1 = vpack.c.bf16 %v1459_v29, %v1459_v29 }
 0x4a4   : > { %v1464_v52 = vrot.slane %v1462_v1, 3  ;;  %v8088_v1 = vld [vmem:[#allocation110_spill] sm:$0xff] }
 0x4a6   : > { %1499 = vmatmul.mubr.bf16.vlgmr.msra.gmra.mrb[16].mxu1 %v1464_v52  ;;  %1540 = vmatmul.mubr.bf16.vlgmr.msra.gmra.mrb[20].mxu0 %v1464_v52 }
 0x4a7   : > { %5178 = vmatpush3.bf16.msra.mxu1 %v6609_v45  ;;  %5193 = vmatprep.mubr.msk.bf16.mxu1 %vm5960_vm2, %v8084_v15 }
 0x4a8   : > { %5179 = vmatprep.subr.bf16.mxu1 %v8084_v15  ;;  %1622 = vmatpush1.bf16.msra.mxu0 %v6441_v26 }
 0x4a9   : > { %1623 = vmatprep.subr.bf16.mxu0 %v6445_v53  ;;  %1653 = vmatprep.mubr.bf16.mxu0 %v8074_v39 }
 0x4ab   : > { %5180 = vmatpush3.bf16.msra.mxu1 %v6614_v11 }
 0x4ac   : > { %5181 = vmatprep.subr.bf16.mxu1 %v8084_v15  ;;  %1624 = vmatpush1.bf16.msra.mxu0 %v6451_v50 }
 0x4ad   : > { %1625 = vmatprep.subr.bf16.mxu0 %v6460_v58 }
 0x4af   : > { %5182 = vmatpush3.bf16.msra.mxu1 %v6625_v48 }
 0x4b0   : > { %5183 = vmatprep.subr.bf16.mxu1 %v8084_v15  ;;  %1626 = vmatpush1.bf16.msra.mxu0 %v6483_v38 }
 0x4b1   : > { %1627 = vmatprep.subr.bf16.mxu0 %v6493_v12 }
 0x4b3   : > { %5184 = vmatpush3.bf16.msra.mxu1 %v6633_v37 }
 0x4b4   : > { %5185 = vmatprep.subr.bf16.mxu1 %v8084_v15  ;;  %1628 = vmatpush1.bf16.msra.mxu0 %v6503_v14 }
 0x4b5   : > { %1629 = vmatprep.subr.bf16.mxu0 %v6513_v35 }
 0x4b7   : > { %5186 = vmatpush3.bf16.msra.mxu1 %v6641_v20 }
 0x4b8   : > { %5187 = vmatprep.subr.bf16.mxu1 %v8084_v15  ;;  %1630 = vmatpush1.bf16.msra.mxu0 %v6524_v9 }
 0x4b9   : > { %1631 = vmatprep.subr.bf16.mxu0 %v6534_v27 }
 0x4bb   : > { %5188 = vmatpush3.bf16.msra.mxu1 %v6649_v23 }
 0x4bc   : > { %5189 = vmatprep.subr.bf16.mxu1 %v8084_v15  ;;  %1632 = vmatpush1.bf16.msra.mxu0 %v6545_v33 }
 0x4bd   : > { %1633 = vmatprep.subr.bf16.mxu0 %v6555_v25 }
 0x4bf   : > { %5190 = vmatpush3.bf16.msra.mxu1 %v6657_v13 }
 0x4c0   : > { %5191 = vmatprep.subr.bf16.mxu1 %v8084_v15  ;;  %1634 = vmatpush1.bf16.msra.mxu0 %v6565_v28 }
 0x4c1   : > { %1635 = vmatprep.subr.bf16.mxu0 %v6575_v18 }
 0x4c3   : > { %5192 = vmatpush3.bf16.msra.mxu1 %v6665_v17 }
 0x4c4   : > { %1662 = vmatprep.subr.bf16.mxu1 %v6455_v57  ;;  %1636 = vmatpush1.bf16.msra.mxu0 %v6585_v40 }
 0x4c5   : > { %5197 = vmatprep.subr.bf16.mxu0 %v8084_v15 }
 0x4c6   : > { %5194 = vmatmul.mubr.bf16.vlgmr.msra.gmra.mrb[20].mxu1 %v1464_v52 }
 0x4c7   : > { %1663 = vmatpush1.bf16.msra.mxu1 %v6464_v0  ;;  %1694 = vmatprep.mubr.bf16.mxu1 %v8074_v39 }
 0x4c8   : > { %1664 = vmatprep.subr.bf16.mxu1 %v6468_v6 }
 0x4cb   : > { %1665 = vmatpush1.bf16.msra.mxu1 %v6477_v61 }
 0x4cc   : > { %1666 = vmatprep.subr.bf16.mxu1 %v6488_v4 }
 0x4cf   : > { %1667 = vmatpush1.bf16.msra.mxu1 %v6498_v60 }
 0x4d0   : > { %1668 = vmatprep.subr.bf16.mxu1 %v6508_v16 }
 0x4d3   : > { %1669 = vmatpush1.bf16.msra.mxu1 %v6519_v22 }
 0x4d4   : > { %1670 = vmatprep.subr.bf16.mxu1 %v6529_v24 }
 0x4d7   : > { %1671 = vmatpush1.bf16.msra.mxu1 %v6540_v30 }
 0x4d8   : > { %1672 = vmatprep.subr.bf16.mxu1 %v6550_v19 }
 0x4db   : > { %1673 = vmatpush1.bf16.msra.mxu1 %v6560_v31 }
 0x4dc   : > { %1674 = vmatprep.subr.bf16.mxu1 %v6570_v34 }
 0x4df   : > { %1675 = vmatpush1.bf16.msra.mxu1 %v6580_v21 }
 0x4e0   : > { %1676 = vmatprep.subr.bf16.mxu1 %v6590_v42 }
 0x4e3   : > { %1677 = vmatpush1.bf16.msra.mxu1 %v6596_v43 }
 0x4e4   : > { %1791 = vmatprep.subr.bf16.mxu1 %v6437_v41 }
 0x579   : > { %v1500_v49 = vpop.f32.mrb[16].mxu1  ;;  %v1541_v46 = vpop.f32.mrb[20].mxu0 }
 0x57a   : > { %v1502_v8 = vpop.f32.mrb[17].mxu1  ;;  %v1542_v47 = vpop.f32.mrb[21].mxu0  ;;  %v1587_v7 = vadd.f32 %v1500_v49, %v8087_v32 }
 0x57b   : > { %v1588_v5 = vadd.f32 %v1502_v8, %v8086_v51  ;;  %v1504_v10 = vpop.f32.mrb[18].mxu1  ;;  %v1544_v36 = vpop.f32.mrb[22].mxu0  ;;  %v1589_v52 = vadd.f32 %v1542_v47, %v8088_v1 }
 0x57c   : > { %v1505_v2 = vpop.f32.mrb[19].mxu1  ;;  %v1545_v3 = vpop.f32.mrb[23].mxu0  ;;  %v4799_v63 = vmul.f32 -1.442695, %v1587_v7 }
 0x57d   : > { %v4800_v44 = vmul.f32 -1.442695, %v1588_v5  ;;  %v4801_v62 = vmul.f32 -1.442695, %v1589_v52  ;;  %v8089_v5 = vld [vmem:[#allocation120_spill] sm:$0xff] }
 0x57f   : > { %5637 = vpow2.f32 %v4800_v44 }
 0x580   : > { %5639 = vpow2.f32 %v4799_v63 }
 0x589   : > { %v5638_v55 = vpop.eup %5637 }
 0x58a   : > { %v1600_v29 = vadd.f32 1.0, %v5638_v55  ;;  %v5640_v46 = vpop.eup %5639 }
 0x58b   : > { %v1594_v10 = vadd.f32 1.0, %v5640_v46 }
 0x58c   : > { %5641 = vrcp.f32 %v1600_v29 }
 0x58d   : > { %5643 = vpow2.f32 %v4801_v62 }
 0x58e   : > { %5645 = vrcp.f32 %v1594_v10 }
 0x596   : > { %v5642_v8 = vpop.eup %5641 }
 0x597   : > { %v1613_v36 = vmul.f32 %v5642_v8, %v1611_v59  ;;  %v5644_v63 = vpop.eup %5643 }
 0x598   : > { %v5646_v55 = vpop.eup %5645  ;;  %v1606_v47 = vadd.f32 1.0, %v5644_v63 }
 0x599   : > { %v1581_v2 = vpop.f32.mrb[20].mxu1 }
 0x59a   : > { %v1590_v3 = vadd.f32 %v1581_v2, %v8089_v5  ;;  %v5195_v44 = vpop.f32.mrb[21].mxu1 }
 0x59b   : > { %v1584_v49 = vpop.f32.mrb[22].mxu1 }
 0x59c   : > { %5647 = vtanh.f32 %v1590_v3  ;;  %v5196_v7 = vpop.f32.mrb[23].mxu1 }
 0x59d   : > { %5649 = vrcp.f32 %v1606_v47 }
 0x5a6   : > { %v5648_v29 = vpop.eup %5647 }
 0x5a7   : > { %v1614_v56 = vmul.f32 %v5648_v29, %v5646_v55  ;;  %v5650_v62 = vpop.eup %5649 }
 0x5a9   : > { %v6879_v1 = vadd.f32 %v1614_v56, %v1613_v36 }
 0x5ab   : > { %5651 = vtanh.f32 %v6879_v1  ;;  %1619 = vst [vmem:[#allocation3 + $0x8] sm:$0x3] %v6879_v1 }
 0x5b5   : > { %v5652_v59 = vpop.eup %5651 }
 0x5b6   : > { %v1617_v54 = vmul.f32 %v5652_v59, %v5650_v62 }
 0x5b8   : > { %1618 = vst [vmem:[#allocation2 + $0x8] sm:$0x3] %v1617_v54  ;;  %v1620_v52 = vpack.c.bf16 %v1617_v54, %v1617_v54 }
 0x5ba   : > { %1654 = vmatmul.mubr.bf16.vlgmr.msra.gmra.mrb[24].mxu0 %v1620_v52  ;;  %1695 = vmatmul.mubr.bf16.vlgmr.msra.gmra.mrb[24].mxu1 %v1620_v52 }
 0x5bb   : > { %5198 = vmatpush3.bf16.msra.mxu0 %v6609_v45  ;;  %5213 = vmatprep.mubr.msk.bf16.mxu0 %vm5960_vm2, %v8084_v15 }
 0x5bc   : > { %5199 = vmatprep.subr.bf16.mxu0 %v8084_v15  ;;  %1792 = vmatpush1.bf16.msra.mxu1 %v6441_v26 }
 0x5bd   : > { %1793 = vmatprep.subr.bf16.mxu1 %v6445_v53  ;;  %1823 = vmatprep.mubr.bf16.mxu1 %v8074_v39 }
 0x5bf   : > { %5200 = vmatpush3.bf16.msra.mxu0 %v6614_v11 }
 0x5c0   : > { %5201 = vmatprep.subr.bf16.mxu0 %v8084_v15  ;;  %1794 = vmatpush1.bf16.msra.mxu1 %v6451_v50 }
 0x5c1   : > { %1795 = vmatprep.subr.bf16.mxu1 %v6460_v58 }
 0x5c3   : > { %5202 = vmatpush3.bf16.msra.mxu0 %v6625_v48 }
 0x5c4   : > { %5203 = vmatprep.subr.bf16.mxu0 %v8084_v15  ;;  %1796 = vmatpush1.bf16.msra.mxu1 %v6483_v38 }
 0x5c5   : > { %1797 = vmatprep.subr.bf16.mxu1 %v6493_v12 }
 0x5c7   : > { %5204 = vmatpush3.bf16.msra.mxu0 %v6633_v37 }
 0x5c8   : > { %5205 = vmatprep.subr.bf16.mxu0 %v8084_v15  ;;  %1798 = vmatpush1.bf16.msra.mxu1 %v6503_v14 }
 0x5c9   : > { %1799 = vmatprep.subr.bf16.mxu1 %v6513_v35 }
 0x5cb   : > { %5206 = vmatpush3.bf16.msra.mxu0 %v6641_v20 }
 0x5cc   : > { %5207 = vmatprep.subr.bf16.mxu0 %v8084_v15  ;;  %1800 = vmatpush1.bf16.msra.mxu1 %v6524_v9 }
 0x5cd   : > { %1801 = vmatprep.subr.bf16.mxu1 %v6534_v27 }
 0x5cf   : > { %5208 = vmatpush3.bf16.msra.mxu0 %v6649_v23 }
 0x5d0   : > { %5209 = vmatprep.subr.bf16.mxu0 %v8084_v15  ;;  %1802 = vmatpush1.bf16.msra.mxu1 %v6545_v33 }
 0x5d1   : > { %1803 = vmatprep.subr.bf16.mxu1 %v6555_v25 }
 0x5d3   : > { %5210 = vmatpush3.bf16.msra.mxu0 %v6657_v13 }
 0x5d4   : > { %5211 = vmatprep.subr.bf16.mxu0 %v8084_v15  ;;  %1804 = vmatpush1.bf16.msra.mxu1 %v6565_v28 }
 0x5d5   : > { %1805 = vmatprep.subr.bf16.mxu1 %v6575_v18 }
 0x5d7   : > { %5212 = vmatpush3.bf16.msra.mxu0 %v6665_v17 }
 0x5d8   : > { %1832 = vmatprep.subr.bf16.mxu0 %v6455_v57  ;;  %1806 = vmatpush1.bf16.msra.mxu1 %v6585_v40 }
 0x5d9   : > { %5217 = vmatprep.subr.bf16.mxu1 %v8084_v15 }
 0x5da   : > { %5214 = vmatmul.mubr.bf16.vlgmr.msra.gmra.mrb[28].mxu0 %v1620_v52  ;;  %v8090_v52 = vld [vmem:[#allocation110_spill] sm:$0xff] }
 0x5db   : > { %1833 = vmatpush1.bf16.msra.mxu0 %v6464_v0  ;;  %1864 = vmatprep.mubr.bf16.mxu0 %v8074_v39 }
 0x5dc   : > { %1834 = vmatprep.subr.bf16.mxu0 %v6468_v6 }
 0x5df   : > { %1835 = vmatpush1.bf16.msra.mxu0 %v6477_v61 }
 0x5e0   : > { %1836 = vmatprep.subr.bf16.mxu0 %v6488_v4 }
 0x5e3   : > { %1837 = vmatpush1.bf16.msra.mxu0 %v6498_v60 }
 0x5e4   : > { %1838 = vmatprep.subr.bf16.mxu0 %v6508_v16 }
 0x5e7   : > { %1839 = vmatpush1.bf16.msra.mxu0 %v6519_v22 }
 0x5e8   : > { %1840 = vmatprep.subr.bf16.mxu0 %v6529_v24 }
 0x5eb   : > { %1841 = vmatpush1.bf16.msra.mxu0 %v6540_v30 }
 0x5ec   : > { %1842 = vmatprep.subr.bf16.mxu0 %v6550_v19 }
 0x5ef   : > { %1843 = vmatpush1.bf16.msra.mxu0 %v6560_v31 }
 0x5f0   : > { %1844 = vmatprep.subr.bf16.mxu0 %v6570_v34 }
 0x5f3   : > { %1845 = vmatpush1.bf16.msra.mxu0 %v6580_v21 }
 0x5f4   : > { %1846 = vmatprep.subr.bf16.mxu0 %v6590_v42 }
 0x5f7   : > { %1847 = vmatpush1.bf16.msra.mxu0 %v6596_v43 }
 0x5f8   : > { %1961 = vmatprep.subr.bf16.mxu0 %v6437_v41 }
 0x68d   : > { %v1655_v56 = vpop.f32.mrb[24].mxu0  ;;  %v1696_v46 = vpop.f32.mrb[24].mxu1 }
 0x68e   : > { %v1657_v8 = vpop.f32.mrb[25].mxu0  ;;  %v1697_v10 = vpop.f32.mrb[25].mxu1  ;;  %v1746_v55 = vrot.slane %v1655_v56, 6 }
 0x68f   : > { %v1747_v36 = vrot.slane %v1657_v8, 6  ;;  %v1659_v2 = vpop.f32.mrb[26].mxu0  ;;  %v1699_v3 = vpop.f32.mrb[26].mxu1  ;;  %v1748_v54 = vrot.slane %v1697_v10, 6 }
 0x690   : > { %v1660_v44 = vpop.f32.mrb[27].mxu0  ;;  %v1700_v49 = vpop.f32.mrb[27].mxu1  ;;  %v1754_v29 = vadd.f32 %v1746_v55, %v8087_v32  ;;  %v1778_v2 = vrot.slane %v6879_v1, 6 }
 0x691   : > { %v1755_v7 = vadd.f32 %v1747_v36, %v8086_v51  ;;  %v1756_v46 = vadd.f32 %v1748_v54, %v8090_v52 }
 0x692   : > { %v4802_v47 = vmul.f32 -1.442695, %v1754_v29 }
 0x693   : > { %v4803_v63 = vmul.f32 -1.442695, %v1755_v7  ;;  %v4804_v3 = vmul.f32 -1.442695, %v1756_v46 }
 0x695   : > { %5653 = vpow2.f32 %v4803_v63 }
 0x696   : > { %5655 = vpow2.f32 %v4802_v47 }
 0x69f   : > { %v5654_v62 = vpop.eup %5653 }
 0x6a0   : > { %v1767_v59 = vadd.f32 1.0, %v5654_v62  ;;  %v5656_v8 = vpop.eup %5655 }
 0x6a1   : > { %v1761_v49 = vadd.f32 1.0, %v5656_v8 }
 0x6a2   : > { %5657 = vrcp.f32 %v1767_v59 }
 0x6a3   : > { %5659 = vpow2.f32 %v4804_v3 }
 0x6a4   : > { %5661 = vrcp.f32 %v1761_v49 }
 0x6ac   : > { %v5658_v44 = vpop.eup %5657 }
 0x6ad   : > { %v1780_v36 = vmul.f32 %v5658_v44, %v1778_v2  ;;  %v1736_v7 = vpop.f32.mrb[28].mxu0  ;;  %v5660_v10 = vpop.eup %5659 }
 0x6ae   : > { %v1749_v56 = vrot.slane %v1736_v7, 6  ;;  %v5215_v63 = vpop.f32.mrb[29].mxu0  ;;  %v5662_v62 = vpop.eup %5661  ;;  %v1773_v54 = vadd.f32 1.0, %v5660_v10 }
 0x6af   : > { %v1739_v55 = vpop.f32.mrb[30].mxu0 }
 0x6b0   : > { %v1757_v29 = vadd.f32 %v1749_v56, %v8089_v5  ;;  %v5216_v47 = vpop.f32.mrb[31].mxu0 }
 0x6b2   : > { %5663 = vtanh.f32 %v1757_v29 }
 0x6b3   : > { %5665 = vrcp.f32 %v1773_v54 }
 0x6bc   : > { %v5664_v59 = vpop.eup %5663 }
 0x6bd   : > { %v1781_v52 = vmul.f32 %v5664_v59, %v5662_v62  ;;  %v5666_v46 = vpop.eup %5665 }
 0x6bf   : > { %v6940_v1 = vadd.f32 %v1781_v52, %v1780_v36 }
 0x6c1   : > { %5667 = vtanh.f32 %v6940_v1  ;;  %1786 = vst [vmem:[#allocation3 + $0x8] sm:$0xc] %v6940_v1 }
 0x6cb   : > { %v5668_v8 = vpop.eup %5667 }
 0x6cc   : > { %v1784_v2 = vmul.f32 %v5668_v8, %v5666_v46 }
 0x6ce   : > { %1785 = vst [vmem:[#allocation2 + $0x8] sm:$0xc] %v1784_v2  ;;  %v1787_v3 = vpack.c.bf16 %v1784_v2, %v1784_v2 }
 0x6d0   : > { %v1789_v44 = vrot.slane %v1787_v3, 1 }
 0x6d2   : > { %1824 = vmatmul.mubr.bf16.vlgmr.msra.gmra.mrb[28].mxu1 %v1789_v44  ;;  %1865 = vmatmul.mubr.bf16.vlgmr.msra.gmra.mrb[32].mxu0 %v1789_v44 }
 0x6d3   : > { %5218 = vmatpush3.bf16.msra.mxu1 %v6609_v45  ;;  %5233 = vmatprep.mubr.msk.bf16.mxu1 %vm5960_vm2, %v8084_v15 }
 0x6d4   : > { %5219 = vmatprep.subr.bf16.mxu1 %v8084_v15  ;;  %1962 = vmatpush1.bf16.msra.mxu0 %v6441_v26 }
 0x6d5   : > { %1963 = vmatprep.subr.bf16.mxu0 %v6445_v53  ;;  %1993 = vmatprep.mubr.bf16.mxu0 %v8074_v39 }
 0x6d7   : > { %5220 = vmatpush3.bf16.msra.mxu1 %v6614_v11 }
 0x6d8   : > { %5221 = vmatprep.subr.bf16.mxu1 %v8084_v15  ;;  %1964 = vmatpush1.bf16.msra.mxu0 %v6451_v50 }
 0x6d9   : > { %1965 = vmatprep.subr.bf16.mxu0 %v6460_v58 }
 0x6db   : > { %5222 = vmatpush3.bf16.msra.mxu1 %v6625_v48 }
 0x6dc   : > { %5223 = vmatprep.subr.bf16.mxu1 %v8084_v15  ;;  %1966 = vmatpush1.bf16.msra.mxu0 %v6483_v38 }
 0x6dd   : > { %1967 = vmatprep.subr.bf16.mxu0 %v6493_v12 }
 0x6df   : > { %5224 = vmatpush3.bf16.msra.mxu1 %v6633_v37 }
 0x6e0   : > { %5225 = vmatprep.subr.bf16.mxu1 %v8084_v15  ;;  %1968 = vmatpush1.bf16.msra.mxu0 %v6503_v14 }
 0x6e1   : > { %1969 = vmatprep.subr.bf16.mxu0 %v6513_v35 }
 0x6e3   : > { %5226 = vmatpush3.bf16.msra.mxu1 %v6641_v20 }
 0x6e4   : > { %5227 = vmatprep.subr.bf16.mxu1 %v8084_v15  ;;  %1970 = vmatpush1.bf16.msra.mxu0 %v6524_v9 }
 0x6e5   : > { %1971 = vmatprep.subr.bf16.mxu0 %v6534_v27 }
 0x6e7   : > { %5228 = vmatpush3.bf16.msra.mxu1 %v6649_v23 }
 0x6e8   : > { %5229 = vmatprep.subr.bf16.mxu1 %v8084_v15  ;;  %1972 = vmatpush1.bf16.msra.mxu0 %v6545_v33 }
 0x6e9   : > { %1973 = vmatprep.subr.bf16.mxu0 %v6555_v25 }
 0x6eb   : > { %5230 = vmatpush3.bf16.msra.mxu1 %v6657_v13 }
 0x6ec   : > { %5231 = vmatprep.subr.bf16.mxu1 %v8084_v15  ;;  %1974 = vmatpush1.bf16.msra.mxu0 %v6565_v28 }
 0x6ed   : > { %1975 = vmatprep.subr.bf16.mxu0 %v6575_v18 }
 0x6ef   : > { %5232 = vmatpush3.bf16.msra.mxu1 %v6665_v17 }
 0x6f0   : > { %2002 = vmatprep.subr.bf16.mxu1 %v6455_v57  ;;  %1976 = vmatpush1.bf16.msra.mxu0 %v6585_v40 }
 0x6f1   : > { %5237 = vmatprep.subr.bf16.mxu0 %v8084_v15 }
 0x6f2   : > { %5234 = vmatmul.mubr.bf16.vlgmr.msra.gmra.mrb[32].mxu1 %v1789_v44  ;;  %v8091_v44 = vld [vmem:[#allocation110_spill] sm:$0xff] }
 0x6f3   : > { %2003 = vmatpush1.bf16.msra.mxu1 %v6464_v0  ;;  %2034 = vmatprep.mubr.bf16.mxu1 %v8074_v39 }
 0x6f4   : > { %2004 = vmatprep.subr.bf16.mxu1 %v6468_v6 }
 0x6f7   : > { %2005 = vmatpush1.bf16.msra.mxu1 %v6477_v61 }
 0x6f8   : > { %2006 = vmatprep.subr.bf16.mxu1 %v6488_v4 }
 0x6fb   : > { %2007 = vmatpush1.bf16.msra.mxu1 %v6498_v60 }
 0x6fc   : > { %2008 = vmatprep.subr.bf16.mxu1 %v6508_v16 }
 0x6ff   : > { %2009 = vmatpush1.bf16.msra.mxu1 %v6519_v22 }
 0x700   : > { %2010 = vmatprep.subr.bf16.mxu1 %v6529_v24 }
 0x703   : > { %2011 = vmatpush1.bf16.msra.mxu1 %v6540_v30 }
 0x704   : > { %2012 = vmatprep.subr.bf16.mxu1 %v6550_v19 }
 0x707   : > { %2013 = vmatpush1.bf16.msra.mxu1 %v6560_v31 }
 0x708   : > { %2014 = vmatprep.subr.bf16.mxu1 %v6570_v34 }
 0x70b   : > { %2015 = vmatpush1.bf16.msra.mxu1 %v6580_v21 }
 0x70c   : > { %2016 = vmatprep.subr.bf16.mxu1 %v6590_v42 }
 0x70f   : > { %2017 = vmatpush1.bf16.msra.mxu1 %v6596_v43 }
 0x710   : > { %2131 = vmatprep.subr.bf16.mxu1 %v6437_v41 }
 0x7a5   : > { %v1825_v52 = vpop.f32.mrb[28].mxu1  ;;  %v1866_v49 = vpop.f32.mrb[32].mxu0 }
 0x7a6   : > { %v1827_v36 = vpop.f32.mrb[29].mxu1  ;;  %v1867_v7 = vpop.f32.mrb[33].mxu0  ;;  %v1916_v59 = vrot.slane %v1825_v52, 4 }
 0x7a7   : > { %v1917_v56 = vrot.slane %v1827_v36, 4  ;;  %v1829_v63 = vpop.f32.mrb[30].mxu1  ;;  %v1869_v55 = vpop.f32.mrb[34].mxu0  ;;  %v1918_v3 = vrot.slane %v1867_v7, 4 }
 0x7a8   : > { %v1830_v29 = vpop.f32.mrb[31].mxu1  ;;  %v1870_v47 = vpop.f32.mrb[35].mxu0  ;;  %v1924_v54 = vadd.f32 %v1916_v59, %v8087_v32  ;;  %v1948_v63 = vrot.slane %v6940_v1, 6 }
 0x7a9   : > { %v1925_v10 = vadd.f32 %v1917_v56, %v8086_v51  ;;  %v1926_v49 = vadd.f32 %v1918_v3, %v8091_v44 }
 0x7aa   : > { %v4805_v46 = vmul.f32 -1.442695, %v1924_v54 }
 0x7ab   : > { %v4806_v62 = vmul.f32 -1.442695, %v1925_v10  ;;  %v4807_v55 = vmul.f32 -1.442695, %v1926_v49 }
 0x7ad   : > { %5669 = vpow2.f32 %v4806_v62 }
 0x7ae   : > { %5671 = vpow2.f32 %v4805_v46 }
 0x7b7   : > { %v5670_v8 = vpop.eup %5669 }
 0x7b8   : > { %v1937_v2 = vadd.f32 1.0, %v5670_v8  ;;  %v5672_v36 = vpop.eup %5671 }
 0x7b9   : > { %v1931_v47 = vadd.f32 1.0, %v5672_v36 }
 0x7ba   : > { %5673 = vrcp.f32 %v1937_v2 }
 0x7bb   : > { %5675 = vpow2.f32 %v4807_v55 }
 0x7bc   : > { %5677 = vrcp.f32 %v1931_v47 }
 0x7c4   : > { %v5674_v29 = vpop.eup %5673 }
 0x7c5   : > { %v1950_v56 = vmul.f32 %v5674_v29, %v1948_v63  ;;  %v1906_v10 = vpop.f32.mrb[32].mxu1  ;;  %v5676_v7 = vpop.eup %5675 }
 0x7c6   : > { %v1919_v52 = vrot.slane %v1906_v10, 4  ;;  %v5235_v62 = vpop.f32.mrb[33].mxu1  ;;  %v5678_v8 = vpop.eup %5677  ;;  %v1943_v3 = vadd.f32 1.0, %v5676_v7 }
 0x7c7   : > { %v1909_v59 = vpop.f32.mrb[34].mxu1 }
 0x7c8   : > { %v1927_v54 = vadd.f32 %v1919_v52, %v8089_v5  ;;  %v5236_v46 = vpop.f32.mrb[35].mxu1 }
 0x7ca   : > { %5679 = vtanh.f32 %v1927_v54 }
 0x7cb   : > { %5681 = vrcp.f32 %v1943_v3 }
 0x7d4   : > { %v5680_v2 = vpop.eup %5679 }
 0x7d5   : > { %v1951_v44 = vmul.f32 %v5680_v2, %v5678_v8  ;;  %v5682_v49 = vpop.eup %5681 }
 0x7d7   : > { %v7001_v1 = vadd.f32 %v1951_v44, %v1950_v56 }
 0x7d9   : > { %5683 = vtanh.f32 %v7001_v1  ;;  %1956 = vst [vmem:[#allocation3 + $0x8] sm:$0x30] %v7001_v1 }
 0x7e3   : > { %v5684_v36 = vpop.eup %5683 }
 0x7e4   : > { %v1954_v63 = vmul.f32 %v5684_v36, %v5682_v49 }
 0x7e6   : > { %1955 = vst [vmem:[#allocation2 + $0x8] sm:$0x30] %v1954_v63  ;;  %v1957_v55 = vpack.c.bf16 %v1954_v63, %v1954_v63 }
 0x7e8   : > { %v1959_v29 = vrot.slane %v1957_v55, 2 }
 0x7ea   : > { %1994 = vmatmul.mubr.bf16.vlgmr.msra.gmra.mrb[36].mxu0 %v1959_v29  ;;  %2035 = vmatmul.mubr.bf16.vlgmr.msra.gmra.mrb[36].mxu1 %v1959_v29 }
 0x7eb   : > { %5238 = vmatpush3.bf16.msra.mxu0 %v6609_v45  ;;  %5253 = vmatprep.mubr.msk.bf16.mxu0 %vm5960_vm2, %v8084_v15 }
 0x7ec   : > { %5239 = vmatprep.subr.bf16.mxu0 %v8084_v15  ;;  %2132 = vmatpush1.bf16.msra.mxu1 %v6441_v26 }
 0x7ed   : > { %2133 = vmatprep.subr.bf16.mxu1 %v6445_v53  ;;  %2163 = vmatprep.mubr.bf16.mxu1 %v8074_v39 }
 0x7ef   : > { %5240 = vmatpush3.bf16.msra.mxu0 %v6614_v11 }
 0x7f0   : > { %5241 = vmatprep.subr.bf16.mxu0 %v8084_v15  ;;  %2134 = vmatpush1.bf16.msra.mxu1 %v6451_v50 }
 0x7f1   : > { %2135 = vmatprep.subr.bf16.mxu1 %v6460_v58 }
 0x7f3   : > { %5242 = vmatpush3.bf16.msra.mxu0 %v6625_v48 }
 0x7f4   : > { %5243 = vmatprep.subr.bf16.mxu0 %v8084_v15  ;;  %2136 = vmatpush1.bf16.msra.mxu1 %v6483_v38 }
 0x7f5   : > { %2137 = vmatprep.subr.bf16.mxu1 %v6493_v12 }
 0x7f7   : > { %5244 = vmatpush3.bf16.msra.mxu0 %v6633_v37 }
 0x7f8   : > { %5245 = vmatprep.subr.bf16.mxu0 %v8084_v15  ;;  %2138 = vmatpush1.bf16.msra.mxu1 %v6503_v14 }
 0x7f9   : > { %2139 = vmatprep.subr.bf16.mxu1 %v6513_v35 }
 0x7fb   : > { %5246 = vmatpush3.bf16.msra.mxu0 %v6641_v20 }
 0x7fc   : > { %5247 = vmatprep.subr.bf16.mxu0 %v8084_v15  ;;  %2140 = vmatpush1.bf16.msra.mxu1 %v6524_v9 }
 0x7fd   : > { %2141 = vmatprep.subr.bf16.mxu1 %v6534_v27 }
 0x7ff   : > { %5248 = vmatpush3.bf16.msra.mxu0 %v6649_v23 }
 0x800   : > { %5249 = vmatprep.subr.bf16.mxu0 %v8084_v15  ;;  %2142 = vmatpush1.bf16.msra.mxu1 %v6545_v33 }
 0x801   : > { %2143 = vmatprep.subr.bf16.mxu1 %v6555_v25 }
 0x803   : > { %5250 = vmatpush3.bf16.msra.mxu0 %v6657_v13 }
 0x804   : > { %5251 = vmatprep.subr.bf16.mxu0 %v8084_v15  ;;  %2144 = vmatpush1.bf16.msra.mxu1 %v6565_v28 }
 0x805   : > { %2145 = vmatprep.subr.bf16.mxu1 %v6575_v18 }
 0x807   : > { %5252 = vmatpush3.bf16.msra.mxu0 %v6665_v17 }
 0x808   : > { %2172 = vmatprep.subr.bf16.mxu0 %v6455_v57  ;;  %2146 = vmatpush1.bf16.msra.mxu1 %v6585_v40 }
 0x809   : > { %5257 = vmatprep.subr.bf16.mxu1 %v8084_v15 }
 0x80a   : > { %5254 = vmatmul.mubr.bf16.vlgmr.msra.gmra.mrb[40].mxu0 %v1959_v29  ;;  %v8092_v29 = vld [vmem:[#allocation110_spill] sm:$0xff] }
 0x80b   : > { %2173 = vmatpush1.bf16.msra.mxu0 %v6464_v0  ;;  %2204 = vmatprep.mubr.bf16.mxu0 %v8074_v39 }
 0x80c   : > { %2174 = vmatprep.subr.bf16.mxu0 %v6468_v6 }
 0x80f   : > { %2175 = vmatpush1.bf16.msra.mxu0 %v6477_v61 }
 0x810   : > { %2176 = vmatprep.subr.bf16.mxu0 %v6488_v4 }
 0x813   : > { %2177 = vmatpush1.bf16.msra.mxu0 %v6498_v60 }
 0x814   : > { %2178 = vmatprep.subr.bf16.mxu0 %v6508_v16 }
 0x817   : > { %2179 = vmatpush1.bf16.msra.mxu0 %v6519_v22 }
 0x818   : > { %2180 = vmatprep.subr.bf16.mxu0 %v6529_v24 }
 0x81b   : > { %2181 = vmatpush1.bf16.msra.mxu0 %v6540_v30 }
 0x81c   : > { %2182 = vmatprep.subr.bf16.mxu0 %v6550_v19 }
 0x81f   : > { %2183 = vmatpush1.bf16.msra.mxu0 %v6560_v31 }
 0x820   : > { %2184 = vmatprep.subr.bf16.mxu0 %v6570_v34 }
 0x823   : > { %2185 = vmatpush1.bf16.msra.mxu0 %v6580_v21 }
 0x824   : > { %2186 = vmatprep.subr.bf16.mxu0 %v6590_v42 }
 0x827   : > { %2187 = vmatpush1.bf16.msra.mxu0 %v6596_v43 }
 0x828   : > { %2286 = vmatprep.subr.bf16.mxu0 %v6437_v41 }
 0x8bd   : > { %v1995_v44 = vpop.f32.mrb[36].mxu0  ;;  %v2036_v47 = vpop.f32.mrb[36].mxu1 }
 0x8be   : > { %v1997_v56 = vpop.f32.mrb[37].mxu0  ;;  %v2037_v10 = vpop.f32.mrb[37].mxu1  ;;  %v2086_v2 = vrot.slane %v1995_v44, 2 }
 0x8bf   : > { %v2087_v52 = vrot.slane %v1997_v56, 2  ;;  %v1999_v62 = vpop.f32.mrb[38].mxu0  ;;  %v2039_v59 = vpop.f32.mrb[38].mxu1  ;;  %v2088_v55 = vrot.slane %v2037_v10, 2 }
 0x8c0   : > { %v2000_v54 = vpop.f32.mrb[39].mxu0  ;;  %v2040_v46 = vpop.f32.mrb[39].mxu1  ;;  %v2094_v3 = vadd.f32 %v2086_v2, %v8087_v32  ;;  %v2118_v62 = vrot.slane %v7001_v1, 6 }
 0x8c1   : > { %v2095_v7 = vadd.f32 %v2087_v52, %v8086_v51  ;;  %v2096_v47 = vadd.f32 %v2088_v55, %v8092_v29 }
 0x8c2   : > { %v4808_v49 = vmul.f32 -1.442695, %v2094_v3 }
 0x8c3   : > { %v4809_v8 = vmul.f32 -1.442695, %v2095_v7  ;;  %v4810_v59 = vmul.f32 -1.442695, %v2096_v47 }
 0x8c5   : > { %5685 = vpow2.f32 %v4809_v8 }
 0x8c6   : > { %5687 = vpow2.f32 %v4808_v49 }
 0x8cf   : > { %v5686_v36 = vpop.eup %5685 }
 0x8d0   : > { %v2107_v63 = vadd.f32 1.0, %v5686_v36  ;;  %v5688_v56 = vpop.eup %5687 }
 0x8d1   : > { %v2101_v46 = vadd.f32 1.0, %v5688_v56 }
 0x8d2   : > { %5689 = vrcp.f32 %v2107_v63 }
 0x8d3   : > { %5691 = vpow2.f32 %v4810_v59 }
 0x8d4   : > { %5693 = vrcp.f32 %v2101_v46 }
 0x8dc   : > { %v5690_v54 = vpop.eup %5689 }
 0x8dd   : > { %v2120_v51 = vmul.f32 %v5690_v54, %v2118_v62  ;;  %v2076_v52 = vpop.f32.mrb[40].mxu0  ;;  %v5692_v10 = vpop.eup %5691 }
 0x8de   : > { %v2089_v44 = vrot.slane %v2076_v52, 2  ;;  %v5255_v7 = vpop.f32.mrb[41].mxu0  ;;  %v5694_v3 = vpop.eup %5693  ;;  %v2113_v36 = vadd.f32 1.0, %v5692_v10  ;;  %v8094_v10 = vld [vmem:[#allocation107_spill] sm:$0xff] }
 0x8df   : > { %v2079_v32 = vpop.f32.mrb[42].mxu0 }
 0x8e0   : > { %v2097_v8 = vadd.f32 %v2089_v44, %v8089_v5  ;;  %v5256_v2 = vpop.f32.mrb[43].mxu0 }
 0x8e2   : > { %5695 = vtanh.f32 %v2097_v8 }
 0x8e3   : > { %5697 = vrcp.f32 %v2113_v36 }
 0x8ec   : > { %v5696_v49 = vpop.eup %5695 }
 0x8ed   : > { %v2121_v63 = vmul.f32 %v5696_v49, %v5694_v3  ;;  %v5698_v55 = vpop.eup %5697 }
 0x8ef   : > { %v7062_v1 = vadd.f32 %v2121_v63, %v2120_v51  ;;  %v8093_v51 = vld [vmem:[#allocation109_spill] sm:$0xff] }
 0x8f1   : > { %5699 = vtanh.f32 %v7062_v1  ;;  %2126 = vst [vmem:[#allocation3 + $0x8] sm:$0xc0] %v7062_v1 }
 0x8fb   : > { %v5700_v29 = vpop.eup %5699 }
 0x8fc   : > { %v2124_v47 = vmul.f32 %v5700_v29, %v5698_v55  ;;  %v8095_v55 = vld [vmem:[#allocation114_spill] sm:$0xff] }
 0x8fe   : > { %2125 = vst [vmem:[#allocation2 + $0x8] sm:$0xc0] %v2124_v47  ;;  %v2127_v5 = vpack.c.bf16 %v2124_v47, %v2124_v47 }
 0x900   : > { %v2129_v56 = vrot.slane %v2127_v5, 3  ;;  %v2276_v5 = vrot.slane %v7062_v1, 6 }
 0x902   : > { %2164 = vmatmul.mubr.bf16.vlgmr.msra.gmra.mrb[40].mxu1 %v2129_v56  ;;  %2205 = vmatmul.mubr.bf16.vlgmr.msra.gmra.mrb[44].mxu0 %v2129_v56 }
 0x903   : > { %5258 = vmatpush3.bf16.msra.mxu1 %v6609_v45  ;;  %5273 = vmatprep.mubr.msk.bf16.mxu1 %vm5960_vm2, %v8084_v15 }
 0x904   : > { %5259 = vmatprep.subr.bf16.mxu1 %v8084_v15  ;;  %2287 = vmatpush1.bf16.msra.mxu0 %v6441_v26 }
 0x905   : > { %2288 = vmatprep.subr.bf16.mxu0 %v6445_v53  ;;  %2318 = vmatprep.mubr.bf16.mxu0 %v8074_v39 }
 0x907   : > { %5260 = vmatpush3.bf16.msra.mxu1 %v6614_v11 }
 0x908   : > { %5261 = vmatprep.subr.bf16.mxu1 %v8084_v15  ;;  %2289 = vmatpush1.bf16.msra.mxu0 %v6451_v50 }
 0x909   : > { %2290 = vmatprep.subr.bf16.mxu0 %v6460_v58 }
 0x90b   : > { %5262 = vmatpush3.bf16.msra.mxu1 %v6625_v48 }
 0x90c   : > { %5263 = vmatprep.subr.bf16.mxu1 %v8084_v15  ;;  %2291 = vmatpush1.bf16.msra.mxu0 %v6483_v38 }
 0x90d   : > { %2292 = vmatprep.subr.bf16.mxu0 %v6493_v12 }
 0x90f   : > { %5264 = vmatpush3.bf16.msra.mxu1 %v6633_v37 }
 0x910   : > { %5265 = vmatprep.subr.bf16.mxu1 %v8084_v15  ;;  %2293 = vmatpush1.bf16.msra.mxu0 %v6503_v14 }
 0x911   : > { %2294 = vmatprep.subr.bf16.mxu0 %v6513_v35 }
 0x913   : > { %5266 = vmatpush3.bf16.msra.mxu1 %v6641_v20 }
 0x914   : > { %5267 = vmatprep.subr.bf16.mxu1 %v8084_v15  ;;  %2295 = vmatpush1.bf16.msra.mxu0 %v6524_v9 }
 0x915   : > { %2296 = vmatprep.subr.bf16.mxu0 %v6534_v27 }
 0x917   : > { %5268 = vmatpush3.bf16.msra.mxu1 %v6649_v23 }
 0x918   : > { %5269 = vmatprep.subr.bf16.mxu1 %v8084_v15  ;;  %2297 = vmatpush1.bf16.msra.mxu0 %v6545_v33 }
 0x919   : > { %2298 = vmatprep.subr.bf16.mxu0 %v6555_v25 }
 0x91b   : > { %5270 = vmatpush3.bf16.msra.mxu1 %v6657_v13 }
 0x91c   : > { %5271 = vmatprep.subr.bf16.mxu1 %v8084_v15  ;;  %2299 = vmatpush1.bf16.msra.mxu0 %v6565_v28 }
 0x91d   : > { %2300 = vmatprep.subr.bf16.mxu0 %v6575_v18 }
 0x91f   : > { %5272 = vmatpush3.bf16.msra.mxu1 %v6665_v17 }
 0x920   : > { %2327 = vmatprep.subr.bf16.mxu1 %v6455_v57  ;;  %2301 = vmatpush1.bf16.msra.mxu0 %v6585_v40 }
 0x921   : > { %5277 = vmatprep.subr.bf16.mxu0 %v8084_v15 }
 0x922   : > { %5274 = vmatmul.mubr.bf16.vlgmr.msra.gmra.mrb[44].mxu1 %v2129_v56 }
 0x923   : > { %2328 = vmatpush1.bf16.msra.mxu1 %v6464_v0  ;;  %2359 = vmatprep.mubr.bf16.mxu1 %v8074_v39 }
 0x924   : > { %2329 = vmatprep.subr.bf16.mxu1 %v6468_v6 }
 0x927   : > { %2330 = vmatpush1.bf16.msra.mxu1 %v6477_v61 }
 0x928   : > { %2331 = vmatprep.subr.bf16.mxu1 %v6488_v4 }
 0x92b   : > { %2332 = vmatpush1.bf16.msra.mxu1 %v6498_v60 }
 0x92c   : > { %2333 = vmatprep.subr.bf16.mxu1 %v6508_v16 }
 0x92f   : > { %2334 = vmatpush1.bf16.msra.mxu1 %v6519_v22 }
 0x930   : > { %2335 = vmatprep.subr.bf16.mxu1 %v6529_v24 }
 0x933   : > { %2336 = vmatpush1.bf16.msra.mxu1 %v6540_v30 }
 0x934   : > { %2337 = vmatprep.subr.bf16.mxu1 %v6550_v19 }
 0x937   : > { %2338 = vmatpush1.bf16.msra.mxu1 %v6560_v31 }
 0x938   : > { %2339 = vmatprep.subr.bf16.mxu1 %v6570_v34 }
 0x93b   : > { %2340 = vmatpush1.bf16.msra.mxu1 %v6580_v21 }
 0x93c   : > { %2341 = vmatprep.subr.bf16.mxu1 %v6590_v42 }
 0x93f   : > { %2342 = vmatpush1.bf16.msra.mxu1 %v6596_v43 }
 0x940   : > { %2456 = vmatprep.subr.bf16.mxu1 %v6437_v41 }
 0x9d5   : > { %v2165_v62 = vpop.f32.mrb[40].mxu1  ;;  %v2206_v59 = vpop.f32.mrb[44].mxu0 }
 0x9d6   : > { %v2167_v54 = vpop.f32.mrb[41].mxu1  ;;  %v2207_v46 = vpop.f32.mrb[45].mxu0  ;;  %v2252_v3 = vadd.f32 %v2165_v62, %v8094_v10 }
 0x9d7   : > { %v2253_v52 = vadd.f32 %v2167_v54, %v8093_v51  ;;  %v2169_v44 = vpop.f32.mrb[42].mxu1  ;;  %v2209_v7 = vpop.f32.mrb[46].mxu0  ;;  %v2254_v29 = vadd.f32 %v2207_v46, %v8095_v55 }
 0x9d8   : > { %v2170_v32 = vpop.f32.mrb[43].mxu1  ;;  %v2210_v8 = vpop.f32.mrb[47].mxu0  ;;  %v4811_v49 = vmul.f32 -1.442695, %v2252_v3 }
 0x9d9   : > { %v4812_v2 = vmul.f32 -1.442695, %v2253_v52  ;;  %v4813_v56 = vmul.f32 -1.442695, %v2254_v29  ;;  %v8096_v52 = vld [vmem:[#allocation116_spill] sm:$0xff] }
 0x9db   : > { %5701 = vpow2.f32 %v4812_v2 }
 0x9dc   : > { %5703 = vpow2.f32 %v4811_v49 }
 0x9e5   : > { %v5702_v36 = vpop.eup %5701 }
 0x9e6   : > { %v2265_v63 = vadd.f32 1.0, %v5702_v36  ;;  %v5704_v47 = vpop.eup %5703 }
 0x9e7   : > { %v2259_v54 = vadd.f32 1.0, %v5704_v47 }
 0x9e8   : > { %5705 = vrcp.f32 %v2265_v63 }
 0x9e9   : > { %5707 = vpow2.f32 %v4813_v56 }
 0x9ea   : > { %5709 = vrcp.f32 %v2259_v54 }
 0x9f2   : > { %v5706_v59 = vpop.eup %5705 }
 0x9f3   : > { %v2278_v44 = vmul.f32 %v5706_v59, %v2276_v5  ;;  %v5708_v3 = vpop.eup %5707 }
 0x9f4   : > { %v5710_v49 = vpop.eup %5709  ;;  %v2271_v46 = vadd.f32 1.0, %v5708_v3 }
 0x9f5   : > { %v2246_v7 = vpop.f32.mrb[44].mxu1 }
 0x9f6   : > { %v2255_v32 = vadd.f32 %v2246_v7, %v8096_v52  ;;  %v5275_v8 = vpop.f32.mrb[45].mxu1 }
 0x9f7   : > { %v2249_v62 = vpop.f32.mrb[46].mxu1 }
 0x9f8   : > { %5711 = vtanh.f32 %v2255_v32  ;;  %v5276_v2 = vpop.f32.mrb[47].mxu1 }
 0x9f9   : > { %5713 = vrcp.f32 %v2271_v46 }
 0xa02   : > { %v5712_v36 = vpop.eup %5711 }
 0xa03   : > { %v2279_v63 = vmul.f32 %v5712_v36, %v5710_v49  ;;  %v5714_v1 = vpop.eup %5713 }
 0xa05   : > { %v7123_v55 = vadd.f32 %v2279_v63, %v2278_v44 }
 0xa07   : > { %5715 = vtanh.f32 %v7123_v55  ;;  %2284 = vst [vmem:[#allocation3 + $0x10] sm:$0x3] %v7123_v55 }
 0xa11   : > { %v5716_v29 = vpop.eup %5715 }
 0xa12   : > { %v2282_v47 = vmul.f32 %v5716_v29, %v5714_v1 }
 0xa14   : > { %2283 = vst [vmem:[#allocation2 + $0x10] sm:$0x3] %v2282_v47  ;;  %v2285_v5 = vpack.c.bf16 %v2282_v47, %v2282_v47 }
 0xa16   : > { %2319 = vmatmul.mubr.bf16.vlgmr.msra.gmra.mrb[48].mxu0 %v2285_v5  ;;  %2360 = vmatmul.mubr.bf16.vlgmr.msra.gmra.mrb[48].mxu1 %v2285_v5 }
 0xa17   : > { %5278 = vmatpush3.bf16.msra.mxu0 %v6609_v45  ;;  %5293 = vmatprep.mubr.msk.bf16.mxu0 %vm5960_vm2, %v8084_v15 }
 0xa18   : > { %5279 = vmatprep.subr.bf16.mxu0 %v8084_v15  ;;  %2457 = vmatpush1.bf16.msra.mxu1 %v6441_v26 }
 0xa19   : > { %2458 = vmatprep.subr.bf16.mxu1 %v6445_v53  ;;  %2488 = vmatprep.mubr.bf16.mxu1 %v8074_v39 }
 0xa1b   : > { %5280 = vmatpush3.bf16.msra.mxu0 %v6614_v11 }
 0xa1c   : > { %5281 = vmatprep.subr.bf16.mxu0 %v8084_v15  ;;  %2459 = vmatpush1.bf16.msra.mxu1 %v6451_v50 }
 0xa1d   : > { %2460 = vmatprep.subr.bf16.mxu1 %v6460_v58 }
 0xa1f   : > { %5282 = vmatpush3.bf16.msra.mxu0 %v6625_v48 }
 0xa20   : > { %5283 = vmatprep.subr.bf16.mxu0 %v8084_v15  ;;  %2461 = vmatpush1.bf16.msra.mxu1 %v6483_v38 }
 0xa21   : > { %2462 = vmatprep.subr.bf16.mxu1 %v6493_v12 }
 0xa23   : > { %5284 = vmatpush3.bf16.msra.mxu0 %v6633_v37 }
 0xa24   : > { %5285 = vmatprep.subr.bf16.mxu0 %v8084_v15  ;;  %2463 = vmatpush1.bf16.msra.mxu1 %v6503_v14 }
 0xa25   : > { %2464 = vmatprep.subr.bf16.mxu1 %v6513_v35 }
 0xa27   : > { %5286 = vmatpush3.bf16.msra.mxu0 %v6641_v20 }
 0xa28   : > { %5287 = vmatprep.subr.bf16.mxu0 %v8084_v15  ;;  %2465 = vmatpush1.bf16.msra.mxu1 %v6524_v9 }
 0xa29   : > { %2466 = vmatprep.subr.bf16.mxu1 %v6534_v27 }
 0xa2b   : > { %5288 = vmatpush3.bf16.msra.mxu0 %v6649_v23 }
 0xa2c   : > { %5289 = vmatprep.subr.bf16.mxu0 %v8084_v15  ;;  %2467 = vmatpush1.bf16.msra.mxu1 %v6545_v33 }
 0xa2d   : > { %2468 = vmatprep.subr.bf16.mxu1 %v6555_v25 }
 0xa2f   : > { %5290 = vmatpush3.bf16.msra.mxu0 %v6657_v13 }
 0xa30   : > { %5291 = vmatprep.subr.bf16.mxu0 %v8084_v15  ;;  %2469 = vmatpush1.bf16.msra.mxu1 %v6565_v28 }
 0xa31   : > { %2470 = vmatprep.subr.bf16.mxu1 %v6575_v18 }
 0xa33   : > { %5292 = vmatpush3.bf16.msra.mxu0 %v6665_v17 }
 0xa34   : > { %2497 = vmatprep.subr.bf16.mxu0 %v6455_v57  ;;  %2471 = vmatpush1.bf16.msra.mxu1 %v6585_v40 }
 0xa35   : > { %5297 = vmatprep.subr.bf16.mxu1 %v8084_v15 }
 0xa36   : > { %5294 = vmatmul.mubr.bf16.vlgmr.msra.gmra.mrb[52].mxu0 %v2285_v5  ;;  %v8097_v5 = vld [vmem:[#allocation114_spill] sm:$0xff] }
 0xa37   : > { %2498 = vmatpush1.bf16.msra.mxu0 %v6464_v0  ;;  %2529 = vmatprep.mubr.bf16.mxu0 %v8074_v39 }
 0xa38   : > { %2499 = vmatprep.subr.bf16.mxu0 %v6468_v6 }
 0xa3b   : > { %2500 = vmatpush1.bf16.msra.mxu0 %v6477_v61 }
 0xa3c   : > { %2501 = vmatprep.subr.bf16.mxu0 %v6488_v4 }
 0xa3f   : > { %2502 = vmatpush1.bf16.msra.mxu0 %v6498_v60 }
 0xa40   : > { %2503 = vmatprep.subr.bf16.mxu0 %v6508_v16 }
 0xa43   : > { %2504 = vmatpush1.bf16.msra.mxu0 %v6519_v22 }
 0xa44   : > { %2505 = vmatprep.subr.bf16.mxu0 %v6529_v24 }
 0xa47   : > { %2506 = vmatpush1.bf16.msra.mxu0 %v6540_v30 }
 0xa48   : > { %2507 = vmatprep.subr.bf16.mxu0 %v6550_v19 }
 0xa4b   : > { %2508 = vmatpush1.bf16.msra.mxu0 %v6560_v31 }
 0xa4c   : > { %2509 = vmatprep.subr.bf16.mxu0 %v6570_v34 }
 0xa4f   : > { %2510 = vmatpush1.bf16.msra.mxu0 %v6580_v21 }
 0xa50   : > { %2511 = vmatprep.subr.bf16.mxu0 %v6590_v42 }
 0xa53   : > { %2512 = vmatpush1.bf16.msra.mxu0 %v6596_v43 }
 0xa54   : > { %2626 = vmatprep.subr.bf16.mxu0 %v6437_v41 }
 0xae9   : > { %v2320_v56 = vpop.f32.mrb[48].mxu0  ;;  %v2361_v59 = vpop.f32.mrb[48].mxu1 }
 0xaea   : > { %v2322_v54 = vpop.f32.mrb[49].mxu0  ;;  %v2362_v44 = vpop.f32.mrb[49].mxu1  ;;  %v2411_v36 = vrot.slane %v2320_v56, 6 }
 0xaeb   : > { %v2412_v7 = vrot.slane %v2322_v54, 6  ;;  %v2324_v32 = vpop.f32.mrb[50].mxu0  ;;  %v2364_v8 = vpop.f32.mrb[50].mxu1  ;;  %v2413_v47 = vrot.slane %v2362_v44, 6 }
 0xaec   : > { %v2325_v62 = vpop.f32.mrb[51].mxu0  ;;  %v2365_v2 = vpop.f32.mrb[51].mxu1  ;;  %v2419_v46 = vadd.f32 %v2411_v36, %v8094_v10  ;;  %v2443_v32 = vrot.slane %v7123_v55, 6 }
 0xaed   : > { %v2420_v3 = vadd.f32 %v2412_v7, %v8093_v51  ;;  %v2421_v59 = vadd.f32 %v2413_v47, %v8097_v5 }
 0xaee   : > { %v4814_v63 = vmul.f32 -1.442695, %v2419_v46 }
 0xaef   : > { %v4815_v49 = vmul.f32 -1.442695, %v2420_v3  ;;  %v4816_v8 = vmul.f32 -1.442695, %v2421_v59 }
 0xaf1   : > { %5717 = vpow2.f32 %v4815_v49 }
 0xaf2   : > { %5719 = vpow2.f32 %v4814_v63 }
 0xafb   : > { %v5718_v1 = vpop.eup %5717 }
 0xafc   : > { %v2432_v29 = vadd.f32 1.0, %v5718_v1  ;;  %v5720_v54 = vpop.eup %5719 }
 0xafd   : > { %v2426_v2 = vadd.f32 1.0, %v5720_v54 }
 0xafe   : > { %5721 = vrcp.f32 %v2432_v29 }
 0xaff   : > { %5723 = vpow2.f32 %v4816_v8 }
 0xb00   : > { %5725 = vrcp.f32 %v2426_v2 }
 0xb08   : > { %v5722_v62 = vpop.eup %5721 }
 0xb09   : > { %v2445_v7 = vmul.f32 %v5722_v62, %v2443_v32  ;;  %v2401_v3 = vpop.f32.mrb[52].mxu0  ;;  %v5724_v44 = vpop.eup %5723 }
 0xb0a   : > { %v2414_v56 = vrot.slane %v2401_v3, 6  ;;  %v5295_v49 = vpop.f32.mrb[53].mxu0  ;;  %v5726_v1 = vpop.eup %5725  ;;  %v2438_v47 = vadd.f32 1.0, %v5724_v44 }
 0xb0b   : > { %v2404_v36 = vpop.f32.mrb[54].mxu0 }
 0xb0c   : > { %v2422_v46 = vadd.f32 %v2414_v56, %v8096_v52  ;;  %v5296_v63 = vpop.f32.mrb[55].mxu0 }
 0xb0e   : > { %5727 = vtanh.f32 %v2422_v46 }
 0xb0f   : > { %5729 = vrcp.f32 %v2438_v47 }
 0xb18   : > { %v5728_v29 = vpop.eup %5727 }
 0xb19   : > { %v2446_v5 = vmul.f32 %v5728_v29, %v5726_v1  ;;  %v5730_v59 = vpop.eup %5729 }
 0xb1b   : > { %v7184_v55 = vadd.f32 %v2446_v5, %v2445_v7 }
 0xb1d   : > { %5731 = vtanh.f32 %v7184_v55  ;;  %2451 = vst [vmem:[#allocation3 + $0x10] sm:$0xc] %v7184_v55 }
 0xb27   : > { %v5732_v54 = vpop.eup %5731 }
 0xb28   : > { %v2449_v32 = vmul.f32 %v5732_v54, %v5730_v59 }
 0xb2a   : > { %2450 = vst [vmem:[#allocation2 + $0x10] sm:$0xc] %v2449_v32  ;;  %v2452_v8 = vpack.c.bf16 %v2449_v32, %v2449_v32 }
 0xb2c   : > { %v2454_v62 = vrot.slane %v2452_v8, 1 }
 0xb2e   : > { %2489 = vmatmul.mubr.bf16.vlgmr.msra.gmra.mrb[52].mxu1 %v2454_v62  ;;  %2530 = vmatmul.mubr.bf16.vlgmr.msra.gmra.mrb[56].mxu0 %v2454_v62 }
 0xb2f   : > { %5298 = vmatpush3.bf16.msra.mxu1 %v6609_v45  ;;  %5313 = vmatprep.mubr.msk.bf16.mxu1 %vm5960_vm2, %v8084_v15 }
 0xb30   : > { %5299 = vmatprep.subr.bf16.mxu1 %v8084_v15  ;;  %2627 = vmatpush1.bf16.msra.mxu0 %v6441_v26 }
 0xb31   : > { %2628 = vmatprep.subr.bf16.mxu0 %v6445_v53  ;;  %2658 = vmatprep.mubr.bf16.mxu0 %v8074_v39 }
 0xb33   : > { %5300 = vmatpush3.bf16.msra.mxu1 %v6614_v11 }
 0xb34   : > { %5301 = vmatprep.subr.bf16.mxu1 %v8084_v15  ;;  %2629 = vmatpush1.bf16.msra.mxu0 %v6451_v50 }
 0xb35   : > { %2630 = vmatprep.subr.bf16.mxu0 %v6460_v58 }
 0xb37   : > { %5302 = vmatpush3.bf16.msra.mxu1 %v6625_v48 }
 0xb38   : > { %5303 = vmatprep.subr.bf16.mxu1 %v8084_v15  ;;  %2631 = vmatpush1.bf16.msra.mxu0 %v6483_v38 }
 0xb39   : > { %2632 = vmatprep.subr.bf16.mxu0 %v6493_v12 }
 0xb3b   : > { %5304 = vmatpush3.bf16.msra.mxu1 %v6633_v37 }
 0xb3c   : > { %5305 = vmatprep.subr.bf16.mxu1 %v8084_v15  ;;  %2633 = vmatpush1.bf16.msra.mxu0 %v6503_v14 }
 0xb3d   : > { %2634 = vmatprep.subr.bf16.mxu0 %v6513_v35 }
 0xb3f   : > { %5306 = vmatpush3.bf16.msra.mxu1 %v6641_v20 }
 0xb40   : > { %5307 = vmatprep.subr.bf16.mxu1 %v8084_v15  ;;  %2635 = vmatpush1.bf16.msra.mxu0 %v6524_v9 }
 0xb41   : > { %2636 = vmatprep.subr.bf16.mxu0 %v6534_v27 }
 0xb43   : > { %5308 = vmatpush3.bf16.msra.mxu1 %v6649_v23 }
 0xb44   : > { %5309 = vmatprep.subr.bf16.mxu1 %v8084_v15  ;;  %2637 = vmatpush1.bf16.msra.mxu0 %v6545_v33 }
 0xb45   : > { %2638 = vmatprep.subr.bf16.mxu0 %v6555_v25 }
 0xb47   : > { %5310 = vmatpush3.bf16.msra.mxu1 %v6657_v13 }
 0xb48   : > { %5311 = vmatprep.subr.bf16.mxu1 %v8084_v15  ;;  %2639 = vmatpush1.bf16.msra.mxu0 %v6565_v28 }
 0xb49   : > { %2640 = vmatprep.subr.bf16.mxu0 %v6575_v18 }
 0xb4b   : > { %5312 = vmatpush3.bf16.msra.mxu1 %v6665_v17 }
 0xb4c   : > { %2667 = vmatprep.subr.bf16.mxu1 %v6455_v57  ;;  %2641 = vmatpush1.bf16.msra.mxu0 %v6585_v40 }
 0xb4d   : > { %5317 = vmatprep.subr.bf16.mxu0 %v8084_v15 }
 0xb4e   : > { %5314 = vmatmul.mubr.bf16.vlgmr.msra.gmra.mrb[56].mxu1 %v2454_v62  ;;  %v8098_v62 = vld [vmem:[#allocation114_spill] sm:$0xff] }
 0xb4f   : > { %2668 = vmatpush1.bf16.msra.mxu1 %v6464_v0  ;;  %2699 = vmatprep.mubr.bf16.mxu1 %v8074_v39 }
 0xb50   : > { %2669 = vmatprep.subr.bf16.mxu1 %v6468_v6 }
 0xb53   : > { %2670 = vmatpush1.bf16.msra.mxu1 %v6477_v61 }
 0xb54   : > { %2671 = vmatprep.subr.bf16.mxu1 %v6488_v4 }
 0xb57   : > { %2672 = vmatpush1.bf16.msra.mxu1 %v6498_v60 }
 0xb58   : > { %2673 = vmatprep.subr.bf16.mxu1 %v6508_v16 }
 0xb5b   : > { %2674 = vmatpush1.bf16.msra.mxu1 %v6519_v22 }
 0xb5c   : > { %2675 = vmatprep.subr.bf16.mxu1 %v6529_v24 }
 0xb5f   : > { %2676 = vmatpush1.bf16.msra.mxu1 %v6540_v30 }
 0xb60   : > { %2677 = vmatprep.subr.bf16.mxu1 %v6550_v19 }
 0xb63   : > { %2678 = vmatpush1.bf16.msra.mxu1 %v6560_v31 }
 0xb64   : > { %2679 = vmatprep.subr.bf16.mxu1 %v6570_v34 }
 0xb67   : > { %2680 = vmatpush1.bf16.msra.mxu1 %v6580_v21 }
 0xb68   : > { %2681 = vmatprep.subr.bf16.mxu1 %v6590_v42 }
 0xb6b   : > { %2682 = vmatpush1.bf16.msra.mxu1 %v6596_v43 }
 0xb6c   : > { %2796 = vmatprep.subr.bf16.mxu1 %v6437_v41 }
 0xc01   : > { %v2490_v5 = vpop.f32.mrb[52].mxu1  ;;  %v2531_v2 = vpop.f32.mrb[56].mxu0 }
 0xc02   : > { %v2492_v7 = vpop.f32.mrb[53].mxu1  ;;  %v2532_v3 = vpop.f32.mrb[57].mxu0  ;;  %v2581_v29 = vrot.slane %v2490_v5, 4 }
 0xc03   : > { %v2582_v56 = vrot.slane %v2492_v7, 4  ;;  %v2494_v49 = vpop.f32.mrb[54].mxu1  ;;  %v2534_v36 = vpop.f32.mrb[58].mxu0  ;;  %v2583_v8 = vrot.slane %v2532_v3, 4 }
 0xc04   : > { %v2495_v46 = vpop.f32.mrb[55].mxu1  ;;  %v2535_v63 = vpop.f32.mrb[59].mxu0  ;;  %v2589_v47 = vadd.f32 %v2581_v29, %v8094_v10  ;;  %v2613_v49 = vrot.slane %v7184_v55, 6 }
 0xc05   : > { %v2590_v44 = vadd.f32 %v2582_v56, %v8093_v51  ;;  %v2591_v2 = vadd.f32 %v2583_v8, %v8098_v62 }
 0xc06   : > { %v4817_v59 = vmul.f32 -1.442695, %v2589_v47 }
 0xc07   : > { %v4818_v1 = vmul.f32 -1.442695, %v2590_v44  ;;  %v4819_v36 = vmul.f32 -1.442695, %v2591_v2 }
 0xc09   : > { %5733 = vpow2.f32 %v4818_v1 }
 0xc0a   : > { %5735 = vpow2.f32 %v4817_v59 }
 0xc13   : > { %v5734_v54 = vpop.eup %5733 }
 0xc14   : > { %v2602_v32 = vadd.f32 1.0, %v5734_v54  ;;  %v5736_v7 = vpop.eup %5735 }
 0xc15   : > { %v2596_v63 = vadd.f32 1.0, %v5736_v7 }
 0xc16   : > { %5737 = vrcp.f32 %v2602_v32 }
 0xc17   : > { %5739 = vpow2.f32 %v4819_v36 }
 0xc18   : > { %5741 = vrcp.f32 %v2596_v63 }
 0xc20   : > { %v5738_v46 = vpop.eup %5737 }
 0xc21   : > { %v2615_v56 = vmul.f32 %v5738_v46, %v2613_v49  ;;  %v2571_v44 = vpop.f32.mrb[56].mxu1  ;;  %v5740_v3 = vpop.eup %5739 }
 0xc22   : > { %v2584_v5 = vrot.slane %v2571_v44, 4  ;;  %v5315_v1 = vpop.f32.mrb[57].mxu1  ;;  %v5742_v54 = vpop.eup %5741  ;;  %v2608_v8 = vadd.f32 1.0, %v5740_v3 }
 0xc23   : > { %v2574_v29 = vpop.f32.mrb[58].mxu1 }
 0xc24   : > { %v2592_v47 = vadd.f32 %v2584_v5, %v8096_v52  ;;  %v5316_v59 = vpop.f32.mrb[59].mxu1 }
 0xc26   : > { %5743 = vtanh.f32 %v2592_v47 }
 0xc27   : > { %5745 = vrcp.f32 %v2608_v8 }
 0xc30   : > { %v5744_v32 = vpop.eup %5743 }
 0xc31   : > { %v2616_v62 = vmul.f32 %v5744_v32, %v5742_v54  ;;  %v5746_v2 = vpop.eup %5745 }
 0xc33   : > { %v7245_v55 = vadd.f32 %v2616_v62, %v2615_v56 }
 0xc35   : > { %5747 = vtanh.f32 %v7245_v55  ;;  %2621 = vst [vmem:[#allocation3 + $0x10] sm:$0x30] %v7245_v55 }
 0xc3f   : > { %v5748_v7 = vpop.eup %5747 }
 0xc40   : > { %v2619_v49 = vmul.f32 %v5748_v7, %v5746_v2 }
 0xc42   : > { %2620 = vst [vmem:[#allocation2 + $0x10] sm:$0x30] %v2619_v49  ;;  %v2622_v36 = vpack.c.bf16 %v2619_v49, %v2619_v49 }
 0xc44   : > { %v2624_v46 = vrot.slane %v2622_v36, 2 }
 0xc46   : > { %2659 = vmatmul.mubr.bf16.vlgmr.msra.gmra.mrb[60].mxu0 %v2624_v46  ;;  %2700 = vmatmul.mubr.bf16.vlgmr.msra.gmra.mrb[60].mxu1 %v2624_v46 }
 0xc47   : > { %5318 = vmatpush3.bf16.msra.mxu0 %v6609_v45  ;;  %5333 = vmatprep.mubr.msk.bf16.mxu0 %vm5960_vm2, %v8084_v15 }
 0xc48   : > { %5319 = vmatprep.subr.bf16.mxu0 %v8084_v15  ;;  %2797 = vmatpush1.bf16.msra.mxu1 %v6441_v26 }
 0xc49   : > { %2798 = vmatprep.subr.bf16.mxu1 %v6445_v53  ;;  %2828 = vmatprep.mubr.bf16.mxu1 %v8074_v39 }
 0xc4b   : > { %5320 = vmatpush3.bf16.msra.mxu0 %v6614_v11 }
 0xc4c   : > { %5321 = vmatprep.subr.bf16.mxu0 %v8084_v15  ;;  %2799 = vmatpush1.bf16.msra.mxu1 %v6451_v50 }
 0xc4d   : > { %2800 = vmatprep.subr.bf16.mxu1 %v6460_v58 }
 0xc4f   : > { %5322 = vmatpush3.bf16.msra.mxu0 %v6625_v48 }
 0xc50   : > { %5323 = vmatprep.subr.bf16.mxu0 %v8084_v15  ;;  %2801 = vmatpush1.bf16.msra.mxu1 %v6483_v38 }
 0xc51   : > { %2802 = vmatprep.subr.bf16.mxu1 %v6493_v12 }
 0xc53   : > { %5324 = vmatpush3.bf16.msra.mxu0 %v6633_v37 }
 0xc54   : > { %5325 = vmatprep.subr.bf16.mxu0 %v8084_v15  ;;  %2803 = vmatpush1.bf16.msra.mxu1 %v6503_v14 }
 0xc55   : > { %2804 = vmatprep.subr.bf16.mxu1 %v6513_v35 }
 0xc57   : > { %5326 = vmatpush3.bf16.msra.mxu0 %v6641_v20 }
 0xc58   : > { %5327 = vmatprep.subr.bf16.mxu0 %v8084_v15  ;;  %2805 = vmatpush1.bf16.msra.mxu1 %v6524_v9 }
 0xc59   : > { %2806 = vmatprep.subr.bf16.mxu1 %v6534_v27 }
 0xc5b   : > { %5328 = vmatpush3.bf16.msra.mxu0 %v6649_v23 }
 0xc5c   : > { %5329 = vmatprep.subr.bf16.mxu0 %v8084_v15  ;;  %2807 = vmatpush1.bf16.msra.mxu1 %v6545_v33 }
 0xc5d   : > { %2808 = vmatprep.subr.bf16.mxu1 %v6555_v25 }
 0xc5f   : > { %5330 = vmatpush3.bf16.msra.mxu0 %v6657_v13 }
 0xc60   : > { %5331 = vmatprep.subr.bf16.mxu0 %v8084_v15  ;;  %2809 = vmatpush1.bf16.msra.mxu1 %v6565_v28 }
 0xc61   : > { %2810 = vmatprep.subr.bf16.mxu1 %v6575_v18 }
 0xc63   : > { %5332 = vmatpush3.bf16.msra.mxu0 %v6665_v17 }
 0xc64   : > { %2837 = vmatprep.subr.bf16.mxu0 %v6455_v57  ;;  %2811 = vmatpush1.bf16.msra.mxu1 %v6585_v40 }
 0xc65   : > { %5337 = vmatprep.subr.bf16.mxu1 %v8084_v15 }
 0xc66   : > { %5334 = vmatmul.mubr.bf16.vlgmr.msra.gmra.mrb[64].mxu0 %v2624_v46  ;;  %v8099_v46 = vld [vmem:[#allocation114_spill] sm:$0xff] }
 0xc67   : > { %2838 = vmatpush1.bf16.msra.mxu0 %v6464_v0  ;;  %2869 = vmatprep.mubr.bf16.mxu0 %v8074_v39 }
 0xc68   : > { %2839 = vmatprep.subr.bf16.mxu0 %v6468_v6 }
 0xc6b   : > { %2840 = vmatpush1.bf16.msra.mxu0 %v6477_v61 }
 0xc6c   : > { %2841 = vmatprep.subr.bf16.mxu0 %v6488_v4 }
 0xc6f   : > { %2842 = vmatpush1.bf16.msra.mxu0 %v6498_v60 }
 0xc70   : > { %2843 = vmatprep.subr.bf16.mxu0 %v6508_v16 }
 0xc73   : > { %2844 = vmatpush1.bf16.msra.mxu0 %v6519_v22 }
 0xc74   : > { %2845 = vmatprep.subr.bf16.mxu0 %v6529_v24 }
 0xc77   : > { %2846 = vmatpush1.bf16.msra.mxu0 %v6540_v30 }
 0xc78   : > { %2847 = vmatprep.subr.bf16.mxu0 %v6550_v19 }
 0xc7b   : > { %2848 = vmatpush1.bf16.msra.mxu0 %v6560_v31 }
 0xc7c   : > { %2849 = vmatprep.subr.bf16.mxu0 %v6570_v34 }
 0xc7f   : > { %2850 = vmatpush1.bf16.msra.mxu0 %v6580_v21 }
 0xc80   : > { %2851 = vmatprep.subr.bf16.mxu0 %v6590_v42 }
 0xc83   : > { %2852 = vmatpush1.bf16.msra.mxu0 %v6596_v43 }
 0xc84   : > { %2951 = vmatprep.subr.bf16.mxu0 %v6437_v41 }
 0xd19   : > { %v2660_v62 = vpop.f32.mrb[60].mxu0  ;;  %v2701_v63 = vpop.f32.mrb[60].mxu1 }
 0xd1a   : > { %v2662_v56 = vpop.f32.mrb[61].mxu0  ;;  %v2702_v44 = vpop.f32.mrb[61].mxu1  ;;  %v2751_v32 = vrot.slane %v2660_v62, 2 }
 0xd1b   : > { %v2752_v5 = vrot.slane %v2662_v56, 2  ;;  %v2664_v1 = vpop.f32.mrb[62].mxu0  ;;  %v2704_v29 = vpop.f32.mrb[62].mxu1  ;;  %v2753_v36 = vrot.slane %v2702_v44, 2 }
 0xd1c   : > { %v2665_v47 = vpop.f32.mrb[63].mxu0  ;;  %v2705_v59 = vpop.f32.mrb[63].mxu1  ;;  %v2759_v8 = vadd.f32 %v2751_v32, %v8094_v10  ;;  %v2783_v1 = vrot.slane %v7245_v55, 6 }
 0xd1d   : > { %v2760_v3 = vadd.f32 %v2752_v5, %v8093_v51  ;;  %v2761_v63 = vadd.f32 %v2753_v36, %v8099_v46 }
 0xd1e   : > { %v4820_v2 = vmul.f32 -1.442695, %v2759_v8 }
 0xd1f   : > { %v4821_v54 = vmul.f32 -1.442695, %v2760_v3  ;;  %v4822_v29 = vmul.f32 -1.442695, %v2761_v63 }
 0xd21   : > { %5749 = vpow2.f32 %v4821_v54 }
 0xd22   : > { %5751 = vpow2.f32 %v4820_v2 }
 0xd2b   : > { %v5750_v7 = vpop.eup %5749 }
 0xd2c   : > { %v2772_v49 = vadd.f32 1.0, %v5750_v7  ;;  %v5752_v56 = vpop.eup %5751 }
 0xd2d   : > { %v2766_v59 = vadd.f32 1.0, %v5752_v56 }
 0xd2e   : > { %5753 = vrcp.f32 %v2772_v49 }
 0xd2f   : > { %5755 = vpow2.f32 %v4822_v29 }
 0xd30   : > { %5757 = vrcp.f32 %v2766_v59 }
 0xd38   : > { %v5754_v47 = vpop.eup %5753 }
 0xd39   : > { %v2785_v51 = vmul.f32 %v5754_v47, %v2783_v1  ;;  %v2741_v5 = vpop.f32.mrb[64].mxu0  ;;  %v5756_v44 = vpop.eup %5755 }
 0xd3a   : > { %v2754_v62 = vrot.slane %v2741_v5, 2  ;;  %v5335_v3 = vpop.f32.mrb[65].mxu0  ;;  %v5758_v8 = vpop.eup %5757  ;;  %v2778_v7 = vadd.f32 1.0, %v5756_v44  ;;  %v8101_v44 = vld [vmem:[#allocation111_spill] sm:$0xff] }
 0xd3b   : > { %v2744_v10 = vpop.f32.mrb[66].mxu0 }
 0xd3c   : > { %v2762_v54 = vadd.f32 %v2754_v62, %v8096_v52  ;;  %v5336_v32 = vpop.f32.mrb[67].mxu0 }
 0xd3e   : > { %5759 = vtanh.f32 %v2762_v54 }
 0xd3f   : > { %5761 = vrcp.f32 %v2778_v7 }
 0xd48   : > { %v5760_v2 = vpop.eup %5759 }
 0xd49   : > { %v2786_v49 = vmul.f32 %v5760_v2, %v5758_v8  ;;  %v5762_v36 = vpop.eup %5761 }
 0xd4b   : > { %v7306_v55 = vadd.f32 %v2786_v49, %v2785_v51  ;;  %v8100_v51 = vld [vmem:[#allocation112_spill] sm:$0xff] }
 0xd4d   : > { %5763 = vtanh.f32 %v7306_v55  ;;  %2791 = vst [vmem:[#allocation3 + $0x10] sm:$0xc0] %v7306_v55 }
 0xd57   : > { %v5764_v46 = vpop.eup %5763 }
 0xd58   : > { %v2789_v63 = vmul.f32 %v5764_v46, %v5762_v36  ;;  %v8102_v36 = vld [vmem:[#allocation117_spill] sm:$0xff] }
 0xd5a   : > { %2790 = vst [vmem:[#allocation2 + $0x10] sm:$0xc0] %v2789_v63  ;;  %v2792_v52 = vpack.c.bf16 %v2789_v63, %v2789_v63 }
 0xd5c   : > { %v2794_v56 = vrot.slane %v2792_v52, 3  ;;  %v2941_v52 = vrot.slane %v7306_v55, 6 }
 0xd5e   : > { %2829 = vmatmul.mubr.bf16.vlgmr.msra.gmra.mrb[64].mxu1 %v2794_v56  ;;  %2870 = vmatmul.mubr.bf16.vlgmr.msra.gmra.mrb[68].mxu0 %v2794_v56 }
 0xd5f   : > { %5338 = vmatpush3.bf16.msra.mxu1 %v6609_v45  ;;  %5353 = vmatprep.mubr.msk.bf16.mxu1 %vm5960_vm2, %v8084_v15 }
 0xd60   : > { %5339 = vmatprep.subr.bf16.mxu1 %v8084_v15  ;;  %2952 = vmatpush1.bf16.msra.mxu0 %v6441_v26 }
 0xd61   : > { %2953 = vmatprep.subr.bf16.mxu0 %v6445_v53  ;;  %2983 = vmatprep.mubr.bf16.mxu0 %v8074_v39 }
 0xd63   : > { %5340 = vmatpush3.bf16.msra.mxu1 %v6614_v11 }
 0xd64   : > { %5341 = vmatprep.subr.bf16.mxu1 %v8084_v15  ;;  %2954 = vmatpush1.bf16.msra.mxu0 %v6451_v50 }
 0xd65   : > { %2955 = vmatprep.subr.bf16.mxu0 %v6460_v58 }
 0xd67   : > { %5342 = vmatpush3.bf16.msra.mxu1 %v6625_v48 }
 0xd68   : > { %5343 = vmatprep.subr.bf16.mxu1 %v8084_v15  ;;  %2956 = vmatpush1.bf16.msra.mxu0 %v6483_v38 }
 0xd69   : > { %2957 = vmatprep.subr.bf16.mxu0 %v6493_v12 }
 0xd6b   : > { %5344 = vmatpush3.bf16.msra.mxu1 %v6633_v37 }
 0xd6c   : > { %5345 = vmatprep.subr.bf16.mxu1 %v8084_v15  ;;  %2958 = vmatpush1.bf16.msra.mxu0 %v6503_v14 }
 0xd6d   : > { %2959 = vmatprep.subr.bf16.mxu0 %v6513_v35 }
 0xd6f   : > { %5346 = vmatpush3.bf16.msra.mxu1 %v6641_v20 }
 0xd70   : > { %5347 = vmatprep.subr.bf16.mxu1 %v8084_v15  ;;  %2960 = vmatpush1.bf16.msra.mxu0 %v6524_v9 }
 0xd71   : > { %2961 = vmatprep.subr.bf16.mxu0 %v6534_v27 }
 0xd73   : > { %5348 = vmatpush3.bf16.msra.mxu1 %v6649_v23 }
 0xd74   : > { %5349 = vmatprep.subr.bf16.mxu1 %v8084_v15  ;;  %2962 = vmatpush1.bf16.msra.mxu0 %v6545_v33 }
 0xd75   : > { %2963 = vmatprep.subr.bf16.mxu0 %v6555_v25 }
 0xd77   : > { %5350 = vmatpush3.bf16.msra.mxu1 %v6657_v13 }
 0xd78   : > { %5351 = vmatprep.subr.bf16.mxu1 %v8084_v15  ;;  %2964 = vmatpush1.bf16.msra.mxu0 %v6565_v28 }
 0xd79   : > { %2965 = vmatprep.subr.bf16.mxu0 %v6575_v18 }
 0xd7b   : > { %5352 = vmatpush3.bf16.msra.mxu1 %v6665_v17 }
 0xd7c   : > { %2992 = vmatprep.subr.bf16.mxu1 %v6455_v57  ;;  %2966 = vmatpush1.bf16.msra.mxu0 %v6585_v40 }
 0xd7d   : > { %5357 = vmatprep.subr.bf16.mxu0 %v8084_v15 }
 0xd7e   : > { %5354 = vmatmul.mubr.bf16.vlgmr.msra.gmra.mrb[68].mxu1 %v2794_v56 }
 0xd7f   : > { %2993 = vmatpush1.bf16.msra.mxu1 %v6464_v0  ;;  %3024 = vmatprep.mubr.bf16.mxu1 %v8074_v39 }
 0xd80   : > { %2994 = vmatprep.subr.bf16.mxu1 %v6468_v6 }
 0xd83   : > { %2995 = vmatpush1.bf16.msra.mxu1 %v6477_v61 }
 0xd84   : > { %2996 = vmatprep.subr.bf16.mxu1 %v6488_v4 }
 0xd87   : > { %2997 = vmatpush1.bf16.msra.mxu1 %v6498_v60 }
 0xd88   : > { %2998 = vmatprep.subr.bf16.mxu1 %v6508_v16 }
 0xd8b   : > { %2999 = vmatpush1.bf16.msra.mxu1 %v6519_v22 }
 0xd8c   : > { %3000 = vmatprep.subr.bf16.mxu1 %v6529_v24 }
 0xd8f   : > { %3001 = vmatpush1.bf16.msra.mxu1 %v6540_v30 }
 0xd90   : > { %3002 = vmatprep.subr.bf16.mxu1 %v6550_v19 }
 0xd93   : > { %3003 = vmatpush1.bf16.msra.mxu1 %v6560_v31 }
 0xd94   : > { %3004 = vmatprep.subr.bf16.mxu1 %v6570_v34 }
 0xd97   : > { %3005 = vmatpush1.bf16.msra.mxu1 %v6580_v21 }
 0xd98   : > { %3006 = vmatprep.subr.bf16.mxu1 %v6590_v42 }
 0xd9b   : > { %3007 = vmatpush1.bf16.msra.mxu1 %v6596_v43 }
 0xd9c   : > { %3121 = vmatprep.subr.bf16.mxu1 %v6437_v41 }
 0xe31   : > { %v2830_v1 = vpop.f32.mrb[64].mxu1  ;;  %v2871_v29 = vpop.f32.mrb[68].mxu0 }
 0xe32   : > { %v2832_v47 = vpop.f32.mrb[65].mxu1  ;;  %v2872_v59 = vpop.f32.mrb[69].mxu0  ;;  %v2917_v8 = vadd.f32 %v2830_v1, %v8101_v44 }
 0xe33   : > { %v2918_v5 = vadd.f32 %v2832_v47, %v8100_v51  ;;  %v2834_v62 = vpop.f32.mrb[66].mxu1  ;;  %v2874_v3 = vpop.f32.mrb[70].mxu0  ;;  %v2919_v46 = vadd.f32 %v2872_v59, %v8102_v36 }
 0xe34   : > { %v2835_v10 = vpop.f32.mrb[67].mxu1  ;;  %v2875_v54 = vpop.f32.mrb[71].mxu0  ;;  %v4823_v2 = vmul.f32 -1.442695, %v2917_v8 }
 0xe35   : > { %v4824_v32 = vmul.f32 -1.442695, %v2918_v5  ;;  %v4825_v56 = vmul.f32 -1.442695, %v2919_v46  ;;  %v8103_v5 = vld [vmem:[#allocation119_spill] sm:$0xff] }
 0xe37   : > { %5765 = vpow2.f32 %v4824_v32 }
 0xe38   : > { %5767 = vpow2.f32 %v4823_v2 }
 0xe41   : > { %v5766_v7 = vpop.eup %5765 }
 0xe42   : > { %v2930_v49 = vadd.f32 1.0, %v5766_v7  ;;  %v5768_v63 = vpop.eup %5767 }
 0xe43   : > { %v2924_v47 = vadd.f32 1.0, %v5768_v63 }
 0xe44   : > { %5769 = vrcp.f32 %v2930_v49 }
 0xe45   : > { %5771 = vpow2.f32 %v4825_v56 }
 0xe46   : > { %5773 = vrcp.f32 %v2924_v47 }
 0xe4e   : > { %v5770_v29 = vpop.eup %5769 }
 0xe4f   : > { %v2943_v62 = vmul.f32 %v5770_v29, %v2941_v52  ;;  %v5772_v8 = vpop.eup %5771 }
 0xe50   : > { %v5774_v2 = vpop.eup %5773  ;;  %v2936_v59 = vadd.f32 1.0, %v5772_v8 }
 0xe51   : > { %v2911_v3 = vpop.f32.mrb[68].mxu1 }
 0xe52   : > { %v2920_v10 = vadd.f32 %v2911_v3, %v8103_v5  ;;  %v5355_v54 = vpop.f32.mrb[69].mxu1 }
 0xe53   : > { %v2914_v1 = vpop.f32.mrb[70].mxu1 }
 0xe54   : > { %5775 = vtanh.f32 %v2920_v10  ;;  %v5356_v32 = vpop.f32.mrb[71].mxu1 }
 0xe55   : > { %5777 = vrcp.f32 %v2936_v59 }
 0xe5e   : > { %v5776_v7 = vpop.eup %5775 }
 0xe5f   : > { %v2944_v49 = vmul.f32 %v5776_v7, %v5774_v2  ;;  %v5778_v55 = vpop.eup %5777 }
 0xe61   : > { %v7367_v36 = vadd.f32 %v2944_v49, %v2943_v62 }
 0xe63   : > { %5779 = vtanh.f32 %v7367_v36  ;;  %2949 = vst [vmem:[#allocation3 + $0x18] sm:$0x3] %v7367_v36 }
 0xe6d   : > { %v5780_v46 = vpop.eup %5779 }
 0xe6e   : > { %v2947_v63 = vmul.f32 %v5780_v46, %v5778_v55 }
 0xe70   : > { %2948 = vst [vmem:[#allocation2 + $0x18] sm:$0x3] %v2947_v63  ;;  %v2950_v52 = vpack.c.bf16 %v2947_v63, %v2947_v63  ;;  %v8104_v63 = vld [vmem:[#allocation117_spill] sm:$0xff] }
 0xe72   : > { %2984 = vmatmul.mubr.bf16.vlgmr.msra.gmra.mrb[72].mxu0 %v2950_v52  ;;  %3025 = vmatmul.mubr.bf16.vlgmr.msra.gmra.mrb[72].mxu1 %v2950_v52 }
 0xe73   : > { %5358 = vmatpush3.bf16.msra.mxu0 %v6609_v45  ;;  %5373 = vmatprep.mubr.msk.bf16.mxu0 %vm5960_vm2, %v8084_v15 }
 0xe74   : > { %5359 = vmatprep.subr.bf16.mxu0 %v8084_v15  ;;  %3122 = vmatpush1.bf16.msra.mxu1 %v6441_v26 }
 0xe75   : > { %3123 = vmatprep.subr.bf16.mxu1 %v6445_v53  ;;  %3153 = vmatprep.mubr.bf16.mxu1 %v8074_v39 }
 0xe77   : > { %5360 = vmatpush3.bf16.msra.mxu0 %v6614_v11 }
 0xe78   : > { %5361 = vmatprep.subr.bf16.mxu0 %v8084_v15  ;;  %3124 = vmatpush1.bf16.msra.mxu1 %v6451_v50 }
 0xe79   : > { %3125 = vmatprep.subr.bf16.mxu1 %v6460_v58 }
 0xe7b   : > { %5362 = vmatpush3.bf16.msra.mxu0 %v6625_v48 }
 0xe7c   : > { %5363 = vmatprep.subr.bf16.mxu0 %v8084_v15  ;;  %3126 = vmatpush1.bf16.msra.mxu1 %v6483_v38 }
 0xe7d   : > { %3127 = vmatprep.subr.bf16.mxu1 %v6493_v12 }
 0xe7f   : > { %5364 = vmatpush3.bf16.msra.mxu0 %v6633_v37 }
 0xe80   : > { %5365 = vmatprep.subr.bf16.mxu0 %v8084_v15  ;;  %3128 = vmatpush1.bf16.msra.mxu1 %v6503_v14 }
 0xe81   : > { %3129 = vmatprep.subr.bf16.mxu1 %v6513_v35 }
 0xe83   : > { %5366 = vmatpush3.bf16.msra.mxu0 %v6641_v20 }
 0xe84   : > { %5367 = vmatprep.subr.bf16.mxu0 %v8084_v15  ;;  %3130 = vmatpush1.bf16.msra.mxu1 %v6524_v9 }
 0xe85   : > { %3131 = vmatprep.subr.bf16.mxu1 %v6534_v27 }
 0xe87   : > { %5368 = vmatpush3.bf16.msra.mxu0 %v6649_v23 }
 0xe88   : > { %5369 = vmatprep.subr.bf16.mxu0 %v8084_v15  ;;  %3132 = vmatpush1.bf16.msra.mxu1 %v6545_v33 }
 0xe89   : > { %3133 = vmatprep.subr.bf16.mxu1 %v6555_v25 }
 0xe8b   : > { %5370 = vmatpush3.bf16.msra.mxu0 %v6657_v13 }
 0xe8c   : > { %5371 = vmatprep.subr.bf16.mxu0 %v8084_v15  ;;  %3134 = vmatpush1.bf16.msra.mxu1 %v6565_v28 }
 0xe8d   : > { %3135 = vmatprep.subr.bf16.mxu1 %v6575_v18 }
 0xe8f   : > { %5372 = vmatpush3.bf16.msra.mxu0 %v6665_v17 }
 0xe90   : > { %3162 = vmatprep.subr.bf16.mxu0 %v6455_v57  ;;  %3136 = vmatpush1.bf16.msra.mxu1 %v6585_v40 }
 0xe91   : > { %5377 = vmatprep.subr.bf16.mxu1 %v8084_v15 }
 0xe92   : > { %5374 = vmatmul.mubr.bf16.vlgmr.msra.gmra.mrb[76].mxu0 %v2950_v52 }
 0xe93   : > { %3163 = vmatpush1.bf16.msra.mxu0 %v6464_v0  ;;  %3194 = vmatprep.mubr.bf16.mxu0 %v8074_v39 }
 0xe94   : > { %3164 = vmatprep.subr.bf16.mxu0 %v6468_v6 }
 0xe97   : > { %3165 = vmatpush1.bf16.msra.mxu0 %v6477_v61 }
 0xe98   : > { %3166 = vmatprep.subr.bf16.mxu0 %v6488_v4 }
 0xe9b   : > { %3167 = vmatpush1.bf16.msra.mxu0 %v6498_v60 }
 0xe9c   : > { %3168 = vmatprep.subr.bf16.mxu0 %v6508_v16 }
 0xe9f   : > { %3169 = vmatpush1.bf16.msra.mxu0 %v6519_v22 }
 0xea0   : > { %3170 = vmatprep.subr.bf16.mxu0 %v6529_v24 }
 0xea3   : > { %3171 = vmatpush1.bf16.msra.mxu0 %v6540_v30 }
 0xea4   : > { %3172 = vmatprep.subr.bf16.mxu0 %v6550_v19 }
 0xea7   : > { %3173 = vmatpush1.bf16.msra.mxu0 %v6560_v31 }
 0xea8   : > { %3174 = vmatprep.subr.bf16.mxu0 %v6570_v34 }
 0xeab   : > { %3175 = vmatpush1.bf16.msra.mxu0 %v6580_v21 }
 0xeac   : > { %3176 = vmatprep.subr.bf16.mxu0 %v6590_v42 }
 0xeaf   : > { %3177 = vmatpush1.bf16.msra.mxu0 %v6596_v43 }
 0xeb0   : > { %3291 = vmatprep.subr.bf16.mxu0 %v6437_v41 }
 0xf45   : > { %v2985_v56 = vpop.f32.mrb[72].mxu0  ;;  %v3026_v29 = vpop.f32.mrb[72].mxu1 }
 0xf46   : > { %v2987_v47 = vpop.f32.mrb[73].mxu0  ;;  %v3027_v62 = vpop.f32.mrb[73].mxu1  ;;  %v3076_v7 = vrot.slane %v2985_v56, 6 }
 0xf47   : > { %v3077_v3 = vrot.slane %v2987_v47, 6  ;;  %v2989_v10 = vpop.f32.mrb[74].mxu0  ;;  %v3029_v54 = vpop.f32.mrb[74].mxu1  ;;  %v3078_v46 = vrot.slane %v3027_v62, 6  ;;  %v3108_v47 = vrot.slane %v7367_v36, 6 }
 0xf48   : > { %v2990_v1 = vpop.f32.mrb[75].mxu0  ;;  %v3030_v32 = vpop.f32.mrb[75].mxu1  ;;  %v3084_v59 = vadd.f32 %v3076_v7, %v8101_v44 }
 0xf49   : > { %v3085_v8 = vadd.f32 %v3077_v3, %v8100_v51  ;;  %v3086_v52 = vadd.f32 %v3078_v46, %v8104_v63 }
 0xf4a   : > { %v4826_v49 = vmul.f32 -1.442695, %v3084_v59 }
 0xf4b   : > { %v4827_v2 = vmul.f32 -1.442695, %v3085_v8  ;;  %v4828_v10 = vmul.f32 -1.442695, %v3086_v52 }
 0xf4d   : > { %5781 = vpow2.f32 %v4827_v2 }
 0xf4e   : > { %5783 = vpow2.f32 %v4826_v49 }
 0xf57   : > { %v5782_v55 = vpop.eup %5781 }
 0xf58   : > { %v3097_v41 = vadd.f32 1.0, %v5782_v55  ;;  %v5784_v29 = vpop.eup %5783 }
 0xf59   : > { %v3091_v1 = vadd.f32 1.0, %v5784_v29 }
 0xf5a   : > { %5785 = vrcp.f32 %v3097_v41 }
 0xf5b   : > { %5787 = vpow2.f32 %v4828_v10 }
 0xf5c   : > { %5789 = vrcp.f32 %v3091_v1 }
 0xf64   : > { %v5786_v54 = vpop.eup %5785 }
 0xf65   : > { %v3110_v3 = vmul.f32 %v5786_v54, %v3108_v47  ;;  %v3066_v32 = vpop.f32.mrb[76].mxu0  ;;  %v5788_v62 = vpop.eup %5787 }
 0xf66   : > { %v3079_v56 = vrot.slane %v3066_v32, 6  ;;  %v5375_v8 = vpop.f32.mrb[77].mxu0  ;;  %v5790_v49 = vpop.eup %5789  ;;  %v3103_v41 = vadd.f32 1.0, %v5788_v62 }
 0xf67   : > { %v3069_v2 = vpop.f32.mrb[78].mxu0 }
 0xf68   : > { %v3087_v7 = vadd.f32 %v3079_v56, %v8103_v5  ;;  %v5376_v59 = vpop.f32.mrb[79].mxu0 }
 0xf6a   : > { %5791 = vtanh.f32 %v3087_v7 }
 0xf6b   : > { %5793 = vrcp.f32 %v3103_v41 }
 0xf74   : > { %v5792_v55 = vpop.eup %5791 }
 0xf75   : > { %v3111_v46 = vmul.f32 %v5792_v55, %v5790_v49  ;;  %v5794_v52 = vpop.eup %5793 }
 0xf77   : > { %v7428_v36 = vadd.f32 %v3111_v46, %v3110_v3 }
 0xf79   : > { %5795 = vtanh.f32 %v7428_v36  ;;  %3116 = vst [vmem:[#allocation3 + $0x18] sm:$0xc] %v7428_v36 }
 0xf83   : > { %v5796_v29 = vpop.eup %5795 }
 0xf84   : > { %v3114_v47 = vmul.f32 %v5796_v29, %v5794_v52 }
 0xf86   : > { %3115 = vst [vmem:[#allocation2 + $0x18] sm:$0xc] %v3114_v47  ;;  %v3117_v10 = vpack.c.bf16 %v3114_v47, %v3114_v47 }
 0xf88   : > { %v3119_v54 = vrot.slane %v3117_v10, 1 }
 0xf8a   : > { %3154 = vmatmul.mubr.bf16.vlgmr.msra.gmra.mrb[76].mxu1 %v3119_v54  ;;  %3195 = vmatmul.mubr.bf16.vlgmr.msra.gmra.mrb[80].mxu0 %v3119_v54 }
 0xf8b   : > { %5378 = vmatpush3.bf16.msra.mxu1 %v6609_v45  ;;  %5393 = vmatprep.mubr.msk.bf16.mxu1 %vm5960_vm2, %v8084_v15 }
 0xf8c   : > { %5379 = vmatprep.subr.bf16.mxu1 %v8084_v15  ;;  %3292 = vmatpush1.bf16.msra.mxu0 %v6441_v26 }
 0xf8d   : > { %3293 = vmatprep.subr.bf16.mxu0 %v6445_v53  ;;  %3323 = vmatprep.mubr.bf16.mxu0 %v8074_v39 }
 0xf8f   : > { %5380 = vmatpush3.bf16.msra.mxu1 %v6614_v11 }
 0xf90   : > { %5381 = vmatprep.subr.bf16.mxu1 %v8084_v15  ;;  %3294 = vmatpush1.bf16.msra.mxu0 %v6451_v50 }
 0xf91   : > { %3295 = vmatprep.subr.bf16.mxu0 %v6460_v58 }
 0xf93   : > { %5382 = vmatpush3.bf16.msra.mxu1 %v6625_v48 }
 0xf94   : > { %5383 = vmatprep.subr.bf16.mxu1 %v8084_v15  ;;  %3296 = vmatpush1.bf16.msra.mxu0 %v6483_v38 }
 0xf95   : > { %3297 = vmatprep.subr.bf16.mxu0 %v6493_v12 }
 0xf97   : > { %5384 = vmatpush3.bf16.msra.mxu1 %v6633_v37 }
 0xf98   : > { %5385 = vmatprep.subr.bf16.mxu1 %v8084_v15  ;;  %3298 = vmatpush1.bf16.msra.mxu0 %v6503_v14 }
 0xf99   : > { %3299 = vmatprep.subr.bf16.mxu0 %v6513_v35 }
 0xf9b   : > { %5386 = vmatpush3.bf16.msra.mxu1 %v6641_v20 }
 0xf9c   : > { %5387 = vmatprep.subr.bf16.mxu1 %v8084_v15  ;;  %3300 = vmatpush1.bf16.msra.mxu0 %v6524_v9 }
 0xf9d   : > { %3301 = vmatprep.subr.bf16.mxu0 %v6534_v27 }
 0xf9f   : > { %5388 = vmatpush3.bf16.msra.mxu1 %v6649_v23 }
 0xfa0   : > { %5389 = vmatprep.subr.bf16.mxu1 %v8084_v15  ;;  %3302 = vmatpush1.bf16.msra.mxu0 %v6545_v33 }
 0xfa1   : > { %3303 = vmatprep.subr.bf16.mxu0 %v6555_v25 }
 0xfa3   : > { %5390 = vmatpush3.bf16.msra.mxu1 %v6657_v13 }
 0xfa4   : > { %5391 = vmatprep.subr.bf16.mxu1 %v8084_v15  ;;  %3304 = vmatpush1.bf16.msra.mxu0 %v6565_v28 }
 0xfa5   : > { %3305 = vmatprep.subr.bf16.mxu0 %v6575_v18 }
 0xfa7   : > { %5392 = vmatpush3.bf16.msra.mxu1 %v6665_v17 }
 0xfa8   : > { %3332 = vmatprep.subr.bf16.mxu1 %v6455_v57  ;;  %3306 = vmatpush1.bf16.msra.mxu0 %v6585_v40  ;;  %v3278_v57 = vrot.slane %v7428_v36, 6 }
 0xfa9   : > { %5397 = vmatprep.subr.bf16.mxu0 %v8084_v15 }
 0xfaa   : > { %5394 = vmatmul.mubr.bf16.vlgmr.msra.gmra.mrb[80].mxu1 %v3119_v54 }
 0xfab   : > { %3333 = vmatpush1.bf16.msra.mxu1 %v6464_v0  ;;  %3364 = vmatprep.mubr.bf16.mxu1 %v8074_v39 }
 0xfac   : > { %3334 = vmatprep.subr.bf16.mxu1 %v6468_v6 }
 0xfaf   : > { %3335 = vmatpush1.bf16.msra.mxu1 %v6477_v61 }
 0xfb0   : > { %3336 = vmatprep.subr.bf16.mxu1 %v6488_v4 }
 0xfb3   : > { %3337 = vmatpush1.bf16.msra.mxu1 %v6498_v60 }
 0xfb4   : > { %3338 = vmatprep.subr.bf16.mxu1 %v6508_v16 }
 0xfb7   : > { %3339 = vmatpush1.bf16.msra.mxu1 %v6519_v22 }
 0xfb8   : > { %3340 = vmatprep.subr.bf16.mxu1 %v6529_v24 }
 0xfbb   : > { %3341 = vmatpush1.bf16.msra.mxu1 %v6540_v30 }
 0xfbc   : > { %3342 = vmatprep.subr.bf16.mxu1 %v6550_v19 }
 0xfbf   : > { %3343 = vmatpush1.bf16.msra.mxu1 %v6560_v31 }
 0xfc0   : > { %3344 = vmatprep.subr.bf16.mxu1 %v6570_v34 }
 0xfc3   : > { %3345 = vmatpush1.bf16.msra.mxu1 %v6580_v21 }
 0xfc4   : > { %3346 = vmatprep.subr.bf16.mxu1 %v6590_v42 }
 0xfc7   : > { %3347 = vmatpush1.bf16.msra.mxu1 %v6596_v43 }
0x105d   : > { %v3155_v4 = vpop.f32.mrb[76].mxu1  ;;  %v3196_v9 = vpop.f32.mrb[80].mxu0 }
0x105e   : > { %v3157_v12 = vpop.f32.mrb[77].mxu1  ;;  %v3197_v16 = vpop.f32.mrb[81].mxu0  ;;  %v3246_v61 = vrot.slane %v3155_v4, 4 }
0x105f   : > { %v3247_v22 = vrot.slane %v3157_v12, 4  ;;  %v3159_v24 = vpop.f32.mrb[78].mxu1  ;;  %v3199_v27 = vpop.f32.mrb[82].mxu0  ;;  %v3248_v26 = vrot.slane %v3197_v16, 4 }
0x1060   : > { %v3160_v30 = vpop.f32.mrb[79].mxu1  ;;  %v3200_v33 = vpop.f32.mrb[83].mxu0  ;;  %v3254_v34 = vadd.f32 %v3246_v61, %v8101_v44 }
0x1061   : > { %v3255_v40 = vadd.f32 %v3247_v22, %v8100_v51  ;;  %v3256_v53 = vadd.f32 %v3248_v26, %v8104_v63 }
0x1062   : > { %v4829_v38 = vmul.f32 -1.442695, %v3254_v34 }
0x1063   : > { %v4830_v31 = vmul.f32 -1.442695, %v3255_v40  ;;  %v4831_v58 = vmul.f32 -1.442695, %v3256_v53 }
0x1065   : > { %5797 = vpow2.f32 %v4830_v31 }
0x1066   : > { %5799 = vpow2.f32 %v4829_v38 }
0x106f   : > { %v5798_v42 = vpop.eup %5797 }
0x1070   : > { %v3267_v43 = vadd.f32 1.0, %v5798_v42  ;;  %v5800_v50 = vpop.eup %5799 }
0x1071   : > { %v3261_v6 = vadd.f32 1.0, %v5800_v50 }
0x1072   : > { %5801 = vrcp.f32 %v3267_v43 }
0x1073   : > { %5803 = vpow2.f32 %v4831_v58 }
0x1074   : > { %5805 = vrcp.f32 %v3261_v6 }
0x107c   : > { %v5802_v0 = vpop.eup %5801 }
0x107d   : > { %v3280_v60 = vmul.f32 %v5802_v0, %v3278_v57  ;;  %v3236_v14 = vpop.f32.mrb[80].mxu1  ;;  %v5804_v21 = vpop.eup %5803 }
0x107e   : > { %v3249_v35 = vrot.slane %v3236_v14, 4  ;;  %v5395_v19 = vpop.f32.mrb[81].mxu1  ;;  %v5806_v39 = vpop.eup %5805  ;;  %v3273_v3 = vadd.f32 1.0, %v5804_v21 }
0x107f   : > { %v3239_v25 = vpop.f32.mrb[82].mxu1 }
0x1080   : > { %v3257_v28 = vadd.f32 %v3249_v35, %v8103_v5  ;;  %v5396_v18 = vpop.f32.mrb[83].mxu1 }
0x1082   : > { %5807 = vtanh.f32 %v3257_v28 }
0x1083   : > { %5809 = vrcp.f32 %v3273_v3 }
0x108c   : > { %v5808_v1 = vpop.eup %5807 }
0x108d   : > { %v3281_v32 = vmul.f32 %v5808_v1, %v5806_v39  ;;  %v5810_v8 = vpop.eup %5809 }
0x108f   : > { %v3282_v56 = vadd.f32 %v3281_v32, %v3280_v60 }
0x1091   : > { %5811 = vtanh.f32 %v3282_v56  ;;  %3286 = vst [vmem:[#allocation3 + $0x18] sm:$0x30] %v3282_v56  ;;  %v3448_v4 = vrot.slane %v3282_v56, 6 }
0x109b   : > { %v5812_v2 = vpop.eup %5811 }
0x109c   : > { %v3284_v7 = vmul.f32 %v5812_v2, %v5810_v8 }
0x109e   : > { %3285 = vst [vmem:[#allocation2 + $0x18] sm:$0x30] %v3284_v7  ;;  %v3287_v59 = vpack.c.bf16 %v3284_v7, %v3284_v7 }
0x10a0   : > { %v3289_v62 = vrot.slane %v3287_v59, 2 }
0x10a2   : > { %3324 = vmatmul.mubr.bf16.vlgmr.msra.gmra.mrb[84].mxu0 %v3289_v62  ;;  %3365 = vmatmul.mubr.bf16.vlgmr.msra.gmra.mrb[84].mxu1 %v3289_v62 }
0x10a3   : > { %5398 = vmatpush3.bf16.msra.mxu0 %v6609_v45  ;;  %5413 = vmatprep.mubr.msk.bf16.mxu0 %vm5960_vm2, %v8084_v15 }
0x10a4   : > { %5399 = vmatprep.subr.bf16.mxu0 %v8084_v15 }
0x10a7   : > { %5400 = vmatpush3.bf16.msra.mxu0 %v6614_v11 }
0x10a8   : > { %5401 = vmatprep.subr.bf16.mxu0 %v8084_v15 }
0x10ab   : > { %5402 = vmatpush3.bf16.msra.mxu0 %v6625_v48 }
0x10ac   : > { %5403 = vmatprep.subr.bf16.mxu0 %v8084_v15 }
0x10af   : > { %5404 = vmatpush3.bf16.msra.mxu0 %v6633_v37 }
0x10b0   : > { %5405 = vmatprep.subr.bf16.mxu0 %v8084_v15 }
0x10b3   : > { %5406 = vmatpush3.bf16.msra.mxu0 %v6641_v20 }
0x10b4   : > { %5407 = vmatprep.subr.bf16.mxu0 %v8084_v15 }
0x10b7   : > { %5408 = vmatpush3.bf16.msra.mxu0 %v6649_v23 }
0x10b8   : > { %5409 = vmatprep.subr.bf16.mxu0 %v8084_v15 }
0x10bb   : > { %5410 = vmatpush3.bf16.msra.mxu0 %v6657_v13 }
0x10bc   : > { %5411 = vmatprep.subr.bf16.mxu0 %v8084_v15 }
0x10bf   : > { %5412 = vmatpush3.bf16.msra.mxu0 %v6665_v17 }
0x10c2   : > { %5414 = vmatmul.mubr.bf16.vlgmr.msra.gmra.mrb[88].mxu0 %v3289_v62 }
0x1175   : > { %v3325_v45 = vpop.f32.mrb[84].mxu0  ;;  %v3366_v11 = vpop.f32.mrb[84].mxu1 }
0x1176   : > { %v3327_v48 = vpop.f32.mrb[85].mxu0  ;;  %v3367_v37 = vpop.f32.mrb[85].mxu1  ;;  %v3416_v52 = vrot.slane %v3325_v45, 2 }
0x1177   : > { %v3417_v49 = vrot.slane %v3327_v48, 2  ;;  %v3329_v55 = vpop.f32.mrb[86].mxu0  ;;  %v3369_v20 = vpop.f32.mrb[86].mxu1  ;;  %v3418_v47 = vrot.slane %v3367_v37, 2 }
0x1178   : > { %v3330_v41 = vpop.f32.mrb[87].mxu0  ;;  %v3370_v46 = vpop.f32.mrb[87].mxu1  ;;  %v3424_v13 = vadd.f32 %v3416_v52, %v8101_v44 }
0x1179   : > { %v3425_v23 = vadd.f32 %v3417_v49, %v8100_v51  ;;  %v3426_v10 = vadd.f32 %v3418_v47, %v8104_v63 }
0x117a   : > { %v4832_v15 = vmul.f32 -1.442695, %v3424_v13 }
0x117b   : > { %v4833_v36 = vmul.f32 -1.442695, %v3425_v23  ;;  %v4834_v9 = vmul.f32 -1.442695, %v3426_v10 }
0x117d   : > { %5813 = vpow2.f32 %v4833_v36 }
0x117e   : > { %5815 = vpow2.f32 %v4832_v15 }
0x1187   : > { %v5814_v29 = vpop.eup %5813 }
0x1188   : > { %v3437_v17 = vadd.f32 1.0, %v5814_v29  ;;  %v5816_v54 = vpop.eup %5815 }
0x1189   : > { %v3431_v16 = vadd.f32 1.0, %v5816_v54 }
0x118a   : > { %5817 = vrcp.f32 %v3437_v17 }
0x118b   : > { %5819 = vpow2.f32 %v4834_v9 }
0x118c   : > { %5821 = vrcp.f32 %v3431_v16 }
0x1194   : > { %v5818_v12 = vpop.eup %5817 }
0x1195   : > { %v3450_v22 = vmul.f32 %v5818_v12, %v3448_v4  ;;  %v3406_v51 = vpop.f32.mrb[88].mxu0  ;;  %v5820_v40 = vpop.eup %5819 }
0x1196   : > { %v3419_v24 = vrot.slane %v3406_v51, 2  ;;  %v5415_v27 = vpop.f32.mrb[89].mxu0  ;;  %v5822_v31 = vpop.eup %5821  ;;  %v3443_v63 = vadd.f32 1.0, %v5820_v40 }
0x1197   : > { %v3409_v30 = vpop.f32.mrb[90].mxu0 }
0x1198   : > { %v3427_v44 = vadd.f32 %v3419_v24, %v8103_v5  ;;  %v5416_v33 = vpop.f32.mrb[91].mxu0 }
0x119a   : > { %5823 = vtanh.f32 %v3427_v44 }
0x119b   : > { %5825 = vrcp.f32 %v3443_v63 }
0x11a4   : > { %v5824_v61 = vpop.eup %5823 }
0x11a5   : > { %v3451_v34 = vmul.f32 %v5824_v61, %v5822_v31  ;;  %v5826_v42 = vpop.eup %5825 }
0x11a7   : > { %v3452_v38 = vadd.f32 %v3451_v34, %v3450_v22 }
0x11a9   : > { %5827 = vtanh.f32 %v3452_v38  ;;  %3456 = vst [vmem:[#allocation3 + $0x18] sm:$0xc0] %v3452_v38 }
0x11b3   : > { %v5828_v43 = vpop.eup %5827 }
0x11b4   : > { %v3454_v26 = vmul.f32 %v5828_v43, %v5826_v42 }
0x11b6   : > { %3455 = vst [vmem:[#allocation2 + $0x18] sm:$0xc0] %v3454_v26 }
0x11b7 PF: > { %p4835_p8 = scmp.le.s32.totalorder %s5939_s21, 0 }
0x11b8   : > { %v8105_v5 = vld [vmem:[#allocation7_spill] sm:$0xff] (!%p4835_p8)  ;;  %v8106_v53 = vld [vmem:[#allocation4_spill] sm:$0xff] (!%p4835_p8)  ;;  %v8107_v57 = vld [vmem:[#allocation9_spill] sm:$0xff] (!%p4835_p8)  ;;  %v5961_v62 = vmov (!%p4835_p8), 0  }
0x11b9   : > { %3460 = sbr.rel (%p4835_p8) target bundleno = 4903 (0x1327), region = 52  ;;  %v4837_v50 = vcombine.high (!%p4835_p8), %v8106_v53, %v8105_v5  ;;  %v8108_v58 = vld [vmem:[#allocation6_spill] sm:$0xff] (!%p4835_p8)  ;;  %v4836_v6 = vcombine.low (!%p4835_p8), %v8106_v53, %v8105_v5  ;;  %v8109_v60 = vld [vmem:[#allocation13_spill] sm:$0xff] (!%p4835_p8)  ;;  %v8111_v19 = vld [vmem:[#allocation15_spill] sm:$0xff] (!%p4835_p8)  ;;  %3773 = vmatprep.mubr.bf16.mxu1 (!%p4835_p8), %v5961_v62 }
0x11ba   : > { %v4840_v0 = vcombine.low (!%p4835_p8), %v8108_v58, %v8107_v57  ;;  %v8110_v14 = vld [vmem:[#allocation10_spill] sm:$0xff] (!%p4835_p8)  ;;  %v8112_v25 = vld [vmem:[#allocation12_spill] sm:$0xff] (!%p4835_p8)  ;;  %v7524_v39 = vld [vmem:[#allocation2 + $0x8] sm:$0xff] (!%p4835_p8) }
0x11bb   : > { %v4842_v35 = vcombine.high (!%p4835_p8), %v8110_v14, %v8109_v60  ;;  %v4845_v28 = vcombine.low (!%p4835_p8), %v8112_v25, %v8111_v19  ;;  %v7520_v18 = vld [vmem:[#allocation2] sm:$0xff] (!%p4835_p8)  ;;  %3741 = vmatprep.subr.bf16.mxu1 (!%p4835_p8), %v4837_v50  ;;  %v4841_v21 = vcombine.low (!%p4835_p8), %v8110_v14, %v8109_v60  ;;  %v8113_v1 = vld [vmem:[#allocation19_spill] sm:$0xff] (!%p4835_p8)  ;;  %v8115_v56 = vld [vmem:[#allocation21_spill] sm:$0xff] (!%p4835_p8)  ;;  %v3479_v11 = vrot.slane (!%p4835_p8), %v7524_v39, 6 }
0x11bc   : > { %5417 = vmatprep.subr.bf16.mxu0 (!%p4835_p8), %v4840_v0  ;;  %3742 = vmatpush1.bf16.msra.mxu1 (!%p4835_p8), %v4836_v6  ;;  %v8114_v3 = vld [vmem:[#allocation16_spill] sm:$0xff] (!%p4835_p8)  ;;  %v8116_v8 = vld [vmem:[#allocation18_spill] sm:$0xff] (!%p4835_p8)  ;;  %v3478_v59 = vrot.slane (!%p4835_p8), %v7520_v18, 6  ;;  %v8118_v49 = vld [vmem:[#allocation25_spill] sm:$0xff] (!%p4835_p8) }
0x11bd   : > { %5418 = vmatpush3.bf16.msra.mxu0 (!%p4835_p8), %v4840_v0  ;;  %3743 = vmatprep.subr.bf16.mxu1 (!%p4835_p8), %v4842_v35  ;;  %v4847_v32 = vcombine.high (!%p4835_p8), %v8114_v3, %v8113_v1  ;;  %v4850_v2 = vcombine.low (!%p4835_p8), %v8116_v8, %v8115_v56  ;;  %v7530_v7 = vld [vmem:[#allocation2 + $0x18] sm:$0xff] (!%p4835_p8)  ;;  %v8117_v45 = vld [vmem:[#allocation100_spill] sm:$0xff] (!%p4835_p8)  ;;  %v4846_v48 = vcombine.low (!%p4835_p8), %v8114_v3, %v8113_v1  ;;  %v8119_v55 = vld [vmem:[#allocation22_spill] sm:$0xff] (!%p4835_p8) }
0x11be   : > { %5419 = vmatprep.subr.bf16.mxu0 (!%p4835_p8), %v4845_v28  ;;  %vm3474_vm3 = vcmp.lt.s32.totalorder (!%p4835_p8), %v8117_v45, 2  ;;  %v3481_v37 = vrot.slane (!%p4835_p8), %v7530_v7, 6  ;;  %v4852_v20 = vcombine.high (!%p4835_p8), %v8119_v55, %v8118_v49  ;;  %v8120_v41 = vld [vmem:[#allocation27_spill] sm:$0xff] (!%p4835_p8)  ;;  %v8121_v46 = vld [vmem:[#allocation24_spill] sm:$0xff] (!%p4835_p8)  ;;  %v4851_v15 = vcombine.low (!%p4835_p8), %v8119_v55, %v8118_v49  ;;  %v8124_v54 = vld [vmem:[#allocation33_spill] sm:$0xff] (!%p4835_p8) }
0x11bf   : > { %v4855_v23 = vcombine.low (!%p4835_p8), %v8121_v46, %v8120_v41  ;;  %v3484_v36 = vsel (!%p4835_p8), %vm3474_vm3, %v3478_v59, %v3479_v11  ;;  %v8122_v17 = vld [vmem:[#allocation31_spill] sm:$0xff] (!%p4835_p8)  ;;  %v8123_v47 = vld [vmem:[#allocation28_spill] sm:$0xff] (!%p4835_p8)  ;;  %v8125_v4 = vld [vmem:[#allocation30_spill] sm:$0xff] (!%p4835_p8)  ;;  %vm3510_vm4 = vcmp.lt.s32.totalorder (!%p4835_p8), %v8117_v45, 6 }
0x11c0   : > { %3744 = vmatpush1.bf16.msra.mxu1 %v4841_v21  ;;  %v3485_v52 = vsel %vm3474_vm3, %v3481_v37, %v3478_v59  ;;  %v4857_v10 = vcombine.high %v8123_v47, %v8122_v17  ;;  %v4860_v9 = vcombine.low %v8125_v4, %v8124_v54  ;;  %v4856_v12 = vcombine.low %v8123_v47, %v8122_v17  ;;  %v8126_v16 = vld [vmem:[#allocation37_spill] sm:$0xff]  ;;  %v8127_v22 = vld [vmem:[#allocation34_spill] sm:$0xff]  ;;  %v8128_v24 = vld [vmem:[#allocation39_spill] sm:$0xff] }
0x11c1   : > { %5420 = vmatpush3.bf16.msra.mxu0 %v4845_v28  ;;  %3745 = vmatprep.subr.bf16.mxu1 %v4847_v32  ;;  %v3486_v13 = vsel %vm3474_vm3, %v7520_v18, %v3485_v52  ;;  %v4862_v51 = vcombine.high %v8127_v22, %v8126_v16  ;;  %v8129_v27 = vld [vmem:[#allocation36_spill] sm:$0xff]  ;;  %v4861_v44 = vcombine.low %v8127_v22, %v8126_v16  ;;  %v8130_v33 = vld [vmem:[#allocation43_spill] sm:$0xff]  ;;  %v8132_v61 = vld [vmem:[#allocation45_spill] sm:$0xff] }
0x11c2   : > { %5421 = vmatprep.subr.bf16.mxu0 %v4850_v2  ;;  %v7552_v29 = vpack.c.bf16 %v3484_v36, %v3486_v13  ;;  %v4865_v30 = vcombine.low %v8129_v27, %v8128_v24  ;;  %v8131_v40 = vld [vmem:[#allocation40_spill] sm:$0xff]  ;;  %v8133_v63 = vld [vmem:[#allocation42_spill] sm:$0xff]  ;;  %v8134_v26 = vld [vmem:[#allocation49_spill] sm:$0xff] }
0x11c3   : > { %v4867_v31 = vcombine.high %v8131_v40, %v8130_v33  ;;  %v4870_v34 = vcombine.low %v8133_v63, %v8132_v61  ;;  %v7571_v38 = vld [vmem:[#allocation2 + $0x10] sm:$0xff]  ;;  %v4866_v42 = vcombine.low %v8131_v40, %v8130_v33  ;;  %v8136_v50 = vld [vmem:[#allocation51_spill] sm:$0xff]  ;;  %v8137_v57 = vld [vmem:[#allocation48_spill] sm:$0xff] }
0x11c4   : > { %3746 = vmatpush1.bf16.msra.mxu1 %v4846_v48  ;;  %5433 = vmatprep.mubr.bf16.mxu0 %v7552_v29  ;;  %v3480_v43 = vrot.slane %v7571_v38, 6  ;;  %v8135_v5 = vld [vmem:[#allocation46_spill] sm:$0xff]  ;;  %v4875_v58 = vcombine.low %v8137_v57, %v8136_v50  ;;  %v8138_v14 = vld [vmem:[#allocation8_spill] sm:$0xff]  ;;  %v8139_v35 = vld [vmem:[#allocation5_spill] sm:$0xff] }
0x11c5   : > { %5422 = vmatpush3.bf16.msra.mxu0 %v4850_v2  ;;  %3747 = vmatprep.subr.bf16.mxu1 %v4852_v20  ;;  %v4872_v53 = vcombine.high %v8135_v5, %v8134_v26  ;;  %v4871_v0 = vcombine.low %v8135_v5, %v8134_v26  ;;  %v4839_v19 = vcombine.high %v8139_v35, %v8138_v14  ;;  %v8140_v25 = vld [vmem:[#allocation55_spill] sm:$0xff]  ;;  %v8141_v28 = vld [vmem:[#allocation52_spill] sm:$0xff]  ;;  %v8142_v56 = vld [vmem:[#allocation14_spill] sm:$0xff] }
0x11c6   : > { %5423 = vmatprep.subr.bf16.mxu0 %v4855_v23  ;;  %v3482_v6 = vsel %vm3474_vm3, %v3480_v43, %v3481_v37  ;;  %v3483_v60 = vsel %vm3474_vm3, %v3479_v11, %v3480_v43  ;;  %v4877_v21 = vcombine.high %v8141_v28, %v8140_v25  ;;  %v4838_v3 = vcombine.low %v8139_v35, %v8138_v14  ;;  %v8143_v8 = vld [vmem:[#allocation11_spill] sm:$0xff]  ;;  %v8144_v59 = vld [vmem:[#allocation61_spill] sm:$0xff]  ;;  %v8145_v11 = vld [vmem:[#allocation58_spill] sm:$0xff] }
0x11c7   : > { %v7590_v1 = vpack.c.bf16 %v3482_v6, %v3483_v60  ;;  %v4876_v32 = vcombine.low %v8141_v28, %v8140_v25  ;;  %v4844_v2 = vcombine.high %v8143_v8, %v8142_v56  ;;  %v4882_v48 = vcombine.high %v8145_v11, %v8144_v59  ;;  %v8146_v55 = vld [vmem:[#allocation20_spill] sm:$0xff]  ;;  %v8147_v20 = vld [vmem:[#allocation17_spill] sm:$0xff]  ;;  %v8148_v46 = vld [vmem:[#allocation67_spill] sm:$0xff] }
0x11c8   : > { %3748 = vmatpush1.bf16.msra.mxu1 %v4851_v15  ;;  %v4843_v37 = vcombine.low %v8143_v8, %v8142_v56  ;;  %v4881_v49 = vcombine.low %v8145_v11, %v8144_v59  ;;  %v4849_v41 = vcombine.high %v8147_v20, %v8146_v55  ;;  %v4848_v52 = vcombine.low %v8147_v20, %v8146_v55  ;;  %v8150_v15 = vld [vmem:[#allocation26_spill] sm:$0xff]  ;;  %v8151_v17 = vld [vmem:[#allocation23_spill] sm:$0xff]  ;;  %v8154_v16 = vld [vmem:[#allocation32_spill] sm:$0xff] }
0x11c9   : > { %5424 = vmatpush3.bf16.msra.mxu0 %v4855_v23  ;;  %3749 = vmatprep.subr.bf16.mxu1 %v4857_v10  ;;  %v8149_v23 = vld [vmem:[#allocation64_spill] sm:$0xff]  ;;  %v4854_v47 = vcombine.high %v8151_v17, %v8150_v15  ;;  %v8152_v10 = vld [vmem:[#allocation73_spill] sm:$0xff]  ;;  %v8153_v54 = vld [vmem:[#allocation70_spill] sm:$0xff]  ;;  %v3506_v6 = vrot.slane %v7520_v18, 2  ;;  %v3507_v35 = vrot.slane %v7524_v39, 2  ;;  %v7671_v55 = vadd.s32 24, %v8117_v45 }
0x11ca   : > { %5425 = vmatprep.subr.bf16.mxu0 %v4860_v9  ;;  %v4887_v36 = vcombine.high %v8149_v23, %v8148_v46  ;;  %v4886_v13 = vcombine.low %v8149_v23, %v8148_v46  ;;  %v4892_v4 = vcombine.high %v8153_v54, %v8152_v10  ;;  %v8155_v22 = vld [vmem:[#allocation29_spill] sm:$0xff]  ;;  %v8156_v24 = vld [vmem:[#allocation79_spill] sm:$0xff]  ;;  %v8157_v27 = vld [vmem:[#allocation76_spill] sm:$0xff]  ;;  %v3509_v20 = vrot.slane %v7530_v7, 2 }
0x11cb   : > { %v4896_v33 = vcombine.low %v8157_v27, %v8156_v24  ;;  %v8158_v40 = vld [vmem:[#allocation38_spill] sm:$0xff]  ;;  %v8160_v63 = vld [vmem:[#allocation85_spill] sm:$0xff]  ;;  %v8162_v5 = vld [vmem:[#allocation44_spill] sm:$0xff]  ;;  %v3513_v8 = vsel %vm3510_vm4, %v3506_v6, %v3507_v35  ;;  %vm3505_vm5 = vcmp.ge.s32.totalorder %v7671_v55, 30 }
0x11cc   : > { %3750 = vmatpush1.bf16.msra.mxu1 %v4856_v12  ;;  %v4891_v12 = vcombine.low %v8153_v54, %v8152_v10  ;;  %v8164_v57 = vld [vmem:[#allocation91_spill] sm:$0xff]  ;;  %v8166_v25 = vld [vmem:[#allocation50_spill] sm:$0xff]  ;;  %v8171_v59 = vld [vmem:[#allocation53_spill] sm:$0xff] }
0x11cd   : > { %5426 = vmatpush3.bf16.msra.mxu0 %v4860_v9  ;;  %3751 = vmatprep.subr.bf16.mxu1 %v4862_v51  ;;  %v4853_v9 = vcombine.low %v8151_v17, %v8150_v15  ;;  %v4859_v51 = vcombine.high %v8155_v22, %v8154_v16  ;;  %v8167_v28 = vld [vmem:[#allocation47_spill] sm:$0xff]  ;;  %v8174_v23 = vld [vmem:[#allocation62_spill] sm:$0xff]  ;;  %v8177_v15 = vld [vmem:[#allocation60_spill] sm:$0xff] }
0x11ce   : > { %5427 = vmatprep.subr.bf16.mxu0 %v4865_v30  ;;  %v4873_v56 = vcombine.low %v8167_v28, %v8166_v25 }
0x11d0   : > { %3752 = vmatpush1.bf16.msra.mxu1 %v4861_v44  ;;  %v4858_v44 = vcombine.low %v8155_v22, %v8154_v16  ;;  %v8180_v22 = vld [vmem:[#allocation69_spill] sm:$0xff] }
0x11d1   : > { %5428 = vmatpush3.bf16.msra.mxu0 %v4865_v30  ;;  %3753 = vmatprep.subr.bf16.mxu1 %v4867_v31  ;;  %v4897_v30 = vcombine.high %v8157_v27, %v8156_v24  ;;  %v8159_v31 = vld [vmem:[#allocation35_spill] sm:$0xff] }
0x11d2   : > { %5429 = vmatprep.subr.bf16.mxu0 %v4870_v34  ;;  %v4864_v61 = vcombine.high %v8159_v31, %v8158_v40  ;;  %v4863_v43 = vcombine.low %v8159_v31, %v8158_v40  ;;  %v8185_v40 = vld [vmem:[#allocation72_spill] sm:$0xff] }
0x11d4   : > { %3754 = vmatpush1.bf16.msra.mxu1 %v4866_v42 }
0x11d5   : > { %5430 = vmatpush3.bf16.msra.mxu0 %v4870_v34  ;;  %3755 = vmatprep.subr.bf16.mxu1 %v4872_v53  ;;  %v8161_v34 = vld [vmem:[#allocation82_spill] sm:$0xff]  ;;  %v8163_v53 = vld [vmem:[#allocation41_spill] sm:$0xff] }
0x11d6   : > { %5431 = vmatprep.subr.bf16.mxu0 %v4875_v58  ;;  %v4902_v42 = vcombine.high %v8161_v34, %v8160_v63  ;;  %v4901_v26 = vcombine.low %v8161_v34, %v8160_v63  ;;  %v4869_v50 = vcombine.high %v8163_v53, %v8162_v5  ;;  %v4868_v60 = vcombine.low %v8163_v53, %v8162_v5  ;;  %v8186_v63 = vld [vmem:[#allocation80_spill] sm:$0xff]  ;;  %v8187_v34 = vld [vmem:[#allocation77_spill] sm:$0xff]  ;;  %v8190_v53 = vld [vmem:[#allocation86_spill] sm:$0xff] }
0x11d8   : > { %3756 = vmatpush1.bf16.msra.mxu1 %v4871_v0 }
0x11d9   : > { %5432 = vmatpush3.bf16.msra.mxu0 %v4875_v58  ;;  %3794 = vmatprep.subr.bf16.mxu1 %v4839_v19  ;;  %v8165_v58 = vld [vmem:[#allocation88_spill] sm:$0xff]  ;;  %v3508_v19 = vrot.slane %v7571_v38, 2 }
0x11da   : > { %4126 = vmatprep.subr.bf16.mxu0 %v4877_v21  ;;  %v4907_v0 = vcombine.high %v8165_v58, %v8164_v57  ;;  %v4906_v14 = vcombine.low %v8165_v58, %v8164_v57  ;;  %v4874_v21 = vcombine.high %v8167_v28, %v8166_v25  ;;  %v8192_v58 = vld [vmem:[#allocation87_spill] sm:$0xff]  ;;  %v8196_v25 = vld [vmem:[#allocation93_spill] sm:$0xff]  ;;  %v8197_v28 = vld [vmem:[#allocation90_spill] sm:$0xff] }
0x11db   : > { %3774 = vmatmul.mubr.bf16.vlgmr.msra.gmra.mrb[0].mxu1 %v7552_v29  ;;  %v3512_v38 = vsel %vm3510_vm4, %v3507_v35, %v3508_v19  ;;  %v3511_v54 = vsel %vm3510_vm4, %v3508_v19, %v3509_v20  ;;  %v8195_v35 = vld [vmem:[#allocation89_spill] sm:$0xff] }
0x11dc   : > { %5434 = vmatmul.mubr.bf16.vlgmr.msra.gmra.mrb[0].mxu0 %v7590_v1  ;;  %3795 = vmatpush1.bf16.msra.mxu1 %v4838_v3  ;;  %v8168_v3 = vld [vmem:[#allocation97_spill] sm:$0xff] }
0x11dd   : > { %4127 = vmatpush1.bf16.msra.mxu0 %v4876_v32  ;;  %3796 = vmatprep.subr.bf16.mxu1 %v4844_v2  ;;  %v8169_v32 = vld [vmem:[#allocation94_spill] sm:$0xff]  ;;  %v8170_v2 = vld [vmem:[#allocation56_spill] sm:$0xff] }
0x11de   : > { %4128 = vmatprep.subr.bf16.mxu0 %v4882_v48  ;;  %3783 = vmatprep.mubr.bf16.mxu1 %v5961_v62  ;;  %v4912_v18 = vcombine.high %v8169_v32, %v8168_v3  ;;  %v4911_v39 = vcombine.low %v8169_v32, %v8168_v3  ;;  %v4879_v11 = vcombine.high %v8171_v59, %v8170_v2  ;;  %v8172_v48 = vld [vmem:[#allocation57_spill] sm:$0xff]  ;;  %v8198_v32 = vld [vmem:[#allocation98_spill] sm:$0xff] }
0x11df   : > { %4158 = vmatprep.mubr.bf16.mxu0 %v5961_v62  ;;  %v4878_v46 = vcombine.low %v8171_v59, %v8170_v2 }
0x11e0   : > { %3797 = vmatpush1.bf16.msra.mxu1 %v4843_v37  ;;  %v8173_v37 = vld [vmem:[#allocation54_spill] sm:$0xff] }
0x11e1   : > { %4129 = vmatpush1.bf16.msra.mxu0 %v4881_v49  ;;  %3798 = vmatprep.subr.bf16.mxu1 %v4849_v41  ;;  %v4880_v49 = vcombine.low %v8173_v37, %v8172_v48  ;;  %v7674_v41 = vpack.c.bf16 %v3512_v38, %v3513_v8  ;;  %v8201_v38 = vld [vmem:[#allocation96_spill] sm:$0xff] }
0x11e2   : > { %4130 = vmatprep.subr.bf16.mxu0 %v4887_v36  ;;  %v8175_v36 = vld [vmem:[#allocation59_spill] sm:$0xff] }
0x11e3   : > { %3784 = vmatmul.mubr.bf16.gmra.mrb[4].mxu1 %v7590_v1  ;;  %v4883_v10 = vcombine.low %v8175_v36, %v8174_v23 }
0x11e4   : > { %3799 = vmatpush1.bf16.msra.mxu1 %v4848_v52  ;;  %3826 = vmatprep.mubr.bf16.mxu1 %v5961_v62  ;;  %v4884_v52 = vcombine.high %v8175_v36, %v8174_v23  ;;  %v8202_v36 = vld [vmem:[#allocation101_spill] sm:$0xff] }
0x11e5   : > { %4131 = vmatpush1.bf16.msra.mxu0 %v4886_v13  ;;  %3800 = vmatprep.subr.bf16.mxu1 %v4854_v47  ;;  %v8176_v13 = vld [vmem:[#allocation63_spill] sm:$0xff]  ;;  %v3514_v47 = vsel %vm3510_vm4, %v3509_v20, %v3506_v6 }
0x11e6   : > { %4132 = vmatprep.subr.bf16.mxu0 %v4892_v4  ;;  %v4885_v17 = vcombine.low %v8177_v15, %v8176_v13  ;;  %v3518_v4 = vsel %vm3505_vm5, %v7530_v7, %v3514_v47  ;;  %v8182_v7 = vld [vmem:[#allocation74_spill] sm:$0xff]  ;;  %v8204_v47 = vld [vmem:[#allocation103_spill] sm:$0xff] }
0x11e7   : > { %v3917_v24 = vpack.c.bf16 %v3518_v4, %v3511_v54  ;;  %v8203_v13 = vld [vmem:[#allocation102_spill] sm:$0xff]  ;;  %v8205_v4 = vld [vmem:[#allocation104_spill] sm:$0xff] }
0x11e8   : > { %3801 = vmatpush1.bf16.msra.mxu1 %v4853_v9  ;;  %v8178_v9 = vld [vmem:[#allocation68_spill] sm:$0xff] }
0x11e9   : > { %4133 = vmatpush1.bf16.msra.mxu0 %v4891_v12  ;;  %3802 = vmatprep.subr.bf16.mxu1 %v4859_v51  ;;  %v8179_v12 = vld [vmem:[#allocation65_spill] sm:$0xff]  ;;  %v8181_v51 = vld [vmem:[#allocation66_spill] sm:$0xff] }
0x11ea   : > { %4134 = vmatprep.subr.bf16.mxu0 %v4897_v30  ;;  %v4889_v16 = vcombine.high %v8179_v12, %v8178_v9  ;;  %v4888_v27 = vcombine.low %v8179_v12, %v8178_v9  ;;  %v8183_v30 = vld [vmem:[#allocation71_spill] sm:$0xff] }
0x11ec   : > { %3803 = vmatpush1.bf16.msra.mxu1 %v4858_v44  ;;  %v4894_v44 = vcombine.high %v8183_v30, %v8182_v7 }
0x11ed   : > { %4135 = vmatpush1.bf16.msra.mxu0 %v4896_v33  ;;  %3804 = vmatprep.subr.bf16.mxu1 %v4864_v61  ;;  %v8184_v33 = vld [vmem:[#allocation75_spill] sm:$0xff]  ;;  %v4893_v61 = vcombine.low %v8183_v30, %v8182_v7 }
0x11ee   : > { %4136 = vmatprep.subr.bf16.mxu0 %v4902_v42  ;;  %v4895_v31 = vcombine.low %v8185_v40, %v8184_v33  ;;  %v4899_v42 = vcombine.high %v8187_v34, %v8186_v63  ;;  %v8208_v33 = vld [vmem:[#allocation111_spill] sm:$0xff] }
0x11f0   : > { %3805 = vmatpush1.bf16.msra.mxu1 %v4863_v43  ;;  %v8188_v43 = vld [vmem:[#allocation81_spill] sm:$0xff] }
0x11f1   : > { %4137 = vmatpush1.bf16.msra.mxu0 %v4901_v26  ;;  %3806 = vmatprep.subr.bf16.mxu1 %v4869_v50  ;;  %v8189_v26 = vld [vmem:[#allocation78_spill] sm:$0xff]  ;;  %v8191_v50 = vld [vmem:[#allocation83_spill] sm:$0xff] }
0x11f2   : > { %4138 = vmatprep.subr.bf16.mxu0 %v4907_v0  ;;  %v4900_v5 = vcombine.low %v8189_v26, %v8188_v43  ;;  %v4904_v57 = vcombine.high %v8191_v50, %v8190_v53  ;;  %v8193_v0 = vld [vmem:[#allocation84_spill] sm:$0xff] }
0x11f3   : > { %v4905_v6 = vcombine.low %v8193_v0, %v8192_v58 }
0x11f4   : > { %3807 = vmatpush1.bf16.msra.mxu1 %v4868_v60  ;;  %v4903_v60 = vcombine.low %v8191_v50, %v8190_v53 }
0x11f5   : > { %4139 = vmatpush1.bf16.msra.mxu0 %v4906_v14  ;;  %3808 = vmatprep.subr.bf16.mxu1 %v4874_v21  ;;  %v8194_v14 = vld [vmem:[#allocation92_spill] sm:$0xff]  ;;  %v4910_v21 = vcombine.low %v8197_v28, %v8196_v25 }
0x11f6   : > { %4140 = vmatprep.subr.bf16.mxu0 %v4912_v18  ;;  %v4909_v19 = vcombine.high %v8195_v35, %v8194_v14  ;;  %v4908_v3 = vcombine.low %v8195_v35, %v8194_v14  ;;  %v8199_v18 = vld [vmem:[#allocation95_spill] sm:$0xff] }
0x11f7   : > { %v4913_v2 = vcombine.low %v8199_v18, %v8198_v32 }
0x11f8   : > { %3809 = vmatpush1.bf16.msra.mxu1 %v4873_v56  ;;  %v4914_v56 = vcombine.high %v8199_v18, %v8198_v32 }
0x11f9   : > { %4141 = vmatpush1.bf16.msra.mxu0 %v4911_v39  ;;  %4179 = vmatprep.subr.bf16.mxu1 %v4879_v11  ;;  %v8200_v39 = vld [vmem:[#allocation99_spill] sm:$0xff] }
0x11fa   : > { %5437 = vmatprep.subr.bf16.mxu0 %v4880_v49  ;;  %v4915_v8 = vcombine.low %v8201_v38, %v8200_v39 }
0x11fb   : > { %3827 = vmatmul.mubr.bf16.vlgmr.msra.gmra.mrb[8].mxu1 %v7552_v29  ;;  %v4890_v29 = vcombine.low %v8181_v51, %v8180_v22 }
0x11fc   : > { %4159 = vmatmul.mubr.bf16.vlgmr.msra.gmra.mrb[4].mxu0 %v7674_v41  ;;  %4180 = vmatpush1.bf16.msra.mxu1 %v4878_v46 }
0x11fd   : > { %5438 = vmatpush3.bf16.msra.mxu0 %v4880_v49  ;;  %4181 = vmatprep.subr.bf16.mxu1 %v4884_v52 }
0x11fe   : > { %5439 = vmatprep.subr.bf16.mxu0 %v4885_v17  ;;  %4168 = vmatprep.mubr.bf16.mxu0 %v5961_v62 }
0x11ff   : > { %3836 = vmatprep.mubr.bf16.mxu1 %v5961_v62 }
0x1200   : > { %4182 = vmatpush1.bf16.msra.mxu1 %v4883_v10 }
0x1201   : > { %5440 = vmatpush3.bf16.msra.mxu0 %v4885_v17  ;;  %4183 = vmatprep.subr.bf16.mxu1 %v4889_v16 }
0x1202   : > { %5441 = vmatprep.subr.bf16.mxu0 %v4890_v29 }
0x1203   : > { %3837 = vmatmul.mubr.bf16.gmra.mrb[12].mxu1 %v7590_v1  ;;  %v4898_v1 = vcombine.low %v8187_v34, %v8186_v63  ;;  %v8209_v34 = vld [vmem:[#allocation112_spill] sm:$0xff] }
0x1204   : > { %4169 = vmatmul.mubr.bf16.gmra.mrb[8].mxu0 %v3917_v24  ;;  %4184 = vmatpush1.bf16.msra.mxu1 %v4888_v27  ;;  %v8207_v27 = vld [vmem:[#allocation109_spill] sm:$0xff] }
0x1205   : > { %5442 = vmatpush3.bf16.msra.mxu0 %v4890_v29  ;;  %4185 = vmatprep.subr.bf16.mxu1 %v4894_v44  ;;  %v8206_v29 = vld [vmem:[#allocation107_spill] sm:$0xff] }
0x1206   : > { %5443 = vmatprep.subr.bf16.mxu0 %v4895_v31  ;;  %4211 = vmatprep.mubr.bf16.mxu1 %v5961_v62 }
0x1207   : > { %5453 = vmatprep.mubr.bf16.mxu0 %v7674_v41 }
0x1208   : > { %4186 = vmatpush1.bf16.msra.mxu1 %v4893_v61 }
0x1209   : > { %5444 = vmatpush3.bf16.msra.mxu0 %v4895_v31  ;;  %4187 = vmatprep.subr.bf16.mxu1 %v4899_v42 }
0x120a   : > { %5445 = vmatprep.subr.bf16.mxu0 %v4900_v5 }
0x120c   : > { %4188 = vmatpush1.bf16.msra.mxu1 %v4898_v1 }
0x120d   : > { %5446 = vmatpush3.bf16.msra.mxu0 %v4900_v5  ;;  %4189 = vmatprep.subr.bf16.mxu1 %v4904_v57 }
0x120e   : > { %5447 = vmatprep.subr.bf16.mxu0 %v4905_v6 }
0x1210   : > { %4190 = vmatpush1.bf16.msra.mxu1 %v4903_v60 }
0x1211   : > { %5448 = vmatpush3.bf16.msra.mxu0 %v4905_v6  ;;  %4191 = vmatprep.subr.bf16.mxu1 %v4909_v19 }
0x1212   : > { %5449 = vmatprep.subr.bf16.mxu0 %v4910_v21 }
0x1214   : > { %4192 = vmatpush1.bf16.msra.mxu1 %v4908_v3 }
0x1215   : > { %5450 = vmatpush3.bf16.msra.mxu0 %v4910_v21  ;;  %4193 = vmatprep.subr.bf16.mxu1 %v4914_v56 }
0x1216   : > { %5451 = vmatprep.subr.bf16.mxu0 %v4915_v8 }
0x1218   : > { %4194 = vmatpush1.bf16.msra.mxu1 %v4913_v2 }
0x1219   : > { %5452 = vmatpush3.bf16.msra.mxu0 %v4915_v8 }
0x121b   : > { %4212 = vmatmul.mubr.bf16.vlgmr.msra.gmra.mrb[8].mxu1 %v7674_v41 }
0x121c   : > { %5454 = vmatmul.mubr.bf16.vlgmr.msra.gmra.mrb[0].mxu0 %v3917_v24  ;;  %4221 = vmatprep.mubr.bf16.mxu1 %v5961_v62 }
0x1223   : > { %4222 = vmatmul.mubr.bf16.gmra.mrb[12].mxu1 %v3917_v24 }
0x12ae   : > { %v3775_v59 = vpop.f32.mrb[0].mxu1 }
0x12af   : > { %v3777_v11 = vpop.f32.mrb[1].mxu1  ;;  %v3896_v52 = vadd.f32 %v3775_v59, %v8202_v36 }
0x12b0   : > { %v3779_v48 = vpop.f32.mrb[2].mxu1  ;;  %v3897_v15 = vadd.f32 %v3777_v11, %v8203_v13  ;;  %v7745_v11 = vld [vmem:[#allocation3] sm:$0xff] }
0x12b1   : > { %v3781_v37 = vpop.f32.mrb[3].mxu1  ;;  %v3901_v10 = vadd.f32 %v3779_v48, %v8204_v47  ;;  %v7747_v48 = vld [vmem:[#allocation3 + $0x18] sm:$0xff] }
0x12b2   : > { %v3902_v62 = vadd.f32 %v3781_v37, %v8205_v4  ;;  %v8210_v37 = vld [vmem:[#allocation105_spill] sm:$0xff] }
0x12b6   : > { %v3785_v49 = vpop.f32.mrb[4].mxu1 }
0x12b7   : > { %v3787_v20 = vpop.f32.mrb[5].mxu1  ;;  %v3906_v24 = vadd.f32 %v3785_v49, %v8206_v29 }
0x12b8   : > { %v3789_v46 = vpop.f32.mrb[6].mxu1  ;;  %v3907_v7 = vadd.f32 %v3787_v20, %v8207_v27  ;;  %v8211_v20 = vld [vmem:[#allocation116_spill] sm:$0xff] }
0x12b9   : > { %v3791_v23 = vpop.f32.mrb[7].mxu1  ;;  %v3911_v40 = vadd.f32 %v3789_v46, %v8208_v33  ;;  %v8216_v33 = vld [vmem:[#allocation120_spill] sm:$0xff] }
0x12ba   : > { %v3912_v42 = vadd.f32 %v3791_v23, %v8209_v34 }
0x12cf   : > { %v4160_v17 = vpop.f32.mrb[4].mxu0 }
0x12d0   : > { %v4281_v41 = vadd.f32 %v4160_v17, %v3896_v52  ;;  %v4162_v54 = vpop.f32.mrb[5].mxu0 }
0x12d1   : > { %v4282_v9 = vadd.f32 %v4162_v54, %v3897_v15  ;;  %v4164_v12 = vpop.f32.mrb[6].mxu0  ;;  %v8212_v15 = vld [vmem:[#allocation118_spill] sm:$0xff]  ;;  %v8213_v54 = vld [vmem:[#allocation108_spill] sm:$0xff] }
0x12d2   : > { %v4286_v16 = vadd.f32 %v4164_v12, %v3901_v10  ;;  %v4166_v22 = vpop.f32.mrb[7].mxu0  ;;  %v4916_v30 = vmul.f32 -1.442695, %v4281_v41  ;;  %v3493_v12 = vrot.slane %v7747_v48, 6 }
0x12d3   : > { %v4287_v51 = vadd.f32 %v4166_v22, %v3902_v62  ;;  %v4920_v31 = vmul.f32 -1.442695, %v4282_v9  ;;  %v7755_v22 = vld [vmem:[#allocation3 + $0x10] sm:$0xff] }
0x12d4   : > { %5829 = vpow2.f32 %v4916_v30  ;;  %v4917_v60 = vmul.f32 -1.442695, %v4286_v16  ;;  %v3490_v16 = vrot.slane %v7745_v11, 6  ;;  %v8215_v30 = vld [vmem:[#allocation106_spill] sm:$0xff] }
0x12d5   : > { %v4921_v43 = vmul.f32 -1.442695, %v4287_v51  ;;  %5831 = vpow2.f32 %v4920_v31  ;;  %v8214_v51 = vld [vmem:[#allocation119_spill] sm:$0xff] }
0x12d6   : > { %v3497_v34 = vsel %vm3474_vm3, %v3493_v12, %v3490_v16 }
0x12d7   : > { %v4170_v44 = vpop.f32.mrb[8].mxu0  ;;  %5833 = vpow2.f32 %v4921_v43 }
0x12d8   : > { %v4291_v61 = vadd.f32 %v4170_v44, %v3906_v24  ;;  %v4172_v63 = vpop.f32.mrb[9].mxu0 }
0x12d9   : > { %v4292_v26 = vadd.f32 %v4172_v63, %v3907_v7  ;;  %v4174_v5 = vpop.f32.mrb[10].mxu0  ;;  %v7758_v7 = vld [vmem:[#allocation3 + $0x8] sm:$0xff] }
0x12da   : > { %v4918_v1 = vmul.f32 -1.442695, %v4291_v61  ;;  %v4296_v53 = vadd.f32 %v4174_v5, %v3911_v40  ;;  %v4176_v50 = vpop.f32.mrb[11].mxu0  ;;  %v3492_v61 = vrot.slane %v7755_v22, 6  ;;  %v8217_v5 = vld [vmem:[#allocation110_spill] sm:$0xff] }
0x12db   : > { %v4922_v57 = vmul.f32 -1.442695, %v4292_v26  ;;  %v4297_v58 = vadd.f32 %v4176_v50, %v3912_v42  ;;  %v3491_v26 = vrot.slane %v7758_v7, 6 }
0x12dc   : > { %v4919_v0 = vmul.f32 -1.442695, %v4296_v53  ;;  %5835 = vpow2.f32 %v4918_v1  ;;  %v8218_v53 = vld [vmem:[#allocation113_spill] sm:$0xff] }
0x12dd   : > { %5837 = vpow2.f32 %v4922_v57  ;;  %v4923_v6 = vmul.f32 -1.442695, %v4297_v58 }
0x12de   : > { %5839 = vpow2.f32 %v4919_v0  ;;  %v5830_v14 = vpop.eup %5829 }
0x12df   : > { %5841 = vpow2.f32 %v4923_v6  ;;  %v5832_v35 = vpop.eup %5831  ;;  %v4313_v28 = vadd.f32 1.0, %v5830_v14  ;;  %v3495_v14 = vsel %vm3474_vm3, %v3491_v26, %v3492_v61 }
0x12e0   : > { %5843 = vpow2.f32 %v4917_v60  ;;  %v4337_v3 = vadd.f32 1.0, %v5832_v35 }
0x12e1   : > { %v5834_v19 = vpop.eup %5833  ;;  %5845 = vrcp.f32 %v4313_v28 }
0x12e2   : > { %v4338_v18 = vadd.f32 1.0, %v5834_v19  ;;  %5847 = vrcp.f32 %v4337_v3  ;;  %v8219_v19 = vld [vmem:[#allocation115_spill] sm:$0xff]  ;;  %v3498_v3 = vsel %vm3474_vm3, %v7745_v11, %v3497_v34 }
0x12e4   : > { %5849 = vrcp.f32 %v4338_v18 }
0x12e6   : > { %v5836_v25 = vpop.eup %5835 }
0x12e7   : > { %v5838_v21 = vpop.eup %5837  ;;  %v4315_v56 = vadd.f32 1.0, %v5836_v25 }
0x12e8   : > { %v5840_v32 = vpop.eup %5839  ;;  %v4339_v39 = vadd.f32 1.0, %v5838_v21 }
0x12e9   : > { %v4316_v38 = vadd.f32 1.0, %v5840_v32  ;;  %v5842_v8 = vpop.eup %5841  ;;  %5851 = vrcp.f32 %v4315_v56 }
0x12ea   : > { %5853 = vrcp.f32 %v4339_v39  ;;  %v5844_v52 = vpop.eup %5843  ;;  %v4340_v13 = vadd.f32 1.0, %v5842_v8 }
0x12eb   : > { %5855 = vrcp.f32 %v4316_v38  ;;  %v4314_v24 = vadd.f32 1.0, %v5844_v52  ;;  %v5846_v31 = vpop.eup %5845 }
0x12ec   : > { %v5848_v63 = vpop.eup %5847 }
0x12ee   : > { %v4213_v2 = vpop.f32.mrb[8].mxu1  ;;  %v5850_v43 = vpop.eup %5849 }
0x12ef   : > { %v5455_v59 = vpop.f32.mrb[0].mxu0  ;;  %v5493_v49 = vadd.f32 %v4213_v2, %v8210_v37  ;;  %v4215_v23 = vpop.f32.mrb[9].mxu1 }
0x12f0   : > { %v5501_v46 = vadd.f32 %v5455_v59, %v8211_v20  ;;  %v4266_v36 = vpop.f32.mrb[1].mxu0  ;;  %v4217_v47 = vpop.f32.mrb[10].mxu1  ;;  %v5494_v44 = vadd.f32 %v4215_v23, %v8215_v30  ;;  %v4377_v59 = vmul.f32 %v5848_v63, %v3498_v3  ;;  %v3494_v23 = vsel %vm3474_vm3, %v3492_v61, %v3493_v12 }
0x12f1   : > { %v5502_v17 = vadd.f32 %v4266_v36, %v8212_v15  ;;  %v5456_v10 = vpop.f32.mrb[2].mxu0  ;;  %v4928_v41 = vmul.f32 -1.442695, %v5493_v49  ;;  %v5495_v4 = vadd.f32 %v4217_v47, %v8213_v54  ;;  %v4219_v62 = vpop.f32.mrb[11].mxu1  ;;  %v8220_v49 = vld [vmem:[#allocation114_spill] sm:$0xff]  ;;  %v3496_v54 = vsel %vm3474_vm3, %v3490_v16, %v3491_v26 }
0x12f2   : > { %5857 = vtanh.f32 %v5501_v46  ;;  %v4269_v9 = vpop.f32.mrb[3].mxu0  ;;  %v5503_v29 = vadd.f32 %v5456_v10, %v8214_v51  ;;  %v5496_v1 = vadd.f32 %v4219_v62, %v8217_v5  ;;  %v4924_v0 = vmul.f32 -1.442695, %v5494_v44 }
0x12f3   : > { %5859 = vtanh.f32 %v5502_v17  ;;  %v4929_v27 = vmul.f32 -1.442695, %v5495_v4  ;;  %v5504_v40 = vadd.f32 %v4269_v9, %v8216_v33  ;;  %v5852_v58 = vpop.eup %5851  ;;  %v8221_v17 = vld [vmem:[#allocation117_spill] sm:$0xff]  ;;  %v3519_v44 = vrot.slane %v7745_v11, 2 }
0x12f4   : > { %5861 = vpow2.f32 %v4928_v41  ;;  %v5854_v60 = vpop.eup %5853  ;;  %v4925_v18 = vmul.f32 -1.442695, %v5496_v1  ;;  %v3520_v33 = vrot.slane %v7758_v7, 2  ;;  %v3521_v16 = vrot.slane %v7755_v22, 2 }
0x12f5   : > { %5863 = vrcp.f32 %v4340_v13  ;;  %v5856_v21 = vpop.eup %5855  ;;  %v4379_v38 = vmul.f32 %v5854_v60, %v3495_v14  ;;  %v3522_v7 = vrot.slane %v7747_v48, 2 }
0x12f6   : > { %5865 = vpow2.f32 %v4929_v27  ;;  %v4223_v42 = vpop.f32.mrb[12].mxu1  ;;  %v3524_v11 = vsel %vm3510_vm4, %v3520_v33, %v3521_v16 }
0x12f7   : > { %5867 = vtanh.f32 %v5503_v29  ;;  %v5497_v50 = vadd.f32 %v4223_v42, %v8218_v53  ;;  %v4225_v57 = vpop.f32.mrb[13].mxu1  ;;  %v3525_v42 = vsel %vm3510_vm4, %v3519_v44, %v3520_v33  ;;  %v3523_v14 = vsel %vm3510_vm4, %v3521_v16, %v3522_v7 }
0x12f8   : > { %5869 = vrcp.f32 %v4314_v24  ;;  %v4227_v6 = vpop.f32.mrb[14].mxu1  ;;  %v5498_v20 = vadd.f32 %v4225_v57, %v8220_v49  ;;  %v4378_v24 = vmul.f32 %v5850_v43, %v3496_v54 }
0x12f9   : > { %5871 = vtanh.f32 %v5504_v40  ;;  %v4930_v35 = vmul.f32 -1.442695, %v5497_v50  ;;  %v5499_v25 = vadd.f32 %v4227_v6, %v8219_v19  ;;  %v4229_v28 = vpop.f32.mrb[15].mxu1  ;;  %v3526_v6 = vsel %vm3510_vm4, %v3522_v7, %v3519_v44 }
0x12fa   : > { %v5500_v47 = vadd.f32 %v4229_v28, %v8221_v17  ;;  %v4926_v51 = vmul.f32 -1.442695, %v5498_v20 }
0x12fb   : > { %5873 = vpow2.f32 %v4930_v35  ;;  %v4931_v56 = vmul.f32 -1.442695, %v5499_v25  ;;  %v3530_v25 = vsel %vm3505_vm5, %v7747_v48, %v3526_v6 }
0x12fc   : > { %v5858_v32 = vpop.eup %5857  ;;  %5875 = vpow2.f32 %v4924_v0  ;;  %v4927_v30 = vmul.f32 -1.442695, %v5500_v47 }
0x12fd   : > { %v5860_v39 = vpop.eup %5859  ;;  %v4383_v8 = vmul.f32 %v5858_v32, %v5852_v58  ;;  %5877 = vpow2.f32 %v4931_v56 }
0x12fe   : > { %v5862_v2 = vpop.eup %5861  ;;  %v4381_v37 = vmul.f32 %v5860_v39, %v5846_v31  ;;  %5879 = vpow2.f32 %v4925_v18 }
0x12ff   : > { %v5864_v46 = vpop.eup %5863  ;;  %v4401_v36 = vadd.f32 1.0, %v5862_v2  ;;  %v4387_v52 = vadd.f32 %v4383_v8, %v4379_v38 }
0x1300   : > { %v5866_v13 = vpop.eup %5865  ;;  %v4385_v15 = vadd.f32 %v4381_v37, %v4377_v59  ;;  %v4380_v62 = vmul.f32 %v5864_v46, %v3494_v23 }
0x1301   : > { %v5868_v10 = vpop.eup %5867  ;;  %5881 = vrcp.f32 %v4401_v36  ;;  %v4402_v41 = vadd.f32 1.0, %v5866_v13 }
0x1302   : > { %v5870_v4 = vpop.eup %5869  ;;  %v4384_v9 = vmul.f32 %v5868_v10, %v5856_v21 }
0x1303   : > { %v5872_v29 = vpop.eup %5871  ;;  %5883 = vrcp.f32 %v4402_v41 }
0x1304   : > { %v4388_v12 = vadd.f32 %v4384_v9, %v4380_v62  ;;  %v4382_v27 = vmul.f32 %v5872_v29, %v5870_v4  ;;  %5885 = vpow2.f32 %v4926_v51 }
0x1305   : > { %v5874_v40 = vpop.eup %5873  ;;  %5887 = vpow2.f32 %v4927_v30 }
0x1306   : > { %v4386_v31 = vadd.f32 %v4382_v27, %v4378_v24  ;;  %v5876_v61 = vpop.eup %5875  ;;  %v4403_v63 = vadd.f32 1.0, %v5874_v40 }
0x1307   : > { %v5878_v34 = vpop.eup %5877  ;;  %v4361_v1 = vadd.f32 1.0, %v5876_v61 }
0x1308   : > { %5889 = vrcp.f32 %v4403_v63  ;;  %v4404_v43 = vadd.f32 1.0, %v5878_v34  ;;  %v5880_v26 = vpop.eup %5879 }
0x1309   : > { %v4362_v22 = vadd.f32 1.0, %v5880_v26 }
0x130a   : > { %5891 = vrcp.f32 %v4404_v43 }
0x130b   : > { %v5882_v5 = vpop.eup %5881  ;;  %5893 = vrcp.f32 %v4361_v1 }
0x130c   : > { %v4413_v53 = vmul.f32 %v5882_v5, %v3525_v42 }
0x130d   : > { %v5884_v50 = vpop.eup %5883 }
0x130e   : > { %v4417_v57 = vadd.f32 %v4413_v53, %v4385_v15  ;;  %v4414_v58 = vmul.f32 %v5884_v50, %v3524_v11  ;;  %v5886_v0 = vpop.eup %5885 }
0x130f   : > { %v5888_v35 = vpop.eup %5887  ;;  %v4363_v28 = vadd.f32 1.0, %v5886_v0 }
0x1310   : > { %5895 = vtanh.f32 %v4417_v57  ;;  %4433 = vst [vmem:[#allocation3] sm:$0xff] %v4417_v57  ;;  %v4418_v60 = vadd.f32 %v4414_v58, %v4386_v31  ;;  %v4364_v32 = vadd.f32 1.0, %v5888_v35 }
0x1311   : > { %5897 = vrcp.f32 %v4362_v22 }
0x1312   : > { %5899 = vtanh.f32 %v4418_v60  ;;  %4434 = vst [vmem:[#allocation3 + $0x8] sm:$0xff] %v4418_v60  ;;  %v5890_v19 = vpop.eup %5889 }
0x1313   : > { %v4415_v21 = vmul.f32 %v5890_v19, %v3523_v14  ;;  %5901 = vrcp.f32 %v4363_v28 }
0x1314   : > { %v5892_v3 = vpop.eup %5891 }
0x1315   : > { %v4419_v18 = vadd.f32 %v4415_v21, %v4387_v52  ;;  %v4416_v56 = vmul.f32 %v5892_v3, %v3530_v25  ;;  %v5894_v45 = vpop.eup %5893 }
0x1317   : > { %5903 = vtanh.f32 %v4419_v18  ;;  %4435 = vst [vmem:[#allocation3 + $0x10] sm:$0xff] %v4419_v18  ;;  %v4420_v39 = vadd.f32 %v4416_v56, %v4388_v12 }
0x1318   : > { %5905 = vrcp.f32 %v4364_v32 }
0x1319   : > { %5907 = vtanh.f32 %v4420_v39  ;;  %4436 = vst [vmem:[#allocation3 + $0x18] sm:$0xff] %v4420_v39 }
0x131a   : > { %v5896_v38 = vpop.eup %5895 }
0x131b   : > { %v5898_v8 = vpop.eup %5897  ;;  %v4425_v2 = vmul.f32 %v5896_v38, %v5894_v45 }
0x131c   : > { %v5900_v59 = vpop.eup %5899 }
0x131d   : > { %4429 = vst [vmem:[#allocation2] sm:$0xff] %v4425_v2  ;;  %v4426_v55 = vmul.f32 %v5900_v59, %v5898_v8  ;;  %v5902_v48 = vpop.eup %5901 }
0x131f   : > { %4430 = vst [vmem:[#allocation2 + $0x8] sm:$0xff] %v4426_v55 }
0x1321   : > { %v5904_v37 = vpop.eup %5903 }
0x1322   : > { %v5906_v49 = vpop.eup %5905  ;;  %v4427_v20 = vmul.f32 %v5904_v37, %v5902_v48 }
0x1323   : > { %v5908_v46 = vpop.eup %5907 }
0x1324   : > { %4431 = vst [vmem:[#allocation2 + $0x10] sm:$0xff] %v4427_v20  ;;  %v4428_v23 = vmul.f32 %v5908_v46, %v5906_v49 }
0x1326   : > { %4432 = vst [vmem:[#allocation2 + $0x18] sm:$0xff] %v4428_v23 }
0x1327 PF: > { %v5909_v36 = vld [vmem:[%s6068_s18] sm:$0xff]   ;;  %v5910_v52 = vld [vmem:[%s6068_s18 + $0x8] sm:$0xff]   ;;  %v5911_v13 = vld [vmem:[%s6068_s18 + $0x10] sm:$0xff]  }
0x1328   : > { %5457 = vmatprep.subr.bf16.mxu0 %v5909_v36  ;;  %v5912_v15 = vld [vmem:[%s6068_s18 + $0x18] sm:$0xff]   ;;  %v4453_v17 = vld [vmem:[#allocation2] sm:$0xff]  ;;  %v4454_v47 = vld [vmem:[#allocation2 + $0x8] sm:$0xff] }
0x1329   : > { %5458 = vmatpush3.bf16.msra.mxu0 %v5909_v36  ;;  %v4457_v10 = vpack.c.bf16 %v4454_v47, %v4453_v17  ;;  %v5913_v41 = vld [vmem:[%s6068_s18 + $0x20] sm:$0xff]   ;;  %v5914_v54 = vld [vmem:[%s6068_s18 + $0x28] sm:$0xff]   ;;  %v5915_v4 = vld [vmem:[%s6068_s18 + $0x30] sm:$0xff]  }
0x132a   : > { %5459 = vmatprep.subr.bf16.mxu0 %v5910_v52  ;;  %v5916_v62 = vld [vmem:[%s6068_s18 + $0x38] sm:$0xff]  }
0x132b   : > { %5473 = vmatprep.mubr.bf16.mxu0 %v4457_v10  ;;  %v4455_v9 = vld [vmem:[#allocation2 + $0x10] sm:$0xff] }
0x132d   : > { %5460 = vmatpush3.bf16.msra.mxu0 %v5910_v52  ;;  %v4456_v51 = vld [vmem:[#allocation2 + $0x18] sm:$0xff] }
0x132e   : > { %5461 = vmatprep.subr.bf16.mxu0 %v5911_v13  ;;  %v4458_v29 = vpack.c.bf16 %v4456_v51, %v4455_v9 }
0x1331   : > { %5462 = vmatpush3.bf16.msra.mxu0 %v5911_v13 }
0x1332   : > { %5463 = vmatprep.subr.bf16.mxu0 %v5912_v15 }
0x1335   : > { %5464 = vmatpush3.bf16.msra.mxu0 %v5912_v15 }
0x1336   : > { %5465 = vmatprep.subr.bf16.mxu0 %v5913_v41 }
0x1339   : > { %5466 = vmatpush3.bf16.msra.mxu0 %v5913_v41 }
0x133a   : > { %5467 = vmatprep.subr.bf16.mxu0 %v5914_v54 }
0x133d   : > { %5468 = vmatpush3.bf16.msra.mxu0 %v5914_v54 }
0x133e   : > { %5469 = vmatprep.subr.bf16.mxu0 %v5915_v4 }
0x1341   : > { %5470 = vmatpush3.bf16.msra.mxu0 %v5915_v4 }
0x1342   : > { %5471 = vmatprep.subr.bf16.mxu0 %v5916_v62 }
0x1345   : > { %5472 = vmatpush3.bf16.msra.mxu0 %v5916_v62 }
0x1348   : > { %5474 = vmatmul.mubr.bf16.vlgmr.msra.gmra.mrb[0].mxu0 %v4458_v29 }
0x141b   : > { %v5475_v12 = vpop.f32.mrb[0].mxu0 }
0x141c   : > { %4558 = vst [vmem:[%s6094_s29 + $0x10] sm:$0xff] %v5475_v12  ;;  %v4541_v24 = vpop.f32.mrb[1].mxu0 }
0x141d   : > { %4556 = vst [vmem:[%s6094_s29] sm:$0xff] %v4541_v24  ;;  %v5476_v27 = vpop.f32.mrb[2].mxu0 }
0x141e   : > { %4559 = vst [vmem:[%s6094_s29 + $0x18] sm:$0xff] %v5476_v27  ;;  %v4544_v30 = vpop.f32.mrb[3].mxu0 }
0x141f   : > { %4557 = vst [vmem:[%s6094_s29 + $0x8] sm:$0xff] %v4544_v30 }
0x1420 PF: > { %s16_s25 = sadd.s32 1, %s5955_s25   ;;  %s8222_s21 = smov %s5947_s23 }
0x1421   : > { %p13_p9 = scmp.ge.s32.totalorder %s16_s25, 34   ;;  %s8223_s22 = smov %s5951_s24 }
0x1422   : > { %s8224_s23 = smov %s8227_s26  ;;  %s8225_s24 = smov %s8231_s27 }
0x1423   :  { %15 = sbr.rel (!%p13_p9) target bundleno = 3 (0x3), region = 97 }

// kernel: pyramid_model_forward.3
= control target key start
LH: loop header
LB: loop body
LE: loop exit
PB: predicated region body
PF: predicated region fallthrough
CT: control target
= control target key end

     0   :  { %s6137_s21 = smov 0   ;;  %s6139_s22 = smov 0   ;;  %s7969_s0 = inlined_call_operand.vmem [shape: bf16[2,16,32,64], index: 0, kind: input, shape index: {}]   ;;  %s7970_s1 = inlined_call_operand.vmem [shape: bf16[2,64,640], index: 1, kind: input, shape index: {}]   ;;  %s7971_s2 = inlined_call_operand.vmem [shape: f32[2,1,640], index: 2, kind: input, shape index: {}]   ;;  %s7972_s3 = inlined_call_operand.vmem [shape: bf16[2,128,640], index: 3, kind: input, shape index: {}]   ;;  %s7973_s4 = inlined_call_operand.vmem [shape: bf16[2,128,640], index: 4, kind: input, shape index: {}]   ;;  %s7974_s5 = inlined_call_operand.vmem [shape: bf16[2,128,128], index: 5, kind: input, shape index: {}]   ;;  %s7975_s6 = inlined_call_operand.vmem [shape: f32[2,16,32,128], index: 6, kind: output, shape index: {}]  }
   0x1   :  { %s6141_s23 = smov 0   ;;  %s6143_s24 = smov 0  }
   0x2   :  { %s6145_s25 = smov 0  }
   0x3 LB: > { %s25_s26 = sadd.s32 1, %s6087_s23  ;;  %s28_s27 = sadd.s32 1, %s6091_s24  ;;  %s6095_s25 = sphi %s6145_s25, %s16_s25   ;;  %s6091_s24 = sphi %s6143_s24, %s8372_s24   ;;  %s6087_s23 = sphi %s6141_s23, %s8371_s23   ;;  %s6083_s22 = sphi %s6139_s22, %s8370_s22   ;;  %s6079_s21 = sphi %s6137_s21, %s8369_s21  }
   0x4   : > { %p26_p0 = scmp.ge.s32.totalorder %s25_s26, 16  ;;  %p4815_p1 = scmp.ge.s32.totalorder %s6095_s25, 1 }
   0x5   : > { %p281_p2 = scmp.lt.s32.totalorder %s6095_s25, 33 }
   0x6   : > { %s8374_s26 = smov (%p26_p0, %s25_s26), 0  ;;  %s8376_s27 = smov (!%p26_p0, %s28_s27), %s6091_s24 }
   0x7   : > { %p282_p3 = pnand %p4815_p1, %p281_p2  ;;  %p30_p4 = scmp.ge.s32.totalorder %s8376_s27, 2 }
   0x9   : > { %s8378_s27 = smov (%p30_p4, %s8376_s27), 0  ;;  %285 = sbr.rel (%p282_p3) target bundleno = 5164 (0x142c), region = 44 }
  0x10   : > { %p343_p5 = scmp.lt.s32.totalorder %s6083_s22, 1  ;;  %p345_p6 = scmp.lt.s32.totalorder %s6079_s21, 15  ;;  %v7976_v0 = vmov 0   ;;  %vm651_vm0 = vcmask 523264  }
  0x11   : > { %690 = vmatprep.mubr.bf16.mxu0 %v7976_v0  ;;  %743 = vmatprep.mubr.bf16.mxu1 %v7976_v0  ;;  %p4855_p7 = scmp.ne.s32.totalorder %s6079_s21, 0 }
  0x12   : > { %s8380_s22 = smov (!%p343_p5, %s6083_s22), 1  ;;  %vm6100_vm1 = vmmov (!%p4855_p7), 0  }
  0x13   : > { %s346_s28 = scalar_select %p345_p6, %s6079_s21, 15 }
  0x14   : > { %s5635_s29 = smul.u32 160, %s8380_s22  ;;  %s4817_s30 = sshll.u32 %s8380_s22, 6 }
  0x15   : > { %s5637_s7 = smul.u32 320, %s8380_s22  ;;  %s4816_s8 = sshll.u32 %s346_s28, 2 }
  0x16   : > { %s6181_s11 = scalar_lea.vmem %s7970_s1, %s5635_s29  ;;  %s6200_s15 = sadd.s32 %s4817_s30, %s4816_s8 }
  0x17   : > { %s6188_s14 = scalar_lea.vmem %s7972_s3, %s5637_s7  ;;  %v5683_v1 = vld [vmem:[%s6181_s11 + $0x4] ss:$20 sps:$4 sm:$0xff]   ;;  %s6205_s18 = scalar_lea.vmem %s7974_s5, %s4817_s30 }
  0x18   : > { %v6192_v2 = vld [vmem:[%s6188_s14] sm:$0xff]  ;;  %v6195_v3 = vld [vmem:[%s6188_s14 + $0x8] sm:$0xff]  ;;  %v6198_v4 = vld [vmem:[%s6188_s14 + $0x10] sm:$0xf]  ;;  %658 = vmatprep.subr.bf16.mxu0 %v5683_v1  ;;  %s4826_s19 = sshll.u32 %s6200_s15, 3  ;;  %s6326_s9 = scalar_lea.vmem %s7973_s4, %s5637_s7 }
  0x19   : > { %8104 = vst [vmem:[#allocation4_spill] sm:$0xff] %v6192_v2  ;;  %8105 = vst [vmem:[#allocation5_spill] sm:$0xff] %v6195_v3  ;;  %v6208_v5 = vld [vmem:[%s6188_s14 + $0x14] sm:$0xff]  ;;  %v6211_v6 = vld [vmem:[%s6188_s14 + $0x1c] sm:$0xff]  ;;  %s6229_s29 = scalar_lea.vmem %s7975_s6, %s4826_s19  ;;  %s4818_s7 = sshll.u32 %s6200_s15, 2 }
  0x1a   : > { %8106 = vst [vmem:[#allocation6_spill] sm:$0xff] %v6198_v4  ;;  %8107 = vst [vmem:[#allocation7_spill] sm:$0xff] %v6208_v5  ;;  %v6214_v7 = vld [vmem:[%s6188_s14 + $0x24] sm:$0xf]  ;;  %v6218_v8 = vld [vmem:[%s6188_s14 + $0x28] sm:$0xff]  ;;  %s351_s13 = scalar_lea.vmem %s7969_s0, %s4818_s7 }
  0x1b   : > { %8108 = vst [vmem:[#allocation8_spill] sm:$0xff] %v6211_v6  ;;  %8109 = vst [vmem:[#allocation9_spill] sm:$0xff] %v6214_v7  ;;  %v6221_v9 = vld [vmem:[%s6188_s14 + $0x30] sm:$0xff]  ;;  %v6224_v10 = vld [vmem:[%s6188_s14 + $0x38] sm:$0xf] }
  0x1c   : > { %8110 = vst [vmem:[#allocation10_spill] sm:$0xff] %v6218_v8  ;;  %8111 = vst [vmem:[#allocation11_spill] sm:$0xff] %v6221_v9  ;;  %v6232_v11 = vld [vmem:[%s6188_s14 + $0x3c] sm:$0xff]  ;;  %v6235_v12 = vld [vmem:[%s6188_s14 + $0x44] sm:$0xff] }
  0x1d   : > { %8112 = vst [vmem:[#allocation12_spill] sm:$0xff] %v6224_v10  ;;  %8113 = vst [vmem:[#allocation13_spill] sm:$0xff] %v6232_v11  ;;  %v6238_v13 = vld [vmem:[%s6188_s14 + $0x4c] sm:$0xf]  ;;  %v6241_v14 = vld [vmem:[%s6188_s14 + $0x50] sm:$0xff] }
  0x1e   : > { %8114 = vst [vmem:[#allocation14_spill] sm:$0xff] %v6235_v12  ;;  %8115 = vst [vmem:[#allocation15_spill] sm:$0xff] %v6238_v13  ;;  %v6244_v15 = vld [vmem:[%s6188_s14 + $0x58] sm:$0xff]  ;;  %v6247_v16 = vld [vmem:[%s6188_s14 + $0x60] sm:$0xf] }
  0x1f   : > { %8116 = vst [vmem:[#allocation16_spill] sm:$0xff] %v6241_v14  ;;  %8117 = vst [vmem:[#allocation17_spill] sm:$0xff] %v6244_v15  ;;  %v6250_v17 = vld [vmem:[%s6188_s14 + $0x64] sm:$0xff]  ;;  %v6253_v18 = vld [vmem:[%s6188_s14 + $0x6c] sm:$0xff] }
  0x20   : > { %8118 = vst [vmem:[#allocation18_spill] sm:$0xff] %v6247_v16  ;;  %8119 = vst [vmem:[#allocation19_spill] sm:$0xff] %v6250_v17  ;;  %v6256_v19 = vld [vmem:[%s6188_s14 + $0x74] sm:$0xf]  ;;  %v6259_v20 = vld [vmem:[%s6188_s14 + $0x78] sm:$0xff] }
  0x21   : > { %8120 = vst [vmem:[#allocation20_spill] sm:$0xff] %v6253_v18  ;;  %8121 = vst [vmem:[#allocation21_spill] sm:$0xff] %v6256_v19  ;;  %v6262_v21 = vld [vmem:[%s6188_s14 + $0x80] sm:$0xff]  ;;  %v6265_v22 = vld [vmem:[%s6188_s14 + $0x88] sm:$0xf] }
  0x22   : > { %8122 = vst [vmem:[#allocation22_spill] sm:$0xff] %v6259_v20  ;;  %8123 = vst [vmem:[#allocation23_spill] sm:$0xff] %v6262_v21  ;;  %v6268_v23 = vld [vmem:[%s6188_s14 + $0x8c] sm:$0xff]  ;;  %v6271_v24 = vld [vmem:[%s6188_s14 + $0x94] sm:$0xff] }
  0x23   : > { %8124 = vst [vmem:[#allocation24_spill] sm:$0xff] %v6265_v22  ;;  %8125 = vst [vmem:[#allocation25_spill] sm:$0xff] %v6268_v23  ;;  %v6274_v25 = vld [vmem:[%s6188_s14 + $0x9c] sm:$0xf]  ;;  %v6277_v26 = vld [vmem:[%s6188_s14 + $0xa0] sm:$0xff] }
  0x24   : > { %8126 = vst [vmem:[#allocation26_spill] sm:$0xff] %v6271_v24  ;;  %8127 = vst [vmem:[#allocation27_spill] sm:$0xff] %v6274_v25  ;;  %v6280_v27 = vld [vmem:[%s6188_s14 + $0xa8] sm:$0xff]  ;;  %v6283_v28 = vld [vmem:[%s6188_s14 + $0xb0] sm:$0xf] }
  0x25   : > { %8128 = vst [vmem:[#allocation28_spill] sm:$0xff] %v6277_v26  ;;  %8129 = vst [vmem:[#allocation29_spill] sm:$0xff] %v6280_v27  ;;  %v6286_v29 = vld [vmem:[%s6188_s14 + $0xb4] sm:$0xff]  ;;  %v6289_v30 = vld [vmem:[%s6188_s14 + $0xbc] sm:$0xff] }
  0x26   : > { %8130 = vst [vmem:[#allocation30_spill] sm:$0xff] %v6283_v28  ;;  %8131 = vst [vmem:[#allocation31_spill] sm:$0xff] %v6286_v29  ;;  %v6292_v31 = vld [vmem:[%s6188_s14 + $0xc4] sm:$0xf]  ;;  %v6295_v32 = vld [vmem:[%s6188_s14 + $0xc8] sm:$0xff] }
  0x27   : > { %8132 = vst [vmem:[#allocation32_spill] sm:$0xff] %v6289_v30  ;;  %8133 = vst [vmem:[#allocation33_spill] sm:$0xff] %v6292_v31  ;;  %v6298_v33 = vld [vmem:[%s6188_s14 + $0xd0] sm:$0xff]  ;;  %v6301_v34 = vld [vmem:[%s6188_s14 + $0xd8] sm:$0xf] }
  0x28   : > { %8134 = vst [vmem:[#allocation34_spill] sm:$0xff] %v6295_v32  ;;  %8135 = vst [vmem:[#allocation35_spill] sm:$0xff] %v6298_v33  ;;  %v6304_v35 = vld [vmem:[%s6188_s14 + $0xdc] sm:$0xff]  ;;  %v6307_v36 = vld [vmem:[%s6188_s14 + $0xe4] sm:$0xff] }
  0x29   : > { %8136 = vst [vmem:[#allocation36_spill] sm:$0xff] %v6301_v34  ;;  %8137 = vst [vmem:[#allocation37_spill] sm:$0xff] %v6304_v35  ;;  %v6310_v37 = vld [vmem:[%s6188_s14 + $0xec] sm:$0xf]  ;;  %v6313_v38 = vld [vmem:[%s6188_s14 + $0xf0] sm:$0xff] }
  0x2a   : > { %8138 = vst [vmem:[#allocation38_spill] sm:$0xff] %v6307_v36  ;;  %8139 = vst [vmem:[#allocation39_spill] sm:$0xff] %v6310_v37  ;;  %v6316_v39 = vld [vmem:[%s6188_s14 + $0xf8] sm:$0xff]  ;;  %v6319_v40 = vld [vmem:[%s6188_s14 + $0x100] sm:$0xf] }
  0x2b   : > { %8140 = vst [vmem:[#allocation40_spill] sm:$0xff] %v6313_v38  ;;  %8141 = vst [vmem:[#allocation41_spill] sm:$0xff] %v6316_v39  ;;  %v6329_v41 = vld [vmem:[%s6188_s14 + $0x104] sm:$0xff]  ;;  %v6332_v42 = vld [vmem:[%s6188_s14 + $0x10c] sm:$0xff] }
  0x2c   : > { %8142 = vst [vmem:[#allocation42_spill] sm:$0xff] %v6319_v40  ;;  %8143 = vst [vmem:[#allocation43_spill] sm:$0xff] %v6329_v41  ;;  %v6335_v43 = vld [vmem:[%s6188_s14 + $0x114] sm:$0xf]  ;;  %v6338_v44 = vld [vmem:[%s6188_s14 + $0x118] sm:$0xff] }
  0x2d   : > { %8144 = vst [vmem:[#allocation44_spill] sm:$0xff] %v6332_v42  ;;  %8145 = vst [vmem:[#allocation45_spill] sm:$0xff] %v6335_v43  ;;  %v6341_v45 = vld [vmem:[%s6188_s14 + $0x120] sm:$0xff]  ;;  %v6344_v46 = vld [vmem:[%s6188_s14 + $0x128] sm:$0xf] }
  0x2e   : > { %8146 = vst [vmem:[#allocation46_spill] sm:$0xff] %v6338_v44  ;;  %8147 = vst [vmem:[#allocation47_spill] sm:$0xff] %v6341_v45  ;;  %v6347_v47 = vld [vmem:[%s6188_s14 + $0x12c] sm:$0xff]  ;;  %v6350_v48 = vld [vmem:[%s6188_s14 + $0x134] sm:$0xff] }
  0x2f   : > { %8148 = vst [vmem:[#allocation48_spill] sm:$0xff] %v6344_v46  ;;  %8149 = vst [vmem:[#allocation49_spill] sm:$0xff] %v6347_v47  ;;  %v6353_v49 = vld [vmem:[%s6188_s14 + $0x13c] sm:$0xf]  ;;  %v6356_v50 = vld [vmem:[%s6326_s9] sm:$0xff]  ;;  %s5636_s14 = smul.u32 5, %s8380_s22 }
  0x30   : > { %8150 = vst [vmem:[#allocation50_spill] sm:$0xff] %v6350_v48  ;;  %8151 = vst [vmem:[#allocation51_spill] sm:$0xff] %v6353_v49  ;;  %v6359_v51 = vld [vmem:[%s6326_s9 + $0x8] sm:$0xff]  ;;  %v6362_v52 = vld [vmem:[%s6326_s9 + $0x10] sm:$0xf] }
  0x31   : > { %8152 = vst [vmem:[#allocation52_spill] sm:$0xff] %v6356_v50  ;;  %8153 = vst [vmem:[#allocation53_spill] sm:$0xff] %v6359_v51  ;;  %v6365_v53 = vld [vmem:[%s6326_s9 + $0x14] sm:$0xff]  ;;  %v6368_v54 = vld [vmem:[%s6326_s9 + $0x1c] sm:$0xff]  ;;  %s360_s17 = scalar_lea.vmem %s7971_s2, %s5636_s14 }
  0x32   : > { %8154 = vst [vmem:[#allocation54_spill] sm:$0xff] %v6362_v52  ;;  %8155 = vst [vmem:[#allocation55_spill] sm:$0xff] %v6365_v53  ;;  %v6371_v55 = vld [vmem:[%s6326_s9 + $0x24] sm:$0xf]  ;;  %v6374_v56 = vld [vmem:[%s6326_s9 + $0x28] sm:$0xff] }
  0x33   : > { %8156 = vst [vmem:[#allocation56_spill] sm:$0xff] %v6368_v54  ;;  %8157 = vst [vmem:[#allocation57_spill] sm:$0xff] %v6371_v55  ;;  %v6377_v57 = vld [vmem:[%s6326_s9 + $0x30] sm:$0xff]  ;;  %v6380_v58 = vld [vmem:[%s6326_s9 + $0x38] sm:$0xf] }
  0x34   : > { %8158 = vst [vmem:[#allocation58_spill] sm:$0xff] %v6374_v56  ;;  %8159 = vst [vmem:[#allocation59_spill] sm:$0xff] %v6377_v57  ;;  %v6383_v59 = vld [vmem:[%s6326_s9 + $0x3c] sm:$0xff]  ;;  %v6386_v60 = vld [vmem:[%s6326_s9 + $0x44] sm:$0xff] }
  0x35   : > { %8160 = vst [vmem:[#allocation60_spill] sm:$0xff] %v6380_v58  ;;  %8161 = vst [vmem:[#allocation61_spill] sm:$0xff] %v6383_v59  ;;  %v6389_v61 = vld [vmem:[%s6326_s9 + $0x4c] sm:$0xf]  ;;  %v6392_v62 = vld [vmem:[%s6326_s9 + $0x50] sm:$0xff] }
  0x36   : > { %8162 = vst [vmem:[#allocation62_spill] sm:$0xff] %v6386_v60  ;;  %8163 = vst [vmem:[#allocation63_spill] sm:$0xff] %v6389_v61  ;;  %v6395_v63 = vld [vmem:[%s6326_s9 + $0x58] sm:$0xff]  ;;  %v6398_v1 = vld [vmem:[%s6326_s9 + $0x60] sm:$0xf] }
  0x37   : > { %8164 = vst [vmem:[#allocation64_spill] sm:$0xff] %v6392_v62  ;;  %8165 = vst [vmem:[#allocation65_spill] sm:$0xff] %v6395_v63  ;;  %v6401_v0 = vld [vmem:[%s6326_s9 + $0x64] sm:$0xff]  ;;  %v6404_v58 = vld [vmem:[%s6326_s9 + $0x6c] sm:$0xff] }
  0x38   : > { %8166 = vst [vmem:[#allocation66_spill] sm:$0xff] %v6398_v1  ;;  %8167 = vst [vmem:[#allocation67_spill] sm:$0xff] %v6401_v0  ;;  %v6407_v57 = vld [vmem:[%s6326_s9 + $0x74] sm:$0xf]  ;;  %v6410_v61 = vld [vmem:[%s6326_s9 + $0x78] sm:$0xff] }
  0x39   : > { %8168 = vst [vmem:[#allocation68_spill] sm:$0xff] %v6404_v58  ;;  %8169 = vst [vmem:[#allocation69_spill] sm:$0xff] %v6407_v57  ;;  %v6413_v60 = vld [vmem:[%s6326_s9 + $0x80] sm:$0xff]  ;;  %v6416_v63 = vld [vmem:[%s6326_s9 + $0x88] sm:$0xf] }
  0x3a   : > { %8170 = vst [vmem:[#allocation70_spill] sm:$0xff] %v6410_v61  ;;  %8171 = vst [vmem:[#allocation71_spill] sm:$0xff] %v6413_v60  ;;  %v6419_v1 = vld [vmem:[%s6326_s9 + $0x8c] sm:$0xff]  ;;  %v6422_v52 = vld [vmem:[%s6326_s9 + $0x94] sm:$0xff] }
  0x3b   : > { %8172 = vst [vmem:[#allocation72_spill] sm:$0xff] %v6416_v63  ;;  %8173 = vst [vmem:[#allocation73_spill] sm:$0xff] %v6419_v1  ;;  %v6425_v58 = vld [vmem:[%s6326_s9 + $0x9c] sm:$0xf]  ;;  %v6428_v57 = vld [vmem:[%s6326_s9 + $0xa0] sm:$0xff] }
  0x3c   : > { %8174 = vst [vmem:[#allocation74_spill] sm:$0xff] %v6422_v52  ;;  %8175 = vst [vmem:[#allocation75_spill] sm:$0xff] %v6425_v58  ;;  %v6431_v55 = vld [vmem:[%s6326_s9 + $0xa8] sm:$0xff]  ;;  %v6434_v60 = vld [vmem:[%s6326_s9 + $0xb0] sm:$0xf] }
  0x3d   : > { %8176 = vst [vmem:[#allocation76_spill] sm:$0xff] %v6428_v57  ;;  %8177 = vst [vmem:[#allocation77_spill] sm:$0xff] %v6431_v55  ;;  %v6437_v63 = vld [vmem:[%s6326_s9 + $0xb4] sm:$0xff]  ;;  %v6440_v51 = vld [vmem:[%s6326_s9 + $0xbc] sm:$0xff] }
  0x3e   : > { %8178 = vst [vmem:[#allocation78_spill] sm:$0xff] %v6434_v60  ;;  %8179 = vst [vmem:[#allocation79_spill] sm:$0xff] %v6437_v63  ;;  %v6443_v52 = vld [vmem:[%s6326_s9 + $0xc4] sm:$0xf]  ;;  %v6446_v58 = vld [vmem:[%s6326_s9 + $0xc8] sm:$0xff] }
  0x3f   : > { %8180 = vst [vmem:[#allocation80_spill] sm:$0xff] %v6440_v51  ;;  %8181 = vst [vmem:[#allocation81_spill] sm:$0xff] %v6443_v52  ;;  %v6449_v54 = vld [vmem:[%s6326_s9 + $0xd0] sm:$0xff]  ;;  %v6452_v55 = vld [vmem:[%s6326_s9 + $0xd8] sm:$0xf] }
  0x40   : > { %8182 = vst [vmem:[#allocation82_spill] sm:$0xff] %v6446_v58  ;;  %8183 = vst [vmem:[#allocation83_spill] sm:$0xff] %v6449_v54  ;;  %v6455_v60 = vld [vmem:[%s6326_s9 + $0xdc] sm:$0xff]  ;;  %v6458_v57 = vld [vmem:[%s6326_s9 + $0xe4] sm:$0xff] }
  0x41   : > { %8184 = vst [vmem:[#allocation84_spill] sm:$0xff] %v6452_v55  ;;  %8185 = vst [vmem:[#allocation85_spill] sm:$0xff] %v6455_v60  ;;  %v6461_v51 = vld [vmem:[%s6326_s9 + $0xec] sm:$0xf]  ;;  %v6464_v63 = vld [vmem:[%s6326_s9 + $0xf0] sm:$0xff] }
  0x42   : > { %8186 = vst [vmem:[#allocation86_spill] sm:$0xff] %v6458_v57  ;;  %8187 = vst [vmem:[#allocation87_spill] sm:$0xff] %v6461_v51  ;;  %v6467_v52 = vld [vmem:[%s6326_s9 + $0xf8] sm:$0xff]  ;;  %v6470_v58 = vld [vmem:[%s6326_s9 + $0x100] sm:$0xf] }
  0x43   : > { %8188 = vst [vmem:[#allocation88_spill] sm:$0xff] %v6464_v63  ;;  %8189 = vst [vmem:[#allocation89_spill] sm:$0xff] %v6467_v52  ;;  %v6473_v54 = vld [vmem:[%s6326_s9 + $0x104] sm:$0xff]  ;;  %v6476_v55 = vld [vmem:[%s6326_s9 + $0x10c] sm:$0xff] }
  0x44   : > { %8190 = vst [vmem:[#allocation90_spill] sm:$0xff] %v6470_v58  ;;  %8191 = vst [vmem:[#allocation91_spill] sm:$0xff] %v6473_v54  ;;  %v6479_v60 = vld [vmem:[%s6326_s9 + $0x114] sm:$0xf]  ;;  %v6482_v57 = vld [vmem:[%s6326_s9 + $0x118] sm:$0xff] }
  0x45   : > { %8192 = vst [vmem:[#allocation92_spill] sm:$0xff] %v6476_v55  ;;  %8193 = vst [vmem:[#allocation93_spill] sm:$0xff] %v6479_v60  ;;  %v6485_v61 = vld [vmem:[%s6326_s9 + $0x120] sm:$0xff]  ;;  %v6488_v51 = vld [vmem:[%s6326_s9 + $0x128] sm:$0xf] }
  0x46   : > { %8194 = vst [vmem:[#allocation94_spill] sm:$0xff] %v6482_v57  ;;  %8195 = vst [vmem:[#allocation95_spill] sm:$0xff] %v6485_v61  ;;  %v6491_v52 = vld [vmem:[%s6326_s9 + $0x12c] sm:$0xff]  ;;  %v6494_v63 = vld [vmem:[%s6326_s9 + $0x134] sm:$0xff] }
  0x47   : > { %8196 = vst [vmem:[#allocation96_spill] sm:$0xff] %v6488_v51  ;;  %8197 = vst [vmem:[#allocation97_spill] sm:$0xff] %v6491_v52  ;;  %v6497_v58 = vld [vmem:[%s6326_s9 + $0x13c] sm:$0xf]  ;;  %v5685_v55 = vld [vmem:[%s6181_s11] ss:$20 sps:$4 sm:$0xff]  }
  0x48   : > { %8198 = vst [vmem:[#allocation98_spill] sm:$0xff] %v6494_v63  ;;  %8199 = vst [vmem:[#allocation99_spill] sm:$0xff] %v6497_v58  ;;  %v5686_v54 = vld [vmem:[%s6181_s11 + $0x2c] ss:$20 sps:$4 sm:$0xff]   ;;  %v5688_v60 = vld [vmem:[%s6181_s11 + $0x28] ss:$20 sps:$4 sm:$0xff]   ;;  %659 = vmatpush1.bf16.msra.mxu0 %v5685_v55 }
  0x49   : > { %v5689_v57 = vld [vmem:[%s6181_s11 + $0xc] ss:$20 sps:$4 sm:$0xff]   ;;  %v5691_v1 = vld [vmem:[%s6181_s11 + $0x8] ss:$20 sps:$4 sm:$0xff]   ;;  %660 = vmatprep.subr.bf16.mxu0 %v5686_v54  ;;  %v5697_v63 = vld [vmem:[%s6181_s11 + $0x30] ss:$20 sps:$4 sm:$0xff]  }
  0x4a   : > { %v5692_v61 = vld [vmem:[%s6181_s11 + $0x54] ss:$20 sps:$4 sm:$0xff]   ;;  %711 = vmatprep.subr.bf16.mxu1 %v5689_v57  ;;  %v5694_v58 = vld [vmem:[%s6181_s11 + $0x50] ss:$20 sps:$4 sm:$0xff]   ;;  %v5703_v54 = vld [vmem:[%s6181_s11 + $0x58] ss:$20 sps:$4 sm:$0xff]  }
  0x4b   : > { %712 = vmatpush1.bf16.msra.mxu1 %v5691_v1  ;;  %v5695_v51 = vld [vmem:[%s6181_s11 + $0x34] ss:$20 sps:$4 sm:$0xff]   ;;  %v5698_v52 = vld [vmem:[%s6181_s11 + $0x7c] ss:$20 sps:$4 sm:$0xff]   ;;  %v5700_v57 = vld [vmem:[%s6181_s11 + $0x78] ss:$20 sps:$4 sm:$0xff]  }
  0x4c   : > { %661 = vmatpush1.bf16.msra.mxu0 %v5688_v60  ;;  %713 = vmatprep.subr.bf16.mxu1 %v5695_v51  ;;  %v5701_v55 = vld [vmem:[%s6181_s11 + $0x5c] ss:$20 sps:$4 sm:$0xff]   ;;  %v5706_v60 = vld [vmem:[%s6181_s11 + $0x84] ss:$20 sps:$4 sm:$0xff]   ;;  %v5708_v0 = vld [vmem:[%s6181_s11 + $0x80] ss:$20 sps:$4 sm:$0xff]  }
  0x4d   : > { %662 = vmatprep.subr.bf16.mxu0 %v5692_v61  ;;  %v5705_v1 = vld [vmem:[%s6181_s11 + $0x10] ss:$20 sps:$4 sm:$0xff]   ;;  %v5709_v51 = vld [vmem:[%s6181_s11 + $0x38] ss:$20 sps:$4 sm:$0xff]  }
  0x4e   : > { %v5704_v62 = vld [vmem:[%s351_s13] sm:$0xff]   ;;  %v5710_v61 = vld [vmem:[%s351_s13 + $0x8] sm:$0xff]  }
  0x4f   : > { %714 = vmatpush1.bf16.msra.mxu1 %v5697_v63  ;;  %v5712_v63 = vld [vmem:[%s6181_s11 + $0x88] ss:$20 sps:$4 sm:$0xff]  }
  0x50   : > { %663 = vmatpush1.bf16.msra.mxu0 %v5694_v58  ;;  %715 = vmatprep.subr.bf16.mxu1 %v5701_v55  ;;  %v8200_v58 = vmov 0  }
  0x51   : > { %664 = vmatprep.subr.bf16.mxu0 %v5698_v52  ;;  %v5711_v52 = vld [vmem:[%s6181_s11 + $0x60] ss:$20 sps:$4 sm:$0xff]  }
  0x53   : > { %716 = vmatpush1.bf16.msra.mxu1 %v5703_v54 }
  0x54   : > { %665 = vmatpush1.bf16.msra.mxu0 %v5700_v57  ;;  %717 = vmatprep.subr.bf16.mxu1 %v5706_v60  ;;  %v510_v57 = vld [vmem:[%s360_s17] sm:$0x1f] }
  0x55   : > { %5223 = vmatprep.subr.bf16.mxu0 %v5705_v1 }
  0x57   : > { %4849 = vmatmul.mubr.msk.bf16.vlgmr.msra.gmra.mrb[0].mxu0 %vm651_vm0, %v5704_v62  ;;  %718 = vmatpush1.bf16.msra.mxu1 %v5708_v0  ;;  %v512_v0 = vlaneseq }
  0x58   : > { %5224 = vmatpush3.bf16.msra.mxu0 %v5705_v1  ;;  %700 = vmatprep.mubr.bf16.mxu0 %v8200_v58 }
  0x59   : > { %5225 = vmatprep.subr.bf16.mxu0 %v5709_v51  ;;  %v6531_v55 = vshrl.u32 %v512_v0, 7 }
  0x5a   : > { %4851 = vmatmul.mubr.msk.bf16.vlgmr.msra.gmra.mrb[0].mxu1 %vm651_vm0, %v5704_v62 }
  0x5b   : > { %753 = vmatprep.mubr.bf16.mxu1 %v8200_v58  ;;  %8201 = vst [vmem:[#allocation100_spill] sm:$0xff] %v6531_v55  ;;  %v514_v54 = vsub.s32 0, %v6531_v55  ;;  %v518_v1 = vsub.s32 1, %v6531_v55 }
  0x5c   : > { %5226 = vmatpush3.bf16.msra.mxu0 %v5709_v51  ;;  %v526_v51 = vsub.s32 3, %v6531_v55 }
  0x5d   : > { %5227 = vmatprep.subr.bf16.mxu0 %v5711_v52  ;;  %v515_v60 = vrot.slane %v510_v57, %v514_v54  ;;  %v519_v58 = vrot.slane %v510_v57, %v518_v1 }
  0x5e   : > { %v527_v56 = vrot.slane %v510_v57, %v526_v51 }
  0x5f   : > { %4850 = vmatmul.mubr.msk.bf16.gmra.mrb[4].mxu0 %vm651_vm0, %v5710_v61 }
  0x60   : > { %5228 = vmatpush3.bf16.msra.mxu0 %v5711_v52  ;;  %5231 = vmatprep.mubr.msk.bf16.mxu0 %vm651_vm0, %v5704_v62  ;;  %v522_v62 = vsub.s32 2, %v6531_v55 }
  0x61   : > { %5229 = vmatprep.subr.bf16.mxu0 %v5712_v63 }
  0x62   : > { %4852 = vmatmul.mubr.msk.bf16.gmra.mrb[4].mxu1 %vm651_vm0, %v5710_v61 }
  0x64   : > { %5230 = vmatpush3.bf16.msra.mxu0 %v5712_v63 }
  0x67   : > { %5232 = vmatmul.mubr.msk.bf16.vlgmr.msra.gmra.mrb[8].mxu0 %vm651_vm0, %v5710_v61  ;;  %v523_v61 = vrot.slane %v510_v57, %v522_v62 }
 0x12a   : > { %v692_v52 = vpop.f32.mrb[0].mxu0 }
 0x12b   : > { %v6540_v63 = vadd.f32 %v692_v52, %v515_v60  ;;  %v694_v0 = vpop.f32.mrb[1].mxu0 }
 0x12c   : > { %v6542_v59 = vadd.f32 %v694_v0, %v519_v58  ;;  %v696_v50 = vpop.f32.mrb[2].mxu0 }
 0x12d   : > { %8202 = vst [vmem:[#allocation101_spill] sm:$0xff] %v6540_v63  ;;  %v6544_v53 = vadd.f32 %v696_v50, %v515_v60  ;;  %v698_v46 = vpop.f32.mrb[3].mxu0  ;;  %v745_v49 = vpop.f32.mrb[0].mxu1 }
 0x12e   : > { %8203 = vst [vmem:[#allocation102_spill] sm:$0xff] %v6542_v59  ;;  %v6546_v40 = vadd.f32 %v698_v46, %v519_v58  ;;  %v6548_v43 = vadd.f32 %v745_v49, %v523_v61  ;;  %v747_v54 = vpop.f32.mrb[1].mxu1 }
 0x12f   : > { %8204 = vst [vmem:[#allocation103_spill] sm:$0xff] %v6544_v53  ;;  %v6550_v34 = vadd.f32 %v747_v54, %v527_v56  ;;  %v749_v1 = vpop.f32.mrb[2].mxu1  ;;  %v530_v53 = vsub.s32 4, %v6531_v55 }
 0x130   : > { %8205 = vst [vmem:[#allocation104_spill] sm:$0xff] %v6546_v40  ;;  %8206 = vst [vmem:[#allocation105_spill] sm:$0xff] %v6548_v43  ;;  %v6552_v62 = vadd.f32 %v749_v1, %v523_v61  ;;  %v751_v52 = vpop.f32.mrb[3].mxu1 }
 0x131   : > { %8207 = vst [vmem:[#allocation106_spill] sm:$0xff] %v6550_v34  ;;  %v6554_v37 = vadd.f32 %v751_v52, %v527_v56 }
 0x132   : > { %8208 = vst [vmem:[#allocation107_spill] sm:$0xff] %v6552_v62  ;;  %v702_v51 = vpop.f32.mrb[4].mxu0 }
 0x133   : > { %8209 = vst [vmem:[#allocation108_spill] sm:$0xff] %v6554_v37  ;;  %v6556_v0 = vadd.f32 %v702_v51, %v515_v60  ;;  %v704_v50 = vpop.f32.mrb[5].mxu0  ;;  %v531_v51 = vrot.slane %v510_v57, %v530_v53  ;;  %v6592_v53 = vcombine.high (!%p4855_p7), %v6218_v8, %v6232_v11  ;;  %v6602_v57 = vcombine.high (!%p4855_p7), %v6195_v3, %v6211_v6 }
 0x134   : > { %v6559_v28 = vadd.f32 %v704_v50, %v519_v58  ;;  %v706_v46 = vpop.f32.mrb[6].mxu0 }
 0x135   : > { %8210 = vst [vmem:[#allocation109_spill] sm:$0xff] %v6556_v0  ;;  %v6561_v49 = vadd.f32 %v706_v46, %v515_v60  ;;  %v708_v43 = vpop.f32.mrb[7].mxu0  ;;  %v755_v54 = vpop.f32.mrb[4].mxu1  ;;  %1093 = vmatprep.subr.bf16.mxu1 (!%p4855_p7), %v6602_v57 }
 0x136   : > { %8211 = vst [vmem:[#allocation110_spill] sm:$0xff] %v6559_v28  ;;  %v6563_v40 = vadd.f32 %v708_v43, %v519_v58  ;;  %v6565_v1 = vadd.f32 %v755_v54, %v523_v61  ;;  %v757_v62 = vpop.f32.mrb[5].mxu1 }
 0x137   : > { %8212 = vst [vmem:[#allocation111_spill] sm:$0xff] %v6561_v49  ;;  %v6567_v52 = vadd.f32 %v757_v62, %v527_v56  ;;  %v759_v37 = vpop.f32.mrb[6].mxu1  ;;  %v6611_v62 = vcombine.low (!%p4855_p7), %v6195_v3, %v6211_v6  ;;  %v6635_v3 = vcombine.high (!%p4855_p7), %v6244_v15, %v6253_v18  ;;  %v6671_v6 = vcombine.low (!%p4855_p7), %v6277_v26, %v6286_v29 }
 0x138   : > { %8213 = vst [vmem:[#allocation112_spill] sm:$0xff] %v6563_v40  ;;  %8214 = vst [vmem:[#allocation113_spill] sm:$0xff] %v6565_v1  ;;  %v6569_v0 = vadd.f32 %v759_v37, %v523_v61  ;;  %v761_v31 = vpop.f32.mrb[7].mxu1  ;;  %v6584_v37 = vcombine.high (!%p4855_p7), %v6192_v2, %v6208_v5  ;;  %v6607_v61 = vcombine.high (!%p4855_p7), %v6241_v14, %v6250_v17 }
 0x139   : > { %8215 = vst [vmem:[#allocation114_spill] sm:$0xff] %v6567_v52  ;;  %v6571_v55 = vadd.f32 %v761_v31, %v527_v56  ;;  %v6588_v31 = vcombine.low (!%p4855_p7), %v6192_v2, %v6208_v5  ;;  %v6598_v56 = vcombine.low (!%p4855_p7), %v6218_v8, %v6232_v11  ;;  %1094 = vmatpush1.bf16.msra.mxu1 (!%p4855_p7), %v6611_v62 }
 0x13a   : > { %8216 = vst [vmem:[#allocation115_spill] sm:$0xff] %v6569_v0  ;;  %v5233_v50 = vpop.f32.mrb[8].mxu0  ;;  %816 = sbr.rel (%p4855_p7) target bundleno = 4547 (0x11c3), region = 48  ;;  %1052 = vmatprep.subr.bf16.mxu0 (!%p4855_p7), %v6584_v37  ;;  %v6630_v0 = vcombine.low (!%p4855_p7), %v6241_v14, %v6250_v17 }
 0x13b   : > { %8217 = vst [vmem:[#allocation116_spill] sm:$0xff] %v6571_v55  ;;  %v6573_v28 = vadd.f32 %v5233_v50, %v531_v51  ;;  %v798_v60 = vpop.f32.mrb[9].mxu0  ;;  %1053 = vmatpush1.bf16.msra.mxu0 (!%p4855_p7), %v6588_v31  ;;  %v8021_v50 = vmov (!%p4855_p7), 0  }
 0x13c   : > { %v6575_v46 = vadd.f32 %v798_v60, %v531_v51  ;;  %v5234_v43 = vpop.f32.mrb[10].mxu0  ;;  %1054 = vmatprep.subr.bf16.mxu0 (!%p4855_p7), %v6592_v53  ;;  %1084 = vmatprep.mubr.bf16.mxu0 (!%p4855_p7), %v8021_v50  ;;  %v4856_v60 = vmul.f32 (!%p4855_p7), -1.442695, %v6540_v63 }
 0x13d   : > { %8218 = vst [vmem:[#allocation117_spill] sm:$0xff] %v6573_v28  ;;  %v6577_v58 = vadd.f32 %v5234_v43, %v531_v51  ;;  %v801_v54 = vpop.f32.mrb[11].mxu0  ;;  %v4857_v43 = vmul.f32 (!%p4855_p7), -1.442695, %v6542_v59  ;;  %1125 = vmatprep.mubr.bf16.mxu1 (!%p4855_p7), %v8021_v50  ;;  %v6645_v50 = vcombine.low (!%p4855_p7), %v6244_v15, %v6253_v18  ;;  %v4858_v15 = vmul.f32 (!%p4855_p7), -1.442695, %v6550_v34 }
 0x13e   : > { %8219 = vst [vmem:[#allocation118_spill] sm:$0xff] %v6575_v46  ;;  %v6579_v1 = vadd.f32 %v801_v54, %v531_v51  ;;  %v6615_v51 = vcombine.high (!%p4855_p7), %v6221_v9, %v6235_v12  ;;  %v6624_v54 = vcombine.low (!%p4855_p7), %v6221_v9, %v6235_v12  ;;  %5713 = vpow2.f32 (!%p4855_p7), %v4856_v60 }
 0x13f   : > { %8220 = vst [vmem:[#allocation119_spill] sm:$0xff] %v6577_v58  ;;  %1055 = vmatpush1.bf16.msra.mxu0 (!%p4855_p7), %v6598_v56  ;;  %v6640_v9 = vcombine.high (!%p4855_p7), %v6259_v20, %v6268_v23  ;;  %5715 = vpow2.f32 (!%p4855_p7), %v4857_v43  ;;  %v6650_v60 = vcombine.low (!%p4855_p7), %v6259_v20, %v6268_v23  ;;  %v6655_v12 = vcombine.high (!%p4855_p7), %v6262_v21, %v6271_v24 }
 0x140   : > { %8221 = vst [vmem:[#allocation120_spill] sm:$0xff] %v6579_v1  ;;  %1095 = vmatprep.subr.bf16.mxu1 (!%p4855_p7), %v6615_v51  ;;  %1056 = vmatprep.subr.bf16.mxu0 (!%p4855_p7), %v6607_v61  ;;  %v6660_v43 = vcombine.high (!%p4855_p7), %v6277_v26, %v6286_v29  ;;  %v6666_v18 = vcombine.low (!%p4855_p7), %v6262_v21, %v6271_v24  ;;  %5717 = vpow2.f32 (!%p4855_p7), %v4858_v15 }
 0x141   : > { %1096 = vmatpush1.bf16.msra.mxu1 %v6624_v54  ;;  %v6676_v20 = vcombine.high %v6280_v27, %v6289_v30  ;;  %v6681_v23 = vcombine.high %v6295_v32, %v6304_v35  ;;  %5719 = vtanh.f32 %v6575_v46  ;;  %v6687_v26 = vcombine.low %v6280_v27, %v6289_v30 }
 0x142   : > { %1097 = vmatprep.subr.bf16.mxu1 %v6635_v3  ;;  %v6692_v29 = vcombine.low %v6295_v32, %v6304_v35  ;;  %v6697_v15 = vcombine.high %v6298_v33, %v6307_v36  ;;  %v6707_v27 = vcombine.low %v6298_v33, %v6307_v36  ;;  %v6717_v30 = vcombine.high %v6316_v39, %v6332_v42 }
 0x143   : > { %1057 = vmatpush1.bf16.msra.mxu0 %v6630_v0  ;;  %v6732_v36 = vcombine.low %v6338_v44, %v6347_v47 }
 0x144   : > { %1058 = vmatprep.subr.bf16.mxu0 %v6640_v9 }
 0x145   : > { %1098 = vmatpush1.bf16.msra.mxu1 %v6645_v50 }
 0x146   : > { %1099 = vmatprep.subr.bf16.mxu1 %v6655_v12 }
 0x147   : > { %1059 = vmatpush1.bf16.msra.mxu0 %v6650_v60 }
 0x148   : > { %1060 = vmatprep.subr.bf16.mxu0 %v6660_v43  ;;  %v5714_v21 = vpop.eup %5713 }
 0x149   : > { %v5716_v24 = vpop.eup %5715  ;;  %v820_v14 = vadd.f32 1.0, %v5714_v21  ;;  %1100 = vmatpush1.bf16.msra.mxu1 %v6666_v18  ;;  %v6702_v21 = vcombine.high %v6313_v38, %v6329_v41 }
 0x14a   : > { %v826_v17 = vadd.f32 1.0, %v5716_v24  ;;  %1101 = vmatprep.subr.bf16.mxu1 %v6676_v20  ;;  %v6712_v24 = vcombine.low %v6313_v38, %v6329_v41  ;;  %v5718_v33 = vpop.eup %5717  ;;  %v6737_v38 = vcombine.high %v6341_v45, %v6350_v48 }
 0x14b   : > { %1061 = vmatpush1.bf16.msra.mxu0 %v6671_v6  ;;  %5721 = vrcp.f32 %v820_v14  ;;  %v6722_v14 = vcombine.high %v6338_v44, %v6347_v47  ;;  %v5720_v41 = vpop.eup %5719  ;;  %v832_v35 = vadd.f32 1.0, %v5718_v33  ;;  %v8084_v47 = vmov 0.0  }
 0x14c   : > { %1062 = vmatprep.subr.bf16.mxu0 %v6681_v23  ;;  %5723 = vrcp.f32 %v826_v17  ;;  %v6727_v17 = vcombine.low %v6316_v39, %v6332_v42  ;;  %v6743_v39 = vcombine.low %v6341_v45, %v6350_v48 }
 0x14d   : > { %1102 = vmatpush1.bf16.msra.mxu1 %v6687_v26  ;;  %5725 = vrcp.f32 %v832_v35  ;;  %v8222_v35 = vmov 0  }
 0x14e   : > { %1103 = vmatprep.subr.bf16.mxu1 %v6697_v15 }
 0x14f   : > { %1063 = vmatpush1.bf16.msra.mxu0 %v6692_v29 }
 0x150   : > { %1064 = vmatprep.subr.bf16.mxu0 %v6702_v21 }
 0x151   : > { %1104 = vmatpush1.bf16.msra.mxu1 %v6707_v27 }
 0x152   : > { %1105 = vmatprep.subr.bf16.mxu1 %v6717_v30 }
 0x153   : > { %1065 = vmatpush1.bf16.msra.mxu0 %v6712_v24 }
 0x154   : > { %1066 = vmatprep.subr.bf16.mxu0 %v6722_v14 }
 0x155   : > { %v5722_v32 = vpop.eup %5721  ;;  %1106 = vmatpush1.bf16.msra.mxu1 %v6727_v17 }
 0x156   : > { %v5724_v42 = vpop.eup %5723  ;;  %v837_v44 = vmul.f32 %v5722_v32, %v5720_v41  ;;  %1107 = vmatprep.subr.bf16.mxu1 %v6737_v38  ;;  %v6756_v41 = vcombine.low %v6198_v4, %v6214_v7 }
 0x157   : > { %1067 = vmatpush1.bf16.msra.mxu0 %v6732_v36  ;;  %v836_v8 = vmul.f32 0.0, %v5724_v42  ;;  %v5726_v33 = vpop.eup %5725 }
 0x158   : > { %5235 = vmatprep.subr.bf16.mxu0 %v8084_v47 }
 0x159   : > { %v6748_v11 = vadd.f32 %v837_v44, %v836_v8  ;;  %1108 = vmatpush1.bf16.msra.mxu1 %v6743_v39  ;;  %v6761_v8 = vcombine.low %v6224_v10, %v6238_v13  ;;  %v6772_v44 = vcombine.low %v6247_v16, %v6256_v19 }
 0x15a   : > { %1222 = vmatprep.subr.bf16.mxu1 %v6584_v37 }
 0x15b   : > { %5727 = vtanh.f32 %v6748_v11  ;;  %842 = vst [vmem:[#allocation3] sm:$0x3] %v6748_v11 }
 0x165   : > { %v5728_v45 = vpop.eup %5727 }
 0x166   : > { %v840_v32 = vmul.f32 %v5728_v45, %v5726_v33  ;;  %v6780_v45 = vcombine.low %v6265_v22, %v6274_v25  ;;  %v8223_v33 = vld [vmem:[#allocation33_spill] sm:$0xff]  ;;  %v8225_v22 = vld [vmem:[#allocation39_spill] sm:$0xff]  ;;  %v8226_v25 = vld [vmem:[#allocation36_spill] sm:$0xff] }
 0x167   : > { %v6796_v16 = vcombine.low %v8226_v25, %v8225_v22  ;;  %v8229_v22 = vld [vmem:[#allocation51_spill] sm:$0xff]  ;;  %v8230_v25 = vld [vmem:[#allocation48_spill] sm:$0xff] }
 0x168   : > { %841 = vst [vmem:[#allocation2] sm:$0x3] %v840_v32  ;;  %v843_v42 = vpack.c.bf16 %v840_v32, %v840_v32  ;;  %v8224_v32 = vld [vmem:[#allocation30_spill] sm:$0xff]  ;;  %v6812_v10 = vcombine.low %v8230_v25, %v8229_v22 }
 0x169   : > { %v6788_v48 = vcombine.low %v8224_v32, %v8223_v33  ;;  %v8227_v33 = vld [vmem:[#allocation45_spill] sm:$0xff]  ;;  %v8228_v32 = vld [vmem:[#allocation42_spill] sm:$0xff] }
 0x16a   : > { %1085 = vmatmul.mubr.bf16.vlgmr.msra.gmra.mrb[0].mxu0 %v843_v42  ;;  %1126 = vmatmul.mubr.bf16.vlgmr.msra.gmra.mrb[0].mxu1 %v843_v42  ;;  %v6804_v19 = vcombine.low %v8228_v32, %v8227_v33 }
 0x16b   : > { %5236 = vmatpush3.bf16.msra.mxu0 %v6756_v41  ;;  %5251 = vmatprep.mubr.msk.bf16.mxu0 %vm6100_vm1, %v8084_v47 }
 0x16c   : > { %5237 = vmatprep.subr.bf16.mxu0 %v8084_v47  ;;  %1223 = vmatpush1.bf16.msra.mxu1 %v6588_v31 }
 0x16d   : > { %1224 = vmatprep.subr.bf16.mxu1 %v6592_v53  ;;  %1254 = vmatprep.mubr.bf16.mxu1 %v8222_v35 }
 0x16f   : > { %5238 = vmatpush3.bf16.msra.mxu0 %v6761_v8 }
 0x170   : > { %5239 = vmatprep.subr.bf16.mxu0 %v8084_v47  ;;  %1225 = vmatpush1.bf16.msra.mxu1 %v6598_v56 }
 0x171   : > { %1226 = vmatprep.subr.bf16.mxu1 %v6607_v61 }
 0x173   : > { %5240 = vmatpush3.bf16.msra.mxu0 %v6772_v44 }
 0x174   : > { %5241 = vmatprep.subr.bf16.mxu0 %v8084_v47  ;;  %1227 = vmatpush1.bf16.msra.mxu1 %v6630_v0 }
 0x175   : > { %1228 = vmatprep.subr.bf16.mxu1 %v6640_v9 }
 0x177   : > { %5242 = vmatpush3.bf16.msra.mxu0 %v6780_v45 }
 0x178   : > { %5243 = vmatprep.subr.bf16.mxu0 %v8084_v47  ;;  %1229 = vmatpush1.bf16.msra.mxu1 %v6650_v60 }
 0x179   : > { %1230 = vmatprep.subr.bf16.mxu1 %v6660_v43 }
 0x17b   : > { %5244 = vmatpush3.bf16.msra.mxu0 %v6788_v48 }
 0x17c   : > { %5245 = vmatprep.subr.bf16.mxu0 %v8084_v47  ;;  %1231 = vmatpush1.bf16.msra.mxu1 %v6671_v6 }
 0x17d   : > { %1232 = vmatprep.subr.bf16.mxu1 %v6681_v23 }
 0x17f   : > { %5246 = vmatpush3.bf16.msra.mxu0 %v6796_v16 }
 0x180   : > { %5247 = vmatprep.subr.bf16.mxu0 %v8084_v47  ;;  %1233 = vmatpush1.bf16.msra.mxu1 %v6692_v29 }
 0x181   : > { %1234 = vmatprep.subr.bf16.mxu1 %v6702_v21 }
 0x183   : > { %5248 = vmatpush3.bf16.msra.mxu0 %v6804_v19 }
 0x184   : > { %5249 = vmatprep.subr.bf16.mxu0 %v8084_v47  ;;  %1235 = vmatpush1.bf16.msra.mxu1 %v6712_v24 }
 0x185   : > { %1236 = vmatprep.subr.bf16.mxu1 %v6722_v14 }
 0x187   : > { %5250 = vmatpush3.bf16.msra.mxu0 %v6812_v10 }
 0x188   : > { %1263 = vmatprep.subr.bf16.mxu0 %v6602_v57  ;;  %1237 = vmatpush1.bf16.msra.mxu1 %v6732_v36 }
 0x189   : > { %5255 = vmatprep.subr.bf16.mxu1 %v8084_v47 }
 0x18a   : > { %5252 = vmatmul.mubr.bf16.vlgmr.msra.gmra.mrb[4].mxu0 %v843_v42 }
 0x18b   : > { %1264 = vmatpush1.bf16.msra.mxu0 %v6611_v62  ;;  %1295 = vmatprep.mubr.bf16.mxu0 %v8222_v35 }
 0x18c   : > { %1265 = vmatprep.subr.bf16.mxu0 %v6615_v51 }
 0x18f   : > { %1266 = vmatpush1.bf16.msra.mxu0 %v6624_v54 }
 0x190   : > { %1267 = vmatprep.subr.bf16.mxu0 %v6635_v3 }
 0x193   : > { %1268 = vmatpush1.bf16.msra.mxu0 %v6645_v50 }
 0x194   : > { %1269 = vmatprep.subr.bf16.mxu0 %v6655_v12 }
 0x197   : > { %1270 = vmatpush1.bf16.msra.mxu0 %v6666_v18 }
 0x198   : > { %1271 = vmatprep.subr.bf16.mxu0 %v6676_v20 }
 0x19b   : > { %1272 = vmatpush1.bf16.msra.mxu0 %v6687_v26 }
 0x19c   : > { %1273 = vmatprep.subr.bf16.mxu0 %v6697_v15 }
 0x19f   : > { %1274 = vmatpush1.bf16.msra.mxu0 %v6707_v27 }
 0x1a0   : > { %1275 = vmatprep.subr.bf16.mxu0 %v6717_v30 }
 0x1a3   : > { %1276 = vmatpush1.bf16.msra.mxu0 %v6727_v17 }
 0x1a4   : > { %1277 = vmatprep.subr.bf16.mxu0 %v6737_v38 }
 0x1a7   : > { %1278 = vmatpush1.bf16.msra.mxu0 %v6743_v39 }
 0x1a8   : > { %1392 = vmatprep.subr.bf16.mxu0 %v6584_v37 }
 0x23d   : > { %v1086_v42 = vpop.f32.mrb[0].mxu0  ;;  %v1127_v33 = vpop.f32.mrb[0].mxu1 }
 0x23e   : > { %v1088_v32 = vpop.f32.mrb[1].mxu0  ;;  %v1128_v22 = vpop.f32.mrb[1].mxu1  ;;  %v1177_v2 = vrot.slane %v1086_v42, 6 }
 0x23f   : > { %v1090_v25 = vpop.f32.mrb[2].mxu0  ;;  %v1130_v47 = vpop.f32.mrb[2].mxu1  ;;  %v1178_v7 = vrot.slane %v1088_v32, 6  ;;  %v1179_v40 = vrot.slane %v1128_v22, 6 }
 0x240   : > { %v1091_v13 = vpop.f32.mrb[3].mxu0  ;;  %v1131_v4 = vpop.f32.mrb[3].mxu1  ;;  %v1185_v58 = vadd.f32 %v1177_v2, %v6540_v63 }
 0x241   : > { %v1186_v5 = vadd.f32 %v1178_v7, %v6542_v59  ;;  %v1187_v28 = vadd.f32 %v1179_v40, %v6550_v34 }
 0x242   : > { %v4899_v49 = vmul.f32 -1.442695, %v1185_v58 }
 0x243   : > { %v4900_v55 = vmul.f32 -1.442695, %v1186_v5  ;;  %v4901_v1 = vmul.f32 -1.442695, %v1187_v28 }
 0x245   : > { %5729 = vpow2.f32 %v4900_v55  ;;  %v1209_v55 = vrot.slane %v6748_v11, 6  ;;  %v8231_v11 = vmov 0.0  }
 0x246   : > { %5731 = vpow2.f32 %v4899_v49 }
 0x247   : > { %5733 = vpow2.f32 %v4901_v1 }
 0x24f   : > { %v5730_v33 = vpop.eup %5729 }
 0x250   : > { %v5732_v52 = vpop.eup %5731  ;;  %v1198_v25 = vadd.f32 1.0, %v5730_v33 }
 0x251   : > { %v1192_v47 = vadd.f32 1.0, %v5732_v52  ;;  %v5734_v7 = vpop.eup %5733 }
 0x252   : > { %5735 = vrcp.f32 %v1198_v25  ;;  %v1204_v58 = vadd.f32 1.0, %v5734_v7 }
 0x253   : > { %5737 = vrcp.f32 %v1192_v47 }
 0x25c   : > { %v5736_v40 = vpop.eup %5735 }
 0x25d   : > { %v1167_v13 = vpop.f32.mrb[4].mxu0  ;;  %v5738_v49 = vpop.eup %5737  ;;  %v1211_v22 = vmul.f32 %v5736_v40, %v1209_v55 }
 0x25e   : > { %v1180_v4 = vrot.slane %v1167_v13, 6  ;;  %v5253_v42 = vpop.f32.mrb[5].mxu0 }
 0x25f   : > { %v1170_v32 = vpop.f32.mrb[6].mxu0 }
 0x260   : > { %v1188_v2 = vadd.f32 %v1180_v4, %v6575_v46  ;;  %v5254_v5 = vpop.f32.mrb[7].mxu0 }
 0x262   : > { %5739 = vtanh.f32 %v1188_v2 }
 0x263   : > { %5741 = vrcp.f32 %v1204_v58 }
 0x26c   : > { %v5740_v28 = vpop.eup %5739 }
 0x26d   : > { %v1212_v52 = vmul.f32 %v5740_v28, %v5738_v49  ;;  %v5742_v33 = vpop.eup %5741 }
 0x26f   : > { %v6843_v1 = vadd.f32 %v1212_v52, %v1211_v22 }
 0x271   : > { %5743 = vtanh.f32 %v6843_v1  ;;  %1217 = vst [vmem:[#allocation3] sm:$0xc] %v6843_v1 }
 0x27b   : > { %v5744_v25 = vpop.eup %5743 }
 0x27c   : > { %v1215_v47 = vmul.f32 %v5744_v25, %v5742_v33 }
 0x27e   : > { %1216 = vst [vmem:[#allocation2] sm:$0xc] %v1215_v47  ;;  %v1218_v13 = vpack.c.bf16 %v1215_v47, %v1215_v47 }
 0x280   : > { %v1220_v4 = vrot.slane %v1218_v13, 1 }
 0x282   : > { %1255 = vmatmul.mubr.bf16.vlgmr.msra.gmra.mrb[4].mxu1 %v1220_v4  ;;  %1296 = vmatmul.mubr.bf16.vlgmr.msra.gmra.mrb[8].mxu0 %v1220_v4 }
 0x283   : > { %5256 = vmatpush3.bf16.msra.mxu1 %v6756_v41  ;;  %5271 = vmatprep.mubr.msk.bf16.mxu1 %vm6100_vm1, %v8231_v11 }
 0x284   : > { %5257 = vmatprep.subr.bf16.mxu1 %v8231_v11  ;;  %1393 = vmatpush1.bf16.msra.mxu0 %v6588_v31 }
 0x285   : > { %1394 = vmatprep.subr.bf16.mxu0 %v6592_v53  ;;  %1424 = vmatprep.mubr.bf16.mxu0 %v8222_v35 }
 0x287   : > { %5258 = vmatpush3.bf16.msra.mxu1 %v6761_v8 }
 0x288   : > { %5259 = vmatprep.subr.bf16.mxu1 %v8231_v11  ;;  %1395 = vmatpush1.bf16.msra.mxu0 %v6598_v56 }
 0x289   : > { %1396 = vmatprep.subr.bf16.mxu0 %v6607_v61 }
 0x28b   : > { %5260 = vmatpush3.bf16.msra.mxu1 %v6772_v44 }
 0x28c   : > { %5261 = vmatprep.subr.bf16.mxu1 %v8231_v11  ;;  %1397 = vmatpush1.bf16.msra.mxu0 %v6630_v0 }
 0x28d   : > { %1398 = vmatprep.subr.bf16.mxu0 %v6640_v9 }
 0x28f   : > { %5262 = vmatpush3.bf16.msra.mxu1 %v6780_v45 }
 0x290   : > { %5263 = vmatprep.subr.bf16.mxu1 %v8231_v11  ;;  %1399 = vmatpush1.bf16.msra.mxu0 %v6650_v60 }
 0x291   : > { %1400 = vmatprep.subr.bf16.mxu0 %v6660_v43 }
 0x293   : > { %5264 = vmatpush3.bf16.msra.mxu1 %v6788_v48 }
 0x294   : > { %5265 = vmatprep.subr.bf16.mxu1 %v8231_v11  ;;  %1401 = vmatpush1.bf16.msra.mxu0 %v6671_v6 }
 0x295   : > { %1402 = vmatprep.subr.bf16.mxu0 %v6681_v23 }
 0x297   : > { %5266 = vmatpush3.bf16.msra.mxu1 %v6796_v16 }
 0x298   : > { %5267 = vmatprep.subr.bf16.mxu1 %v8231_v11  ;;  %1403 = vmatpush1.bf16.msra.mxu0 %v6692_v29 }
 0x299   : > { %1404 = vmatprep.subr.bf16.mxu0 %v6702_v21 }
 0x29b   : > { %5268 = vmatpush3.bf16.msra.mxu1 %v6804_v19 }
 0x29c   : > { %5269 = vmatprep.subr.bf16.mxu1 %v8231_v11  ;;  %1405 = vmatpush1.bf16.msra.mxu0 %v6712_v24 }
 0x29d   : > { %1406 = vmatprep.subr.bf16.mxu0 %v6722_v14 }
 0x29f   : > { %5270 = vmatpush3.bf16.msra.mxu1 %v6812_v10 }
 0x2a0   : > { %1433 = vmatprep.subr.bf16.mxu1 %v6602_v57  ;;  %1407 = vmatpush1.bf16.msra.mxu0 %v6732_v36 }
 0x2a1   : > { %5275 = vmatprep.subr.bf16.mxu0 %v8231_v11 }
 0x2a2   : > { %5272 = vmatmul.mubr.bf16.vlgmr.msra.gmra.mrb[8].mxu1 %v1220_v4 }
 0x2a3   : > { %1434 = vmatpush1.bf16.msra.mxu1 %v6611_v62  ;;  %1465 = vmatprep.mubr.bf16.mxu1 %v8222_v35 }
 0x2a4   : > { %1435 = vmatprep.subr.bf16.mxu1 %v6615_v51 }
 0x2a7   : > { %1436 = vmatpush1.bf16.msra.mxu1 %v6624_v54 }
 0x2a8   : > { %1437 = vmatprep.subr.bf16.mxu1 %v6635_v3 }
 0x2ab   : > { %1438 = vmatpush1.bf16.msra.mxu1 %v6645_v50 }
 0x2ac   : > { %1439 = vmatprep.subr.bf16.mxu1 %v6655_v12 }
 0x2af   : > { %1440 = vmatpush1.bf16.msra.mxu1 %v6666_v18 }
 0x2b0   : > { %1441 = vmatprep.subr.bf16.mxu1 %v6676_v20 }
 0x2b3   : > { %1442 = vmatpush1.bf16.msra.mxu1 %v6687_v26 }
 0x2b4   : > { %1443 = vmatprep.subr.bf16.mxu1 %v6697_v15 }
 0x2b7   : > { %1444 = vmatpush1.bf16.msra.mxu1 %v6707_v27 }
 0x2b8   : > { %1445 = vmatprep.subr.bf16.mxu1 %v6717_v30 }
 0x2bb   : > { %1446 = vmatpush1.bf16.msra.mxu1 %v6727_v17 }
 0x2bc   : > { %1447 = vmatprep.subr.bf16.mxu1 %v6737_v38 }
 0x2bf   : > { %1448 = vmatpush1.bf16.msra.mxu1 %v6743_v39 }
 0x2c0   : > { %1562 = vmatprep.subr.bf16.mxu1 %v6584_v37 }
 0x355   : > { %v1256_v42 = vpop.f32.mrb[4].mxu1  ;;  %v1297_v32 = vpop.f32.mrb[8].mxu0 }
 0x356   : > { %v1258_v2 = vpop.f32.mrb[5].mxu1  ;;  %v1298_v5 = vpop.f32.mrb[9].mxu0  ;;  %v1347_v52 = vrot.slane %v1256_v42, 4 }
 0x357   : > { %v1348_v7 = vrot.slane %v1258_v2, 4  ;;  %v1260_v55 = vpop.f32.mrb[6].mxu1  ;;  %v1300_v40 = vpop.f32.mrb[10].mxu0  ;;  %v1349_v4 = vrot.slane %v1298_v5, 4 }
 0x358   : > { %v1261_v49 = vpop.f32.mrb[7].mxu1  ;;  %v1301_v58 = vpop.f32.mrb[11].mxu0  ;;  %v1355_v33 = vadd.f32 %v1347_v52, %v6540_v63  ;;  %v1379_v55 = vrot.slane %v6843_v1, 6 }
 0x359   : > { %v1356_v28 = vadd.f32 %v1348_v7, %v6542_v59  ;;  %v1357_v32 = vadd.f32 %v1349_v4, %v6550_v34 }
 0x35a   : > { %v4902_v25 = vmul.f32 -1.442695, %v1355_v33 }
 0x35b   : > { %v4903_v22 = vmul.f32 -1.442695, %v1356_v28  ;;  %v4904_v40 = vmul.f32 -1.442695, %v1357_v32 }
 0x35d   : > { %5745 = vpow2.f32 %v4903_v22 }
 0x35e   : > { %5747 = vpow2.f32 %v4902_v25 }
 0x367   : > { %v5746_v47 = vpop.eup %5745 }
 0x368   : > { %v1368_v13 = vadd.f32 1.0, %v5746_v47  ;;  %v5748_v2 = vpop.eup %5747 }
 0x369   : > { %v1362_v58 = vadd.f32 1.0, %v5748_v2 }
 0x36a   : > { %5749 = vrcp.f32 %v1368_v13 }
 0x36b   : > { %5751 = vpow2.f32 %v4904_v40 }
 0x36c   : > { %5753 = vrcp.f32 %v1362_v58 }
 0x374   : > { %v5750_v49 = vpop.eup %5749 }
 0x375   : > { %v1381_v7 = vmul.f32 %v5750_v49, %v1379_v55  ;;  %v1337_v28 = vpop.f32.mrb[8].mxu1  ;;  %v5752_v5 = vpop.eup %5751 }
 0x376   : > { %v1350_v42 = vrot.slane %v1337_v28, 4  ;;  %v5273_v22 = vpop.f32.mrb[9].mxu1  ;;  %v5754_v47 = vpop.eup %5753  ;;  %v1374_v4 = vadd.f32 1.0, %v5752_v5 }
 0x377   : > { %v1340_v52 = vpop.f32.mrb[10].mxu1 }
 0x378   : > { %v1358_v33 = vadd.f32 %v1350_v42, %v6575_v46  ;;  %v5274_v25 = vpop.f32.mrb[11].mxu1 }
 0x37a   : > { %5755 = vtanh.f32 %v1358_v33 }
 0x37b   : > { %5757 = vrcp.f32 %v1374_v4 }
 0x384   : > { %v5756_v13 = vpop.eup %5755 }
 0x385   : > { %v1382_v34 = vmul.f32 %v5756_v13, %v5754_v47  ;;  %v5758_v32 = vpop.eup %5757 }
 0x387   : > { %v6904_v1 = vadd.f32 %v1382_v34, %v1381_v7 }
 0x389   : > { %5759 = vtanh.f32 %v6904_v1  ;;  %1387 = vst [vmem:[#allocation3] sm:$0x30] %v6904_v1 }
 0x393   : > { %v5760_v2 = vpop.eup %5759 }
 0x394   : > { %v1385_v55 = vmul.f32 %v5760_v2, %v5758_v32 }
 0x396   : > { %1386 = vst [vmem:[#allocation2] sm:$0x30] %v1385_v55  ;;  %v1388_v40 = vpack.c.bf16 %v1385_v55, %v1385_v55 }
 0x398   : > { %v1390_v49 = vrot.slane %v1388_v40, 2 }
 0x39a   : > { %1425 = vmatmul.mubr.bf16.vlgmr.msra.gmra.mrb[12].mxu0 %v1390_v49  ;;  %1466 = vmatmul.mubr.bf16.vlgmr.msra.gmra.mrb[12].mxu1 %v1390_v49 }
 0x39b   : > { %5276 = vmatpush3.bf16.msra.mxu0 %v6756_v41  ;;  %5291 = vmatprep.mubr.msk.bf16.mxu0 %vm6100_vm1, %v8231_v11 }
 0x39c   : > { %5277 = vmatprep.subr.bf16.mxu0 %v8231_v11  ;;  %1563 = vmatpush1.bf16.msra.mxu1 %v6588_v31 }
 0x39d   : > { %1564 = vmatprep.subr.bf16.mxu1 %v6592_v53  ;;  %1594 = vmatprep.mubr.bf16.mxu1 %v8222_v35 }
 0x39f   : > { %5278 = vmatpush3.bf16.msra.mxu0 %v6761_v8 }
 0x3a0   : > { %5279 = vmatprep.subr.bf16.mxu0 %v8231_v11  ;;  %1565 = vmatpush1.bf16.msra.mxu1 %v6598_v56 }
 0x3a1   : > { %1566 = vmatprep.subr.bf16.mxu1 %v6607_v61 }
 0x3a3   : > { %5280 = vmatpush3.bf16.msra.mxu0 %v6772_v44 }
 0x3a4   : > { %5281 = vmatprep.subr.bf16.mxu0 %v8231_v11  ;;  %1567 = vmatpush1.bf16.msra.mxu1 %v6630_v0 }
 0x3a5   : > { %1568 = vmatprep.subr.bf16.mxu1 %v6640_v9 }
 0x3a7   : > { %5282 = vmatpush3.bf16.msra.mxu0 %v6780_v45 }
 0x3a8   : > { %5283 = vmatprep.subr.bf16.mxu0 %v8231_v11  ;;  %1569 = vmatpush1.bf16.msra.mxu1 %v6650_v60 }
 0x3a9   : > { %1570 = vmatprep.subr.bf16.mxu1 %v6660_v43 }
 0x3ab   : > { %5284 = vmatpush3.bf16.msra.mxu0 %v6788_v48 }
 0x3ac   : > { %5285 = vmatprep.subr.bf16.mxu0 %v8231_v11  ;;  %1571 = vmatpush1.bf16.msra.mxu1 %v6671_v6 }
 0x3ad   : > { %1572 = vmatprep.subr.bf16.mxu1 %v6681_v23 }
 0x3af   : > { %5286 = vmatpush3.bf16.msra.mxu0 %v6796_v16 }
 0x3b0   : > { %5287 = vmatprep.subr.bf16.mxu0 %v8231_v11  ;;  %1573 = vmatpush1.bf16.msra.mxu1 %v6692_v29 }
 0x3b1   : > { %1574 = vmatprep.subr.bf16.mxu1 %v6702_v21 }
 0x3b3   : > { %5288 = vmatpush3.bf16.msra.mxu0 %v6804_v19 }
 0x3b4   : > { %5289 = vmatprep.subr.bf16.mxu0 %v8231_v11  ;;  %1575 = vmatpush1.bf16.msra.mxu1 %v6712_v24 }
 0x3b5   : > { %1576 = vmatprep.subr.bf16.mxu1 %v6722_v14 }
 0x3b7   : > { %5290 = vmatpush3.bf16.msra.mxu0 %v6812_v10 }
 0x3b8   : > { %1603 = vmatprep.subr.bf16.mxu0 %v6602_v57  ;;  %1577 = vmatpush1.bf16.msra.mxu1 %v6732_v36 }
 0x3b9   : > { %5295 = vmatprep.subr.bf16.mxu1 %v8231_v11 }
 0x3ba   : > { %5292 = vmatmul.mubr.bf16.vlgmr.msra.gmra.mrb[16].mxu0 %v1390_v49  ;;  %v8232_v49 = vld [vmem:[#allocation106_spill] sm:$0xff] }
 0x3bb   : > { %1604 = vmatpush1.bf16.msra.mxu0 %v6611_v62  ;;  %1635 = vmatprep.mubr.bf16.mxu0 %v8222_v35 }
 0x3bc   : > { %1605 = vmatprep.subr.bf16.mxu0 %v6615_v51 }
 0x3bf   : > { %1606 = vmatpush1.bf16.msra.mxu0 %v6624_v54 }
 0x3c0   : > { %1607 = vmatprep.subr.bf16.mxu0 %v6635_v3 }
 0x3c3   : > { %1608 = vmatpush1.bf16.msra.mxu0 %v6645_v50 }
 0x3c4   : > { %1609 = vmatprep.subr.bf16.mxu0 %v6655_v12 }
 0x3c7   : > { %1610 = vmatpush1.bf16.msra.mxu0 %v6666_v18 }
 0x3c8   : > { %1611 = vmatprep.subr.bf16.mxu0 %v6676_v20 }
 0x3cb   : > { %1612 = vmatpush1.bf16.msra.mxu0 %v6687_v26 }
 0x3cc   : > { %1613 = vmatprep.subr.bf16.mxu0 %v6697_v15 }
 0x3cf   : > { %1614 = vmatpush1.bf16.msra.mxu0 %v6707_v27 }
 0x3d0   : > { %1615 = vmatprep.subr.bf16.mxu0 %v6717_v30 }
 0x3d3   : > { %1616 = vmatpush1.bf16.msra.mxu0 %v6727_v17 }
 0x3d4   : > { %1617 = vmatprep.subr.bf16.mxu0 %v6737_v38 }
 0x3d7   : > { %1618 = vmatpush1.bf16.msra.mxu0 %v6743_v39 }
 0x3d8   : > { %1717 = vmatprep.subr.bf16.mxu0 %v6584_v37 }
 0x46d   : > { %v1426_v34 = vpop.f32.mrb[12].mxu0  ;;  %v1467_v58 = vpop.f32.mrb[12].mxu1 }
 0x46e   : > { %v1428_v7 = vpop.f32.mrb[13].mxu0  ;;  %v1468_v28 = vpop.f32.mrb[13].mxu1  ;;  %v1517_v13 = vrot.slane %v1426_v34, 2 }
 0x46f   : > { %v1518_v42 = vrot.slane %v1428_v7, 2  ;;  %v1430_v22 = vpop.f32.mrb[14].mxu0  ;;  %v1470_v52 = vpop.f32.mrb[14].mxu1  ;;  %v1519_v40 = vrot.slane %v1468_v28, 2 }
 0x470   : > { %v1431_v33 = vpop.f32.mrb[15].mxu0  ;;  %v1471_v25 = vpop.f32.mrb[15].mxu1  ;;  %v1525_v4 = vadd.f32 %v1517_v13, %v6540_v63  ;;  %v1549_v22 = vrot.slane %v6904_v1, 6 }
 0x471   : > { %v1526_v5 = vadd.f32 %v1518_v42, %v6542_v59  ;;  %v1527_v58 = vadd.f32 %v1519_v40, %v8232_v49 }
 0x472   : > { %v4905_v32 = vmul.f32 -1.442695, %v1525_v4 }
 0x473   : > { %v4906_v47 = vmul.f32 -1.442695, %v1526_v5  ;;  %v4907_v52 = vmul.f32 -1.442695, %v1527_v58 }
 0x475   : > { %5761 = vpow2.f32 %v4906_v47 }
 0x476   : > { %5763 = vpow2.f32 %v4905_v32 }
 0x47f   : > { %v5762_v2 = vpop.eup %5761 }
 0x480   : > { %v1538_v55 = vadd.f32 1.0, %v5762_v2  ;;  %v5764_v7 = vpop.eup %5763 }
 0x481   : > { %v1532_v25 = vadd.f32 1.0, %v5764_v7 }
 0x482   : > { %5765 = vrcp.f32 %v1538_v55 }
 0x483   : > { %5767 = vpow2.f32 %v4907_v52 }
 0x484   : > { %5769 = vrcp.f32 %v1532_v25 }
 0x48c   : > { %v5766_v33 = vpop.eup %5765 }
 0x48d   : > { %v1551_v42 = vmul.f32 %v5766_v33, %v1549_v22  ;;  %v1507_v5 = vpop.f32.mrb[16].mxu0  ;;  %v5768_v28 = vpop.eup %5767 }
 0x48e   : > { %v1520_v34 = vrot.slane %v1507_v5, 2  ;;  %v5293_v47 = vpop.f32.mrb[17].mxu0  ;;  %v5770_v2 = vpop.eup %5769  ;;  %v1544_v40 = vadd.f32 1.0, %v5768_v28 }
 0x48f   : > { %v1510_v13 = vpop.f32.mrb[18].mxu0  ;;  %v8233_v47 = vld [vmem:[#allocation104_spill] sm:$0xff] }
 0x490   : > { %v1528_v4 = vadd.f32 %v1520_v34, %v6575_v46  ;;  %v5294_v32 = vpop.f32.mrb[19].mxu0 }
 0x492   : > { %5771 = vtanh.f32 %v1528_v4 }
 0x493   : > { %5773 = vrcp.f32 %v1544_v40  ;;  %v8234_v40 = vld [vmem:[#allocation103_spill] sm:$0xff] }
 0x49c   : > { %v5772_v55 = vpop.eup %5771 }
 0x49d   : > { %v1552_v49 = vmul.f32 %v5772_v55, %v5770_v2  ;;  %v5774_v58 = vpop.eup %5773 }
 0x49f   : > { %v6965_v1 = vadd.f32 %v1552_v49, %v1551_v42 }
 0x4a1   : > { %5775 = vtanh.f32 %v6965_v1  ;;  %1557 = vst [vmem:[#allocation3] sm:$0xc0] %v6965_v1  ;;  %v1707_v46 = vrot.slane %v6965_v1, 6 }
 0x4ab   : > { %v5776_v7 = vpop.eup %5775 }
 0x4ac   : > { %v1555_v22 = vmul.f32 %v5776_v7, %v5774_v58 }
 0x4ae   : > { %1556 = vst [vmem:[#allocation2] sm:$0xc0] %v1555_v22  ;;  %v1558_v52 = vpack.c.bf16 %v1555_v22, %v1555_v22 }
 0x4b0   : > { %v1560_v33 = vrot.slane %v1558_v52, 3  ;;  %v8235_v52 = vld [vmem:[#allocation108_spill] sm:$0xff] }
 0x4b2   : > { %1595 = vmatmul.mubr.bf16.vlgmr.msra.gmra.mrb[16].mxu1 %v1560_v33  ;;  %1636 = vmatmul.mubr.bf16.vlgmr.msra.gmra.mrb[20].mxu0 %v1560_v33 }
 0x4b3   : > { %5296 = vmatpush3.bf16.msra.mxu1 %v6756_v41  ;;  %5311 = vmatprep.mubr.msk.bf16.mxu1 %vm6100_vm1, %v8231_v11 }
 0x4b4   : > { %5297 = vmatprep.subr.bf16.mxu1 %v8231_v11  ;;  %1718 = vmatpush1.bf16.msra.mxu0 %v6588_v31 }
 0x4b5   : > { %1719 = vmatprep.subr.bf16.mxu0 %v6592_v53  ;;  %1749 = vmatprep.mubr.bf16.mxu0 %v8222_v35 }
 0x4b7   : > { %5298 = vmatpush3.bf16.msra.mxu1 %v6761_v8 }
 0x4b8   : > { %5299 = vmatprep.subr.bf16.mxu1 %v8231_v11  ;;  %1720 = vmatpush1.bf16.msra.mxu0 %v6598_v56 }
 0x4b9   : > { %1721 = vmatprep.subr.bf16.mxu0 %v6607_v61 }
 0x4bb   : > { %5300 = vmatpush3.bf16.msra.mxu1 %v6772_v44 }
 0x4bc   : > { %5301 = vmatprep.subr.bf16.mxu1 %v8231_v11  ;;  %1722 = vmatpush1.bf16.msra.mxu0 %v6630_v0 }
 0x4bd   : > { %1723 = vmatprep.subr.bf16.mxu0 %v6640_v9 }
 0x4bf   : > { %5302 = vmatpush3.bf16.msra.mxu1 %v6780_v45 }
 0x4c0   : > { %5303 = vmatprep.subr.bf16.mxu1 %v8231_v11  ;;  %1724 = vmatpush1.bf16.msra.mxu0 %v6650_v60 }
 0x4c1   : > { %1725 = vmatprep.subr.bf16.mxu0 %v6660_v43 }
 0x4c3   : > { %5304 = vmatpush3.bf16.msra.mxu1 %v6788_v48 }
 0x4c4   : > { %5305 = vmatprep.subr.bf16.mxu1 %v8231_v11  ;;  %1726 = vmatpush1.bf16.msra.mxu0 %v6671_v6 }
 0x4c5   : > { %1727 = vmatprep.subr.bf16.mxu0 %v6681_v23 }
 0x4c7   : > { %5306 = vmatpush3.bf16.msra.mxu1 %v6796_v16 }
 0x4c8   : > { %5307 = vmatprep.subr.bf16.mxu1 %v8231_v11  ;;  %1728 = vmatpush1.bf16.msra.mxu0 %v6692_v29 }
 0x4c9   : > { %1729 = vmatprep.subr.bf16.mxu0 %v6702_v21 }
 0x4cb   : > { %5308 = vmatpush3.bf16.msra.mxu1 %v6804_v19 }
 0x4cc   : > { %5309 = vmatprep.subr.bf16.mxu1 %v8231_v11  ;;  %1730 = vmatpush1.bf16.msra.mxu0 %v6712_v24 }
 0x4cd   : > { %1731 = vmatprep.subr.bf16.mxu0 %v6722_v14 }
 0x4cf   : > { %5310 = vmatpush3.bf16.msra.mxu1 %v6812_v10 }
 0x4d0   : > { %1758 = vmatprep.subr.bf16.mxu1 %v6602_v57  ;;  %1732 = vmatpush1.bf16.msra.mxu0 %v6732_v36 }
 0x4d1   : > { %5315 = vmatprep.subr.bf16.mxu0 %v8231_v11 }
 0x4d2   : > { %5312 = vmatmul.mubr.bf16.vlgmr.msra.gmra.mrb[20].mxu1 %v1560_v33 }
 0x4d3   : > { %1759 = vmatpush1.bf16.msra.mxu1 %v6611_v62  ;;  %1790 = vmatprep.mubr.bf16.mxu1 %v8222_v35 }
 0x4d4   : > { %1760 = vmatprep.subr.bf16.mxu1 %v6615_v51 }
 0x4d7   : > { %1761 = vmatpush1.bf16.msra.mxu1 %v6624_v54 }
 0x4d8   : > { %1762 = vmatprep.subr.bf16.mxu1 %v6635_v3 }
 0x4db   : > { %1763 = vmatpush1.bf16.msra.mxu1 %v6645_v50 }
 0x4dc   : > { %1764 = vmatprep.subr.bf16.mxu1 %v6655_v12 }
 0x4df   : > { %1765 = vmatpush1.bf16.msra.mxu1 %v6666_v18 }
 0x4e0   : > { %1766 = vmatprep.subr.bf16.mxu1 %v6676_v20 }
 0x4e3   : > { %1767 = vmatpush1.bf16.msra.mxu1 %v6687_v26 }
 0x4e4   : > { %1768 = vmatprep.subr.bf16.mxu1 %v6697_v15 }
 0x4e7   : > { %1769 = vmatpush1.bf16.msra.mxu1 %v6707_v27 }
 0x4e8   : > { %1770 = vmatprep.subr.bf16.mxu1 %v6717_v30 }
 0x4eb   : > { %1771 = vmatpush1.bf16.msra.mxu1 %v6727_v17 }
 0x4ec   : > { %1772 = vmatprep.subr.bf16.mxu1 %v6737_v38 }
 0x4ef   : > { %1773 = vmatpush1.bf16.msra.mxu1 %v6743_v39 }
 0x4f0   : > { %1887 = vmatprep.subr.bf16.mxu1 %v6584_v37 }
 0x585   : > { %v1596_v25 = vpop.f32.mrb[16].mxu1  ;;  %v1637_v42 = vpop.f32.mrb[20].mxu0 }
 0x586   : > { %v1598_v5 = vpop.f32.mrb[17].mxu1  ;;  %v1638_v34 = vpop.f32.mrb[21].mxu0  ;;  %v1683_v49 = vadd.f32 %v1596_v25, %v8234_v40 }
 0x587   : > { %v1684_v13 = vadd.f32 %v1598_v5, %v8233_v47  ;;  %v1600_v4 = vpop.f32.mrb[18].mxu1  ;;  %v1640_v32 = vpop.f32.mrb[22].mxu0  ;;  %v1685_v33 = vadd.f32 %v1638_v34, %v8235_v52 }
 0x588   : > { %v1601_v28 = vpop.f32.mrb[19].mxu1  ;;  %v1641_v2 = vpop.f32.mrb[23].mxu0  ;;  %v4908_v58 = vmul.f32 -1.442695, %v1683_v49 }
 0x589   : > { %v4909_v55 = vmul.f32 -1.442695, %v1684_v13  ;;  %v4910_v59 = vmul.f32 -1.442695, %v1685_v33  ;;  %v8236_v13 = vld [vmem:[#allocation120_spill] sm:$0xff] }
 0x58b   : > { %5777 = vpow2.f32 %v4909_v55 }
 0x58c   : > { %5779 = vpow2.f32 %v4908_v58 }
 0x595   : > { %v5778_v7 = vpop.eup %5777 }
 0x596   : > { %v1696_v22 = vadd.f32 1.0, %v5778_v7  ;;  %v5780_v42 = vpop.eup %5779 }
 0x597   : > { %v1690_v4 = vadd.f32 1.0, %v5780_v42 }
 0x598   : > { %5781 = vrcp.f32 %v1696_v22 }
 0x599   : > { %5783 = vpow2.f32 %v4910_v59 }
 0x59a   : > { %5785 = vrcp.f32 %v1690_v4 }
 0x5a2   : > { %v5782_v5 = vpop.eup %5781 }
 0x5a3   : > { %v1709_v32 = vmul.f32 %v5782_v5, %v1707_v46  ;;  %v5784_v58 = vpop.eup %5783 }
 0x5a4   : > { %v5786_v7 = vpop.eup %5785  ;;  %v1702_v34 = vadd.f32 1.0, %v5784_v58 }
 0x5a5   : > { %v1677_v28 = vpop.f32.mrb[20].mxu1 }
 0x5a6   : > { %v1686_v2 = vadd.f32 %v1677_v28, %v8236_v13  ;;  %v5313_v55 = vpop.f32.mrb[21].mxu1 }
 0x5a7   : > { %v1680_v25 = vpop.f32.mrb[22].mxu1 }
 0x5a8   : > { %5787 = vtanh.f32 %v1686_v2  ;;  %v5314_v49 = vpop.f32.mrb[23].mxu1 }
 0x5a9   : > { %5789 = vrcp.f32 %v1702_v34 }
 0x5b2   : > { %v5788_v22 = vpop.eup %5787 }
 0x5b3   : > { %v1710_v63 = vmul.f32 %v5788_v22, %v5786_v7  ;;  %v5790_v59 = vpop.eup %5789 }
 0x5b5   : > { %v7026_v52 = vadd.f32 %v1710_v63, %v1709_v32 }
 0x5b7   : > { %5791 = vtanh.f32 %v7026_v52  ;;  %1715 = vst [vmem:[#allocation3 + $0x8] sm:$0x3] %v7026_v52 }
 0x5c1   : > { %v5792_v46 = vpop.eup %5791 }
 0x5c2   : > { %v1713_v1 = vmul.f32 %v5792_v46, %v5790_v59 }
 0x5c4   : > { %1714 = vst [vmem:[#allocation2 + $0x8] sm:$0x3] %v1713_v1  ;;  %v1716_v33 = vpack.c.bf16 %v1713_v1, %v1713_v1 }
 0x5c6   : > { %1750 = vmatmul.mubr.bf16.vlgmr.msra.gmra.mrb[24].mxu0 %v1716_v33  ;;  %1791 = vmatmul.mubr.bf16.vlgmr.msra.gmra.mrb[24].mxu1 %v1716_v33 }
 0x5c7   : > { %5316 = vmatpush3.bf16.msra.mxu0 %v6756_v41  ;;  %5331 = vmatprep.mubr.msk.bf16.mxu0 %vm6100_vm1, %v8231_v11 }
 0x5c8   : > { %5317 = vmatprep.subr.bf16.mxu0 %v8231_v11  ;;  %1888 = vmatpush1.bf16.msra.mxu1 %v6588_v31 }
 0x5c9   : > { %1889 = vmatprep.subr.bf16.mxu1 %v6592_v53  ;;  %1919 = vmatprep.mubr.bf16.mxu1 %v8222_v35 }
 0x5cb   : > { %5318 = vmatpush3.bf16.msra.mxu0 %v6761_v8 }
 0x5cc   : > { %5319 = vmatprep.subr.bf16.mxu0 %v8231_v11  ;;  %1890 = vmatpush1.bf16.msra.mxu1 %v6598_v56 }
 0x5cd   : > { %1891 = vmatprep.subr.bf16.mxu1 %v6607_v61 }
 0x5cf   : > { %5320 = vmatpush3.bf16.msra.mxu0 %v6772_v44 }
 0x5d0   : > { %5321 = vmatprep.subr.bf16.mxu0 %v8231_v11  ;;  %1892 = vmatpush1.bf16.msra.mxu1 %v6630_v0 }
 0x5d1   : > { %1893 = vmatprep.subr.bf16.mxu1 %v6640_v9 }
 0x5d3   : > { %5322 = vmatpush3.bf16.msra.mxu0 %v6780_v45 }
 0x5d4   : > { %5323 = vmatprep.subr.bf16.mxu0 %v8231_v11  ;;  %1894 = vmatpush1.bf16.msra.mxu1 %v6650_v60 }
 0x5d5   : > { %1895 = vmatprep.subr.bf16.mxu1 %v6660_v43 }
 0x5d7   : > { %5324 = vmatpush3.bf16.msra.mxu0 %v6788_v48 }
 0x5d8   : > { %5325 = vmatprep.subr.bf16.mxu0 %v8231_v11  ;;  %1896 = vmatpush1.bf16.msra.mxu1 %v6671_v6 }
 0x5d9   : > { %1897 = vmatprep.subr.bf16.mxu1 %v6681_v23 }
 0x5db   : > { %5326 = vmatpush3.bf16.msra.mxu0 %v6796_v16 }
 0x5dc   : > { %5327 = vmatprep.subr.bf16.mxu0 %v8231_v11  ;;  %1898 = vmatpush1.bf16.msra.mxu1 %v6692_v29 }
 0x5dd   : > { %1899 = vmatprep.subr.bf16.mxu1 %v6702_v21 }
 0x5df   : > { %5328 = vmatpush3.bf16.msra.mxu0 %v6804_v19 }
 0x5e0   : > { %5329 = vmatprep.subr.bf16.mxu0 %v8231_v11  ;;  %1900 = vmatpush1.bf16.msra.mxu1 %v6712_v24 }
 0x5e1   : > { %1901 = vmatprep.subr.bf16.mxu1 %v6722_v14 }
 0x5e3   : > { %5330 = vmatpush3.bf16.msra.mxu0 %v6812_v10 }
 0x5e4   : > { %1928 = vmatprep.subr.bf16.mxu0 %v6602_v57  ;;  %1902 = vmatpush1.bf16.msra.mxu1 %v6732_v36 }
 0x5e5   : > { %5335 = vmatprep.subr.bf16.mxu1 %v8231_v11 }
 0x5e6   : > { %5332 = vmatmul.mubr.bf16.vlgmr.msra.gmra.mrb[28].mxu0 %v1716_v33  ;;  %v8237_v33 = vld [vmem:[#allocation108_spill] sm:$0xff] }
 0x5e7   : > { %1929 = vmatpush1.bf16.msra.mxu0 %v6611_v62  ;;  %1960 = vmatprep.mubr.bf16.mxu0 %v8222_v35 }
 0x5e8   : > { %1930 = vmatprep.subr.bf16.mxu0 %v6615_v51 }
 0x5eb   : > { %1931 = vmatpush1.bf16.msra.mxu0 %v6624_v54 }
 0x5ec   : > { %1932 = vmatprep.subr.bf16.mxu0 %v6635_v3 }
 0x5ef   : > { %1933 = vmatpush1.bf16.msra.mxu0 %v6645_v50 }
 0x5f0   : > { %1934 = vmatprep.subr.bf16.mxu0 %v6655_v12 }
 0x5f3   : > { %1935 = vmatpush1.bf16.msra.mxu0 %v6666_v18 }
 0x5f4   : > { %1936 = vmatprep.subr.bf16.mxu0 %v6676_v20 }
 0x5f7   : > { %1937 = vmatpush1.bf16.msra.mxu0 %v6687_v26 }
 0x5f8   : > { %1938 = vmatprep.subr.bf16.mxu0 %v6697_v15 }
 0x5fb   : > { %1939 = vmatpush1.bf16.msra.mxu0 %v6707_v27 }
 0x5fc   : > { %1940 = vmatprep.subr.bf16.mxu0 %v6717_v30 }
 0x5ff   : > { %1941 = vmatpush1.bf16.msra.mxu0 %v6727_v17 }
 0x600   : > { %1942 = vmatprep.subr.bf16.mxu0 %v6737_v38 }
 0x603   : > { %1943 = vmatpush1.bf16.msra.mxu0 %v6743_v39 }
 0x604   : > { %2057 = vmatprep.subr.bf16.mxu0 %v6584_v37 }
 0x699   : > { %v1751_v63 = vpop.f32.mrb[24].mxu0  ;;  %v1792_v42 = vpop.f32.mrb[24].mxu1 }
 0x69a   : > { %v1753_v5 = vpop.f32.mrb[25].mxu0  ;;  %v1793_v4 = vpop.f32.mrb[25].mxu1  ;;  %v1842_v7 = vrot.slane %v1751_v63, 6 }
 0x69b   : > { %v1843_v32 = vrot.slane %v1753_v5, 6  ;;  %v1755_v28 = vpop.f32.mrb[26].mxu0  ;;  %v1795_v2 = vpop.f32.mrb[26].mxu1  ;;  %v1844_v1 = vrot.slane %v1793_v4, 6 }
 0x69c   : > { %v1756_v55 = vpop.f32.mrb[27].mxu0  ;;  %v1796_v25 = vpop.f32.mrb[27].mxu1  ;;  %v1850_v22 = vadd.f32 %v1842_v7, %v8234_v40  ;;  %v1874_v28 = vrot.slane %v7026_v52, 6 }
 0x69d   : > { %v1851_v49 = vadd.f32 %v1843_v32, %v8233_v47  ;;  %v1852_v42 = vadd.f32 %v1844_v1, %v8237_v33 }
 0x69e   : > { %v4911_v34 = vmul.f32 -1.442695, %v1850_v22 }
 0x69f   : > { %v4912_v58 = vmul.f32 -1.442695, %v1851_v49  ;;  %v4913_v2 = vmul.f32 -1.442695, %v1852_v42 }
 0x6a1   : > { %5793 = vpow2.f32 %v4912_v58 }
 0x6a2   : > { %5795 = vpow2.f32 %v4911_v34 }
 0x6ab   : > { %v5794_v59 = vpop.eup %5793 }
 0x6ac   : > { %v1863_v46 = vadd.f32 1.0, %v5794_v59  ;;  %v5796_v5 = vpop.eup %5795 }
 0x6ad   : > { %v1857_v25 = vadd.f32 1.0, %v5796_v5 }
 0x6ae   : > { %5797 = vrcp.f32 %v1863_v46 }
 0x6af   : > { %5799 = vpow2.f32 %v4913_v2 }
 0x6b0   : > { %5801 = vrcp.f32 %v1857_v25 }
 0x6b8   : > { %v5798_v55 = vpop.eup %5797 }
 0x6b9   : > { %v1876_v32 = vmul.f32 %v5798_v55, %v1874_v28  ;;  %v1832_v49 = vpop.f32.mrb[28].mxu0  ;;  %v5800_v4 = vpop.eup %5799 }
 0x6ba   : > { %v1845_v63 = vrot.slane %v1832_v49, 6  ;;  %v5333_v58 = vpop.f32.mrb[29].mxu0  ;;  %v5802_v59 = vpop.eup %5801  ;;  %v1869_v1 = vadd.f32 1.0, %v5800_v4 }
 0x6bb   : > { %v1835_v7 = vpop.f32.mrb[30].mxu0 }
 0x6bc   : > { %v1853_v22 = vadd.f32 %v1845_v63, %v8236_v13  ;;  %v5334_v34 = vpop.f32.mrb[31].mxu0 }
 0x6be   : > { %5803 = vtanh.f32 %v1853_v22 }
 0x6bf   : > { %5805 = vrcp.f32 %v1869_v1 }
 0x6c8   : > { %v5804_v46 = vpop.eup %5803 }
 0x6c9   : > { %v1877_v33 = vmul.f32 %v5804_v46, %v5802_v59  ;;  %v5806_v42 = vpop.eup %5805 }
 0x6cb   : > { %v7087_v52 = vadd.f32 %v1877_v33, %v1876_v32 }
 0x6cd   : > { %5807 = vtanh.f32 %v7087_v52  ;;  %1882 = vst [vmem:[#allocation3 + $0x8] sm:$0xc] %v7087_v52 }
 0x6d7   : > { %v5808_v5 = vpop.eup %5807 }
 0x6d8   : > { %v1880_v28 = vmul.f32 %v5808_v5, %v5806_v42 }
 0x6da   : > { %1881 = vst [vmem:[#allocation2 + $0x8] sm:$0xc] %v1880_v28  ;;  %v1883_v2 = vpack.c.bf16 %v1880_v28, %v1880_v28 }
 0x6dc   : > { %v1885_v55 = vrot.slane %v1883_v2, 1 }
 0x6de   : > { %1920 = vmatmul.mubr.bf16.vlgmr.msra.gmra.mrb[28].mxu1 %v1885_v55  ;;  %1961 = vmatmul.mubr.bf16.vlgmr.msra.gmra.mrb[32].mxu0 %v1885_v55 }
 0x6df   : > { %5336 = vmatpush3.bf16.msra.mxu1 %v6756_v41  ;;  %5351 = vmatprep.mubr.msk.bf16.mxu1 %vm6100_vm1, %v8231_v11 }
 0x6e0   : > { %5337 = vmatprep.subr.bf16.mxu1 %v8231_v11  ;;  %2058 = vmatpush1.bf16.msra.mxu0 %v6588_v31 }
 0x6e1   : > { %2059 = vmatprep.subr.bf16.mxu0 %v6592_v53  ;;  %2089 = vmatprep.mubr.bf16.mxu0 %v8222_v35 }
 0x6e3   : > { %5338 = vmatpush3.bf16.msra.mxu1 %v6761_v8 }
 0x6e4   : > { %5339 = vmatprep.subr.bf16.mxu1 %v8231_v11  ;;  %2060 = vmatpush1.bf16.msra.mxu0 %v6598_v56 }
 0x6e5   : > { %2061 = vmatprep.subr.bf16.mxu0 %v6607_v61 }
 0x6e7   : > { %5340 = vmatpush3.bf16.msra.mxu1 %v6772_v44 }
 0x6e8   : > { %5341 = vmatprep.subr.bf16.mxu1 %v8231_v11  ;;  %2062 = vmatpush1.bf16.msra.mxu0 %v6630_v0 }
 0x6e9   : > { %2063 = vmatprep.subr.bf16.mxu0 %v6640_v9 }
 0x6eb   : > { %5342 = vmatpush3.bf16.msra.mxu1 %v6780_v45 }
 0x6ec   : > { %5343 = vmatprep.subr.bf16.mxu1 %v8231_v11  ;;  %2064 = vmatpush1.bf16.msra.mxu0 %v6650_v60 }
 0x6ed   : > { %2065 = vmatprep.subr.bf16.mxu0 %v6660_v43 }
 0x6ef   : > { %5344 = vmatpush3.bf16.msra.mxu1 %v6788_v48 }
 0x6f0   : > { %5345 = vmatprep.subr.bf16.mxu1 %v8231_v11  ;;  %2066 = vmatpush1.bf16.msra.mxu0 %v6671_v6 }
 0x6f1   : > { %2067 = vmatprep.subr.bf16.mxu0 %v6681_v23 }
 0x6f3   : > { %5346 = vmatpush3.bf16.msra.mxu1 %v6796_v16 }
 0x6f4   : > { %5347 = vmatprep.subr.bf16.mxu1 %v8231_v11  ;;  %2068 = vmatpush1.bf16.msra.mxu0 %v6692_v29 }
 0x6f5   : > { %2069 = vmatprep.subr.bf16.mxu0 %v6702_v21 }
 0x6f7   : > { %5348 = vmatpush3.bf16.msra.mxu1 %v6804_v19 }
 0x6f8   : > { %5349 = vmatprep.subr.bf16.mxu1 %v8231_v11  ;;  %2070 = vmatpush1.bf16.msra.mxu0 %v6712_v24 }
 0x6f9   : > { %2071 = vmatprep.subr.bf16.mxu0 %v6722_v14 }
 0x6fb   : > { %5350 = vmatpush3.bf16.msra.mxu1 %v6812_v10 }
 0x6fc   : > { %2098 = vmatprep.subr.bf16.mxu1 %v6602_v57  ;;  %2072 = vmatpush1.bf16.msra.mxu0 %v6732_v36 }
 0x6fd   : > { %5355 = vmatprep.subr.bf16.mxu0 %v8231_v11 }
 0x6fe   : > { %5352 = vmatmul.mubr.bf16.vlgmr.msra.gmra.mrb[32].mxu1 %v1885_v55  ;;  %v8238_v55 = vld [vmem:[#allocation108_spill] sm:$0xff] }
 0x6ff   : > { %2099 = vmatpush1.bf16.msra.mxu1 %v6611_v62  ;;  %2130 = vmatprep.mubr.bf16.mxu1 %v8222_v35 }
 0x700   : > { %2100 = vmatprep.subr.bf16.mxu1 %v6615_v51 }
 0x703   : > { %2101 = vmatpush1.bf16.msra.mxu1 %v6624_v54 }
 0x704   : > { %2102 = vmatprep.subr.bf16.mxu1 %v6635_v3 }
 0x707   : > { %2103 = vmatpush1.bf16.msra.mxu1 %v6645_v50 }
 0x708   : > { %2104 = vmatprep.subr.bf16.mxu1 %v6655_v12 }
 0x70b   : > { %2105 = vmatpush1.bf16.msra.mxu1 %v6666_v18 }
 0x70c   : > { %2106 = vmatprep.subr.bf16.mxu1 %v6676_v20 }
 0x70f   : > { %2107 = vmatpush1.bf16.msra.mxu1 %v6687_v26 }
 0x710   : > { %2108 = vmatprep.subr.bf16.mxu1 %v6697_v15 }
 0x713   : > { %2109 = vmatpush1.bf16.msra.mxu1 %v6707_v27 }
 0x714   : > { %2110 = vmatprep.subr.bf16.mxu1 %v6717_v30 }
 0x717   : > { %2111 = vmatpush1.bf16.msra.mxu1 %v6727_v17 }
 0x718   : > { %2112 = vmatprep.subr.bf16.mxu1 %v6737_v38 }
 0x71b   : > { %2113 = vmatpush1.bf16.msra.mxu1 %v6743_v39 }
 0x71c   : > { %2227 = vmatprep.subr.bf16.mxu1 %v6584_v37 }
 0x7b1   : > { %v1921_v33 = vpop.f32.mrb[28].mxu1  ;;  %v1962_v25 = vpop.f32.mrb[32].mxu0 }
 0x7b2   : > { %v1923_v32 = vpop.f32.mrb[29].mxu1  ;;  %v1963_v49 = vpop.f32.mrb[33].mxu0  ;;  %v2012_v46 = vrot.slane %v1921_v33, 4 }
 0x7b3   : > { %v2013_v63 = vrot.slane %v1923_v32, 4  ;;  %v1925_v58 = vpop.f32.mrb[30].mxu1  ;;  %v1965_v7 = vpop.f32.mrb[34].mxu0  ;;  %v2014_v2 = vrot.slane %v1963_v49, 4 }
 0x7b4   : > { %v1926_v22 = vpop.f32.mrb[31].mxu1  ;;  %v1966_v34 = vpop.f32.mrb[35].mxu0  ;;  %v2020_v1 = vadd.f32 %v2012_v46, %v8234_v40  ;;  %v2044_v58 = vrot.slane %v7087_v52, 6 }
 0x7b5   : > { %v2021_v4 = vadd.f32 %v2013_v63, %v8233_v47  ;;  %v2022_v25 = vadd.f32 %v2014_v2, %v8238_v55 }
 0x7b6   : > { %v4914_v42 = vmul.f32 -1.442695, %v2020_v1 }
 0x7b7   : > { %v4915_v59 = vmul.f32 -1.442695, %v2021_v4  ;;  %v4916_v7 = vmul.f32 -1.442695, %v2022_v25 }
 0x7b9   : > { %5809 = vpow2.f32 %v4915_v59 }
 0x7ba   : > { %5811 = vpow2.f32 %v4914_v42 }
 0x7c3   : > { %v5810_v5 = vpop.eup %5809 }
 0x7c4   : > { %v2033_v28 = vadd.f32 1.0, %v5810_v5  ;;  %v5812_v32 = vpop.eup %5811 }
 0x7c5   : > { %v2027_v34 = vadd.f32 1.0, %v5812_v32 }
 0x7c6   : > { %5813 = vrcp.f32 %v2033_v28 }
 0x7c7   : > { %5815 = vpow2.f32 %v4916_v7 }
 0x7c8   : > { %5817 = vrcp.f32 %v2027_v34 }
 0x7d0   : > { %v5814_v22 = vpop.eup %5813 }
 0x7d1   : > { %v2046_v63 = vmul.f32 %v5814_v22, %v2044_v58  ;;  %v2002_v4 = vpop.f32.mrb[32].mxu1  ;;  %v5816_v49 = vpop.eup %5815 }
 0x7d2   : > { %v2015_v33 = vrot.slane %v2002_v4, 4  ;;  %v5353_v59 = vpop.f32.mrb[33].mxu1  ;;  %v5818_v5 = vpop.eup %5817  ;;  %v2039_v2 = vadd.f32 1.0, %v5816_v49 }
 0x7d3   : > { %v2005_v46 = vpop.f32.mrb[34].mxu1 }
 0x7d4   : > { %v2023_v1 = vadd.f32 %v2015_v33, %v8236_v13  ;;  %v5354_v42 = vpop.f32.mrb[35].mxu1 }
 0x7d6   : > { %5819 = vtanh.f32 %v2023_v1 }
 0x7d7   : > { %5821 = vrcp.f32 %v2039_v2 }
 0x7e0   : > { %v5820_v28 = vpop.eup %5819 }
 0x7e1   : > { %v2047_v55 = vmul.f32 %v5820_v28, %v5818_v5  ;;  %v5822_v25 = vpop.eup %5821 }
 0x7e3   : > { %v7148_v52 = vadd.f32 %v2047_v55, %v2046_v63 }
 0x7e5   : > { %5823 = vtanh.f32 %v7148_v52  ;;  %2052 = vst [vmem:[#allocation3 + $0x8] sm:$0x30] %v7148_v52 }
 0x7ef   : > { %v5824_v32 = vpop.eup %5823 }
 0x7f0   : > { %v2050_v58 = vmul.f32 %v5824_v32, %v5822_v25 }
 0x7f2   : > { %2051 = vst [vmem:[#allocation2 + $0x8] sm:$0x30] %v2050_v58  ;;  %v2053_v7 = vpack.c.bf16 %v2050_v58, %v2050_v58 }
 0x7f4   : > { %v2055_v22 = vrot.slane %v2053_v7, 2 }
 0x7f6   : > { %2090 = vmatmul.mubr.bf16.vlgmr.msra.gmra.mrb[36].mxu0 %v2055_v22  ;;  %2131 = vmatmul.mubr.bf16.vlgmr.msra.gmra.mrb[36].mxu1 %v2055_v22 }
 0x7f7   : > { %5356 = vmatpush3.bf16.msra.mxu0 %v6756_v41  ;;  %5371 = vmatprep.mubr.msk.bf16.mxu0 %vm6100_vm1, %v8231_v11 }
 0x7f8   : > { %5357 = vmatprep.subr.bf16.mxu0 %v8231_v11  ;;  %2228 = vmatpush1.bf16.msra.mxu1 %v6588_v31 }
 0x7f9   : > { %2229 = vmatprep.subr.bf16.mxu1 %v6592_v53  ;;  %2259 = vmatprep.mubr.bf16.mxu1 %v8222_v35 }
 0x7fb   : > { %5358 = vmatpush3.bf16.msra.mxu0 %v6761_v8 }
 0x7fc   : > { %5359 = vmatprep.subr.bf16.mxu0 %v8231_v11  ;;  %2230 = vmatpush1.bf16.msra.mxu1 %v6598_v56 }
 0x7fd   : > { %2231 = vmatprep.subr.bf16.mxu1 %v6607_v61 }
 0x7ff   : > { %5360 = vmatpush3.bf16.msra.mxu0 %v6772_v44 }
 0x800   : > { %5361 = vmatprep.subr.bf16.mxu0 %v8231_v11  ;;  %2232 = vmatpush1.bf16.msra.mxu1 %v6630_v0 }
 0x801   : > { %2233 = vmatprep.subr.bf16.mxu1 %v6640_v9 }
 0x803   : > { %5362 = vmatpush3.bf16.msra.mxu0 %v6780_v45 }
 0x804   : > { %5363 = vmatprep.subr.bf16.mxu0 %v8231_v11  ;;  %2234 = vmatpush1.bf16.msra.mxu1 %v6650_v60 }
 0x805   : > { %2235 = vmatprep.subr.bf16.mxu1 %v6660_v43 }
 0x807   : > { %5364 = vmatpush3.bf16.msra.mxu0 %v6788_v48 }
 0x808   : > { %5365 = vmatprep.subr.bf16.mxu0 %v8231_v11  ;;  %2236 = vmatpush1.bf16.msra.mxu1 %v6671_v6 }
 0x809   : > { %2237 = vmatprep.subr.bf16.mxu1 %v6681_v23 }
 0x80b   : > { %5366 = vmatpush3.bf16.msra.mxu0 %v6796_v16 }
 0x80c   : > { %5367 = vmatprep.subr.bf16.mxu0 %v8231_v11  ;;  %2238 = vmatpush1.bf16.msra.mxu1 %v6692_v29 }
 0x80d   : > { %2239 = vmatprep.subr.bf16.mxu1 %v6702_v21 }
 0x80f   : > { %5368 = vmatpush3.bf16.msra.mxu0 %v6804_v19 }
 0x810   : > { %5369 = vmatprep.subr.bf16.mxu0 %v8231_v11  ;;  %2240 = vmatpush1.bf16.msra.mxu1 %v6712_v24 }
 0x811   : > { %2241 = vmatprep.subr.bf16.mxu1 %v6722_v14 }
 0x813   : > { %5370 = vmatpush3.bf16.msra.mxu0 %v6812_v10 }
 0x814   : > { %2268 = vmatprep.subr.bf16.mxu0 %v6602_v57  ;;  %2242 = vmatpush1.bf16.msra.mxu1 %v6732_v36 }
 0x815   : > { %5375 = vmatprep.subr.bf16.mxu1 %v8231_v11 }
 0x816   : > { %5372 = vmatmul.mubr.bf16.vlgmr.msra.gmra.mrb[40].mxu0 %v2055_v22  ;;  %v8239_v22 = vld [vmem:[#allocation108_spill] sm:$0xff] }
 0x817   : > { %2269 = vmatpush1.bf16.msra.mxu0 %v6611_v62  ;;  %2300 = vmatprep.mubr.bf16.mxu0 %v8222_v35 }
 0x818   : > { %2270 = vmatprep.subr.bf16.mxu0 %v6615_v51 }
 0x81b   : > { %2271 = vmatpush1.bf16.msra.mxu0 %v6624_v54 }
 0x81c   : > { %2272 = vmatprep.subr.bf16.mxu0 %v6635_v3 }
 0x81f   : > { %2273 = vmatpush1.bf16.msra.mxu0 %v6645_v50 }
 0x820   : > { %2274 = vmatprep.subr.bf16.mxu0 %v6655_v12 }
 0x823   : > { %2275 = vmatpush1.bf16.msra.mxu0 %v6666_v18 }
 0x824   : > { %2276 = vmatprep.subr.bf16.mxu0 %v6676_v20 }
 0x827   : > { %2277 = vmatpush1.bf16.msra.mxu0 %v6687_v26 }
 0x828   : > { %2278 = vmatprep.subr.bf16.mxu0 %v6697_v15 }
 0x82b   : > { %2279 = vmatpush1.bf16.msra.mxu0 %v6707_v27 }
 0x82c   : > { %2280 = vmatprep.subr.bf16.mxu0 %v6717_v30 }
 0x82f   : > { %2281 = vmatpush1.bf16.msra.mxu0 %v6727_v17 }
 0x830   : > { %2282 = vmatprep.subr.bf16.mxu0 %v6737_v38 }
 0x833   : > { %2283 = vmatpush1.bf16.msra.mxu0 %v6743_v39 }
 0x834   : > { %2382 = vmatprep.subr.bf16.mxu0 %v6584_v37 }
 0x8c9   : > { %v2091_v55 = vpop.f32.mrb[36].mxu0  ;;  %v2132_v34 = vpop.f32.mrb[36].mxu1 }
 0x8ca   : > { %v2093_v63 = vpop.f32.mrb[37].mxu0  ;;  %v2133_v4 = vpop.f32.mrb[37].mxu1  ;;  %v2182_v28 = vrot.slane %v2091_v55, 2 }
 0x8cb   : > { %v2183_v33 = vrot.slane %v2093_v63, 2  ;;  %v2095_v59 = vpop.f32.mrb[38].mxu0  ;;  %v2135_v46 = vpop.f32.mrb[38].mxu1  ;;  %v2184_v7 = vrot.slane %v2133_v4, 2 }
 0x8cc   : > { %v2096_v1 = vpop.f32.mrb[39].mxu0  ;;  %v2136_v42 = vpop.f32.mrb[39].mxu1  ;;  %v2190_v2 = vadd.f32 %v2182_v28, %v8234_v40  ;;  %v2214_v59 = vrot.slane %v7148_v52, 6 }
 0x8cd   : > { %v2191_v49 = vadd.f32 %v2183_v33, %v8233_v47  ;;  %v2192_v34 = vadd.f32 %v2184_v7, %v8239_v22 }
 0x8ce   : > { %v4917_v25 = vmul.f32 -1.442695, %v2190_v2 }
 0x8cf   : > { %v4918_v5 = vmul.f32 -1.442695, %v2191_v49  ;;  %v4919_v46 = vmul.f32 -1.442695, %v2192_v34 }
 0x8d1   : > { %5825 = vpow2.f32 %v4918_v5 }
 0x8d2   : > { %5827 = vpow2.f32 %v4917_v25 }
 0x8db   : > { %v5826_v32 = vpop.eup %5825 }
 0x8dc   : > { %v2203_v58 = vadd.f32 1.0, %v5826_v32  ;;  %v5828_v63 = vpop.eup %5827 }
 0x8dd   : > { %v2197_v42 = vadd.f32 1.0, %v5828_v63 }
 0x8de   : > { %5829 = vrcp.f32 %v2203_v58 }
 0x8df   : > { %5831 = vpow2.f32 %v4919_v46 }
 0x8e0   : > { %5833 = vrcp.f32 %v2197_v42 }
 0x8e8   : > { %v5830_v1 = vpop.eup %5829 }
 0x8e9   : > { %v2216_v47 = vmul.f32 %v5830_v1, %v2214_v59  ;;  %v2172_v33 = vpop.f32.mrb[40].mxu0  ;;  %v5832_v4 = vpop.eup %5831 }
 0x8ea   : > { %v2185_v55 = vrot.slane %v2172_v33, 2  ;;  %v5373_v49 = vpop.f32.mrb[41].mxu0  ;;  %v5834_v2 = vpop.eup %5833  ;;  %v2209_v32 = vadd.f32 1.0, %v5832_v4  ;;  %v8241_v4 = vld [vmem:[#allocation109_spill] sm:$0xff] }
 0x8eb   : > { %v2175_v40 = vpop.f32.mrb[42].mxu0 }
 0x8ec   : > { %v2193_v5 = vadd.f32 %v2185_v55, %v8236_v13  ;;  %v5374_v28 = vpop.f32.mrb[43].mxu0 }
 0x8ee   : > { %5835 = vtanh.f32 %v2193_v5 }
 0x8ef   : > { %5837 = vrcp.f32 %v2209_v32 }
 0x8f8   : > { %v5836_v25 = vpop.eup %5835 }
 0x8f9   : > { %v2217_v58 = vmul.f32 %v5836_v25, %v5834_v2  ;;  %v5838_v7 = vpop.eup %5837 }
 0x8fb   : > { %v7209_v52 = vadd.f32 %v2217_v58, %v2216_v47  ;;  %v8240_v47 = vld [vmem:[#allocation110_spill] sm:$0xff] }
 0x8fd   : > { %5839 = vtanh.f32 %v7209_v52  ;;  %2222 = vst [vmem:[#allocation3 + $0x8] sm:$0xc0] %v7209_v52 }
 0x907   : > { %v5840_v22 = vpop.eup %5839 }
 0x908   : > { %v2220_v34 = vmul.f32 %v5840_v22, %v5838_v7  ;;  %v8242_v7 = vld [vmem:[#allocation114_spill] sm:$0xff] }
 0x90a   : > { %2221 = vst [vmem:[#allocation2 + $0x8] sm:$0xc0] %v2220_v34  ;;  %v2223_v13 = vpack.c.bf16 %v2220_v34, %v2220_v34 }
 0x90c   : > { %v2225_v63 = vrot.slane %v2223_v13, 3  ;;  %v2372_v13 = vrot.slane %v7209_v52, 6 }
 0x90e   : > { %2260 = vmatmul.mubr.bf16.vlgmr.msra.gmra.mrb[40].mxu1 %v2225_v63  ;;  %2301 = vmatmul.mubr.bf16.vlgmr.msra.gmra.mrb[44].mxu0 %v2225_v63 }
 0x90f   : > { %5376 = vmatpush3.bf16.msra.mxu1 %v6756_v41  ;;  %5391 = vmatprep.mubr.msk.bf16.mxu1 %vm6100_vm1, %v8231_v11 }
 0x910   : > { %5377 = vmatprep.subr.bf16.mxu1 %v8231_v11  ;;  %2383 = vmatpush1.bf16.msra.mxu0 %v6588_v31 }
 0x911   : > { %2384 = vmatprep.subr.bf16.mxu0 %v6592_v53  ;;  %2414 = vmatprep.mubr.bf16.mxu0 %v8222_v35 }
 0x913   : > { %5378 = vmatpush3.bf16.msra.mxu1 %v6761_v8 }
 0x914   : > { %5379 = vmatprep.subr.bf16.mxu1 %v8231_v11  ;;  %2385 = vmatpush1.bf16.msra.mxu0 %v6598_v56 }
 0x915   : > { %2386 = vmatprep.subr.bf16.mxu0 %v6607_v61 }
 0x917   : > { %5380 = vmatpush3.bf16.msra.mxu1 %v6772_v44 }
 0x918   : > { %5381 = vmatprep.subr.bf16.mxu1 %v8231_v11  ;;  %2387 = vmatpush1.bf16.msra.mxu0 %v6630_v0 }
 0x919   : > { %2388 = vmatprep.subr.bf16.mxu0 %v6640_v9 }
 0x91b   : > { %5382 = vmatpush3.bf16.msra.mxu1 %v6780_v45 }
 0x91c   : > { %5383 = vmatprep.subr.bf16.mxu1 %v8231_v11  ;;  %2389 = vmatpush1.bf16.msra.mxu0 %v6650_v60 }
 0x91d   : > { %2390 = vmatprep.subr.bf16.mxu0 %v6660_v43 }
 0x91f   : > { %5384 = vmatpush3.bf16.msra.mxu1 %v6788_v48 }
 0x920   : > { %5385 = vmatprep.subr.bf16.mxu1 %v8231_v11  ;;  %2391 = vmatpush1.bf16.msra.mxu0 %v6671_v6 }
 0x921   : > { %2392 = vmatprep.subr.bf16.mxu0 %v6681_v23 }
 0x923   : > { %5386 = vmatpush3.bf16.msra.mxu1 %v6796_v16 }
 0x924   : > { %5387 = vmatprep.subr.bf16.mxu1 %v8231_v11  ;;  %2393 = vmatpush1.bf16.msra.mxu0 %v6692_v29 }
 0x925   : > { %2394 = vmatprep.subr.bf16.mxu0 %v6702_v21 }
 0x927   : > { %5388 = vmatpush3.bf16.msra.mxu1 %v6804_v19 }
 0x928   : > { %5389 = vmatprep.subr.bf16.mxu1 %v8231_v11  ;;  %2395 = vmatpush1.bf16.msra.mxu0 %v6712_v24 }
 0x929   : > { %2396 = vmatprep.subr.bf16.mxu0 %v6722_v14 }
 0x92b   : > { %5390 = vmatpush3.bf16.msra.mxu1 %v6812_v10 }
 0x92c   : > { %2423 = vmatprep.subr.bf16.mxu1 %v6602_v57  ;;  %2397 = vmatpush1.bf16.msra.mxu0 %v6732_v36 }
 0x92d   : > { %5395 = vmatprep.subr.bf16.mxu0 %v8231_v11 }
 0x92e   : > { %5392 = vmatmul.mubr.bf16.vlgmr.msra.gmra.mrb[44].mxu1 %v2225_v63 }
 0x92f   : > { %2424 = vmatpush1.bf16.msra.mxu1 %v6611_v62  ;;  %2455 = vmatprep.mubr.bf16.mxu1 %v8222_v35 }
 0x930   : > { %2425 = vmatprep.subr.bf16.mxu1 %v6615_v51 }
 0x933   : > { %2426 = vmatpush1.bf16.msra.mxu1 %v6624_v54 }
 0x934   : > { %2427 = vmatprep.subr.bf16.mxu1 %v6635_v3 }
 0x937   : > { %2428 = vmatpush1.bf16.msra.mxu1 %v6645_v50 }
 0x938   : > { %2429 = vmatprep.subr.bf16.mxu1 %v6655_v12 }
 0x93b   : > { %2430 = vmatpush1.bf16.msra.mxu1 %v6666_v18 }
 0x93c   : > { %2431 = vmatprep.subr.bf16.mxu1 %v6676_v20 }
 0x93f   : > { %2432 = vmatpush1.bf16.msra.mxu1 %v6687_v26 }
 0x940   : > { %2433 = vmatprep.subr.bf16.mxu1 %v6697_v15 }
 0x943   : > { %2434 = vmatpush1.bf16.msra.mxu1 %v6707_v27 }
 0x944   : > { %2435 = vmatprep.subr.bf16.mxu1 %v6717_v30 }
 0x947   : > { %2436 = vmatpush1.bf16.msra.mxu1 %v6727_v17 }
 0x948   : > { %2437 = vmatprep.subr.bf16.mxu1 %v6737_v38 }
 0x94b   : > { %2438 = vmatpush1.bf16.msra.mxu1 %v6743_v39 }
 0x94c   : > { %2552 = vmatprep.subr.bf16.mxu1 %v6584_v37 }
 0x9e1   : > { %v2261_v59 = vpop.f32.mrb[40].mxu1  ;;  %v2302_v46 = vpop.f32.mrb[44].mxu0 }
 0x9e2   : > { %v2263_v1 = vpop.f32.mrb[41].mxu1  ;;  %v2303_v42 = vpop.f32.mrb[45].mxu0  ;;  %v2348_v2 = vadd.f32 %v2261_v59, %v8241_v4 }
 0x9e3   : > { %v2349_v33 = vadd.f32 %v2263_v1, %v8240_v47  ;;  %v2265_v55 = vpop.f32.mrb[42].mxu1  ;;  %v2305_v49 = vpop.f32.mrb[46].mxu0  ;;  %v2350_v22 = vadd.f32 %v2303_v42, %v8242_v7 }
 0x9e4   : > { %v2266_v40 = vpop.f32.mrb[43].mxu1  ;;  %v2306_v5 = vpop.f32.mrb[47].mxu0  ;;  %v4920_v25 = vmul.f32 -1.442695, %v2348_v2 }
 0x9e5   : > { %v4921_v28 = vmul.f32 -1.442695, %v2349_v33  ;;  %v4922_v63 = vmul.f32 -1.442695, %v2350_v22  ;;  %v8243_v33 = vld [vmem:[#allocation117_spill] sm:$0xff] }
 0x9e7   : > { %5841 = vpow2.f32 %v4921_v28 }
 0x9e8   : > { %5843 = vpow2.f32 %v4920_v25 }
 0x9f1   : > { %v5842_v32 = vpop.eup %5841 }
 0x9f2   : > { %v2361_v58 = vadd.f32 1.0, %v5842_v32  ;;  %v5844_v34 = vpop.eup %5843 }
 0x9f3   : > { %v2355_v1 = vadd.f32 1.0, %v5844_v34 }
 0x9f4   : > { %5845 = vrcp.f32 %v2361_v58 }
 0x9f5   : > { %5847 = vpow2.f32 %v4922_v63 }
 0x9f6   : > { %5849 = vrcp.f32 %v2355_v1 }
 0x9fe   : > { %v5846_v46 = vpop.eup %5845 }
 0x9ff   : > { %v2374_v55 = vmul.f32 %v5846_v46, %v2372_v13  ;;  %v5848_v2 = vpop.eup %5847 }
 0xa00   : > { %v5850_v25 = vpop.eup %5849  ;;  %v2367_v42 = vadd.f32 1.0, %v5848_v2 }
 0xa01   : > { %v2342_v49 = vpop.f32.mrb[44].mxu1 }
 0xa02   : > { %v2351_v40 = vadd.f32 %v2342_v49, %v8243_v33  ;;  %v5393_v5 = vpop.f32.mrb[45].mxu1 }
 0xa03   : > { %v2345_v59 = vpop.f32.mrb[46].mxu1 }
 0xa04   : > { %5851 = vtanh.f32 %v2351_v40  ;;  %v5394_v28 = vpop.f32.mrb[47].mxu1 }
 0xa05   : > { %5853 = vrcp.f32 %v2367_v42 }
 0xa0e   : > { %v5852_v32 = vpop.eup %5851 }
 0xa0f   : > { %v2375_v58 = vmul.f32 %v5852_v32, %v5850_v25  ;;  %v5854_v52 = vpop.eup %5853 }
 0xa11   : > { %v7270_v7 = vadd.f32 %v2375_v58, %v2374_v55 }
 0xa13   : > { %5855 = vtanh.f32 %v7270_v7  ;;  %2380 = vst [vmem:[#allocation3 + $0x10] sm:$0x3] %v7270_v7 }
 0xa1d   : > { %v5856_v22 = vpop.eup %5855 }
 0xa1e   : > { %v2378_v34 = vmul.f32 %v5856_v22, %v5854_v52 }
 0xa20   : > { %2379 = vst [vmem:[#allocation2 + $0x10] sm:$0x3] %v2378_v34  ;;  %v2381_v13 = vpack.c.bf16 %v2378_v34, %v2378_v34 }
 0xa22   : > { %2415 = vmatmul.mubr.bf16.vlgmr.msra.gmra.mrb[48].mxu0 %v2381_v13  ;;  %2456 = vmatmul.mubr.bf16.vlgmr.msra.gmra.mrb[48].mxu1 %v2381_v13 }
 0xa23   : > { %5396 = vmatpush3.bf16.msra.mxu0 %v6756_v41  ;;  %5411 = vmatprep.mubr.msk.bf16.mxu0 %vm6100_vm1, %v8231_v11 }
 0xa24   : > { %5397 = vmatprep.subr.bf16.mxu0 %v8231_v11  ;;  %2553 = vmatpush1.bf16.msra.mxu1 %v6588_v31 }
 0xa25   : > { %2554 = vmatprep.subr.bf16.mxu1 %v6592_v53  ;;  %2584 = vmatprep.mubr.bf16.mxu1 %v8222_v35 }
 0xa27   : > { %5398 = vmatpush3.bf16.msra.mxu0 %v6761_v8 }
 0xa28   : > { %5399 = vmatprep.subr.bf16.mxu0 %v8231_v11  ;;  %2555 = vmatpush1.bf16.msra.mxu1 %v6598_v56 }
 0xa29   : > { %2556 = vmatprep.subr.bf16.mxu1 %v6607_v61 }
 0xa2b   : > { %5400 = vmatpush3.bf16.msra.mxu0 %v6772_v44 }
 0xa2c   : > { %5401 = vmatprep.subr.bf16.mxu0 %v8231_v11  ;;  %2557 = vmatpush1.bf16.msra.mxu1 %v6630_v0 }
 0xa2d   : > { %2558 = vmatprep.subr.bf16.mxu1 %v6640_v9 }
 0xa2f   : > { %5402 = vmatpush3.bf16.msra.mxu0 %v6780_v45 }
 0xa30   : > { %5403 = vmatprep.subr.bf16.mxu0 %v8231_v11  ;;  %2559 = vmatpush1.bf16.msra.mxu1 %v6650_v60 }
 0xa31   : > { %2560 = vmatprep.subr.bf16.mxu1 %v6660_v43 }
 0xa33   : > { %5404 = vmatpush3.bf16.msra.mxu0 %v6788_v48 }
 0xa34   : > { %5405 = vmatprep.subr.bf16.mxu0 %v8231_v11  ;;  %2561 = vmatpush1.bf16.msra.mxu1 %v6671_v6 }
 0xa35   : > { %2562 = vmatprep.subr.bf16.mxu1 %v6681_v23 }
 0xa37   : > { %5406 = vmatpush3.bf16.msra.mxu0 %v6796_v16 }
 0xa38   : > { %5407 = vmatprep.subr.bf16.mxu0 %v8231_v11  ;;  %2563 = vmatpush1.bf16.msra.mxu1 %v6692_v29 }
 0xa39   : > { %2564 = vmatprep.subr.bf16.mxu1 %v6702_v21 }
 0xa3b   : > { %5408 = vmatpush3.bf16.msra.mxu0 %v6804_v19 }
 0xa3c   : > { %5409 = vmatprep.subr.bf16.mxu0 %v8231_v11  ;;  %2565 = vmatpush1.bf16.msra.mxu1 %v6712_v24 }
 0xa3d   : > { %2566 = vmatprep.subr.bf16.mxu1 %v6722_v14 }
 0xa3f   : > { %5410 = vmatpush3.bf16.msra.mxu0 %v6812_v10 }
 0xa40   : > { %2593 = vmatprep.subr.bf16.mxu0 %v6602_v57  ;;  %2567 = vmatpush1.bf16.msra.mxu1 %v6732_v36 }
 0xa41   : > { %5415 = vmatprep.subr.bf16.mxu1 %v8231_v11 }
 0xa42   : > { %5412 = vmatmul.mubr.bf16.vlgmr.msra.gmra.mrb[52].mxu0 %v2381_v13  ;;  %v8244_v13 = vld [vmem:[#allocation114_spill] sm:$0xff] }
 0xa43   : > { %2594 = vmatpush1.bf16.msra.mxu0 %v6611_v62  ;;  %2625 = vmatprep.mubr.bf16.mxu0 %v8222_v35 }
 0xa44   : > { %2595 = vmatprep.subr.bf16.mxu0 %v6615_v51 }
 0xa47   : > { %2596 = vmatpush1.bf16.msra.mxu0 %v6624_v54 }
 0xa48   : > { %2597 = vmatprep.subr.bf16.mxu0 %v6635_v3 }
 0xa4b   : > { %2598 = vmatpush1.bf16.msra.mxu0 %v6645_v50 }
 0xa4c   : > { %2599 = vmatprep.subr.bf16.mxu0 %v6655_v12 }
 0xa4f   : > { %2600 = vmatpush1.bf16.msra.mxu0 %v6666_v18 }
 0xa50   : > { %2601 = vmatprep.subr.bf16.mxu0 %v6676_v20 }
 0xa53   : > { %2602 = vmatpush1.bf16.msra.mxu0 %v6687_v26 }
 0xa54   : > { %2603 = vmatprep.subr.bf16.mxu0 %v6697_v15 }
 0xa57   : > { %2604 = vmatpush1.bf16.msra.mxu0 %v6707_v27 }
 0xa58   : > { %2605 = vmatprep.subr.bf16.mxu0 %v6717_v30 }
 0xa5b   : > { %2606 = vmatpush1.bf16.msra.mxu0 %v6727_v17 }
 0xa5c   : > { %2607 = vmatprep.subr.bf16.mxu0 %v6737_v38 }
 0xa5f   : > { %2608 = vmatpush1.bf16.msra.mxu0 %v6743_v39 }
 0xa60   : > { %2722 = vmatprep.subr.bf16.mxu0 %v6584_v37 }
 0xaf5   : > { %v2416_v63 = vpop.f32.mrb[48].mxu0  ;;  %v2457_v46 = vpop.f32.mrb[48].mxu1 }
 0xaf6   : > { %v2418_v1 = vpop.f32.mrb[49].mxu0  ;;  %v2458_v55 = vpop.f32.mrb[49].mxu1  ;;  %v2507_v32 = vrot.slane %v2416_v63, 6 }
 0xaf7   : > { %v2508_v49 = vrot.slane %v2418_v1, 6  ;;  %v2420_v40 = vpop.f32.mrb[50].mxu0  ;;  %v2460_v5 = vpop.f32.mrb[50].mxu1  ;;  %v2509_v34 = vrot.slane %v2458_v55, 6 }
 0xaf8   : > { %v2421_v59 = vpop.f32.mrb[51].mxu0  ;;  %v2461_v28 = vpop.f32.mrb[51].mxu1  ;;  %v2515_v42 = vadd.f32 %v2507_v32, %v8241_v4  ;;  %v2539_v40 = vrot.slane %v7270_v7, 6 }
 0xaf9   : > { %v2516_v2 = vadd.f32 %v2508_v49, %v8240_v47  ;;  %v2517_v46 = vadd.f32 %v2509_v34, %v8244_v13 }
 0xafa   : > { %v4923_v58 = vmul.f32 -1.442695, %v2515_v42 }
 0xafb   : > { %v4924_v25 = vmul.f32 -1.442695, %v2516_v2  ;;  %v4925_v5 = vmul.f32 -1.442695, %v2517_v46 }
 0xafd   : > { %5857 = vpow2.f32 %v4924_v25 }
 0xafe   : > { %5859 = vpow2.f32 %v4923_v58 }
 0xb07   : > { %v5858_v52 = vpop.eup %5857 }
 0xb08   : > { %v2528_v22 = vadd.f32 1.0, %v5858_v52  ;;  %v5860_v1 = vpop.eup %5859 }
 0xb09   : > { %v2522_v28 = vadd.f32 1.0, %v5860_v1 }
 0xb0a   : > { %5861 = vrcp.f32 %v2528_v22 }
 0xb0b   : > { %5863 = vpow2.f32 %v4925_v5 }
 0xb0c   : > { %5865 = vrcp.f32 %v2522_v28 }
 0xb14   : > { %v5862_v59 = vpop.eup %5861 }
 0xb15   : > { %v2541_v49 = vmul.f32 %v5862_v59, %v2539_v40  ;;  %v2497_v2 = vpop.f32.mrb[52].mxu0  ;;  %v5864_v55 = vpop.eup %5863 }
 0xb16   : > { %v2510_v63 = vrot.slane %v2497_v2, 6  ;;  %v5413_v25 = vpop.f32.mrb[53].mxu0  ;;  %v5866_v52 = vpop.eup %5865  ;;  %v2534_v34 = vadd.f32 1.0, %v5864_v55 }
 0xb17   : > { %v2500_v32 = vpop.f32.mrb[54].mxu0 }
 0xb18   : > { %v2518_v42 = vadd.f32 %v2510_v63, %v8243_v33  ;;  %v5414_v58 = vpop.f32.mrb[55].mxu0 }
 0xb1a   : > { %5867 = vtanh.f32 %v2518_v42 }
 0xb1b   : > { %5869 = vrcp.f32 %v2534_v34 }
 0xb24   : > { %v5868_v22 = vpop.eup %5867 }
 0xb25   : > { %v2542_v13 = vmul.f32 %v5868_v22, %v5866_v52  ;;  %v5870_v46 = vpop.eup %5869 }
 0xb27   : > { %v7331_v7 = vadd.f32 %v2542_v13, %v2541_v49 }
 0xb29   : > { %5871 = vtanh.f32 %v7331_v7  ;;  %2547 = vst [vmem:[#allocation3 + $0x10] sm:$0xc] %v7331_v7 }
 0xb33   : > { %v5872_v1 = vpop.eup %5871 }
 0xb34   : > { %v2545_v40 = vmul.f32 %v5872_v1, %v5870_v46 }
 0xb36   : > { %2546 = vst [vmem:[#allocation2 + $0x10] sm:$0xc] %v2545_v40  ;;  %v2548_v5 = vpack.c.bf16 %v2545_v40, %v2545_v40 }
 0xb38   : > { %v2550_v59 = vrot.slane %v2548_v5, 1 }
 0xb3a   : > { %2585 = vmatmul.mubr.bf16.vlgmr.msra.gmra.mrb[52].mxu1 %v2550_v59  ;;  %2626 = vmatmul.mubr.bf16.vlgmr.msra.gmra.mrb[56].mxu0 %v2550_v59 }
 0xb3b   : > { %5416 = vmatpush3.bf16.msra.mxu1 %v6756_v41  ;;  %5431 = vmatprep.mubr.msk.bf16.mxu1 %vm6100_vm1, %v8231_v11 }
 0xb3c   : > { %5417 = vmatprep.subr.bf16.mxu1 %v8231_v11  ;;  %2723 = vmatpush1.bf16.msra.mxu0 %v6588_v31 }
 0xb3d   : > { %2724 = vmatprep.subr.bf16.mxu0 %v6592_v53  ;;  %2754 = vmatprep.mubr.bf16.mxu0 %v8222_v35 }
 0xb3f   : > { %5418 = vmatpush3.bf16.msra.mxu1 %v6761_v8 }
 0xb40   : > { %5419 = vmatprep.subr.bf16.mxu1 %v8231_v11  ;;  %2725 = vmatpush1.bf16.msra.mxu0 %v6598_v56 }
 0xb41   : > { %2726 = vmatprep.subr.bf16.mxu0 %v6607_v61 }
 0xb43   : > { %5420 = vmatpush3.bf16.msra.mxu1 %v6772_v44 }
 0xb44   : > { %5421 = vmatprep.subr.bf16.mxu1 %v8231_v11  ;;  %2727 = vmatpush1.bf16.msra.mxu0 %v6630_v0 }
 0xb45   : > { %2728 = vmatprep.subr.bf16.mxu0 %v6640_v9 }
 0xb47   : > { %5422 = vmatpush3.bf16.msra.mxu1 %v6780_v45 }
 0xb48   : > { %5423 = vmatprep.subr.bf16.mxu1 %v8231_v11  ;;  %2729 = vmatpush1.bf16.msra.mxu0 %v6650_v60 }
 0xb49   : > { %2730 = vmatprep.subr.bf16.mxu0 %v6660_v43 }
 0xb4b   : > { %5424 = vmatpush3.bf16.msra.mxu1 %v6788_v48 }
 0xb4c   : > { %5425 = vmatprep.subr.bf16.mxu1 %v8231_v11  ;;  %2731 = vmatpush1.bf16.msra.mxu0 %v6671_v6 }
 0xb4d   : > { %2732 = vmatprep.subr.bf16.mxu0 %v6681_v23 }
 0xb4f   : > { %5426 = vmatpush3.bf16.msra.mxu1 %v6796_v16 }
 0xb50   : > { %5427 = vmatprep.subr.bf16.mxu1 %v8231_v11  ;;  %2733 = vmatpush1.bf16.msra.mxu0 %v6692_v29 }
 0xb51   : > { %2734 = vmatprep.subr.bf16.mxu0 %v6702_v21 }
 0xb53   : > { %5428 = vmatpush3.bf16.msra.mxu1 %v6804_v19 }
 0xb54   : > { %5429 = vmatprep.subr.bf16.mxu1 %v8231_v11  ;;  %2735 = vmatpush1.bf16.msra.mxu0 %v6712_v24 }
 0xb55   : > { %2736 = vmatprep.subr.bf16.mxu0 %v6722_v14 }
 0xb57   : > { %5430 = vmatpush3.bf16.msra.mxu1 %v6812_v10 }
 0xb58   : > { %2763 = vmatprep.subr.bf16.mxu1 %v6602_v57  ;;  %2737 = vmatpush1.bf16.msra.mxu0 %v6732_v36 }
 0xb59   : > { %5435 = vmatprep.subr.bf16.mxu0 %v8231_v11 }
 0xb5a   : > { %5432 = vmatmul.mubr.bf16.vlgmr.msra.gmra.mrb[56].mxu1 %v2550_v59  ;;  %v8245_v59 = vld [vmem:[#allocation114_spill] sm:$0xff] }
 0xb5b   : > { %2764 = vmatpush1.bf16.msra.mxu1 %v6611_v62  ;;  %2795 = vmatprep.mubr.bf16.mxu1 %v8222_v35 }
 0xb5c   : > { %2765 = vmatprep.subr.bf16.mxu1 %v6615_v51 }
 0xb5f   : > { %2766 = vmatpush1.bf16.msra.mxu1 %v6624_v54 }
 0xb60   : > { %2767 = vmatprep.subr.bf16.mxu1 %v6635_v3 }
 0xb63   : > { %2768 = vmatpush1.bf16.msra.mxu1 %v6645_v50 }
 0xb64   : > { %2769 = vmatprep.subr.bf16.mxu1 %v6655_v12 }
 0xb67   : > { %2770 = vmatpush1.bf16.msra.mxu1 %v6666_v18 }
 0xb68   : > { %2771 = vmatprep.subr.bf16.mxu1 %v6676_v20 }
 0xb6b   : > { %2772 = vmatpush1.bf16.msra.mxu1 %v6687_v26 }
 0xb6c   : > { %2773 = vmatprep.subr.bf16.mxu1 %v6697_v15 }
 0xb6f   : > { %2774 = vmatpush1.bf16.msra.mxu1 %v6707_v27 }
 0xb70   : > { %2775 = vmatprep.subr.bf16.mxu1 %v6717_v30 }
 0xb73   : > { %2776 = vmatpush1.bf16.msra.mxu1 %v6727_v17 }
 0xb74   : > { %2777 = vmatprep.subr.bf16.mxu1 %v6737_v38 }
 0xb77   : > { %2778 = vmatpush1.bf16.msra.mxu1 %v6743_v39 }
 0xb78   : > { %2892 = vmatprep.subr.bf16.mxu1 %v6584_v37 }
 0xc0d   : > { %v2586_v13 = vpop.f32.mrb[52].mxu1  ;;  %v2627_v28 = vpop.f32.mrb[56].mxu0 }
 0xc0e   : > { %v2588_v49 = vpop.f32.mrb[53].mxu1  ;;  %v2628_v2 = vpop.f32.mrb[57].mxu0  ;;  %v2677_v22 = vrot.slane %v2586_v13, 4 }
 0xc0f   : > { %v2678_v63 = vrot.slane %v2588_v49, 4  ;;  %v2590_v25 = vpop.f32.mrb[54].mxu1  ;;  %v2630_v32 = vpop.f32.mrb[58].mxu0  ;;  %v2679_v5 = vrot.slane %v2628_v2, 4 }
 0xc10   : > { %v2591_v42 = vpop.f32.mrb[55].mxu1  ;;  %v2631_v58 = vpop.f32.mrb[59].mxu0  ;;  %v2685_v34 = vadd.f32 %v2677_v22, %v8241_v4  ;;  %v2709_v25 = vrot.slane %v7331_v7, 6 }
 0xc11   : > { %v2686_v55 = vadd.f32 %v2678_v63, %v8240_v47  ;;  %v2687_v28 = vadd.f32 %v2679_v5, %v8245_v59 }
 0xc12   : > { %v4926_v46 = vmul.f32 -1.442695, %v2685_v34 }
 0xc13   : > { %v4927_v52 = vmul.f32 -1.442695, %v2686_v55  ;;  %v4928_v32 = vmul.f32 -1.442695, %v2687_v28 }
 0xc15   : > { %5873 = vpow2.f32 %v4927_v52 }
 0xc16   : > { %5875 = vpow2.f32 %v4926_v46 }
 0xc1f   : > { %v5874_v1 = vpop.eup %5873 }
 0xc20   : > { %v2698_v40 = vadd.f32 1.0, %v5874_v1  ;;  %v5876_v49 = vpop.eup %5875 }
 0xc21   : > { %v2692_v58 = vadd.f32 1.0, %v5876_v49 }
 0xc22   : > { %5877 = vrcp.f32 %v2698_v40 }
 0xc23   : > { %5879 = vpow2.f32 %v4928_v32 }
 0xc24   : > { %5881 = vrcp.f32 %v2692_v58 }
 0xc2c   : > { %v5878_v42 = vpop.eup %5877 }
 0xc2d   : > { %v2711_v63 = vmul.f32 %v5878_v42, %v2709_v25  ;;  %v2667_v55 = vpop.f32.mrb[56].mxu1  ;;  %v5880_v2 = vpop.eup %5879 }
 0xc2e   : > { %v2680_v13 = vrot.slane %v2667_v55, 4  ;;  %v5433_v52 = vpop.f32.mrb[57].mxu1  ;;  %v5882_v1 = vpop.eup %5881  ;;  %v2704_v5 = vadd.f32 1.0, %v5880_v2 }
 0xc2f   : > { %v2670_v22 = vpop.f32.mrb[58].mxu1 }
 0xc30   : > { %v2688_v34 = vadd.f32 %v2680_v13, %v8243_v33  ;;  %v5434_v46 = vpop.f32.mrb[59].mxu1 }
 0xc32   : > { %5883 = vtanh.f32 %v2688_v34 }
 0xc33   : > { %5885 = vrcp.f32 %v2704_v5 }
 0xc3c   : > { %v5884_v40 = vpop.eup %5883 }
 0xc3d   : > { %v2712_v59 = vmul.f32 %v5884_v40, %v5882_v1  ;;  %v5886_v28 = vpop.eup %5885 }
 0xc3f   : > { %v7392_v7 = vadd.f32 %v2712_v59, %v2711_v63 }
 0xc41   : > { %5887 = vtanh.f32 %v7392_v7  ;;  %2717 = vst [vmem:[#allocation3 + $0x10] sm:$0x30] %v7392_v7 }
 0xc4b   : > { %v5888_v49 = vpop.eup %5887 }
 0xc4c   : > { %v2715_v25 = vmul.f32 %v5888_v49, %v5886_v28 }
 0xc4e   : > { %2716 = vst [vmem:[#allocation2 + $0x10] sm:$0x30] %v2715_v25  ;;  %v2718_v32 = vpack.c.bf16 %v2715_v25, %v2715_v25 }
 0xc50   : > { %v2720_v42 = vrot.slane %v2718_v32, 2 }
 0xc52   : > { %2755 = vmatmul.mubr.bf16.vlgmr.msra.gmra.mrb[60].mxu0 %v2720_v42  ;;  %2796 = vmatmul.mubr.bf16.vlgmr.msra.gmra.mrb[60].mxu1 %v2720_v42 }
 0xc53   : > { %5436 = vmatpush3.bf16.msra.mxu0 %v6756_v41  ;;  %5451 = vmatprep.mubr.msk.bf16.mxu0 %vm6100_vm1, %v8231_v11 }
 0xc54   : > { %5437 = vmatprep.subr.bf16.mxu0 %v8231_v11  ;;  %2893 = vmatpush1.bf16.msra.mxu1 %v6588_v31 }
 0xc55   : > { %2894 = vmatprep.subr.bf16.mxu1 %v6592_v53  ;;  %2924 = vmatprep.mubr.bf16.mxu1 %v8222_v35 }
 0xc57   : > { %5438 = vmatpush3.bf16.msra.mxu0 %v6761_v8 }
 0xc58   : > { %5439 = vmatprep.subr.bf16.mxu0 %v8231_v11  ;;  %2895 = vmatpush1.bf16.msra.mxu1 %v6598_v56 }
 0xc59   : > { %2896 = vmatprep.subr.bf16.mxu1 %v6607_v61 }
 0xc5b   : > { %5440 = vmatpush3.bf16.msra.mxu0 %v6772_v44 }
 0xc5c   : > { %5441 = vmatprep.subr.bf16.mxu0 %v8231_v11  ;;  %2897 = vmatpush1.bf16.msra.mxu1 %v6630_v0 }
 0xc5d   : > { %2898 = vmatprep.subr.bf16.mxu1 %v6640_v9 }
 0xc5f   : > { %5442 = vmatpush3.bf16.msra.mxu0 %v6780_v45 }
 0xc60   : > { %5443 = vmatprep.subr.bf16.mxu0 %v8231_v11  ;;  %2899 = vmatpush1.bf16.msra.mxu1 %v6650_v60 }
 0xc61   : > { %2900 = vmatprep.subr.bf16.mxu1 %v6660_v43 }
 0xc63   : > { %5444 = vmatpush3.bf16.msra.mxu0 %v6788_v48 }
 0xc64   : > { %5445 = vmatprep.subr.bf16.mxu0 %v8231_v11  ;;  %2901 = vmatpush1.bf16.msra.mxu1 %v6671_v6 }
 0xc65   : > { %2902 = vmatprep.subr.bf16.mxu1 %v6681_v23 }
 0xc67   : > { %5446 = vmatpush3.bf16.msra.mxu0 %v6796_v16 }
 0xc68   : > { %5447 = vmatprep.subr.bf16.mxu0 %v8231_v11  ;;  %2903 = vmatpush1.bf16.msra.mxu1 %v6692_v29 }
 0xc69   : > { %2904 = vmatprep.subr.bf16.mxu1 %v6702_v21 }
 0xc6b   : > { %5448 = vmatpush3.bf16.msra.mxu0 %v6804_v19 }
 0xc6c   : > { %5449 = vmatprep.subr.bf16.mxu0 %v8231_v11  ;;  %2905 = vmatpush1.bf16.msra.mxu1 %v6712_v24 }
 0xc6d   : > { %2906 = vmatprep.subr.bf16.mxu1 %v6722_v14 }
 0xc6f   : > { %5450 = vmatpush3.bf16.msra.mxu0 %v6812_v10 }
 0xc70   : > { %2933 = vmatprep.subr.bf16.mxu0 %v6602_v57  ;;  %2907 = vmatpush1.bf16.msra.mxu1 %v6732_v36 }
 0xc71   : > { %5455 = vmatprep.subr.bf16.mxu1 %v8231_v11 }
 0xc72   : > { %5452 = vmatmul.mubr.bf16.vlgmr.msra.gmra.mrb[64].mxu0 %v2720_v42  ;;  %v8246_v42 = vld [vmem:[#allocation114_spill] sm:$0xff] }
 0xc73   : > { %2934 = vmatpush1.bf16.msra.mxu0 %v6611_v62  ;;  %2965 = vmatprep.mubr.bf16.mxu0 %v8222_v35 }
 0xc74   : > { %2935 = vmatprep.subr.bf16.mxu0 %v6615_v51 }
 0xc77   : > { %2936 = vmatpush1.bf16.msra.mxu0 %v6624_v54 }
 0xc78   : > { %2937 = vmatprep.subr.bf16.mxu0 %v6635_v3 }
 0xc7b   : > { %2938 = vmatpush1.bf16.msra.mxu0 %v6645_v50 }
 0xc7c   : > { %2939 = vmatprep.subr.bf16.mxu0 %v6655_v12 }
 0xc7f   : > { %2940 = vmatpush1.bf16.msra.mxu0 %v6666_v18 }
 0xc80   : > { %2941 = vmatprep.subr.bf16.mxu0 %v6676_v20 }
 0xc83   : > { %2942 = vmatpush1.bf16.msra.mxu0 %v6687_v26 }
 0xc84   : > { %2943 = vmatprep.subr.bf16.mxu0 %v6697_v15 }
 0xc87   : > { %2944 = vmatpush1.bf16.msra.mxu0 %v6707_v27 }
 0xc88   : > { %2945 = vmatprep.subr.bf16.mxu0 %v6717_v30 }
 0xc8b   : > { %2946 = vmatpush1.bf16.msra.mxu0 %v6727_v17 }
 0xc8c   : > { %2947 = vmatprep.subr.bf16.mxu0 %v6737_v38 }
 0xc8f   : > { %2948 = vmatpush1.bf16.msra.mxu0 %v6743_v39 }
 0xc90   : > { %3047 = vmatprep.subr.bf16.mxu0 %v6584_v37 }
 0xd25   : > { %v2756_v59 = vpop.f32.mrb[60].mxu0  ;;  %v2797_v58 = vpop.f32.mrb[60].mxu1 }
 0xd26   : > { %v2758_v63 = vpop.f32.mrb[61].mxu0  ;;  %v2798_v55 = vpop.f32.mrb[61].mxu1  ;;  %v2847_v40 = vrot.slane %v2756_v59, 2 }
 0xd27   : > { %v2848_v13 = vrot.slane %v2758_v63, 2  ;;  %v2760_v52 = vpop.f32.mrb[62].mxu0  ;;  %v2800_v22 = vpop.f32.mrb[62].mxu1  ;;  %v2849_v32 = vrot.slane %v2798_v55, 2 }
 0xd28   : > { %v2761_v34 = vpop.f32.mrb[63].mxu0  ;;  %v2801_v46 = vpop.f32.mrb[63].mxu1  ;;  %v2855_v5 = vadd.f32 %v2847_v40, %v8241_v4  ;;  %v2879_v52 = vrot.slane %v7392_v7, 6 }
 0xd29   : > { %v2856_v2 = vadd.f32 %v2848_v13, %v8240_v47  ;;  %v2857_v58 = vadd.f32 %v2849_v32, %v8246_v42 }
 0xd2a   : > { %v4929_v28 = vmul.f32 -1.442695, %v2855_v5 }
 0xd2b   : > { %v4930_v1 = vmul.f32 -1.442695, %v2856_v2  ;;  %v4931_v22 = vmul.f32 -1.442695, %v2857_v58 }
 0xd2d   : > { %5889 = vpow2.f32 %v4930_v1 }
 0xd2e   : > { %5891 = vpow2.f32 %v4929_v28 }
 0xd37   : > { %v5890_v49 = vpop.eup %5889 }
 0xd38   : > { %v2868_v25 = vadd.f32 1.0, %v5890_v49  ;;  %v5892_v63 = vpop.eup %5891 }
 0xd39   : > { %v2862_v46 = vadd.f32 1.0, %v5892_v63 }
 0xd3a   : > { %5893 = vrcp.f32 %v2868_v25 }
 0xd3b   : > { %5895 = vpow2.f32 %v4931_v22 }
 0xd3c   : > { %5897 = vrcp.f32 %v2862_v46 }
 0xd44   : > { %v5894_v34 = vpop.eup %5893 }
 0xd45   : > { %v2881_v47 = vmul.f32 %v5894_v34, %v2879_v52  ;;  %v2837_v13 = vpop.f32.mrb[64].mxu0  ;;  %v5896_v55 = vpop.eup %5895 }
 0xd46   : > { %v2850_v59 = vrot.slane %v2837_v13, 2  ;;  %v5453_v2 = vpop.f32.mrb[65].mxu0  ;;  %v5898_v5 = vpop.eup %5897  ;;  %v2874_v49 = vadd.f32 1.0, %v5896_v55  ;;  %v8248_v55 = vld [vmem:[#allocation111_spill] sm:$0xff] }
 0xd47   : > { %v2840_v4 = vpop.f32.mrb[66].mxu0 }
 0xd48   : > { %v2858_v1 = vadd.f32 %v2850_v59, %v8243_v33  ;;  %v5454_v40 = vpop.f32.mrb[67].mxu0 }
 0xd4a   : > { %5899 = vtanh.f32 %v2858_v1 }
 0xd4b   : > { %5901 = vrcp.f32 %v2874_v49 }
 0xd54   : > { %v5900_v28 = vpop.eup %5899 }
 0xd55   : > { %v2882_v25 = vmul.f32 %v5900_v28, %v5898_v5  ;;  %v5902_v32 = vpop.eup %5901 }
 0xd57   : > { %v7453_v7 = vadd.f32 %v2882_v25, %v2881_v47  ;;  %v8247_v47 = vld [vmem:[#allocation112_spill] sm:$0xff] }
 0xd59   : > { %5903 = vtanh.f32 %v7453_v7  ;;  %2887 = vst [vmem:[#allocation3 + $0x10] sm:$0xc0] %v7453_v7 }
 0xd63   : > { %v5904_v42 = vpop.eup %5903 }
 0xd64   : > { %v2885_v58 = vmul.f32 %v5904_v42, %v5902_v32  ;;  %v8249_v32 = vld [vmem:[#allocation116_spill] sm:$0xff] }
 0xd66   : > { %2886 = vst [vmem:[#allocation2 + $0x10] sm:$0xc0] %v2885_v58  ;;  %v2888_v33 = vpack.c.bf16 %v2885_v58, %v2885_v58 }
 0xd68   : > { %v2890_v63 = vrot.slane %v2888_v33, 3  ;;  %v3037_v33 = vrot.slane %v7453_v7, 6 }
 0xd6a   : > { %2925 = vmatmul.mubr.bf16.vlgmr.msra.gmra.mrb[64].mxu1 %v2890_v63  ;;  %2966 = vmatmul.mubr.bf16.vlgmr.msra.gmra.mrb[68].mxu0 %v2890_v63 }
 0xd6b   : > { %5456 = vmatpush3.bf16.msra.mxu1 %v6756_v41  ;;  %5471 = vmatprep.mubr.msk.bf16.mxu1 %vm6100_vm1, %v8231_v11 }
 0xd6c   : > { %5457 = vmatprep.subr.bf16.mxu1 %v8231_v11  ;;  %3048 = vmatpush1.bf16.msra.mxu0 %v6588_v31 }
 0xd6d   : > { %3049 = vmatprep.subr.bf16.mxu0 %v6592_v53  ;;  %3079 = vmatprep.mubr.bf16.mxu0 %v8222_v35 }
 0xd6f   : > { %5458 = vmatpush3.bf16.msra.mxu1 %v6761_v8 }
 0xd70   : > { %5459 = vmatprep.subr.bf16.mxu1 %v8231_v11  ;;  %3050 = vmatpush1.bf16.msra.mxu0 %v6598_v56 }
 0xd71   : > { %3051 = vmatprep.subr.bf16.mxu0 %v6607_v61 }
 0xd73   : > { %5460 = vmatpush3.bf16.msra.mxu1 %v6772_v44 }
 0xd74   : > { %5461 = vmatprep.subr.bf16.mxu1 %v8231_v11  ;;  %3052 = vmatpush1.bf16.msra.mxu0 %v6630_v0 }
 0xd75   : > { %3053 = vmatprep.subr.bf16.mxu0 %v6640_v9 }
 0xd77   : > { %5462 = vmatpush3.bf16.msra.mxu1 %v6780_v45 }
 0xd78   : > { %5463 = vmatprep.subr.bf16.mxu1 %v8231_v11  ;;  %3054 = vmatpush1.bf16.msra.mxu0 %v6650_v60 }
 0xd79   : > { %3055 = vmatprep.subr.bf16.mxu0 %v6660_v43 }
 0xd7b   : > { %5464 = vmatpush3.bf16.msra.mxu1 %v6788_v48 }
 0xd7c   : > { %5465 = vmatprep.subr.bf16.mxu1 %v8231_v11  ;;  %3056 = vmatpush1.bf16.msra.mxu0 %v6671_v6 }
 0xd7d   : > { %3057 = vmatprep.subr.bf16.mxu0 %v6681_v23 }
 0xd7f   : > { %5466 = vmatpush3.bf16.msra.mxu1 %v6796_v16 }
 0xd80   : > { %5467 = vmatprep.subr.bf16.mxu1 %v8231_v11  ;;  %3058 = vmatpush1.bf16.msra.mxu0 %v6692_v29 }
 0xd81   : > { %3059 = vmatprep.subr.bf16.mxu0 %v6702_v21 }
 0xd83   : > { %5468 = vmatpush3.bf16.msra.mxu1 %v6804_v19 }
 0xd84   : > { %5469 = vmatprep.subr.bf16.mxu1 %v8231_v11  ;;  %3060 = vmatpush1.bf16.msra.mxu0 %v6712_v24 }
 0xd85   : > { %3061 = vmatprep.subr.bf16.mxu0 %v6722_v14 }
 0xd87   : > { %5470 = vmatpush3.bf16.msra.mxu1 %v6812_v10 }
 0xd88   : > { %3088 = vmatprep.subr.bf16.mxu1 %v6602_v57  ;;  %3062 = vmatpush1.bf16.msra.mxu0 %v6732_v36 }
 0xd89   : > { %5475 = vmatprep.subr.bf16.mxu0 %v8231_v11 }
 0xd8a   : > { %5472 = vmatmul.mubr.bf16.vlgmr.msra.gmra.mrb[68].mxu1 %v2890_v63 }
 0xd8b   : > { %3089 = vmatpush1.bf16.msra.mxu1 %v6611_v62  ;;  %3120 = vmatprep.mubr.bf16.mxu1 %v8222_v35 }
 0xd8c   : > { %3090 = vmatprep.subr.bf16.mxu1 %v6615_v51 }
 0xd8f   : > { %3091 = vmatpush1.bf16.msra.mxu1 %v6624_v54 }
 0xd90   : > { %3092 = vmatprep.subr.bf16.mxu1 %v6635_v3 }
 0xd93   : > { %3093 = vmatpush1.bf16.msra.mxu1 %v6645_v50 }
 0xd94   : > { %3094 = vmatprep.subr.bf16.mxu1 %v6655_v12 }
 0xd97   : > { %3095 = vmatpush1.bf16.msra.mxu1 %v6666_v18 }
 0xd98   : > { %3096 = vmatprep.subr.bf16.mxu1 %v6676_v20 }
 0xd9b   : > { %3097 = vmatpush1.bf16.msra.mxu1 %v6687_v26 }
 0xd9c   : > { %3098 = vmatprep.subr.bf16.mxu1 %v6697_v15 }
 0xd9f   : > { %3099 = vmatpush1.bf16.msra.mxu1 %v6707_v27 }
 0xda0   : > { %3100 = vmatprep.subr.bf16.mxu1 %v6717_v30 }
 0xda3   : > { %3101 = vmatpush1.bf16.msra.mxu1 %v6727_v17 }
 0xda4   : > { %3102 = vmatprep.subr.bf16.mxu1 %v6737_v38 }
 0xda7   : > { %3103 = vmatpush1.bf16.msra.mxu1 %v6743_v39 }
 0xda8   : > { %3217 = vmatprep.subr.bf16.mxu1 %v6584_v37 }
 0xe3d   : > { %v2926_v52 = vpop.f32.mrb[64].mxu1  ;;  %v2967_v22 = vpop.f32.mrb[68].mxu0 }
 0xe3e   : > { %v2928_v34 = vpop.f32.mrb[65].mxu1  ;;  %v2968_v46 = vpop.f32.mrb[69].mxu0  ;;  %v3013_v5 = vadd.f32 %v2926_v52, %v8248_v55 }
 0xe3f   : > { %v3014_v13 = vadd.f32 %v2928_v34, %v8247_v47  ;;  %v2930_v59 = vpop.f32.mrb[66].mxu1  ;;  %v2970_v2 = vpop.f32.mrb[70].mxu0  ;;  %v3015_v42 = vadd.f32 %v2968_v46, %v8249_v32 }
 0xe40   : > { %v2931_v4 = vpop.f32.mrb[67].mxu1  ;;  %v2971_v1 = vpop.f32.mrb[71].mxu0  ;;  %v4932_v28 = vmul.f32 -1.442695, %v3013_v5 }
 0xe41   : > { %v4933_v40 = vmul.f32 -1.442695, %v3014_v13  ;;  %v4934_v63 = vmul.f32 -1.442695, %v3015_v42  ;;  %v8250_v13 = vld [vmem:[#allocation119_spill] sm:$0xff] }
 0xe43   : > { %5905 = vpow2.f32 %v4933_v40 }
 0xe44   : > { %5907 = vpow2.f32 %v4932_v28 }
 0xe4d   : > { %v5906_v49 = vpop.eup %5905 }
 0xe4e   : > { %v3026_v25 = vadd.f32 1.0, %v5906_v49  ;;  %v5908_v58 = vpop.eup %5907 }
 0xe4f   : > { %v3020_v34 = vadd.f32 1.0, %v5908_v58 }
 0xe50   : > { %5909 = vrcp.f32 %v3026_v25 }
 0xe51   : > { %5911 = vpow2.f32 %v4934_v63 }
 0xe52   : > { %5913 = vrcp.f32 %v3020_v34 }
 0xe5a   : > { %v5910_v22 = vpop.eup %5909 }
 0xe5b   : > { %v3039_v59 = vmul.f32 %v5910_v22, %v3037_v33  ;;  %v5912_v5 = vpop.eup %5911 }
 0xe5c   : > { %v5914_v28 = vpop.eup %5913  ;;  %v3032_v46 = vadd.f32 1.0, %v5912_v5 }
 0xe5d   : > { %v3007_v2 = vpop.f32.mrb[68].mxu1 }
 0xe5e   : > { %v3016_v4 = vadd.f32 %v3007_v2, %v8250_v13  ;;  %v5473_v1 = vpop.f32.mrb[69].mxu1 }
 0xe5f   : > { %v3010_v52 = vpop.f32.mrb[70].mxu1 }
 0xe60   : > { %5915 = vtanh.f32 %v3016_v4  ;;  %v5474_v40 = vpop.f32.mrb[71].mxu1 }
 0xe61   : > { %5917 = vrcp.f32 %v3032_v46 }
 0xe6a   : > { %v5916_v49 = vpop.eup %5915 }
 0xe6b   : > { %v3040_v25 = vmul.f32 %v5916_v49, %v5914_v28  ;;  %v5918_v7 = vpop.eup %5917 }
 0xe6d   : > { %v7514_v32 = vadd.f32 %v3040_v25, %v3039_v59 }
 0xe6f   : > { %5919 = vtanh.f32 %v7514_v32  ;;  %3045 = vst [vmem:[#allocation3 + $0x18] sm:$0x3] %v7514_v32 }
 0xe79   : > { %v5920_v42 = vpop.eup %5919 }
 0xe7a   : > { %v3043_v58 = vmul.f32 %v5920_v42, %v5918_v7 }
 0xe7c   : > { %3044 = vst [vmem:[#allocation2 + $0x18] sm:$0x3] %v3043_v58  ;;  %v3046_v33 = vpack.c.bf16 %v3043_v58, %v3043_v58  ;;  %v8251_v58 = vld [vmem:[#allocation116_spill] sm:$0xff] }
 0xe7e   : > { %3080 = vmatmul.mubr.bf16.vlgmr.msra.gmra.mrb[72].mxu0 %v3046_v33  ;;  %3121 = vmatmul.mubr.bf16.vlgmr.msra.gmra.mrb[72].mxu1 %v3046_v33 }
 0xe7f   : > { %5476 = vmatpush3.bf16.msra.mxu0 %v6756_v41  ;;  %5491 = vmatprep.mubr.msk.bf16.mxu0 %vm6100_vm1, %v8231_v11 }
 0xe80   : > { %5477 = vmatprep.subr.bf16.mxu0 %v8231_v11  ;;  %3218 = vmatpush1.bf16.msra.mxu1 %v6588_v31 }
 0xe81   : > { %3219 = vmatprep.subr.bf16.mxu1 %v6592_v53  ;;  %3249 = vmatprep.mubr.bf16.mxu1 %v8222_v35 }
 0xe83   : > { %5478 = vmatpush3.bf16.msra.mxu0 %v6761_v8 }
 0xe84   : > { %5479 = vmatprep.subr.bf16.mxu0 %v8231_v11  ;;  %3220 = vmatpush1.bf16.msra.mxu1 %v6598_v56 }
 0xe85   : > { %3221 = vmatprep.subr.bf16.mxu1 %v6607_v61 }
 0xe87   : > { %5480 = vmatpush3.bf16.msra.mxu0 %v6772_v44 }
 0xe88   : > { %5481 = vmatprep.subr.bf16.mxu0 %v8231_v11  ;;  %3222 = vmatpush1.bf16.msra.mxu1 %v6630_v0 }
 0xe89   : > { %3223 = vmatprep.subr.bf16.mxu1 %v6640_v9 }
 0xe8b   : > { %5482 = vmatpush3.bf16.msra.mxu0 %v6780_v45 }
 0xe8c   : > { %5483 = vmatprep.subr.bf16.mxu0 %v8231_v11  ;;  %3224 = vmatpush1.bf16.msra.mxu1 %v6650_v60 }
 0xe8d   : > { %3225 = vmatprep.subr.bf16.mxu1 %v6660_v43 }
 0xe8f   : > { %5484 = vmatpush3.bf16.msra.mxu0 %v6788_v48 }
 0xe90   : > { %5485 = vmatprep.subr.bf16.mxu0 %v8231_v11  ;;  %3226 = vmatpush1.bf16.msra.mxu1 %v6671_v6 }
 0xe91   : > { %3227 = vmatprep.subr.bf16.mxu1 %v6681_v23 }
 0xe93   : > { %5486 = vmatpush3.bf16.msra.mxu0 %v6796_v16 }
 0xe94   : > { %5487 = vmatprep.subr.bf16.mxu0 %v8231_v11  ;;  %3228 = vmatpush1.bf16.msra.mxu1 %v6692_v29 }
 0xe95   : > { %3229 = vmatprep.subr.bf16.mxu1 %v6702_v21 }
 0xe97   : > { %5488 = vmatpush3.bf16.msra.mxu0 %v6804_v19 }
 0xe98   : > { %5489 = vmatprep.subr.bf16.mxu0 %v8231_v11  ;;  %3230 = vmatpush1.bf16.msra.mxu1 %v6712_v24 }
 0xe99   : > { %3231 = vmatprep.subr.bf16.mxu1 %v6722_v14 }
 0xe9b   : > { %5490 = vmatpush3.bf16.msra.mxu0 %v6812_v10 }
 0xe9c   : > { %3258 = vmatprep.subr.bf16.mxu0 %v6602_v57  ;;  %3232 = vmatpush1.bf16.msra.mxu1 %v6732_v36 }
 0xe9d   : > { %5495 = vmatprep.subr.bf16.mxu1 %v8231_v11 }
 0xe9e   : > { %5492 = vmatmul.mubr.bf16.vlgmr.msra.gmra.mrb[76].mxu0 %v3046_v33 }
 0xe9f   : > { %3259 = vmatpush1.bf16.msra.mxu0 %v6611_v62  ;;  %3290 = vmatprep.mubr.bf16.mxu0 %v8222_v35 }
 0xea0   : > { %3260 = vmatprep.subr.bf16.mxu0 %v6615_v51 }
 0xea3   : > { %3261 = vmatpush1.bf16.msra.mxu0 %v6624_v54 }
 0xea4   : > { %3262 = vmatprep.subr.bf16.mxu0 %v6635_v3 }
 0xea7   : > { %3263 = vmatpush1.bf16.msra.mxu0 %v6645_v50 }
 0xea8   : > { %3264 = vmatprep.subr.bf16.mxu0 %v6655_v12 }
 0xeab   : > { %3265 = vmatpush1.bf16.msra.mxu0 %v6666_v18 }
 0xeac   : > { %3266 = vmatprep.subr.bf16.mxu0 %v6676_v20 }
 0xeaf   : > { %3267 = vmatpush1.bf16.msra.mxu0 %v6687_v26 }
 0xeb0   : > { %3268 = vmatprep.subr.bf16.mxu0 %v6697_v15 }
 0xeb3   : > { %3269 = vmatpush1.bf16.msra.mxu0 %v6707_v27 }
 0xeb4   : > { %3270 = vmatprep.subr.bf16.mxu0 %v6717_v30 }
 0xeb7   : > { %3271 = vmatpush1.bf16.msra.mxu0 %v6727_v17 }
 0xeb8   : > { %3272 = vmatprep.subr.bf16.mxu0 %v6737_v38 }
 0xebb   : > { %3273 = vmatpush1.bf16.msra.mxu0 %v6743_v39 }
 0xebc   : > { %3387 = vmatprep.subr.bf16.mxu0 %v6584_v37 }
 0xf51   : > { %v3081_v63 = vpop.f32.mrb[72].mxu0  ;;  %v3122_v22 = vpop.f32.mrb[72].mxu1 }
 0xf52   : > { %v3083_v34 = vpop.f32.mrb[73].mxu0  ;;  %v3123_v59 = vpop.f32.mrb[73].mxu1  ;;  %v3172_v49 = vrot.slane %v3081_v63, 6 }
 0xf53   : > { %v3173_v2 = vrot.slane %v3083_v34, 6  ;;  %v3085_v4 = vpop.f32.mrb[74].mxu0  ;;  %v3125_v1 = vpop.f32.mrb[74].mxu1  ;;  %v3174_v42 = vrot.slane %v3123_v59, 6  ;;  %v3204_v34 = vrot.slane %v7514_v32, 6 }
 0xf54   : > { %v3086_v52 = vpop.f32.mrb[75].mxu0  ;;  %v3126_v40 = vpop.f32.mrb[75].mxu1  ;;  %v3180_v46 = vadd.f32 %v3172_v49, %v8248_v55 }
 0xf55   : > { %v3181_v5 = vadd.f32 %v3173_v2, %v8247_v47  ;;  %v3182_v33 = vadd.f32 %v3174_v42, %v8251_v58 }
 0xf56   : > { %v4935_v25 = vmul.f32 -1.442695, %v3180_v46 }
 0xf57   : > { %v4936_v28 = vmul.f32 -1.442695, %v3181_v5  ;;  %v4937_v4 = vmul.f32 -1.442695, %v3182_v33 }
 0xf59   : > { %5921 = vpow2.f32 %v4936_v28 }
 0xf5a   : > { %5923 = vpow2.f32 %v4935_v25 }
 0xf63   : > { %v5922_v7 = vpop.eup %5921 }
 0xf64   : > { %v3193_v37 = vadd.f32 1.0, %v5922_v7  ;;  %v5924_v22 = vpop.eup %5923 }
 0xf65   : > { %v3187_v52 = vadd.f32 1.0, %v5924_v22 }
 0xf66   : > { %5925 = vrcp.f32 %v3193_v37 }
 0xf67   : > { %5927 = vpow2.f32 %v4937_v4 }
 0xf68   : > { %5929 = vrcp.f32 %v3187_v52 }
 0xf70   : > { %v5926_v1 = vpop.eup %5925 }
 0xf71   : > { %v3206_v2 = vmul.f32 %v5926_v1, %v3204_v34  ;;  %v3162_v40 = vpop.f32.mrb[76].mxu0  ;;  %v5928_v59 = vpop.eup %5927 }
 0xf72   : > { %v3175_v63 = vrot.slane %v3162_v40, 6  ;;  %v5493_v5 = vpop.f32.mrb[77].mxu0  ;;  %v5930_v25 = vpop.eup %5929  ;;  %v3199_v37 = vadd.f32 1.0, %v5928_v59 }
 0xf73   : > { %v3165_v28 = vpop.f32.mrb[78].mxu0 }
 0xf74   : > { %v3183_v49 = vadd.f32 %v3175_v63, %v8250_v13  ;;  %v5494_v46 = vpop.f32.mrb[79].mxu0 }
 0xf76   : > { %5931 = vtanh.f32 %v3183_v49 }
 0xf77   : > { %5933 = vrcp.f32 %v3199_v37 }
 0xf80   : > { %v5932_v7 = vpop.eup %5931 }
 0xf81   : > { %v3207_v42 = vmul.f32 %v5932_v7, %v5930_v25  ;;  %v5934_v33 = vpop.eup %5933 }
 0xf83   : > { %v7575_v32 = vadd.f32 %v3207_v42, %v3206_v2 }
 0xf85   : > { %5935 = vtanh.f32 %v7575_v32  ;;  %3212 = vst [vmem:[#allocation3 + $0x18] sm:$0xc] %v7575_v32 }
 0xf8f   : > { %v5936_v22 = vpop.eup %5935 }
 0xf90   : > { %v3210_v34 = vmul.f32 %v5936_v22, %v5934_v33 }
 0xf92   : > { %3211 = vst [vmem:[#allocation2 + $0x18] sm:$0xc] %v3210_v34  ;;  %v3213_v4 = vpack.c.bf16 %v3210_v34, %v3210_v34 }
 0xf94   : > { %v3215_v1 = vrot.slane %v3213_v4, 1 }
 0xf96   : > { %3250 = vmatmul.mubr.bf16.vlgmr.msra.gmra.mrb[76].mxu1 %v3215_v1  ;;  %3291 = vmatmul.mubr.bf16.vlgmr.msra.gmra.mrb[80].mxu0 %v3215_v1 }
 0xf97   : > { %5496 = vmatpush3.bf16.msra.mxu1 %v6756_v41  ;;  %5511 = vmatprep.mubr.msk.bf16.mxu1 %vm6100_vm1, %v8231_v11 }
 0xf98   : > { %5497 = vmatprep.subr.bf16.mxu1 %v8231_v11  ;;  %3388 = vmatpush1.bf16.msra.mxu0 %v6588_v31 }
 0xf99   : > { %3389 = vmatprep.subr.bf16.mxu0 %v6592_v53  ;;  %3419 = vmatprep.mubr.bf16.mxu0 %v8222_v35 }
 0xf9b   : > { %5498 = vmatpush3.bf16.msra.mxu1 %v6761_v8 }
 0xf9c   : > { %5499 = vmatprep.subr.bf16.mxu1 %v8231_v11  ;;  %3390 = vmatpush1.bf16.msra.mxu0 %v6598_v56 }
 0xf9d   : > { %3391 = vmatprep.subr.bf16.mxu0 %v6607_v61  ;;  %v3374_v61 = vrot.slane %v7575_v32, 6 }
 0xf9f   : > { %5500 = vmatpush3.bf16.msra.mxu1 %v6772_v44 }
 0xfa0   : > { %5501 = vmatprep.subr.bf16.mxu1 %v8231_v11  ;;  %3392 = vmatpush1.bf16.msra.mxu0 %v6630_v0 }
 0xfa1   : > { %3393 = vmatprep.subr.bf16.mxu0 %v6640_v9 }
 0xfa3   : > { %5502 = vmatpush3.bf16.msra.mxu1 %v6780_v45 }
 0xfa4   : > { %5503 = vmatprep.subr.bf16.mxu1 %v8231_v11  ;;  %3394 = vmatpush1.bf16.msra.mxu0 %v6650_v60 }
 0xfa5   : > { %3395 = vmatprep.subr.bf16.mxu0 %v6660_v43 }
 0xfa7   : > { %5504 = vmatpush3.bf16.msra.mxu1 %v6788_v48 }
 0xfa8   : > { %5505 = vmatprep.subr.bf16.mxu1 %v8231_v11  ;;  %3396 = vmatpush1.bf16.msra.mxu0 %v6671_v6 }
 0xfa9   : > { %3397 = vmatprep.subr.bf16.mxu0 %v6681_v23 }
 0xfab   : > { %5506 = vmatpush3.bf16.msra.mxu1 %v6796_v16 }
 0xfac   : > { %5507 = vmatprep.subr.bf16.mxu1 %v8231_v11  ;;  %3398 = vmatpush1.bf16.msra.mxu0 %v6692_v29 }
 0xfad   : > { %3399 = vmatprep.subr.bf16.mxu0 %v6702_v21 }
 0xfaf   : > { %5508 = vmatpush3.bf16.msra.mxu1 %v6804_v19 }
 0xfb0   : > { %5509 = vmatprep.subr.bf16.mxu1 %v8231_v11  ;;  %3400 = vmatpush1.bf16.msra.mxu0 %v6712_v24 }
 0xfb1   : > { %3401 = vmatprep.subr.bf16.mxu0 %v6722_v14 }
 0xfb3   : > { %5510 = vmatpush3.bf16.msra.mxu1 %v6812_v10 }
 0xfb4   : > { %3428 = vmatprep.subr.bf16.mxu1 %v6602_v57  ;;  %3402 = vmatpush1.bf16.msra.mxu0 %v6732_v36 }
 0xfb5   : > { %5515 = vmatprep.subr.bf16.mxu0 %v8231_v11 }
 0xfb6   : > { %5512 = vmatmul.mubr.bf16.vlgmr.msra.gmra.mrb[80].mxu1 %v3215_v1 }
 0xfb7   : > { %3429 = vmatpush1.bf16.msra.mxu1 %v6611_v62  ;;  %3460 = vmatprep.mubr.bf16.mxu1 %v8222_v35 }
 0xfb8   : > { %3430 = vmatprep.subr.bf16.mxu1 %v6615_v51 }
 0xfbb   : > { %3431 = vmatpush1.bf16.msra.mxu1 %v6624_v54 }
 0xfbc   : > { %3432 = vmatprep.subr.bf16.mxu1 %v6635_v3 }
 0xfbf   : > { %3433 = vmatpush1.bf16.msra.mxu1 %v6645_v50 }
 0xfc0   : > { %3434 = vmatprep.subr.bf16.mxu1 %v6655_v12 }
 0xfc3   : > { %3435 = vmatpush1.bf16.msra.mxu1 %v6666_v18 }
 0xfc4   : > { %3436 = vmatprep.subr.bf16.mxu1 %v6676_v20 }
 0xfc7   : > { %3437 = vmatpush1.bf16.msra.mxu1 %v6687_v26 }
 0xfc8   : > { %3438 = vmatprep.subr.bf16.mxu1 %v6697_v15 }
 0xfcb   : > { %3439 = vmatpush1.bf16.msra.mxu1 %v6707_v27 }
 0xfcc   : > { %3440 = vmatprep.subr.bf16.mxu1 %v6717_v30 }
 0xfcf   : > { %3441 = vmatpush1.bf16.msra.mxu1 %v6727_v17 }
 0xfd0   : > { %3442 = vmatprep.subr.bf16.mxu1 %v6737_v38 }
 0xfd3   : > { %3443 = vmatpush1.bf16.msra.mxu1 %v6743_v39 }
0x1069   : > { %v3251_v3 = vpop.f32.mrb[76].mxu1  ;;  %v3292_v6 = vpop.f32.mrb[80].mxu0 }
0x106a   : > { %v3253_v9 = vpop.f32.mrb[77].mxu1  ;;  %v3293_v12 = vpop.f32.mrb[81].mxu0  ;;  %v3342_v0 = vrot.slane %v3251_v3, 4 }
0x106b   : > { %v3343_v18 = vrot.slane %v3253_v9, 4  ;;  %v3255_v20 = vpop.f32.mrb[78].mxu1  ;;  %v3295_v23 = vpop.f32.mrb[82].mxu0  ;;  %v3344_v53 = vrot.slane %v3293_v12, 4 }
0x106c   : > { %v3256_v26 = vpop.f32.mrb[79].mxu1  ;;  %v3296_v29 = vpop.f32.mrb[83].mxu0  ;;  %v3350_v30 = vadd.f32 %v3342_v0, %v8248_v55 }
0x106d   : > { %v3351_v36 = vadd.f32 %v3343_v18, %v8247_v47  ;;  %v3352_v56 = vadd.f32 %v3344_v53, %v8251_v58 }
0x106e   : > { %v4938_v31 = vmul.f32 -1.442695, %v3350_v30 }
0x106f   : > { %v4939_v27 = vmul.f32 -1.442695, %v3351_v36  ;;  %v4940_v62 = vmul.f32 -1.442695, %v3352_v56 }
0x1071   : > { %5937 = vpow2.f32 %v4939_v27 }
0x1072   : > { %5939 = vpow2.f32 %v4938_v31 }
0x107b   : > { %v5938_v38 = vpop.eup %5937 }
0x107c   : > { %v3363_v39 = vadd.f32 1.0, %v5938_v38  ;;  %v5940_v57 = vpop.eup %5939 }
0x107d   : > { %v3357_v50 = vadd.f32 1.0, %v5940_v57 }
0x107e   : > { %5941 = vrcp.f32 %v3363_v39 }
0x107f   : > { %5943 = vpow2.f32 %v4940_v62 }
0x1080   : > { %5945 = vrcp.f32 %v3357_v50 }
0x1088   : > { %v5942_v51 = vpop.eup %5941 }
0x1089   : > { %v3376_v54 = vmul.f32 %v5942_v51, %v3374_v61  ;;  %v3332_v60 = vpop.f32.mrb[80].mxu1  ;;  %v5944_v17 = vpop.eup %5943 }
0x108a   : > { %v3345_v43 = vrot.slane %v3332_v60, 4  ;;  %v5513_v15 = vpop.f32.mrb[81].mxu1  ;;  %v5946_v35 = vpop.eup %5945  ;;  %v3369_v2 = vadd.f32 1.0, %v5944_v17 }
0x108b   : > { %v3335_v21 = vpop.f32.mrb[82].mxu1 }
0x108c   : > { %v3353_v24 = vadd.f32 %v3345_v43, %v8250_v13  ;;  %v5514_v14 = vpop.f32.mrb[83].mxu1 }
0x108e   : > { %5947 = vtanh.f32 %v3353_v24 }
0x108f   : > { %5949 = vrcp.f32 %v3369_v2 }
0x1098   : > { %v5948_v52 = vpop.eup %5947 }
0x1099   : > { %v3377_v40 = vmul.f32 %v5948_v52, %v5946_v35  ;;  %v5950_v5 = vpop.eup %5949 }
0x109b   : > { %v3378_v63 = vadd.f32 %v3377_v40, %v3376_v54 }
0x109d   : > { %5951 = vtanh.f32 %v3378_v63  ;;  %3382 = vst [vmem:[#allocation3 + $0x18] sm:$0x30] %v3378_v63  ;;  %v3544_v3 = vrot.slane %v3378_v63, 6 }
0x10a7   : > { %v5952_v28 = vpop.eup %5951 }
0x10a8   : > { %v3380_v49 = vmul.f32 %v5952_v28, %v5950_v5 }
0x10aa   : > { %3381 = vst [vmem:[#allocation2 + $0x18] sm:$0x30] %v3380_v49  ;;  %v3383_v46 = vpack.c.bf16 %v3380_v49, %v3380_v49 }
0x10ac   : > { %v3385_v59 = vrot.slane %v3383_v46, 2 }
0x10ae   : > { %3420 = vmatmul.mubr.bf16.vlgmr.msra.gmra.mrb[84].mxu0 %v3385_v59  ;;  %3461 = vmatmul.mubr.bf16.vlgmr.msra.gmra.mrb[84].mxu1 %v3385_v59 }
0x10af   : > { %5516 = vmatpush3.bf16.msra.mxu0 %v6756_v41  ;;  %5531 = vmatprep.mubr.msk.bf16.mxu0 %vm6100_vm1, %v8231_v11 }
0x10b0   : > { %5517 = vmatprep.subr.bf16.mxu0 %v8231_v11 }
0x10b3   : > { %5518 = vmatpush3.bf16.msra.mxu0 %v6761_v8 }
0x10b4   : > { %5519 = vmatprep.subr.bf16.mxu0 %v8231_v11 }
0x10b7   : > { %5520 = vmatpush3.bf16.msra.mxu0 %v6772_v44 }
0x10b8   : > { %5521 = vmatprep.subr.bf16.mxu0 %v8231_v11 }
0x10bb   : > { %5522 = vmatpush3.bf16.msra.mxu0 %v6780_v45 }
0x10bc   : > { %5523 = vmatprep.subr.bf16.mxu0 %v8231_v11 }
0x10bf   : > { %5524 = vmatpush3.bf16.msra.mxu0 %v6788_v48 }
0x10c0   : > { %5525 = vmatprep.subr.bf16.mxu0 %v8231_v11 }
0x10c3   : > { %5526 = vmatpush3.bf16.msra.mxu0 %v6796_v16 }
0x10c4   : > { %5527 = vmatprep.subr.bf16.mxu0 %v8231_v11 }
0x10c7   : > { %5528 = vmatpush3.bf16.msra.mxu0 %v6804_v19 }
0x10c8   : > { %5529 = vmatprep.subr.bf16.mxu0 %v8231_v11 }
0x10cb   : > { %5530 = vmatpush3.bf16.msra.mxu0 %v6812_v10 }
0x10ce   : > { %5532 = vmatmul.mubr.bf16.vlgmr.msra.gmra.mrb[88].mxu0 %v3385_v59 }
0x1181   : > { %v3421_v41 = vpop.f32.mrb[84].mxu0  ;;  %v3462_v8 = vpop.f32.mrb[84].mxu1 }
0x1182   : > { %v3423_v44 = vpop.f32.mrb[85].mxu0  ;;  %v3463_v45 = vpop.f32.mrb[85].mxu1  ;;  %v3512_v33 = vrot.slane %v3421_v41, 2 }
0x1183   : > { %v3513_v25 = vrot.slane %v3423_v44, 2  ;;  %v3425_v7 = vpop.f32.mrb[86].mxu0  ;;  %v3465_v48 = vpop.f32.mrb[86].mxu1  ;;  %v3514_v34 = vrot.slane %v3463_v45, 2 }
0x1184   : > { %v3426_v37 = vpop.f32.mrb[87].mxu0  ;;  %v3466_v42 = vpop.f32.mrb[87].mxu1  ;;  %v3520_v19 = vadd.f32 %v3512_v33, %v8248_v55 }
0x1185   : > { %v3521_v16 = vadd.f32 %v3513_v25, %v8247_v47  ;;  %v3522_v4 = vadd.f32 %v3514_v34, %v8251_v58 }
0x1186   : > { %v4941_v11 = vmul.f32 -1.442695, %v3520_v19 }
0x1187   : > { %v4942_v32 = vmul.f32 -1.442695, %v3521_v16  ;;  %v4943_v6 = vmul.f32 -1.442695, %v3522_v4 }
0x1189   : > { %5953 = vpow2.f32 %v4942_v32 }
0x118a   : > { %5955 = vpow2.f32 %v4941_v11 }
0x1193   : > { %v5954_v22 = vpop.eup %5953 }
0x1194   : > { %v3533_v10 = vadd.f32 1.0, %v5954_v22  ;;  %v5956_v1 = vpop.eup %5955 }
0x1195   : > { %v3527_v12 = vadd.f32 1.0, %v5956_v1 }
0x1196   : > { %5957 = vrcp.f32 %v3533_v10 }
0x1197   : > { %5959 = vpow2.f32 %v4943_v6 }
0x1198   : > { %5961 = vrcp.f32 %v3527_v12 }
0x11a0   : > { %v5958_v9 = vpop.eup %5957 }
0x11a1   : > { %v3546_v18 = vmul.f32 %v5958_v9, %v3544_v3  ;;  %v3502_v47 = vpop.f32.mrb[88].mxu0  ;;  %v5960_v36 = vpop.eup %5959 }
0x11a2   : > { %v3515_v20 = vrot.slane %v3502_v47, 2  ;;  %v5533_v23 = vpop.f32.mrb[89].mxu0  ;;  %v5962_v27 = vpop.eup %5961  ;;  %v3539_v58 = vadd.f32 1.0, %v5960_v36 }
0x11a3   : > { %v3505_v26 = vpop.f32.mrb[90].mxu0 }
0x11a4   : > { %v3523_v55 = vadd.f32 %v3515_v20, %v8250_v13  ;;  %v5534_v29 = vpop.f32.mrb[91].mxu0 }
0x11a6   : > { %5963 = vtanh.f32 %v3523_v55 }
0x11a7   : > { %5965 = vrcp.f32 %v3539_v58 }
0x11b0   : > { %v5964_v0 = vpop.eup %5963 }
0x11b1   : > { %v3547_v30 = vmul.f32 %v5964_v0, %v5962_v27  ;;  %v5966_v38 = vpop.eup %5965 }
0x11b3   : > { %v3548_v31 = vadd.f32 %v3547_v30, %v3546_v18 }
0x11b5   : > { %5967 = vtanh.f32 %v3548_v31  ;;  %3552 = vst [vmem:[#allocation3 + $0x18] sm:$0xc0] %v3548_v31 }
0x11bf   : > { %v5968_v39 = vpop.eup %5967 }
0x11c0   : > { %v3550_v53 = vmul.f32 %v5968_v39, %v5966_v38 }
0x11c2   : > { %3551 = vst [vmem:[#allocation2 + $0x18] sm:$0xc0] %v3550_v53 }
0x11c3 PF: > { %p4944_p8 = scmp.le.s32.totalorder %s6079_s21, 0 }
0x11c4   : > { %v8252_v13 = vld [vmem:[#allocation7_spill] sm:$0xff] (!%p4944_p8)  ;;  %v8253_v56 = vld [vmem:[#allocation4_spill] sm:$0xff] (!%p4944_p8)  ;;  %v8254_v61 = vld [vmem:[#allocation9_spill] sm:$0xff] (!%p4944_p8)  ;;  %v6101_v59 = vmov (!%p4944_p8), 0  }
0x11c5   : > { %3556 = sbr.rel (%p4944_p8) target bundleno = 4915 (0x1333), region = 52  ;;  %v4946_v57 = vcombine.high (!%p4944_p8), %v8253_v56, %v8252_v13  ;;  %v8255_v62 = vld [vmem:[#allocation6_spill] sm:$0xff] (!%p4944_p8)  ;;  %v4945_v50 = vcombine.low (!%p4944_p8), %v8253_v56, %v8252_v13  ;;  %v8256_v54 = vld [vmem:[#allocation13_spill] sm:$0xff] (!%p4944_p8)  ;;  %v8258_v15 = vld [vmem:[#allocation15_spill] sm:$0xff] (!%p4944_p8)  ;;  %3869 = vmatprep.mubr.bf16.mxu1 (!%p4944_p8), %v6101_v59 }
0x11c6   : > { %v4949_v51 = vcombine.low (!%p4944_p8), %v8255_v62, %v8254_v61  ;;  %v8257_v60 = vld [vmem:[#allocation10_spill] sm:$0xff] (!%p4944_p8)  ;;  %v8259_v21 = vld [vmem:[#allocation12_spill] sm:$0xff] (!%p4944_p8)  ;;  %v7671_v35 = vld [vmem:[#allocation2 + $0x8] sm:$0xff] (!%p4944_p8) }
0x11c7   : > { %v4951_v43 = vcombine.high (!%p4944_p8), %v8257_v60, %v8256_v54  ;;  %v4954_v24 = vcombine.low (!%p4944_p8), %v8259_v21, %v8258_v15  ;;  %v7667_v14 = vld [vmem:[#allocation2] sm:$0xff] (!%p4944_p8)  ;;  %3837 = vmatprep.subr.bf16.mxu1 (!%p4944_p8), %v4946_v57  ;;  %v4950_v17 = vcombine.low (!%p4944_p8), %v8257_v60, %v8256_v54  ;;  %v8260_v52 = vld [vmem:[#allocation19_spill] sm:$0xff] (!%p4944_p8)  ;;  %v8262_v63 = vld [vmem:[#allocation21_spill] sm:$0xff] (!%p4944_p8)  ;;  %v3575_v8 = vrot.slane (!%p4944_p8), %v7671_v35, 6 }
0x11c8   : > { %5535 = vmatprep.subr.bf16.mxu0 (!%p4944_p8), %v4949_v51  ;;  %3838 = vmatpush1.bf16.msra.mxu1 (!%p4944_p8), %v4945_v50  ;;  %v8261_v2 = vld [vmem:[#allocation16_spill] sm:$0xff] (!%p4944_p8)  ;;  %v8263_v5 = vld [vmem:[#allocation18_spill] sm:$0xff] (!%p4944_p8)  ;;  %v3574_v46 = vrot.slane (!%p4944_p8), %v7667_v14, 6  ;;  %v8265_v25 = vld [vmem:[#allocation25_spill] sm:$0xff] (!%p4944_p8) }
0x11c9   : > { %5536 = vmatpush3.bf16.msra.mxu0 (!%p4944_p8), %v4949_v51  ;;  %3839 = vmatprep.subr.bf16.mxu1 (!%p4944_p8), %v4951_v43  ;;  %v4956_v40 = vcombine.high (!%p4944_p8), %v8261_v2, %v8260_v52  ;;  %v4959_v28 = vcombine.low (!%p4944_p8), %v8263_v5, %v8262_v63  ;;  %v7677_v49 = vld [vmem:[#allocation2 + $0x18] sm:$0xff] (!%p4944_p8)  ;;  %v8264_v41 = vld [vmem:[#allocation100_spill] sm:$0xff] (!%p4944_p8)  ;;  %v4955_v44 = vcombine.low (!%p4944_p8), %v8261_v2, %v8260_v52  ;;  %v8266_v7 = vld [vmem:[#allocation22_spill] sm:$0xff] (!%p4944_p8) }
0x11ca   : > { %5537 = vmatprep.subr.bf16.mxu0 (!%p4944_p8), %v4954_v24  ;;  %vm3570_vm2 = vcmp.lt.s32.totalorder (!%p4944_p8), %v8264_v41, 2  ;;  %v3577_v45 = vrot.slane (!%p4944_p8), %v7677_v49, 6  ;;  %v4961_v48 = vcombine.high (!%p4944_p8), %v8266_v7, %v8265_v25  ;;  %v8267_v37 = vld [vmem:[#allocation27_spill] sm:$0xff] (!%p4944_p8)  ;;  %v8268_v42 = vld [vmem:[#allocation24_spill] sm:$0xff] (!%p4944_p8)  ;;  %v4960_v11 = vcombine.low (!%p4944_p8), %v8266_v7, %v8265_v25  ;;  %v8271_v1 = vld [vmem:[#allocation33_spill] sm:$0xff] (!%p4944_p8) }
0x11cb   : > { %v4964_v16 = vcombine.low (!%p4944_p8), %v8268_v42, %v8267_v37  ;;  %v3580_v32 = vsel (!%p4944_p8), %vm3570_vm2, %v3574_v46, %v3575_v8  ;;  %v8269_v10 = vld [vmem:[#allocation31_spill] sm:$0xff] (!%p4944_p8)  ;;  %v8270_v34 = vld [vmem:[#allocation28_spill] sm:$0xff] (!%p4944_p8)  ;;  %v8272_v3 = vld [vmem:[#allocation30_spill] sm:$0xff] (!%p4944_p8)  ;;  %vm3606_vm3 = vcmp.lt.s32.totalorder (!%p4944_p8), %v8264_v41, 6 }
0x11cc   : > { %3840 = vmatpush1.bf16.msra.mxu1 %v4950_v17  ;;  %v3581_v33 = vsel %vm3570_vm2, %v3577_v45, %v3574_v46  ;;  %v4966_v4 = vcombine.high %v8270_v34, %v8269_v10  ;;  %v4969_v6 = vcombine.low %v8272_v3, %v8271_v1  ;;  %v4965_v9 = vcombine.low %v8270_v34, %v8269_v10  ;;  %v8273_v12 = vld [vmem:[#allocation37_spill] sm:$0xff]  ;;  %v8274_v18 = vld [vmem:[#allocation34_spill] sm:$0xff]  ;;  %v8275_v20 = vld [vmem:[#allocation39_spill] sm:$0xff] }
0x11cd   : > { %5538 = vmatpush3.bf16.msra.mxu0 %v4954_v24  ;;  %3841 = vmatprep.subr.bf16.mxu1 %v4956_v40  ;;  %v3582_v19 = vsel %vm3570_vm2, %v7667_v14, %v3581_v33  ;;  %v4971_v47 = vcombine.high %v8274_v18, %v8273_v12  ;;  %v8276_v23 = vld [vmem:[#allocation36_spill] sm:$0xff]  ;;  %v4970_v55 = vcombine.low %v8274_v18, %v8273_v12  ;;  %v8277_v29 = vld [vmem:[#allocation43_spill] sm:$0xff]  ;;  %v8279_v0 = vld [vmem:[#allocation45_spill] sm:$0xff] }
0x11ce   : > { %5539 = vmatprep.subr.bf16.mxu0 %v4959_v28  ;;  %v7699_v22 = vpack.c.bf16 %v3580_v32, %v3582_v19  ;;  %v4974_v26 = vcombine.low %v8276_v23, %v8275_v20  ;;  %v8278_v36 = vld [vmem:[#allocation40_spill] sm:$0xff]  ;;  %v8280_v58 = vld [vmem:[#allocation42_spill] sm:$0xff]  ;;  %v8281_v53 = vld [vmem:[#allocation49_spill] sm:$0xff] }
0x11cf   : > { %v4976_v27 = vcombine.high %v8278_v36, %v8277_v29  ;;  %v4979_v30 = vcombine.low %v8280_v58, %v8279_v0  ;;  %v7718_v31 = vld [vmem:[#allocation2 + $0x10] sm:$0xff]  ;;  %v4975_v38 = vcombine.low %v8278_v36, %v8277_v29  ;;  %v8283_v57 = vld [vmem:[#allocation51_spill] sm:$0xff]  ;;  %v8284_v61 = vld [vmem:[#allocation48_spill] sm:$0xff] }
0x11d0   : > { %3842 = vmatpush1.bf16.msra.mxu1 %v4955_v44  ;;  %5551 = vmatprep.mubr.bf16.mxu0 %v7699_v22  ;;  %v3576_v39 = vrot.slane %v7718_v31, 6  ;;  %v8282_v13 = vld [vmem:[#allocation46_spill] sm:$0xff]  ;;  %v4984_v62 = vcombine.low %v8284_v61, %v8283_v57  ;;  %v8285_v60 = vld [vmem:[#allocation8_spill] sm:$0xff]  ;;  %v8286_v43 = vld [vmem:[#allocation5_spill] sm:$0xff] }
0x11d1   : > { %5540 = vmatpush3.bf16.msra.mxu0 %v4959_v28  ;;  %3843 = vmatprep.subr.bf16.mxu1 %v4961_v48  ;;  %v4981_v56 = vcombine.high %v8282_v13, %v8281_v53  ;;  %v4980_v51 = vcombine.low %v8282_v13, %v8281_v53  ;;  %v4948_v15 = vcombine.high %v8286_v43, %v8285_v60  ;;  %v8287_v21 = vld [vmem:[#allocation55_spill] sm:$0xff]  ;;  %v8288_v24 = vld [vmem:[#allocation52_spill] sm:$0xff]  ;;  %v8289_v63 = vld [vmem:[#allocation14_spill] sm:$0xff] }
0x11d2   : > { %5541 = vmatprep.subr.bf16.mxu0 %v4964_v16  ;;  %v3578_v50 = vsel %vm3570_vm2, %v3576_v39, %v3577_v45  ;;  %v3579_v54 = vsel %vm3570_vm2, %v3575_v8, %v3576_v39  ;;  %v4986_v17 = vcombine.high %v8288_v24, %v8287_v21  ;;  %v4947_v2 = vcombine.low %v8286_v43, %v8285_v60  ;;  %v8290_v5 = vld [vmem:[#allocation11_spill] sm:$0xff]  ;;  %v8291_v46 = vld [vmem:[#allocation61_spill] sm:$0xff]  ;;  %v8292_v8 = vld [vmem:[#allocation58_spill] sm:$0xff] }
0x11d3   : > { %v7737_v52 = vpack.c.bf16 %v3578_v50, %v3579_v54  ;;  %v4985_v40 = vcombine.low %v8288_v24, %v8287_v21  ;;  %v4953_v28 = vcombine.high %v8290_v5, %v8289_v63  ;;  %v4991_v44 = vcombine.high %v8292_v8, %v8291_v46  ;;  %v8293_v7 = vld [vmem:[#allocation20_spill] sm:$0xff]  ;;  %v8294_v48 = vld [vmem:[#allocation17_spill] sm:$0xff]  ;;  %v8295_v42 = vld [vmem:[#allocation67_spill] sm:$0xff] }
0x11d4   : > { %3844 = vmatpush1.bf16.msra.mxu1 %v4960_v11  ;;  %v4952_v45 = vcombine.low %v8290_v5, %v8289_v63  ;;  %v4990_v25 = vcombine.low %v8292_v8, %v8291_v46  ;;  %v4958_v37 = vcombine.high %v8294_v48, %v8293_v7  ;;  %v4957_v33 = vcombine.low %v8294_v48, %v8293_v7  ;;  %v8297_v11 = vld [vmem:[#allocation26_spill] sm:$0xff]  ;;  %v8298_v10 = vld [vmem:[#allocation23_spill] sm:$0xff]  ;;  %v8301_v12 = vld [vmem:[#allocation32_spill] sm:$0xff] }
0x11d5   : > { %5542 = vmatpush3.bf16.msra.mxu0 %v4964_v16  ;;  %3845 = vmatprep.subr.bf16.mxu1 %v4966_v4  ;;  %v8296_v16 = vld [vmem:[#allocation64_spill] sm:$0xff]  ;;  %v4963_v34 = vcombine.high %v8298_v10, %v8297_v11  ;;  %v8299_v4 = vld [vmem:[#allocation73_spill] sm:$0xff]  ;;  %v8300_v1 = vld [vmem:[#allocation70_spill] sm:$0xff]  ;;  %v3602_v50 = vrot.slane %v7667_v14, 2  ;;  %v3603_v43 = vrot.slane %v7671_v35, 2  ;;  %v7818_v7 = vadd.s32 24, %v8264_v41 }
0x11d6   : > { %5543 = vmatprep.subr.bf16.mxu0 %v4969_v6  ;;  %v4996_v32 = vcombine.high %v8296_v16, %v8295_v42  ;;  %v4995_v19 = vcombine.low %v8296_v16, %v8295_v42  ;;  %v5001_v3 = vcombine.high %v8300_v1, %v8299_v4  ;;  %v8302_v18 = vld [vmem:[#allocation29_spill] sm:$0xff]  ;;  %v8303_v20 = vld [vmem:[#allocation79_spill] sm:$0xff]  ;;  %v8304_v23 = vld [vmem:[#allocation76_spill] sm:$0xff]  ;;  %v3605_v48 = vrot.slane %v7677_v49, 2 }
0x11d7   : > { %v5005_v29 = vcombine.low %v8304_v23, %v8303_v20  ;;  %v8305_v36 = vld [vmem:[#allocation38_spill] sm:$0xff]  ;;  %v8307_v58 = vld [vmem:[#allocation85_spill] sm:$0xff]  ;;  %v8309_v13 = vld [vmem:[#allocation44_spill] sm:$0xff]  ;;  %v3609_v5 = vsel %vm3606_vm3, %v3602_v50, %v3603_v43  ;;  %vm3601_vm4 = vcmp.ge.s32.totalorder %v7818_v7, 30 }
0x11d8   : > { %3846 = vmatpush1.bf16.msra.mxu1 %v4965_v9  ;;  %v5000_v9 = vcombine.low %v8300_v1, %v8299_v4  ;;  %v8311_v61 = vld [vmem:[#allocation91_spill] sm:$0xff]  ;;  %v8313_v21 = vld [vmem:[#allocation50_spill] sm:$0xff]  ;;  %v8318_v46 = vld [vmem:[#allocation53_spill] sm:$0xff] }
0x11d9   : > { %5544 = vmatpush3.bf16.msra.mxu0 %v4969_v6  ;;  %3847 = vmatprep.subr.bf16.mxu1 %v4971_v47  ;;  %v4962_v6 = vcombine.low %v8298_v10, %v8297_v11  ;;  %v4968_v47 = vcombine.high %v8302_v18, %v8301_v12  ;;  %v8314_v24 = vld [vmem:[#allocation47_spill] sm:$0xff]  ;;  %v8321_v16 = vld [vmem:[#allocation62_spill] sm:$0xff]  ;;  %v8324_v11 = vld [vmem:[#allocation60_spill] sm:$0xff] }
0x11da   : > { %5545 = vmatprep.subr.bf16.mxu0 %v4974_v26  ;;  %v4982_v63 = vcombine.low %v8314_v24, %v8313_v21 }
0x11dc   : > { %3848 = vmatpush1.bf16.msra.mxu1 %v4970_v55  ;;  %v4967_v55 = vcombine.low %v8302_v18, %v8301_v12  ;;  %v8327_v18 = vld [vmem:[#allocation69_spill] sm:$0xff] }
0x11dd   : > { %5546 = vmatpush3.bf16.msra.mxu0 %v4974_v26  ;;  %3849 = vmatprep.subr.bf16.mxu1 %v4976_v27  ;;  %v5006_v26 = vcombine.high %v8304_v23, %v8303_v20  ;;  %v8306_v27 = vld [vmem:[#allocation35_spill] sm:$0xff] }
0x11de   : > { %5547 = vmatprep.subr.bf16.mxu0 %v4979_v30  ;;  %v4973_v0 = vcombine.high %v8306_v27, %v8305_v36  ;;  %v4972_v39 = vcombine.low %v8306_v27, %v8305_v36  ;;  %v8332_v36 = vld [vmem:[#allocation72_spill] sm:$0xff] }
0x11e0   : > { %3850 = vmatpush1.bf16.msra.mxu1 %v4975_v38 }
0x11e1   : > { %5548 = vmatpush3.bf16.msra.mxu0 %v4979_v30  ;;  %3851 = vmatprep.subr.bf16.mxu1 %v4981_v56  ;;  %v8308_v30 = vld [vmem:[#allocation82_spill] sm:$0xff]  ;;  %v8310_v56 = vld [vmem:[#allocation41_spill] sm:$0xff] }
0x11e2   : > { %5549 = vmatprep.subr.bf16.mxu0 %v4984_v62  ;;  %v5011_v38 = vcombine.high %v8308_v30, %v8307_v58  ;;  %v5010_v53 = vcombine.low %v8308_v30, %v8307_v58  ;;  %v4978_v57 = vcombine.high %v8310_v56, %v8309_v13  ;;  %v4977_v54 = vcombine.low %v8310_v56, %v8309_v13  ;;  %v8333_v58 = vld [vmem:[#allocation80_spill] sm:$0xff]  ;;  %v8334_v30 = vld [vmem:[#allocation77_spill] sm:$0xff]  ;;  %v8337_v56 = vld [vmem:[#allocation86_spill] sm:$0xff] }
0x11e4   : > { %3852 = vmatpush1.bf16.msra.mxu1 %v4980_v51 }
0x11e5   : > { %5550 = vmatpush3.bf16.msra.mxu0 %v4984_v62  ;;  %3890 = vmatprep.subr.bf16.mxu1 %v4948_v15  ;;  %v8312_v62 = vld [vmem:[#allocation88_spill] sm:$0xff]  ;;  %v3604_v15 = vrot.slane %v7718_v31, 2 }
0x11e6   : > { %4222 = vmatprep.subr.bf16.mxu0 %v4986_v17  ;;  %v5016_v51 = vcombine.high %v8312_v62, %v8311_v61  ;;  %v5015_v60 = vcombine.low %v8312_v62, %v8311_v61  ;;  %v4983_v17 = vcombine.high %v8314_v24, %v8313_v21  ;;  %v8339_v62 = vld [vmem:[#allocation87_spill] sm:$0xff]  ;;  %v8343_v21 = vld [vmem:[#allocation93_spill] sm:$0xff]  ;;  %v8344_v24 = vld [vmem:[#allocation90_spill] sm:$0xff] }
0x11e7   : > { %3870 = vmatmul.mubr.bf16.vlgmr.msra.gmra.mrb[0].mxu1 %v7699_v22  ;;  %v3608_v31 = vsel %vm3606_vm3, %v3603_v43, %v3604_v15  ;;  %v3607_v1 = vsel %vm3606_vm3, %v3604_v15, %v3605_v48  ;;  %v8342_v43 = vld [vmem:[#allocation89_spill] sm:$0xff] }
0x11e8   : > { %5552 = vmatmul.mubr.bf16.vlgmr.msra.gmra.mrb[0].mxu0 %v7737_v52  ;;  %3891 = vmatpush1.bf16.msra.mxu1 %v4947_v2  ;;  %v8315_v2 = vld [vmem:[#allocation97_spill] sm:$0xff] }
0x11e9   : > { %4223 = vmatpush1.bf16.msra.mxu0 %v4985_v40  ;;  %3892 = vmatprep.subr.bf16.mxu1 %v4953_v28  ;;  %v8316_v40 = vld [vmem:[#allocation94_spill] sm:$0xff]  ;;  %v8317_v28 = vld [vmem:[#allocation56_spill] sm:$0xff] }
0x11ea   : > { %4224 = vmatprep.subr.bf16.mxu0 %v4991_v44  ;;  %3879 = vmatprep.mubr.bf16.mxu1 %v6101_v59  ;;  %v5021_v14 = vcombine.high %v8316_v40, %v8315_v2  ;;  %v5020_v35 = vcombine.low %v8316_v40, %v8315_v2  ;;  %v4988_v8 = vcombine.high %v8318_v46, %v8317_v28  ;;  %v8319_v44 = vld [vmem:[#allocation57_spill] sm:$0xff]  ;;  %v8345_v40 = vld [vmem:[#allocation98_spill] sm:$0xff] }
0x11eb   : > { %4254 = vmatprep.mubr.bf16.mxu0 %v6101_v59  ;;  %v4987_v42 = vcombine.low %v8318_v46, %v8317_v28 }
0x11ec   : > { %3893 = vmatpush1.bf16.msra.mxu1 %v4952_v45  ;;  %v8320_v45 = vld [vmem:[#allocation54_spill] sm:$0xff] }
0x11ed   : > { %4225 = vmatpush1.bf16.msra.mxu0 %v4990_v25  ;;  %3894 = vmatprep.subr.bf16.mxu1 %v4958_v37  ;;  %v4989_v25 = vcombine.low %v8320_v45, %v8319_v44  ;;  %v7821_v37 = vpack.c.bf16 %v3608_v31, %v3609_v5  ;;  %v8348_v31 = vld [vmem:[#allocation96_spill] sm:$0xff] }
0x11ee   : > { %4226 = vmatprep.subr.bf16.mxu0 %v4996_v32  ;;  %v8322_v32 = vld [vmem:[#allocation59_spill] sm:$0xff] }
0x11ef   : > { %3880 = vmatmul.mubr.bf16.gmra.mrb[4].mxu1 %v7737_v52  ;;  %v4992_v4 = vcombine.low %v8322_v32, %v8321_v16 }
0x11f0   : > { %3895 = vmatpush1.bf16.msra.mxu1 %v4957_v33  ;;  %3922 = vmatprep.mubr.bf16.mxu1 %v6101_v59  ;;  %v4993_v33 = vcombine.high %v8322_v32, %v8321_v16  ;;  %v8349_v32 = vld [vmem:[#allocation101_spill] sm:$0xff] }
0x11f1   : > { %4227 = vmatpush1.bf16.msra.mxu0 %v4995_v19  ;;  %3896 = vmatprep.subr.bf16.mxu1 %v4963_v34  ;;  %v8323_v19 = vld [vmem:[#allocation63_spill] sm:$0xff]  ;;  %v3610_v34 = vsel %vm3606_vm3, %v3605_v48, %v3602_v50 }
0x11f2   : > { %4228 = vmatprep.subr.bf16.mxu0 %v5001_v3  ;;  %v4994_v10 = vcombine.low %v8324_v11, %v8323_v19  ;;  %v3614_v3 = vsel %vm3601_vm4, %v7677_v49, %v3610_v34  ;;  %v8329_v49 = vld [vmem:[#allocation74_spill] sm:$0xff]  ;;  %v8351_v34 = vld [vmem:[#allocation103_spill] sm:$0xff] }
0x11f3   : > { %v4013_v20 = vpack.c.bf16 %v3614_v3, %v3607_v1  ;;  %v8350_v19 = vld [vmem:[#allocation102_spill] sm:$0xff]  ;;  %v8352_v3 = vld [vmem:[#allocation104_spill] sm:$0xff] }
0x11f4   : > { %3897 = vmatpush1.bf16.msra.mxu1 %v4962_v6  ;;  %v8325_v6 = vld [vmem:[#allocation68_spill] sm:$0xff] }
0x11f5   : > { %4229 = vmatpush1.bf16.msra.mxu0 %v5000_v9  ;;  %3898 = vmatprep.subr.bf16.mxu1 %v4968_v47  ;;  %v8326_v9 = vld [vmem:[#allocation65_spill] sm:$0xff]  ;;  %v8328_v47 = vld [vmem:[#allocation66_spill] sm:$0xff] }
0x11f6   : > { %4230 = vmatprep.subr.bf16.mxu0 %v5006_v26  ;;  %v4998_v12 = vcombine.high %v8326_v9, %v8325_v6  ;;  %v4997_v23 = vcombine.low %v8326_v9, %v8325_v6  ;;  %v8330_v26 = vld [vmem:[#allocation71_spill] sm:$0xff] }
0x11f8   : > { %3899 = vmatpush1.bf16.msra.mxu1 %v4967_v55  ;;  %v5003_v55 = vcombine.high %v8330_v26, %v8329_v49 }
0x11f9   : > { %4231 = vmatpush1.bf16.msra.mxu0 %v5005_v29  ;;  %3900 = vmatprep.subr.bf16.mxu1 %v4973_v0  ;;  %v8331_v29 = vld [vmem:[#allocation75_spill] sm:$0xff]  ;;  %v5002_v0 = vcombine.low %v8330_v26, %v8329_v49 }
0x11fa   : > { %4232 = vmatprep.subr.bf16.mxu0 %v5011_v38  ;;  %v5004_v27 = vcombine.low %v8332_v36, %v8331_v29  ;;  %v5008_v38 = vcombine.high %v8334_v30, %v8333_v58  ;;  %v8355_v29 = vld [vmem:[#allocation111_spill] sm:$0xff] }
0x11fc   : > { %3901 = vmatpush1.bf16.msra.mxu1 %v4972_v39  ;;  %v8335_v39 = vld [vmem:[#allocation81_spill] sm:$0xff] }
0x11fd   : > { %4233 = vmatpush1.bf16.msra.mxu0 %v5010_v53  ;;  %3902 = vmatprep.subr.bf16.mxu1 %v4978_v57  ;;  %v8336_v53 = vld [vmem:[#allocation78_spill] sm:$0xff]  ;;  %v8338_v57 = vld [vmem:[#allocation83_spill] sm:$0xff] }
0x11fe   : > { %4234 = vmatprep.subr.bf16.mxu0 %v5016_v51  ;;  %v5009_v13 = vcombine.low %v8336_v53, %v8335_v39  ;;  %v5013_v61 = vcombine.high %v8338_v57, %v8337_v56  ;;  %v8340_v51 = vld [vmem:[#allocation84_spill] sm:$0xff] }
0x11ff   : > { %v5014_v50 = vcombine.low %v8340_v51, %v8339_v62 }
0x1200   : > { %3903 = vmatpush1.bf16.msra.mxu1 %v4977_v54  ;;  %v5012_v54 = vcombine.low %v8338_v57, %v8337_v56 }
0x1201   : > { %4235 = vmatpush1.bf16.msra.mxu0 %v5015_v60  ;;  %3904 = vmatprep.subr.bf16.mxu1 %v4983_v17  ;;  %v8341_v60 = vld [vmem:[#allocation92_spill] sm:$0xff]  ;;  %v5019_v17 = vcombine.low %v8344_v24, %v8343_v21 }
0x1202   : > { %4236 = vmatprep.subr.bf16.mxu0 %v5021_v14  ;;  %v5018_v15 = vcombine.high %v8342_v43, %v8341_v60  ;;  %v5017_v2 = vcombine.low %v8342_v43, %v8341_v60  ;;  %v8346_v14 = vld [vmem:[#allocation95_spill] sm:$0xff] }
0x1203   : > { %v5022_v28 = vcombine.low %v8346_v14, %v8345_v40 }
0x1204   : > { %3905 = vmatpush1.bf16.msra.mxu1 %v4982_v63  ;;  %v5023_v63 = vcombine.high %v8346_v14, %v8345_v40 }
0x1205   : > { %4237 = vmatpush1.bf16.msra.mxu0 %v5020_v35  ;;  %4275 = vmatprep.subr.bf16.mxu1 %v4988_v8  ;;  %v8347_v35 = vld [vmem:[#allocation99_spill] sm:$0xff] }
0x1206   : > { %5555 = vmatprep.subr.bf16.mxu0 %v4989_v25  ;;  %v5024_v5 = vcombine.low %v8348_v31, %v8347_v35 }
0x1207   : > { %3923 = vmatmul.mubr.bf16.vlgmr.msra.gmra.mrb[8].mxu1 %v7699_v22  ;;  %v4999_v22 = vcombine.low %v8328_v47, %v8327_v18 }
0x1208   : > { %4255 = vmatmul.mubr.bf16.vlgmr.msra.gmra.mrb[4].mxu0 %v7821_v37  ;;  %4276 = vmatpush1.bf16.msra.mxu1 %v4987_v42 }
0x1209   : > { %5556 = vmatpush3.bf16.msra.mxu0 %v4989_v25  ;;  %4277 = vmatprep.subr.bf16.mxu1 %v4993_v33 }
0x120a   : > { %5557 = vmatprep.subr.bf16.mxu0 %v4994_v10  ;;  %4264 = vmatprep.mubr.bf16.mxu0 %v6101_v59 }
0x120b   : > { %3932 = vmatprep.mubr.bf16.mxu1 %v6101_v59 }
0x120c   : > { %4278 = vmatpush1.bf16.msra.mxu1 %v4992_v4 }
0x120d   : > { %5558 = vmatpush3.bf16.msra.mxu0 %v4994_v10  ;;  %4279 = vmatprep.subr.bf16.mxu1 %v4998_v12 }
0x120e   : > { %5559 = vmatprep.subr.bf16.mxu0 %v4999_v22 }
0x120f   : > { %3933 = vmatmul.mubr.bf16.gmra.mrb[12].mxu1 %v7737_v52  ;;  %v5007_v52 = vcombine.low %v8334_v30, %v8333_v58  ;;  %v8356_v30 = vld [vmem:[#allocation112_spill] sm:$0xff] }
0x1210   : > { %4265 = vmatmul.mubr.bf16.gmra.mrb[8].mxu0 %v4013_v20  ;;  %4280 = vmatpush1.bf16.msra.mxu1 %v4997_v23  ;;  %v8354_v23 = vld [vmem:[#allocation110_spill] sm:$0xff] }
0x1211   : > { %5560 = vmatpush3.bf16.msra.mxu0 %v4999_v22  ;;  %4281 = vmatprep.subr.bf16.mxu1 %v5003_v55  ;;  %v8353_v22 = vld [vmem:[#allocation109_spill] sm:$0xff] }
0x1212   : > { %5561 = vmatprep.subr.bf16.mxu0 %v5004_v27  ;;  %4307 = vmatprep.mubr.bf16.mxu1 %v6101_v59 }
0x1213   : > { %5571 = vmatprep.mubr.bf16.mxu0 %v7821_v37 }
0x1214   : > { %4282 = vmatpush1.bf16.msra.mxu1 %v5002_v0 }
0x1215   : > { %5562 = vmatpush3.bf16.msra.mxu0 %v5004_v27  ;;  %4283 = vmatprep.subr.bf16.mxu1 %v5008_v38 }
0x1216   : > { %5563 = vmatprep.subr.bf16.mxu0 %v5009_v13 }
0x1218   : > { %4284 = vmatpush1.bf16.msra.mxu1 %v5007_v52 }
0x1219   : > { %5564 = vmatpush3.bf16.msra.mxu0 %v5009_v13  ;;  %4285 = vmatprep.subr.bf16.mxu1 %v5013_v61 }
0x121a   : > { %5565 = vmatprep.subr.bf16.mxu0 %v5014_v50 }
0x121c   : > { %4286 = vmatpush1.bf16.msra.mxu1 %v5012_v54 }
0x121d   : > { %5566 = vmatpush3.bf16.msra.mxu0 %v5014_v50  ;;  %4287 = vmatprep.subr.bf16.mxu1 %v5018_v15 }
0x121e   : > { %5567 = vmatprep.subr.bf16.mxu0 %v5019_v17 }
0x1220   : > { %4288 = vmatpush1.bf16.msra.mxu1 %v5017_v2 }
0x1221   : > { %5568 = vmatpush3.bf16.msra.mxu0 %v5019_v17  ;;  %4289 = vmatprep.subr.bf16.mxu1 %v5023_v63 }
0x1222   : > { %5569 = vmatprep.subr.bf16.mxu0 %v5024_v5 }
0x1224   : > { %4290 = vmatpush1.bf16.msra.mxu1 %v5022_v28 }
0x1225   : > { %5570 = vmatpush3.bf16.msra.mxu0 %v5024_v5 }
0x1227   : > { %4308 = vmatmul.mubr.bf16.vlgmr.msra.gmra.mrb[8].mxu1 %v7821_v37 }
0x1228   : > { %5572 = vmatmul.mubr.bf16.vlgmr.msra.gmra.mrb[0].mxu0 %v4013_v20  ;;  %4317 = vmatprep.mubr.bf16.mxu1 %v6101_v59 }
0x122f   : > { %4318 = vmatmul.mubr.bf16.gmra.mrb[12].mxu1 %v4013_v20 }
0x12ba   : > { %v3871_v46 = vpop.f32.mrb[0].mxu1 }
0x12bb   : > { %v3873_v8 = vpop.f32.mrb[1].mxu1  ;;  %v3992_v33 = vadd.f32 %v3871_v46, %v8349_v32 }
0x12bc   : > { %v3875_v44 = vpop.f32.mrb[2].mxu1  ;;  %v3993_v11 = vadd.f32 %v3873_v8, %v8350_v19  ;;  %v7892_v8 = vld [vmem:[#allocation3] sm:$0xff] }
0x12bd   : > { %v3877_v45 = vpop.f32.mrb[3].mxu1  ;;  %v3997_v4 = vadd.f32 %v3875_v44, %v8351_v34  ;;  %v7894_v44 = vld [vmem:[#allocation3 + $0x18] sm:$0xff] }
0x12be   : > { %v3998_v59 = vadd.f32 %v3877_v45, %v8352_v3  ;;  %v8357_v45 = vld [vmem:[#allocation105_spill] sm:$0xff] }
0x12c2   : > { %v3881_v25 = vpop.f32.mrb[4].mxu1 }
0x12c3   : > { %v3883_v48 = vpop.f32.mrb[5].mxu1  ;;  %v4002_v20 = vadd.f32 %v3881_v25, %v8353_v22 }
0x12c4   : > { %v3885_v42 = vpop.f32.mrb[6].mxu1  ;;  %v4003_v49 = vadd.f32 %v3883_v48, %v8354_v23  ;;  %v8358_v48 = vld [vmem:[#allocation117_spill] sm:$0xff] }
0x12c5   : > { %v3887_v16 = vpop.f32.mrb[7].mxu1  ;;  %v4007_v36 = vadd.f32 %v3885_v42, %v8355_v29  ;;  %v8363_v29 = vld [vmem:[#allocation120_spill] sm:$0xff] }
0x12c6   : > { %v4008_v38 = vadd.f32 %v3887_v16, %v8356_v30 }
0x12db   : > { %v4256_v10 = vpop.f32.mrb[4].mxu0 }
0x12dc   : > { %v4377_v37 = vadd.f32 %v4256_v10, %v3992_v33  ;;  %v4258_v1 = vpop.f32.mrb[5].mxu0 }
0x12dd   : > { %v4378_v6 = vadd.f32 %v4258_v1, %v3993_v11  ;;  %v4260_v9 = vpop.f32.mrb[6].mxu0  ;;  %v8359_v11 = vld [vmem:[#allocation118_spill] sm:$0xff]  ;;  %v8360_v1 = vld [vmem:[#allocation107_spill] sm:$0xff] }
0x12de   : > { %v4382_v12 = vadd.f32 %v4260_v9, %v3997_v4  ;;  %v4262_v18 = vpop.f32.mrb[7].mxu0  ;;  %v5025_v26 = vmul.f32 -1.442695, %v4377_v37  ;;  %v3589_v9 = vrot.slane %v7894_v44, 6 }
0x12df   : > { %v4383_v47 = vadd.f32 %v4262_v18, %v3998_v59  ;;  %v5029_v27 = vmul.f32 -1.442695, %v4378_v6  ;;  %v7902_v18 = vld [vmem:[#allocation3 + $0x10] sm:$0xff] }
0x12e0   : > { %5969 = vpow2.f32 %v5025_v26  ;;  %v5026_v54 = vmul.f32 -1.442695, %v4382_v12  ;;  %v3586_v12 = vrot.slane %v7892_v8, 6  ;;  %v8362_v26 = vld [vmem:[#allocation106_spill] sm:$0xff] }
0x12e1   : > { %v5030_v39 = vmul.f32 -1.442695, %v4383_v47  ;;  %5971 = vpow2.f32 %v5029_v27  ;;  %v8361_v47 = vld [vmem:[#allocation119_spill] sm:$0xff] }
0x12e2   : > { %v3593_v30 = vsel %vm3570_vm2, %v3589_v9, %v3586_v12 }
0x12e3   : > { %v4266_v55 = vpop.f32.mrb[8].mxu0  ;;  %5973 = vpow2.f32 %v5030_v39 }
0x12e4   : > { %v4387_v0 = vadd.f32 %v4266_v55, %v4002_v20  ;;  %v4268_v58 = vpop.f32.mrb[9].mxu0 }
0x12e5   : > { %v4388_v53 = vadd.f32 %v4268_v58, %v4003_v49  ;;  %v4270_v13 = vpop.f32.mrb[10].mxu0  ;;  %v7905_v49 = vld [vmem:[#allocation3 + $0x8] sm:$0xff] }
0x12e6   : > { %v5027_v52 = vmul.f32 -1.442695, %v4387_v0  ;;  %v4392_v56 = vadd.f32 %v4270_v13, %v4007_v36  ;;  %v4272_v57 = vpop.f32.mrb[11].mxu0  ;;  %v3588_v0 = vrot.slane %v7902_v18, 6  ;;  %v8364_v13 = vld [vmem:[#allocation108_spill] sm:$0xff] }
0x12e7   : > { %v5031_v61 = vmul.f32 -1.442695, %v4388_v53  ;;  %v4393_v62 = vadd.f32 %v4272_v57, %v4008_v38  ;;  %v3587_v53 = vrot.slane %v7905_v49, 6 }
0x12e8   : > { %v5028_v51 = vmul.f32 -1.442695, %v4392_v56  ;;  %5975 = vpow2.f32 %v5027_v52  ;;  %v8365_v56 = vld [vmem:[#allocation113_spill] sm:$0xff] }
0x12e9   : > { %5977 = vpow2.f32 %v5031_v61  ;;  %v5032_v50 = vmul.f32 -1.442695, %v4393_v62 }
0x12ea   : > { %5979 = vpow2.f32 %v5028_v51  ;;  %v5970_v60 = vpop.eup %5969 }
0x12eb   : > { %5981 = vpow2.f32 %v5032_v50  ;;  %v5972_v43 = vpop.eup %5971  ;;  %v4409_v24 = vadd.f32 1.0, %v5970_v60  ;;  %v3591_v60 = vsel %vm3570_vm2, %v3587_v53, %v3588_v0 }
0x12ec   : > { %5983 = vpow2.f32 %v5026_v54  ;;  %v4433_v2 = vadd.f32 1.0, %v5972_v43 }
0x12ed   : > { %v5974_v15 = vpop.eup %5973  ;;  %5985 = vrcp.f32 %v4409_v24 }
0x12ee   : > { %v4434_v14 = vadd.f32 1.0, %v5974_v15  ;;  %5987 = vrcp.f32 %v4433_v2  ;;  %v8366_v15 = vld [vmem:[#allocation115_spill] sm:$0xff]  ;;  %v3594_v2 = vsel %vm3570_vm2, %v7892_v8, %v3593_v30 }
0x12f0   : > { %5989 = vrcp.f32 %v4434_v14 }
0x12f2   : > { %v5976_v21 = vpop.eup %5975 }
0x12f3   : > { %v5978_v17 = vpop.eup %5977  ;;  %v4411_v63 = vadd.f32 1.0, %v5976_v21 }
0x12f4   : > { %v5980_v40 = vpop.eup %5979  ;;  %v4435_v35 = vadd.f32 1.0, %v5978_v17 }
0x12f5   : > { %v4412_v31 = vadd.f32 1.0, %v5980_v40  ;;  %v5982_v5 = vpop.eup %5981  ;;  %5991 = vrcp.f32 %v4411_v63 }
0x12f6   : > { %5993 = vrcp.f32 %v4435_v35  ;;  %v5984_v33 = vpop.eup %5983  ;;  %v4436_v19 = vadd.f32 1.0, %v5982_v5 }
0x12f7   : > { %5995 = vrcp.f32 %v4412_v31  ;;  %v4410_v20 = vadd.f32 1.0, %v5984_v33  ;;  %v5986_v27 = vpop.eup %5985 }
0x12f8   : > { %v5988_v58 = vpop.eup %5987 }
0x12fa   : > { %v4309_v28 = vpop.f32.mrb[8].mxu1  ;;  %v5990_v39 = vpop.eup %5989 }
0x12fb   : > { %v5573_v46 = vpop.f32.mrb[0].mxu0  ;;  %v5611_v25 = vadd.f32 %v4309_v28, %v8357_v45  ;;  %v4311_v16 = vpop.f32.mrb[9].mxu1 }
0x12fc   : > { %v5619_v42 = vadd.f32 %v5573_v46, %v8358_v48  ;;  %v4362_v32 = vpop.f32.mrb[1].mxu0  ;;  %v4313_v34 = vpop.f32.mrb[10].mxu1  ;;  %v5612_v55 = vadd.f32 %v4311_v16, %v8362_v26  ;;  %v4473_v46 = vmul.f32 %v5988_v58, %v3594_v2  ;;  %v3590_v16 = vsel %vm3570_vm2, %v3588_v0, %v3589_v9 }
0x12fd   : > { %v5620_v10 = vadd.f32 %v4362_v32, %v8359_v11  ;;  %v5574_v4 = vpop.f32.mrb[2].mxu0  ;;  %v5037_v37 = vmul.f32 -1.442695, %v5611_v25  ;;  %v5613_v3 = vadd.f32 %v4313_v34, %v8360_v1  ;;  %v4315_v59 = vpop.f32.mrb[11].mxu1  ;;  %v8367_v25 = vld [vmem:[#allocation114_spill] sm:$0xff]  ;;  %v3592_v1 = vsel %vm3570_vm2, %v3586_v12, %v3587_v53 }
0x12fe   : > { %5997 = vtanh.f32 %v5619_v42  ;;  %v4365_v6 = vpop.f32.mrb[3].mxu0  ;;  %v5621_v22 = vadd.f32 %v5574_v4, %v8361_v47  ;;  %v5614_v52 = vadd.f32 %v4315_v59, %v8364_v13  ;;  %v5033_v51 = vmul.f32 -1.442695, %v5612_v55 }
0x12ff   : > { %5999 = vtanh.f32 %v5620_v10  ;;  %v5038_v23 = vmul.f32 -1.442695, %v5613_v3  ;;  %v5622_v36 = vadd.f32 %v4365_v6, %v8363_v29  ;;  %v5992_v62 = vpop.eup %5991  ;;  %v8368_v10 = vld [vmem:[#allocation116_spill] sm:$0xff]  ;;  %v3615_v55 = vrot.slane %v7892_v8, 2 }
0x1300   : > { %6001 = vpow2.f32 %v5037_v37  ;;  %v5994_v54 = vpop.eup %5993  ;;  %v5034_v14 = vmul.f32 -1.442695, %v5614_v52  ;;  %v3616_v29 = vrot.slane %v7905_v49, 2  ;;  %v3617_v12 = vrot.slane %v7902_v18, 2 }
0x1301   : > { %6003 = vrcp.f32 %v4436_v19  ;;  %v5996_v17 = vpop.eup %5995  ;;  %v4475_v31 = vmul.f32 %v5994_v54, %v3591_v60  ;;  %v3618_v49 = vrot.slane %v7894_v44, 2 }
0x1302   : > { %6005 = vpow2.f32 %v5038_v23  ;;  %v4319_v38 = vpop.f32.mrb[12].mxu1  ;;  %v3620_v8 = vsel %vm3606_vm3, %v3616_v29, %v3617_v12 }
0x1303   : > { %6007 = vtanh.f32 %v5621_v22  ;;  %v5615_v57 = vadd.f32 %v4319_v38, %v8365_v56  ;;  %v4321_v61 = vpop.f32.mrb[13].mxu1  ;;  %v3621_v38 = vsel %vm3606_vm3, %v3615_v55, %v3616_v29  ;;  %v3619_v60 = vsel %vm3606_vm3, %v3617_v12, %v3618_v49 }
0x1304   : > { %6009 = vrcp.f32 %v4410_v20  ;;  %v4323_v50 = vpop.f32.mrb[14].mxu1  ;;  %v5616_v48 = vadd.f32 %v4321_v61, %v8367_v25  ;;  %v4474_v20 = vmul.f32 %v5990_v39, %v3592_v1 }
0x1305   : > { %6011 = vtanh.f32 %v5622_v36  ;;  %v5039_v43 = vmul.f32 -1.442695, %v5615_v57  ;;  %v5617_v21 = vadd.f32 %v4323_v50, %v8366_v15  ;;  %v4325_v24 = vpop.f32.mrb[15].mxu1  ;;  %v3622_v50 = vsel %vm3606_vm3, %v3618_v49, %v3615_v55 }
0x1306   : > { %v5618_v34 = vadd.f32 %v4325_v24, %v8368_v10  ;;  %v5035_v47 = vmul.f32 -1.442695, %v5616_v48 }
0x1307   : > { %6013 = vpow2.f32 %v5039_v43  ;;  %v5040_v63 = vmul.f32 -1.442695, %v5617_v21  ;;  %v3626_v21 = vsel %vm3601_vm4, %v7894_v44, %v3622_v50 }
0x1308   : > { %v5998_v40 = vpop.eup %5997  ;;  %6015 = vpow2.f32 %v5033_v51  ;;  %v5036_v26 = vmul.f32 -1.442695, %v5618_v34 }
0x1309   : > { %v6000_v35 = vpop.eup %5999  ;;  %v4479_v5 = vmul.f32 %v5998_v40, %v5992_v62  ;;  %6017 = vpow2.f32 %v5040_v63 }
0x130a   : > { %v6002_v28 = vpop.eup %6001  ;;  %v4477_v45 = vmul.f32 %v6000_v35, %v5986_v27  ;;  %6019 = vpow2.f32 %v5034_v14 }
0x130b   : > { %v6004_v42 = vpop.eup %6003  ;;  %v4497_v32 = vadd.f32 1.0, %v6002_v28  ;;  %v4483_v33 = vadd.f32 %v4479_v5, %v4475_v31 }
0x130c   : > { %v6006_v19 = vpop.eup %6005  ;;  %v4481_v11 = vadd.f32 %v4477_v45, %v4473_v46  ;;  %v4476_v59 = vmul.f32 %v6004_v42, %v3590_v16 }
0x130d   : > { %v6008_v4 = vpop.eup %6007  ;;  %6021 = vrcp.f32 %v4497_v32  ;;  %v4498_v37 = vadd.f32 1.0, %v6006_v19 }
0x130e   : > { %v6010_v3 = vpop.eup %6009  ;;  %v4480_v6 = vmul.f32 %v6008_v4, %v5996_v17 }
0x130f   : > { %v6012_v22 = vpop.eup %6011  ;;  %6023 = vrcp.f32 %v4498_v37 }
0x1310   : > { %v4484_v9 = vadd.f32 %v4480_v6, %v4476_v59  ;;  %v4478_v23 = vmul.f32 %v6012_v22, %v6010_v3  ;;  %6025 = vpow2.f32 %v5035_v47 }
0x1311   : > { %v6014_v36 = vpop.eup %6013  ;;  %6027 = vpow2.f32 %v5036_v26 }
0x1312   : > { %v4482_v27 = vadd.f32 %v4478_v23, %v4474_v20  ;;  %v6016_v0 = vpop.eup %6015  ;;  %v4499_v58 = vadd.f32 1.0, %v6014_v36 }
0x1313   : > { %v6018_v30 = vpop.eup %6017  ;;  %v4457_v52 = vadd.f32 1.0, %v6016_v0 }
0x1314   : > { %6029 = vrcp.f32 %v4499_v58  ;;  %v4500_v39 = vadd.f32 1.0, %v6018_v30  ;;  %v6020_v53 = vpop.eup %6019 }
0x1315   : > { %v4458_v18 = vadd.f32 1.0, %v6020_v53 }
0x1316   : > { %6031 = vrcp.f32 %v4500_v39 }
0x1317   : > { %v6022_v13 = vpop.eup %6021  ;;  %6033 = vrcp.f32 %v4457_v52 }
0x1318   : > { %v4509_v56 = vmul.f32 %v6022_v13, %v3621_v38 }
0x1319   : > { %v6024_v57 = vpop.eup %6023 }
0x131a   : > { %v4513_v61 = vadd.f32 %v4509_v56, %v4481_v11  ;;  %v4510_v62 = vmul.f32 %v6024_v57, %v3620_v8  ;;  %v6026_v51 = vpop.eup %6025 }
0x131b   : > { %v6028_v43 = vpop.eup %6027  ;;  %v4459_v24 = vadd.f32 1.0, %v6026_v51 }
0x131c   : > { %6035 = vtanh.f32 %v4513_v61  ;;  %4529 = vst [vmem:[#allocation3] sm:$0xff] %v4513_v61  ;;  %v4514_v54 = vadd.f32 %v4510_v62, %v4482_v27  ;;  %v4460_v40 = vadd.f32 1.0, %v6028_v43 }
0x131d   : > { %6037 = vrcp.f32 %v4458_v18 }
0x131e   : > { %6039 = vtanh.f32 %v4514_v54  ;;  %4530 = vst [vmem:[#allocation3 + $0x8] sm:$0xff] %v4514_v54  ;;  %v6030_v15 = vpop.eup %6029 }
0x131f   : > { %v4511_v17 = vmul.f32 %v6030_v15, %v3619_v60  ;;  %6041 = vrcp.f32 %v4459_v24 }
0x1320   : > { %v6032_v2 = vpop.eup %6031 }
0x1321   : > { %v4515_v14 = vadd.f32 %v4511_v17, %v4483_v33  ;;  %v4512_v63 = vmul.f32 %v6032_v2, %v3626_v21  ;;  %v6034_v41 = vpop.eup %6033 }
0x1323   : > { %6043 = vtanh.f32 %v4515_v14  ;;  %4531 = vst [vmem:[#allocation3 + $0x10] sm:$0xff] %v4515_v14  ;;  %v4516_v35 = vadd.f32 %v4512_v63, %v4484_v9 }
0x1324   : > { %6045 = vrcp.f32 %v4460_v40 }
0x1325   : > { %6047 = vtanh.f32 %v4516_v35  ;;  %4532 = vst [vmem:[#allocation3 + $0x18] sm:$0xff] %v4516_v35 }
0x1326   : > { %v6036_v31 = vpop.eup %6035 }
0x1327   : > { %v6038_v5 = vpop.eup %6037  ;;  %v4521_v28 = vmul.f32 %v6036_v31, %v6034_v41 }
0x1328   : > { %v6040_v46 = vpop.eup %6039 }
0x1329   : > { %4525 = vst [vmem:[#allocation2] sm:$0xff] %v4521_v28  ;;  %v4522_v7 = vmul.f32 %v6040_v46, %v6038_v5  ;;  %v6042_v44 = vpop.eup %6041 }
0x132b   : > { %4526 = vst [vmem:[#allocation2 + $0x8] sm:$0xff] %v4522_v7 }
0x132d   : > { %v6044_v45 = vpop.eup %6043 }
0x132e   : > { %v6046_v25 = vpop.eup %6045  ;;  %v4523_v48 = vmul.f32 %v6044_v45, %v6042_v44 }
0x132f   : > { %v6048_v42 = vpop.eup %6047 }
0x1330   : > { %4527 = vst [vmem:[#allocation2 + $0x10] sm:$0xff] %v4523_v48  ;;  %v4524_v16 = vmul.f32 %v6048_v42, %v6046_v25 }
0x1332   : > { %4528 = vst [vmem:[#allocation2 + $0x18] sm:$0xff] %v4524_v16 }
0x1333 PF: > { %v6049_v32 = vld [vmem:[%s6205_s18] sm:$0xff]   ;;  %v6050_v33 = vld [vmem:[%s6205_s18 + $0x8] sm:$0xff]   ;;  %v6051_v19 = vld [vmem:[%s6205_s18 + $0x10] sm:$0xff]  }
0x1334   : > { %5575 = vmatprep.subr.bf16.mxu0 %v6049_v32  ;;  %v6052_v11 = vld [vmem:[%s6205_s18 + $0x18] sm:$0xff]   ;;  %v4549_v10 = vld [vmem:[#allocation2] sm:$0xff]  ;;  %v4550_v34 = vld [vmem:[#allocation2 + $0x8] sm:$0xff] }
0x1335   : > { %5576 = vmatpush3.bf16.msra.mxu0 %v6049_v32  ;;  %v4553_v4 = vpack.c.bf16 %v4550_v34, %v4549_v10  ;;  %v6053_v37 = vld [vmem:[%s6205_s18 + $0x20] sm:$0xff]   ;;  %v6054_v1 = vld [vmem:[%s6205_s18 + $0x28] sm:$0xff]   ;;  %v6055_v3 = vld [vmem:[%s6205_s18 + $0x30] sm:$0xff]  }
0x1336   : > { %5577 = vmatprep.subr.bf16.mxu0 %v6050_v33  ;;  %v6056_v59 = vld [vmem:[%s6205_s18 + $0x38] sm:$0xff]  }
0x1337   : > { %5591 = vmatprep.mubr.bf16.mxu0 %v4553_v4  ;;  %v4551_v6 = vld [vmem:[#allocation2 + $0x10] sm:$0xff] }
0x1339   : > { %5578 = vmatpush3.bf16.msra.mxu0 %v6050_v33  ;;  %v4552_v47 = vld [vmem:[#allocation2 + $0x18] sm:$0xff] }
0x133a   : > { %5579 = vmatprep.subr.bf16.mxu0 %v6051_v19  ;;  %v4554_v22 = vpack.c.bf16 %v4552_v47, %v4551_v6 }
0x133d   : > { %5580 = vmatpush3.bf16.msra.mxu0 %v6051_v19 }
0x133e   : > { %5581 = vmatprep.subr.bf16.mxu0 %v6052_v11 }
0x1341   : > { %5582 = vmatpush3.bf16.msra.mxu0 %v6052_v11 }
0x1342   : > { %5583 = vmatprep.subr.bf16.mxu0 %v6053_v37 }
0x1345   : > { %5584 = vmatpush3.bf16.msra.mxu0 %v6053_v37 }
0x1346   : > { %5585 = vmatprep.subr.bf16.mxu0 %v6054_v1 }
0x1349   : > { %5586 = vmatpush3.bf16.msra.mxu0 %v6054_v1 }
0x134a   : > { %5587 = vmatprep.subr.bf16.mxu0 %v6055_v3 }
0x134d   : > { %5588 = vmatpush3.bf16.msra.mxu0 %v6055_v3 }
0x134e   : > { %5589 = vmatprep.subr.bf16.mxu0 %v6056_v59 }
0x1351   : > { %5590 = vmatpush3.bf16.msra.mxu0 %v6056_v59 }
0x1354   : > { %5592 = vmatmul.mubr.bf16.vlgmr.msra.gmra.mrb[0].mxu0 %v4554_v22 }
0x1427   : > { %v5593_v9 = vpop.f32.mrb[0].mxu0 }
0x1428   : > { %4654 = vst [vmem:[%s6229_s29 + $0x10] sm:$0xff] %v5593_v9  ;;  %v4637_v20 = vpop.f32.mrb[1].mxu0 }
0x1429   : > { %4652 = vst [vmem:[%s6229_s29] sm:$0xff] %v4637_v20  ;;  %v5594_v23 = vpop.f32.mrb[2].mxu0 }
0x142a   : > { %4655 = vst [vmem:[%s6229_s29 + $0x18] sm:$0xff] %v5594_v23  ;;  %v4640_v26 = vpop.f32.mrb[3].mxu0 }
0x142b   : > { %4653 = vst [vmem:[%s6229_s29 + $0x8] sm:$0xff] %v4640_v26 }
0x142c PF: > { %s16_s25 = sadd.s32 1, %s6095_s25   ;;  %s8369_s21 = smov %s6087_s23 }
0x142d   : > { %p13_p9 = scmp.ge.s32.totalorder %s16_s25, 34   ;;  %s8370_s22 = smov %s6091_s24 }
0x142e   : > { %s8371_s23 = smov %s8374_s26  ;;  %s8372_s24 = smov %s8378_s27 }
0x142f   :  { %15 = sbr.rel (!%p13_p9) target bundleno = 3 (0x3), region = 97 }

</bundles_post_ra>
